<compile_context>
chip_gen: v6e
topology: v6e:2x2x1
jax: 0.10.0
libtpu: 0.0.40
codegen_flags: <defaults>
</compile_context>

<pallas_src>
import functools

import numpy as np
import jax
import jax.numpy as jnp
from jax.experimental import pallas as pl
from jax.experimental.pallas import tpu as pltpu

EPS = 1e-5          # nn.BatchNorm2d default eps
NEG_SLOPE = 0.01    # F.leaky_relu default negative_slope
LANE = 128


# ------------------------------ small helpers -------------------------------
def _round_up(n, m):
    return ((n + m - 1) // m) * m


def _leaky_relu(v):
    return jnp.where(v >= 0, v, NEG_SLOPE * v)


def _pack_w3x3(w, cin_p, cout_p):
    """OIHW (Cout, Cin, 3, 3) -> (9, Cin_p, Cout_p) bf16, zero-padded channels."""
    co, ci = w.shape[0], w.shape[1]
    wm = jnp.transpose(w.astype(jnp.float32), (2, 3, 1, 0))       # (3,3,Cin,Cout)
    wm = jnp.pad(wm, ((0, 0), (0, 0), (0, cin_p - ci), (0, cout_p - co)))
    return wm.reshape(9, cin_p, cout_p).astype(jnp.bfloat16)


def _pad_vec(v, cp):
    return jnp.pad(v.astype(jnp.float32), (0, cp - v.shape[0]))


def _bn_affine(s, q, count, gamma_p, beta_p):
    """Fold batch stats + gamma/beta into a single per-channel affine."""
    mean = s[0] / count
    var = jnp.maximum(q[0] / count - mean * mean, 0.0)
    scale = gamma_p * jax.lax.rsqrt(var + EPS)
    shift = beta_p - mean * scale
    return scale.reshape(1, -1), shift.reshape(1, -1)


# ------------------------------ Pallas kernels -------------------------------
def _conv3x3_stats_kernel(x_ref, w_ref, y_ref, s_ref, q_ref, *, stride, Ho, Wo):
    """conv1: 9 shifted bf16 matmuls + per-channel sum / sumsq accumulation."""
    b = pl.program_id(0)

    @pl.when(b == 0)
    def _():
        s_ref[...] = jnp.zeros_like(s_ref)
        q_ref[...] = jnp.zeros_like(q_ref)

    cin = x_ref.shape[-1]

    if stride == 1:
        def patch_at(dh, dw):
            return x_ref[0, dh:dh + Ho, dw:dw + Wo, :]
    else:
        # Strided path (not exercised by the demo): value-level strided slice.
        x_full = x_ref[0]

        def patch_at(dh, dw):
            return x_full[dh:dh + (Ho - 1) * stride + 1:stride,
                          dw:dw + (Wo - 1) * stride + 1:stride, :]

    acc = None
    for dh in range(3):
        for dw in range(3):
            patch = patch_at(dh, dw).reshape(Ho * Wo, cin)
            term = jnp.dot(patch, w_ref[dh * 3 + dw],
                           preferred_element_type=jnp.float32)
            acc = term if acc is None else acc + term

    y_ref[0] = acc
    s_ref[...] += jnp.sum(acc, axis=0, keepdims=True)
    q_ref[...] += jnp.sum(acc * acc, axis=0, keepdims=True)


def _conv2_common(y1_ref, a1_ref, b1_ref, w2_ref, y2_ref, s2_ref, q2_ref,
                  hpad_ref, Ho, Wo):
    """bn1-affine + leaky_relu fused prologue, then conv2 as 9 shifted matmuls
    from a zero-padded VMEM scratch, plus per-channel stats for bn2."""
    b = pl.program_id(0)

    @pl.when(b == 0)
    def _():
        s2_ref[...] = jnp.zeros_like(s2_ref)
        q2_ref[...] = jnp.zeros_like(q2_ref)
        hpad_ref[...] = jnp.zeros_like(hpad_ref)   # border stays zero forever

    cw = hpad_ref.shape[-1]
    h = _leaky_relu(y1_ref[0] * a1_ref[...] + b1_ref[...])          # (P, Cw_p)
    hpad_ref[1:Ho + 1, 1:Wo + 1, :] = h.reshape(Ho, Wo, cw).astype(hpad_ref.dtype)

    acc = None
    for dh in range(3):
        for dw in range(3):
            patch = hpad_ref[dh:dh + Ho, dw:dw + Wo, :].reshape(Ho * Wo, cw)
            term = jnp.dot(patch, w2_ref[dh * 3 + dw],
                           preferred_element_type=jnp.float32)
            acc = term if acc is None else acc + term

    y2_ref[0] = acc
    s2_ref[...] += jnp.sum(acc, axis=0, keepdims=True)
    q2_ref[...] += jnp.sum(acc * acc, axis=0, keepdims=True)


def _mid_kernel_id(y1_ref, a1_ref, b1_ref, w2_ref,
                   y2_ref, s2_ref, q2_ref, hpad_ref, *, Ho, Wo):
    _conv2_common(y1_ref, a1_ref, b1_ref, w2_ref, y2_ref, s2_ref, q2_ref,
                  hpad_ref, Ho, Wo)


def _mid_kernel_convsc(y1_ref, a1_ref, b1_ref, w2_ref, xs_ref, ws_ref,
                       y2_ref, s2_ref, q2_ref, ss_ref, qs_ref, hpad_ref,
                       *, Ho, Wo):
    b = pl.program_id(0)

    @pl.when(b == 0)
    def _():
        ss_ref[...] = jnp.zeros_like(ss_ref)
        qs_ref[...] = jnp.zeros_like(qs_ref)

    _conv2_common(y1_ref, a1_ref, b1_ref, w2_ref, y2_ref, s2_ref, q2_ref,
                  hpad_ref, Ho, Wo)

    # 1x1 projection shortcut: stats only; the normalized conv is recomputed
    # in the finalize kernel with the BN scale folded into the weight.
    s = jnp.dot(xs_ref[0], ws_ref[...], preferred_element_type=jnp.float32)
    ss_ref[...] += jnp.sum(s, axis=0, keepdims=True)
    qs_ref[...] += jnp.sum(s * s, axis=0, keepdims=True)


def _final_kernel_id(y2_ref, a2_ref, b2_ref, xid_ref, o_ref):
    v = y2_ref[0] * a2_ref[...] + b2_ref[...] + xid_ref[0]
    o_ref[0] = _leaky_relu(v)


def _final_kernel_convsc(y2_ref, a2_ref, b2_ref, xs_ref, wsf_ref, bs_ref, o_ref):
    v = y2_ref[0] * a2_ref[...] + b2_ref[...]
    s = jnp.dot(xs_ref[0], wsf_ref[...],
                preferred_element_type=jnp.float32) + bs_ref[...]
    o_ref[0] = _leaky_relu(v + s)


# ------------------------------- forward pass --------------------------------
@functools.partial(jax.jit, static_argnames=("stride",))
def wide_resnet_block_forward(x_nchw, params, stride=1):
    w1, g1, b1 = params["w1"], params["g1"], params["b1"]
    w2, g2, b2 = params["w2"], params["g2"], params["b2"]

    N, Cin, H, W = x_nchw.shape
    Cw = int(w1.shape[0])        # out_channels * widen_factor
    Cout = int(w2.shape[0])      # out_channels
    Cin_p = _round_up(Cin, LANE)
    Cw_p = _round_up(Cw, LANE)
    Cout_p = _round_up(Cout, LANE)

    Ho = (H - 1) // stride + 1   # 3x3, pad=1
    Wo = (W - 1) // stride + 1
    P = Ho * Wo
    Hp, Wp = H + 2, W + 2

    # NHWC, channel-pad, then spatial pad=1 for conv1 (bf16 matmul operand).
    x = jnp.transpose(x_nchw, (0, 2, 3, 1)).astype(jnp.float32)
    x_cp = jnp.pad(x, ((0, 0), (0, 0), (0, 0), (0, Cin_p - Cin)))
    x_sp = jnp.pad(x_cp, ((0, 0), (1, 1), (1, 1), (0, 0))).astype(jnp.bfloat16)

    w1m = _pack_w3x3(w1, Cin_p, Cw_p)          # (9, Cin_p, Cw_p) bf16
    w2m = _pack_w3x3(w2, Cw_p, Cout_p)         # (9, Cw_p, Cout_p) bf16
    g1p, b1p = _pad_vec(g1, Cw_p), _pad_vec(b1, Cw_p)
    g2p, b2p = _pad_vec(g2, Cout_p), _pad_vec(b2, Cout_p)

    arb = pltpu.CompilerParams(dimension_semantics=("arbitrary",))
    par = pltpu.CompilerParams(dimension_semantics=("parallel",))

    # ----------------- pass 1: conv1 + BN1 batch statistics -----------------
    k1 = functools.partial(_conv3x3_stats_kernel, stride=stride, Ho=Ho, Wo=Wo)
    y1, s1, q1 = pl.pallas_call(
        k1,
        grid=(N,),
        in_specs=[
            pl.BlockSpec((1, Hp, Wp, Cin_p), lambda b: (b, 0, 0, 0)),
            pl.BlockSpec((9, Cin_p, Cw_p), lambda b: (0, 0, 0)),
        ],
        out_specs=(
            pl.BlockSpec((1, P, Cw_p), lambda b: (b, 0, 0)),
            pl.BlockSpec((1, Cw_p), lambda b: (0, 0)),
            pl.BlockSpec((1, Cw_p), lambda b: (0, 0)),
        ),
        out_shape=(
            jax.ShapeDtypeStruct((N, P, Cw_p), jnp.float32),
            jax.ShapeDtypeStruct((1, Cw_p), jnp.float32),
            jax.ShapeDtypeStruct((1, Cw_p), jnp.float32),
        ),
        compiler_params=arb,
        cost_estimate=pl.CostEstimate(
            flops=int(2 * N * P * 9 * Cin_p * Cw_p),
            transcendentals=0,
            bytes_accessed=int(N * Hp * Wp * Cin_p * 2
                               + 9 * Cin_p * Cw_p * 2
                               + N * P * Cw_p * 4)),
    )(x_sp, w1m)

    a1, sh1 = _bn_affine(s1, q1, N * P, g1p, b1p)        # (1, Cw_p) each

    use_conv_sc = (stride != 1) or (Cin != Cout)

    # ---- pass 2: fused bn1+lrelu, conv2 + BN2 stats (+ shortcut stats) -----
    if use_conv_sc:
        ws, gs_v, bs_v = params["ws"], params["gs"], params["bs"]
        wsm = jnp.pad(ws.reshape(Cout, Cin).T.astype(jnp.float32),
                      ((0, Cin_p - Cin), (0, Cout_p - Cout)))     # (Cin_p, Cout_p)
        wsm_bf = wsm.astype(jnp.bfloat16)
        x_s = x_cp[:, ::stride, ::stride, :].reshape(N, P, Cin_p).astype(jnp.bfloat16)

        k2 = functools.partial(_mid_kernel_convsc, Ho=Ho, Wo=Wo)
        y2, s2, q2, ss, qs = pl.pallas_call(
            k2,
            grid=(N,),
            in_specs=[
                pl.BlockSpec((1, P, Cw_p), lambda b: (b, 0, 0)),
                pl.BlockSpec((1, Cw_p), lambda b: (0, 0)),
                pl.BlockSpec((1, Cw_p), lambda b: (0, 0)),
                pl.BlockSpec((9, Cw_p, Cout_p), lambda b: (0, 0, 0)),
                pl.BlockSpec((1, P, Cin_p), lambda b: (b, 0, 0)),
                pl.BlockSpec((Cin_p, Cout_p), lambda b: (0, 0)),
            ],
            out_specs=(
                pl.BlockSpec((1, P, Cout_p), lambda b: (b, 0, 0)),
                pl.BlockSpec((1, Cout_p), lambda b: (0, 0)),
                pl.BlockSpec((1, Cout_p), lambda b: (0, 0)),
                pl.BlockSpec((1, Cout_p), lambda b: (0, 0)),
                pl.BlockSpec((1, Cout_p), lambda b: (0, 0)),
            ),
            out_shape=(
                jax.ShapeDtypeStruct((N, P, Cout_p), jnp.float32),
                jax.ShapeDtypeStruct((1, Cout_p), jnp.float32),
                jax.ShapeDtypeStruct((1, Cout_p), jnp.float32),
                jax.ShapeDtypeStruct((1, Cout_p), jnp.float32),
                jax.ShapeDtypeStruct((1, Cout_p), jnp.float32),
            ),
            scratch_shapes=[pltpu.VMEM((Ho + 2, Wo + 2, Cw_p), jnp.bfloat16)],
            compiler_params=arb,
            cost_estimate=pl.CostEstimate(
                flops=int(2 * N * P * (9 * Cw_p * Cout_p + Cin_p * Cout_p)),
                transcendentals=0,
                bytes_accessed=int(N * P * (Cw_p * 4 + Cout_p * 4 + Cin_p * 2)
                                   + 9 * Cw_p * Cout_p * 2
                                   + Cin_p * Cout_p * 2)),
        )(y1, a1, sh1, w2m, x_s, wsm_bf)

        a2, sh2 = _bn_affine(s2, q2, N * P, g2p, b2p)
        gsp, bsp = _pad_vec(gs_v, Cout_p), _pad_vec(bs_v, Cout_p)
        sc_s, sh_s = _bn_affine(ss, qs, N * P, gsp, bsp)
        ws_folded = (wsm * sc_s).astype(jnp.bfloat16)      # BN_s scale folded in

        out_p = pl.pallas_call(
            _final_kernel_convsc,
            grid=(N,),
            in_specs=[
                pl.BlockSpec((1, P, Cout_p), lambda b: (b, 0, 0)),
                pl.BlockSpec((1, Cout_p), lambda b: (0, 0)),
                pl.BlockSpec((1, Cout_p), lambda b: (0, 0)),
                pl.BlockSpec((1, P, Cin_p), lambda b: (b, 0, 0)),
                pl.BlockSpec((Cin_p, Cout_p), lambda b: (0, 0)),
                pl.BlockSpec((1, Cout_p), lambda b: (0, 0)),
            ],
            out_specs=pl.BlockSpec((1, P, Cout_p), lambda b: (b, 0, 0)),
            out_shape=jax.ShapeDtypeStruct((N, P, Cout_p), jnp.float32),
            compiler_params=par,
            cost_estimate=pl.CostEstimate(
                flops=int(2 * N * P * Cin_p * Cout_p + 6 * N * P * Cout_p),
                transcendentals=0,
                bytes_accessed=int(N * P * (Cout_p * 8 + Cin_p * 2))),
        )(y2, a2, sh2, x_s, ws_folded, sh_s)
    else:
        # identity shortcut: stride == 1 and Cin == Cout  (so Cin_p == Cout_p)
        x_id = x_cp.reshape(N, P, Cin_p)                     # f32, lane-aligned

        k2 = functools.partial(_mid_kernel_id, Ho=Ho, Wo=Wo)
        y2, s2, q2 = pl.pallas_call(
            k2,
            grid=(N,),
            in_specs=[
                pl.BlockSpec((1, P, Cw_p), lambda b: (b, 0, 0)),
                pl.BlockSpec((1, Cw_p), lambda b: (0, 0)),
                pl.BlockSpec((1, Cw_p), lambda b: (0, 0)),
                pl.BlockSpec((9, Cw_p, Cout_p), lambda b: (0, 0, 0)),
            ],
            out_specs=(
                pl.BlockSpec((1, P, Cout_p), lambda b: (b, 0, 0)),
                pl.BlockSpec((1, Cout_p), lambda b: (0, 0)),
                pl.BlockSpec((1, Cout_p), lambda b: (0, 0)),
            ),
            out_shape=(
                jax.ShapeDtypeStruct((N, P, Cout_p), jnp.float32),
                jax.ShapeDtypeStruct((1, Cout_p), jnp.float32),
                jax.ShapeDtypeStruct((1, Cout_p), jnp.float32),
            ),
            scratch_shapes=[pltpu.VMEM((Ho + 2, Wo + 2, Cw_p), jnp.bfloat16)],
            compiler_params=arb,
            cost_estimate=pl.CostEstimate(
                flops=int(2 * N * P * 9 * Cw_p * Cout_p),
                transcendentals=0,
                bytes_accessed=int(N * P * (Cw_p * 4 + Cout_p * 4)
                                   + 9 * Cw_p * Cout_p * 2)),
        )(y1, a1, sh1, w2m)

        a2, sh2 = _bn_affine(s2, q2, N * P, g2p, b2p)

        out_p = pl.pallas_call(
            _final_kernel_id,
            grid=(N,),
            in_specs=[
                pl.BlockSpec((1, P, Cout_p), lambda b: (b, 0, 0)),
                pl.BlockSpec((1, Cout_p), lambda b: (0, 0)),
                pl.BlockSpec((1, Cout_p), lambda b: (0, 0)),
                pl.BlockSpec((1, P, Cout_p), lambda b: (b, 0, 0)),
            ],
            out_specs=pl.BlockSpec((1, P, Cout_p), lambda b: (b, 0, 0)),
            out_shape=jax.ShapeDtypeStruct((N, P, Cout_p), jnp.float32),
            compiler_params=par,
            cost_estimate=pl.CostEstimate(
                flops=int(6 * N * P * Cout_p),
                transcendentals=0,
                bytes_accessed=int(N * P * Cout_p * 12)),
        )(y2, a2, sh2, x_id)

    out = out_p[:, :, :Cout].reshape(N, Ho, Wo, Cout)
    return jnp.transpose(out, (0, 3, 1, 2))                  # NCHW


# ---------------------------- pure-JAX reference ------------------------------
def _reference_forward(x, params, stride):
    def conv(v, w, s, pad):
        return jax.lax.conv_general_dilated(
            v, w, (s, s), [(pad, pad), (pad, pad)],
            dimension_numbers=("NCHW", "OIHW", "NCHW"))

    def bn(v, g, b):
        mean = v.mean(axis=(0, 2, 3), keepdims=True)
        var = ((v - mean) ** 2).mean(axis=(0, 2, 3), keepdims=True)
        return ((v - mean) / jnp.sqrt(var + EPS)) * g.reshape(1, -1, 1, 1) \
            + b.reshape(1, -1, 1, 1)

    lrelu = lambda v: jnp.where(v >= 0, v, NEG_SLOPE * v)

    out = lrelu(bn(conv(x, params["w1"], stride, 1), params["g1"], params["b1"]))
    out = bn(conv(out, params["w2"], 1, 1), params["g2"], params["b2"])
    Cin, Cout = x.shape[1], params["w2"].shape[0]
    if stride != 1 or Cin != Cout:
        sc = bn(conv(x, params["ws"], stride, 0), params["gs"], params["bs"])
    else:
        sc = x
    return lrelu(out + sc)


# ------------------------------------ main ------------------------------------
if __name__ == "__main__":
    def make_params(key, in_channels, out_channels, widen_factor):
        Cw = out_channels * widen_factor
        k = jax.random.split(key, 10)

        def he(kk, shape):
            fan_in = shape[1] * shape[2] * shape[3]
            return jax.random.normal(kk, shape, jnp.float32) * (2.0 / fan_in) ** 0.5

        p = dict(
            w1=he(k[0], (Cw, in_channels, 3, 3)),
            g1=1.0 + 0.1 * jax.random.normal(k[1], (Cw,), jnp.float32),
            b1=0.1 * jax.random.normal(k[2], (Cw,), jnp.float32),
            w2=he(k[3], (out_channels, Cw, 3, 3)),
            g2=1.0 + 0.1 * jax.random.normal(k[4], (out_channels,), jnp.float32),
            b2=0.1 * jax.random.normal(k[5], (out_channels,), jnp.float32),
            ws=he(k[6], (out_channels, in_channels, 1, 1)),
            gs=1.0 + 0.1 * jax.random.normal(k[7], (out_channels,), jnp.float32),
            bs=0.1 * jax.random.normal(k[8], (out_channels,), jnp.float32),
        )
        return p, k[9]

    key = jax.random.PRNGKey(0)
    N, H, W = 2, 16, 16

    # config 1: projection (1x1 conv + BN) shortcut  (Cin != Cout)
    # config 2: identity shortcut                    (Cin == Cout, stride 1)
    for (cin, cout, widen, stride) in [(4, 8, 2, 1), (8, 8, 2, 1)]:
        key, sub = jax.random.split(key)
        params, xkey = make_params(sub, cin, cout, widen)
        x = jax.random.normal(xkey, (N, cin, H, W), jnp.float32)

        out = jax.block_until_ready(
            wide_resnet_block_forward(x, params, stride=stride))
        assert out.shape == (N, cout, H // stride, W // stride), out.shape

        ref = jax.block_until_ready(_reference_forward(x, params, stride))
        err = float(np.max(np.abs(np.asarray(out) - np.asarray(ref))))
        if not np.allclose(np.asarray(out), np.asarray(ref),
                           rtol=5e-2, atol=5e-2):
            raise AssertionError(
                "mismatch vs reference (cin=%d cout=%d stride=%d), "
                "max abs diff = %g" % (cin, cout, stride, err))

    print("KERNEL_OK")
</pallas_src>

<mosaic_0001>
module attributes {stable_mosaic.version = 11 : i64} {
  func.func @_conv3x3_stats_kernel(%arg0: i32, %arg1: memref<1x18x18x128xbf16, #tpu.memory_space<vmem>>, %arg2: memref<9x128x128xbf16, #tpu.memory_space<vmem>>, %arg3: memref<1x256x128xf32, #tpu.memory_space<vmem>>, %arg4: memref<1x128xf32, #tpu.memory_space<vmem>>, %arg5: memref<1x128xf32, #tpu.memory_space<vmem>>) attributes {dimension_semantics = [#tpu.dimension_semantics<arbitrary>], iteration_bounds = array<i64: 2>, scalar_prefetch = 0 : i64, scratch_operands = 0 : i64, tpu.core_type = #tpu.core_type<tc>, window_params = [{transform_indices = @transform_0, window_bounds = array<i64: 1, 18, 18, 128>}, {pipeline_mode = #tpu.pipeline_mode<synchronous>, transform_indices = @transform_1, window_bounds = array<i64: 9, 128, 128>}, {transform_indices = @transform_2, window_bounds = array<i64: 1, 256, 128>}, {pipeline_mode = #tpu.pipeline_mode<synchronous>, transform_indices = @transform_3, window_bounds = array<i64: 1, 128>}, {pipeline_mode = #tpu.pipeline_mode<synchronous>, transform_indices = @transform_4, window_bounds = array<i64: 1, 128>}]} {
    %c0_i32 = arith.constant 0 : i32
    %0 = arith.cmpi eq, %arg0, %c0_i32 : i32
    %1 = arith.extui %0 : i1 to i32
    %c0_i32_0 = arith.constant 0 : i32
    %2 = arith.cmpi ne, %1, %c0_i32_0 : i32
    scf.if %2 {
      %cst_76 = arith.constant 0.000000e+00 : f32
      %79 = vector.broadcast %cst_76 : f32 to vector<1x128xf32>
      %c0_77 = arith.constant 0 : index
      %c0_78 = arith.constant 0 : index
      %80 = vector.load %arg4[%c0_77, %c0_78] : memref<1x128xf32, #tpu.memory_space<vmem>>, vector<1x128xf32>
      tpu.vector_store %arg4[%c0_77, %c0_78], %79 {strides = array<i32>} : memref<1x128xf32, #tpu.memory_space<vmem>>, vector<1x128xf32>,
      %cst_79 = arith.constant 0.000000e+00 : f32
      %81 = vector.broadcast %cst_79 : f32 to vector<1x128xf32>
      %c0_80 = arith.constant 0 : index
      %c0_81 = arith.constant 0 : index
      %82 = vector.load %arg5[%c0_80, %c0_81] : memref<1x128xf32, #tpu.memory_space<vmem>>, vector<1x128xf32>
      tpu.vector_store %arg5[%c0_80, %c0_81], %81 {strides = array<i32>} : memref<1x128xf32, #tpu.memory_space<vmem>>, vector<1x128xf32>,
    } else {
    }
    %c0 = arith.constant 0 : index
    %c0_1 = arith.constant 0 : index
    %c0_2 = arith.constant 0 : index
    %c0_3 = arith.constant 0 : index
    %3 = vector.load %arg1[%c0, %c0_1, %c0_2, %c0_3] : memref<1x18x18x128xbf16, #tpu.memory_space<vmem>>, vector<1x16x16x128xbf16>
    %4 = vector.shape_cast %3 : vector<1x16x16x128xbf16> to vector<16x16x128xbf16>
    %5 = vector.shape_cast %4 : vector<16x16x128xbf16> to vector<256x128xbf16>
    %c0_4 = arith.constant 0 : index
    %c0_5 = arith.constant 0 : index
    %c0_6 = arith.constant 0 : index
    %6 = vector.load %arg2[%c0_4, %c0_5, %c0_6] : memref<9x128x128xbf16, #tpu.memory_space<vmem>>, vector<1x128x128xbf16>
    %7 = vector.shape_cast %6 : vector<1x128x128xbf16> to vector<128x128xbf16>
    %cst = arith.constant dense<0.000000e+00> : vector<256x128xf32>
    %8 = tpu.matmul %5, %7, %cst {dimension_numbers = #tpu.dot_dimension_numbers<[1], [0], [0], [1], [0, 0, 1, 1], [], []>} : vector<256x128xbf16>, vector<128x128xbf16>, vector<256x128xf32> -> vector<256x128xf32>
    %c0_7 = arith.constant 0 : index
    %c0_8 = arith.constant 0 : index
    %c1 = arith.constant 1 : index
    %c0_9 = arith.constant 0 : index
    %9 = vector.load %arg1[%c0_7, %c0_8, %c1, %c0_9] : memref<1x18x18x128xbf16, #tpu.memory_space<vmem>>, vector<1x16x16x128xbf16>
    %10 = vector.shape_cast %9 : vector<1x16x16x128xbf16> to vector<16x16x128xbf16>
    %11 = vector.shape_cast %10 : vector<16x16x128xbf16> to vector<256x128xbf16>
    %c1_10 = arith.constant 1 : index
    %c0_11 = arith.constant 0 : index
    %c0_12 = arith.constant 0 : index
    %12 = vector.load %arg2[%c1_10, %c0_11, %c0_12] : memref<9x128x128xbf16, #tpu.memory_space<vmem>>, vector<1x128x128xbf16>
    %13 = vector.shape_cast %12 : vector<1x128x128xbf16> to vector<128x128xbf16>
    %cst_13 = arith.constant dense<0.000000e+00> : vector<256x128xf32>
    %14 = tpu.matmul %11, %13, %cst_13 {dimension_numbers = #tpu.dot_dimension_numbers<[1], [0], [0], [1], [0, 0, 1, 1], [], []>} : vector<256x128xbf16>, vector<128x128xbf16>, vector<256x128xf32> -> vector<256x128xf32>
    %15 = arith.addf %8, %14 : vector<256x128xf32>
    %c0_14 = arith.constant 0 : index
    %c0_15 = arith.constant 0 : index
    %c2 = arith.constant 2 : index
    %c0_16 = arith.constant 0 : index
    %16 = vector.load %arg1[%c0_14, %c0_15, %c2, %c0_16] : memref<1x18x18x128xbf16, #tpu.memory_space<vmem>>, vector<1x16x16x128xbf16>
    %17 = vector.shape_cast %16 : vector<1x16x16x128xbf16> to vector<16x16x128xbf16>
    %18 = vector.shape_cast %17 : vector<16x16x128xbf16> to vector<256x128xbf16>
    %c2_17 = arith.constant 2 : index
    %c0_18 = arith.constant 0 : index
    %c0_19 = arith.constant 0 : index
    %19 = vector.load %arg2[%c2_17, %c0_18, %c0_19] : memref<9x128x128xbf16, #tpu.memory_space<vmem>>, vector<1x128x128xbf16>
    %20 = vector.shape_cast %19 : vector<1x128x128xbf16> to vector<128x128xbf16>
    %cst_20 = arith.constant dense<0.000000e+00> : vector<256x128xf32>
    %21 = tpu.matmul %18, %20, %cst_20 {dimension_numbers = #tpu.dot_dimension_numbers<[1], [0], [0], [1], [0, 0, 1, 1], [], []>} : vector<256x128xbf16>, vector<128x128xbf16>, vector<256x128xf32> -> vector<256x128xf32>
    %22 = arith.addf %15, %21 : vector<256x128xf32>
    %c0_21 = arith.constant 0 : index
    %c1_22 = arith.constant 1 : index
    %c0_23 = arith.constant 0 : index
    %c0_24 = arith.constant 0 : index
    %23 = vector.load %arg1[%c0_21, %c1_22, %c0_23, %c0_24] : memref<1x18x18x128xbf16, #tpu.memory_space<vmem>>, vector<1x16x16x128xbf16>
    %24 = vector.shape_cast %23 : vector<1x16x16x128xbf16> to vector<16x16x128xbf16>
    %25 = vector.shape_cast %24 : vector<16x16x128xbf16> to vector<256x128xbf16>
    %c3 = arith.constant 3 : index
    %c0_25 = arith.constant 0 : index
    %c0_26 = arith.constant 0 : index
    %26 = vector.load %arg2[%c3, %c0_25, %c0_26] : memref<9x128x128xbf16, #tpu.memory_space<vmem>>, vector<1x128x128xbf16>
    %27 = vector.shape_cast %26 : vector<1x128x128xbf16> to vector<128x128xbf16>
    %cst_27 = arith.constant dense<0.000000e+00> : vector<256x128xf32>
    %28 = tpu.matmul %25, %27, %cst_27 {dimension_numbers = #tpu.dot_dimension_numbers<[1], [0], [0], [1], [0, 0, 1, 1], [], []>} : vector<256x128xbf16>, vector<128x128xbf16>, vector<256x128xf32> -> vector<256x128xf32>
    %29 = arith.addf %22, %28 : vector<256x128xf32>
    %c0_28 = arith.constant 0 : index
    %c1_29 = arith.constant 1 : index
    %c1_30 = arith.constant 1 : index
    %c0_31 = arith.constant 0 : index
    %30 = vector.load %arg1[%c0_28, %c1_29, %c1_30, %c0_31] : memref<1x18x18x128xbf16, #tpu.memory_space<vmem>>, vector<1x16x16x128xbf16>
    %31 = vector.shape_cast %30 : vector<1x16x16x128xbf16> to vector<16x16x128xbf16>
    %32 = vector.shape_cast %31 : vector<16x16x128xbf16> to vector<256x128xbf16>
    %c4 = arith.constant 4 : index
    %c0_32 = arith.constant 0 : index
    %c0_33 = arith.constant 0 : index
    %33 = vector.load %arg2[%c4, %c0_32, %c0_33] : memref<9x128x128xbf16, #tpu.memory_space<vmem>>, vector<1x128x128xbf16>
    %34 = vector.shape_cast %33 : vector<1x128x128xbf16> to vector<128x128xbf16>
    %cst_34 = arith.constant dense<0.000000e+00> : vector<256x128xf32>
    %35 = tpu.matmul %32, %34, %cst_34 {dimension_numbers = #tpu.dot_dimension_numbers<[1], [0], [0], [1], [0, 0, 1, 1], [], []>} : vector<256x128xbf16>, vector<128x128xbf16>, vector<256x128xf32> -> vector<256x128xf32>
    %36 = arith.addf %29, %35 : vector<256x128xf32>
    %c0_35 = arith.constant 0 : index
    %c1_36 = arith.constant 1 : index
    %c2_37 = arith.constant 2 : index
    %c0_38 = arith.constant 0 : index
    %37 = vector.load %arg1[%c0_35, %c1_36, %c2_37, %c0_38] : memref<1x18x18x128xbf16, #tpu.memory_space<vmem>>, vector<1x16x16x128xbf16>
    %38 = vector.shape_cast %37 : vector<1x16x16x128xbf16> to vector<16x16x128xbf16>
    %39 = vector.shape_cast %38 : vector<16x16x128xbf16> to vector<256x128xbf16>
    %c5 = arith.constant 5 : index
    %c0_39 = arith.constant 0 : index
    %c0_40 = arith.constant 0 : index
    %40 = vector.load %arg2[%c5, %c0_39, %c0_40] : memref<9x128x128xbf16, #tpu.memory_space<vmem>>, vector<1x128x128xbf16>
    %41 = vector.shape_cast %40 : vector<1x128x128xbf16> to vector<128x128xbf16>
    %cst_41 = arith.constant dense<0.000000e+00> : vector<256x128xf32>
    %42 = tpu.matmul %39, %41, %cst_41 {dimension_numbers = #tpu.dot_dimension_numbers<[1], [0], [0], [1], [0, 0, 1, 1], [], []>} : vector<256x128xbf16>, vector<128x128xbf16>, vector<256x128xf32> -> vector<256x128xf32>
    %43 = arith.addf %36, %42 : vector<256x128xf32>
    %c0_42 = arith.constant 0 : index
    %c2_43 = arith.constant 2 : index
    %c0_44 = arith.constant 0 : index
    %c0_45 = arith.constant 0 : index
    %44 = vector.load %arg1[%c0_42, %c2_43, %c0_44, %c0_45] : memref<1x18x18x128xbf16, #tpu.memory_space<vmem>>, vector<1x16x16x128xbf16>
    %45 = vector.shape_cast %44 : vector<1x16x16x128xbf16> to vector<16x16x128xbf16>
    %46 = vector.shape_cast %45 : vector<16x16x128xbf16> to vector<256x128xbf16>
    %c6 = arith.constant 6 : index
    %c0_46 = arith.constant 0 : index
    %c0_47 = arith.constant 0 : index
    %47 = vector.load %arg2[%c6, %c0_46, %c0_47] : memref<9x128x128xbf16, #tpu.memory_space<vmem>>, vector<1x128x128xbf16>
    %48 = vector.shape_cast %47 : vector<1x128x128xbf16> to vector<128x128xbf16>
    %cst_48 = arith.constant dense<0.000000e+00> : vector<256x128xf32>
    %49 = tpu.matmul %46, %48, %cst_48 {dimension_numbers = #tpu.dot_dimension_numbers<[1], [0], [0], [1], [0, 0, 1, 1], [], []>} : vector<256x128xbf16>, vector<128x128xbf16>, vector<256x128xf32> -> vector<256x128xf32>
    %50 = arith.addf %43, %49 : vector<256x128xf32>
    %c0_49 = arith.constant 0 : index
    %c2_50 = arith.constant 2 : index
    %c1_51 = arith.constant 1 : index
    %c0_52 = arith.constant 0 : index
    %51 = vector.load %arg1[%c0_49, %c2_50, %c1_51, %c0_52] : memref<1x18x18x128xbf16, #tpu.memory_space<vmem>>, vector<1x16x16x128xbf16>
    %52 = vector.shape_cast %51 : vector<1x16x16x128xbf16> to vector<16x16x128xbf16>
    %53 = vector.shape_cast %52 : vector<16x16x128xbf16> to vector<256x128xbf16>
    %c7 = arith.constant 7 : index
    %c0_53 = arith.constant 0 : index
    %c0_54 = arith.constant 0 : index
    %54 = vector.load %arg2[%c7, %c0_53, %c0_54] : memref<9x128x128xbf16, #tpu.memory_space<vmem>>, vector<1x128x128xbf16>
    %55 = vector.shape_cast %54 : vector<1x128x128xbf16> to vector<128x128xbf16>
    %cst_55 = arith.constant dense<0.000000e+00> : vector<256x128xf32>
    %56 = tpu.matmul %53, %55, %cst_55 {dimension_numbers = #tpu.dot_dimension_numbers<[1], [0], [0], [1], [0, 0, 1, 1], [], []>} : vector<256x128xbf16>, vector<128x128xbf16>, vector<256x128xf32> -> vector<256x128xf32>
    %57 = arith.addf %50, %56 : vector<256x128xf32>
    %c0_56 = arith.constant 0 : index
    %c2_57 = arith.constant 2 : index
    %c2_58 = arith.constant 2 : index
    %c0_59 = arith.constant 0 : index
    %58 = vector.load %arg1[%c0_56, %c2_57, %c2_58, %c0_59] : memref<1x18x18x128xbf16, #tpu.memory_space<vmem>>, vector<1x16x16x128xbf16>
    %59 = vector.shape_cast %58 : vector<1x16x16x128xbf16> to vector<16x16x128xbf16>
    %60 = vector.shape_cast %59 : vector<16x16x128xbf16> to vector<256x128xbf16>
    %c8 = arith.constant 8 : index
    %c0_60 = arith.constant 0 : index
    %c0_61 = arith.constant 0 : index
    %61 = vector.load %arg2[%c8, %c0_60, %c0_61] : memref<9x128x128xbf16, #tpu.memory_space<vmem>>, vector<1x128x128xbf16>
    %62 = vector.shape_cast %61 : vector<1x128x128xbf16> to vector<128x128xbf16>
    %cst_62 = arith.constant dense<0.000000e+00> : vector<256x128xf32>
    %63 = tpu.matmul %60, %62, %cst_62 {dimension_numbers = #tpu.dot_dimension_numbers<[1], [0], [0], [1], [0, 0, 1, 1], [], []>} : vector<256x128xbf16>, vector<128x128xbf16>, vector<256x128xf32> -> vector<256x128xf32>
    %64 = arith.addf %57, %63 : vector<256x128xf32>
    %c0_63 = arith.constant 0 : index
    %c0_64 = arith.constant 0 : index
    %c0_65 = arith.constant 0 : index
    %65 = vector.load %arg3[%c0_63, %c0_64, %c0_65] : memref<1x256x128xf32, #tpu.memory_space<vmem>>, vector<1x256x128xf32>
    %66 = vector.shape_cast %65 : vector<1x256x128xf32> to vector<256x128xf32>
    %67 = vector.shape_cast %64 : vector<256x128xf32> to vector<1x256x128xf32>
    tpu.vector_store %arg3[%c0_63, %c0_64, %c0_65], %67 {strides = array<i32>} : memref<1x256x128xf32, #tpu.memory_space<vmem>>, vector<1x256x128xf32>,
    %c0_66 = arith.constant 0 : index
    %c0_67 = arith.constant 0 : index
    %68 = vector.load %arg4[%c0_66, %c0_67] : memref<1x128xf32, #tpu.memory_space<vmem>>, vector<1x128xf32>
    %cst_68 = arith.constant dense<0.000000e+00> : vector<128xf32>
    %69 = vector.multi_reduction <add>, %64, %cst_68 [0] : vector<256x128xf32> to vector<128xf32>
    %70 = vector.shape_cast %69 : vector<128xf32> to vector<1x128xf32>
    %71 = arith.addf %68, %70 : vector<1x128xf32>
    %c0_69 = arith.constant 0 : index
    %c0_70 = arith.constant 0 : index
    %72 = vector.load %arg4[%c0_69, %c0_70] : memref<1x128xf32, #tpu.memory_space<vmem>>, vector<1x128xf32>
    tpu.vector_store %arg4[%c0_69, %c0_70], %71 {strides = array<i32>} : memref<1x128xf32, #tpu.memory_space<vmem>>, vector<1x128xf32>,
    %c0_71 = arith.constant 0 : index
    %c0_72 = arith.constant 0 : index
    %73 = vector.load %arg5[%c0_71, %c0_72] : memref<1x128xf32, #tpu.memory_space<vmem>>, vector<1x128xf32>
    %74 = arith.mulf %64, %64 : vector<256x128xf32>
    %cst_73 = arith.constant dense<0.000000e+00> : vector<128xf32>
    %75 = vector.multi_reduction <add>, %74, %cst_73 [0] : vector<256x128xf32> to vector<128xf32>
    %76 = vector.shape_cast %75 : vector<128xf32> to vector<1x128xf32>
    %77 = arith.addf %73, %76 : vector<1x128xf32>
    %c0_74 = arith.constant 0 : index
    %c0_75 = arith.constant 0 : index
    %78 = vector.load %arg5[%c0_74, %c0_75] : memref<1x128xf32, #tpu.memory_space<vmem>>, vector<1x128xf32>
    tpu.vector_store %arg5[%c0_74, %c0_75], %77 {strides = array<i32>} : memref<1x128xf32, #tpu.memory_space<vmem>>, vector<1x128xf32>,
    return
  }
  func.func @transform_0(%arg0: i32) -> (i32, i32, i32, i32) {
    %c0_i32 = arith.constant 0 : i32
    %c0_i32_0 = arith.constant 0 : i32
    %c0_i32_1 = arith.constant 0 : i32
    %c0_i32_2 = arith.constant 0 : i32
    return %arg0, %c0_i32, %c0_i32_0, %c0_i32_1 : i32, i32, i32, i32
  }
  func.func @transform_1(%arg0: i32) -> (i32, i32, i32) {
    %c0_i32 = arith.constant 0 : i32
    %c0_i32_0 = arith.constant 0 : i32
    %c0_i32_1 = arith.constant 0 : i32
    %c0_i32_2 = arith.constant 0 : i32
    return %c0_i32, %c0_i32_0, %c0_i32_1 : i32, i32, i32
  }
  func.func @transform_2(%arg0: i32) -> (i32, i32, i32) {
    %c0_i32 = arith.constant 0 : i32
    %c0_i32_0 = arith.constant 0 : i32
    %c0_i32_1 = arith.constant 0 : i32
    return %arg0, %c0_i32, %c0_i32_0 : i32, i32, i32
  }
  func.func @transform_3(%arg0: i32) -> (i32, i32) {
    %c0_i32 = arith.constant 0 : i32
    %c0_i32_0 = arith.constant 0 : i32
    %c0_i32_1 = arith.constant 0 : i32
    return %c0_i32, %c0_i32_0 : i32, i32
  }
  func.func @transform_4(%arg0: i32) -> (i32, i32) {
    %c0_i32 = arith.constant 0 : i32
    %c0_i32_0 = arith.constant 0 : i32
    %c0_i32_1 = arith.constant 0 : i32
    return %c0_i32, %c0_i32_0 : i32, i32
  }
}

module attributes {stable_mosaic.version = 11 : i64} {
  func.func @_mid_kernel_convsc(%arg0: i32, %arg1: memref<1x256x128xf32, #tpu.memory_space<vmem>>, %arg2: memref<1x128xf32, #tpu.memory_space<vmem>>, %arg3: memref<1x128xf32, #tpu.memory_space<vmem>>, %arg4: memref<9x128x128xbf16, #tpu.memory_space<vmem>>, %arg5: memref<1x256x128xbf16, #tpu.memory_space<vmem>>, %arg6: memref<128x128xbf16, #tpu.memory_space<vmem>>, %arg7: memref<1x256x128xf32, #tpu.memory_space<vmem>>, %arg8: memref<1x128xf32, #tpu.memory_space<vmem>>, %arg9: memref<1x128xf32, #tpu.memory_space<vmem>>, %arg10: memref<1x128xf32, #tpu.memory_space<vmem>>, %arg11: memref<1x128xf32, #tpu.memory_space<vmem>>, %arg12: memref<18x18x128xbf16, #tpu.memory_space<vmem>>) attributes {dimension_semantics = [#tpu.dimension_semantics<arbitrary>], iteration_bounds = array<i64: 2>, scalar_prefetch = 0 : i64, scratch_operands = 1 : i64, tpu.core_type = #tpu.core_type<tc>, window_params = [{transform_indices = @transform_0, window_bounds = array<i64: 1, 256, 128>}, {pipeline_mode = #tpu.pipeline_mode<synchronous>, transform_indices = @transform_1, window_bounds = array<i64: 1, 128>}, {pipeline_mode = #tpu.pipeline_mode<synchronous>, transform_indices = @transform_2, window_bounds = array<i64: 1, 128>}, {pipeline_mode = #tpu.pipeline_mode<synchronous>, transform_indices = @transform_3, window_bounds = array<i64: 9, 128, 128>}, {transform_indices = @transform_4, window_bounds = array<i64: 1, 256, 128>}, {pipeline_mode = #tpu.pipeline_mode<synchronous>, transform_indices = @transform_5, window_bounds = array<i64: 128, 128>}, {transform_indices = @transform_6, window_bounds = array<i64: 1, 256, 128>}, {pipeline_mode = #tpu.pipeline_mode<synchronous>, transform_indices = @transform_7, window_bounds = array<i64: 1, 128>}, {pipeline_mode = #tpu.pipeline_mode<synchronous>, transform_indices = @transform_8, window_bounds = array<i64: 1, 128>}, {pipeline_mode = #tpu.pipeline_mode<synchronous>, transform_indices = @transform_9, window_bounds = array<i64: 1, 128>}, {pipeline_mode = #tpu.pipeline_mode<synchronous>, transform_indices = @transform_10, window_bounds = array<i64: 1, 128>}]} {
    %c0_i32 = arith.constant 0 : i32
    %0 = arith.cmpi eq, %arg0, %c0_i32 : i32
    %1 = arith.extui %0 : i1 to i32
    %c0_i32_0 = arith.constant 0 : i32
    %2 = arith.cmpi ne, %1, %c0_i32_0 : i32
    scf.if %2 {
      %cst_97 = arith.constant 0.000000e+00 : f32
      %104 = vector.broadcast %cst_97 : f32 to vector<1x128xf32>
      %c0_98 = arith.constant 0 : index
      %c0_99 = arith.constant 0 : index
      %105 = vector.load %arg10[%c0_98, %c0_99] : memref<1x128xf32, #tpu.memory_space<vmem>>, vector<1x128xf32>
      tpu.vector_store %arg10[%c0_98, %c0_99], %104 {strides = array<i32>} : memref<1x128xf32, #tpu.memory_space<vmem>>, vector<1x128xf32>,
      %cst_100 = arith.constant 0.000000e+00 : f32
      %106 = vector.broadcast %cst_100 : f32 to vector<1x128xf32>
      %c0_101 = arith.constant 0 : index
      %c0_102 = arith.constant 0 : index
      %107 = vector.load %arg11[%c0_101, %c0_102] : memref<1x128xf32, #tpu.memory_space<vmem>>, vector<1x128xf32>
      tpu.vector_store %arg11[%c0_101, %c0_102], %106 {strides = array<i32>} : memref<1x128xf32, #tpu.memory_space<vmem>>, vector<1x128xf32>,
    } else {
    }
    %c0_i32_1 = arith.constant 0 : i32
    %3 = arith.cmpi eq, %arg0, %c0_i32_1 : i32
    %4 = arith.extui %3 : i1 to i32
    %c0_i32_2 = arith.constant 0 : i32
    %5 = arith.cmpi ne, %4, %c0_i32_2 : i32
    scf.if %5 {
      %cst_97 = arith.constant 0.000000e+00 : f32
      %104 = vector.broadcast %cst_97 : f32 to vector<1x128xf32>
      %c0_98 = arith.constant 0 : index
      %c0_99 = arith.constant 0 : index
      %105 = vector.load %arg8[%c0_98, %c0_99] : memref<1x128xf32, #tpu.memory_space<vmem>>, vector<1x128xf32>
      tpu.vector_store %arg8[%c0_98, %c0_99], %104 {strides = array<i32>} : memref<1x128xf32, #tpu.memory_space<vmem>>, vector<1x128xf32>,
      %cst_100 = arith.constant 0.000000e+00 : f32
      %106 = vector.broadcast %cst_100 : f32 to vector<1x128xf32>
      %c0_101 = arith.constant 0 : index
      %c0_102 = arith.constant 0 : index
      %107 = vector.load %arg9[%c0_101, %c0_102] : memref<1x128xf32, #tpu.memory_space<vmem>>, vector<1x128xf32>
      tpu.vector_store %arg9[%c0_101, %c0_102], %106 {strides = array<i32>} : memref<1x128xf32, #tpu.memory_space<vmem>>, vector<1x128xf32>,
      %cst_103 = arith.constant 0.000000e+00 : bf16
      %108 = vector.broadcast %cst_103 : bf16 to vector<18x18x128xbf16>
      %c0_104 = arith.constant 0 : index
      %c0_105 = arith.constant 0 : index
      %c0_106 = arith.constant 0 : index
      %109 = vector.load %arg12[%c0_104, %c0_105, %c0_106] : memref<18x18x128xbf16, #tpu.memory_space<vmem>>, vector<18x18x128xbf16>
      tpu.vector_store %arg12[%c0_104, %c0_105, %c0_106], %108 {strides = array<i32>} : memref<18x18x128xbf16, #tpu.memory_space<vmem>>, vector<18x18x128xbf16>,
    } else {
    }
    %c0 = arith.constant 0 : index
    %c0_3 = arith.constant 0 : index
    %c0_4 = arith.constant 0 : index
    %6 = vector.load %arg1[%c0, %c0_3, %c0_4] : memref<1x256x128xf32, #tpu.memory_space<vmem>>, vector<1x256x128xf32>
    %7 = vector.shape_cast %6 : vector<1x256x128xf32> to vector<256x128xf32>
    %c0_5 = arith.constant 0 : index
    %c0_6 = arith.constant 0 : index
    %8 = vector.load %arg2[%c0_5, %c0_6] : memref<1x128xf32, #tpu.memory_space<vmem>>, vector<1x128xf32>
    %9 = vector.broadcast %8 : vector<1x128xf32> to vector<256x128xf32>
    %10 = arith.mulf %7, %9 : vector<256x128xf32>
    %c0_7 = arith.constant 0 : index
    %c0_8 = arith.constant 0 : index
    %11 = vector.load %arg3[%c0_7, %c0_8] : memref<1x128xf32, #tpu.memory_space<vmem>>, vector<1x128xf32>
    %12 = vector.broadcast %11 : vector<1x128xf32> to vector<256x128xf32>
    %13 = arith.addf %10, %12 : vector<256x128xf32>
    %cst = arith.constant 0.000000e+00 : f32
    %14 = vector.broadcast %cst : f32 to vector<256x128xf32>
    %15 = arith.cmpf oge, %13, %14 : vector<256x128xf32>
    %cst_9 = arith.constant 0.00999999977 : f32
    %16 = vector.broadcast %cst_9 : f32 to vector<256x128xf32>
    %17 = arith.mulf %16, %13 : vector<256x128xf32>
    %18 = arith.select %15, %13, %17 : vector<256x128xi1>, vector<256x128xf32>
    %19 = vector.shape_cast %18 : vector<256x128xf32> to vector<16x16x128xf32>
    %20 = arith.truncf %19 : vector<16x16x128xf32> to vector<16x16x128xbf16>
    %c1 = arith.constant 1 : index
    %c1_10 = arith.constant 1 : index
    %c0_11 = arith.constant 0 : index
    %21 = vector.load %arg12[%c1, %c1_10, %c0_11] : memref<18x18x128xbf16, #tpu.memory_space<vmem>>, vector<16x16x128xbf16>
    tpu.vector_store %arg12[%c1, %c1_10, %c0_11], %20 {strides = array<i32>} : memref<18x18x128xbf16, #tpu.memory_space<vmem>>, vector<16x16x128xbf16>,
    %c0_12 = arith.constant 0 : index
    %c0_13 = arith.constant 0 : index
    %c0_14 = arith.constant 0 : index
    %22 = vector.load %arg12[%c0_12, %c0_13, %c0_14] : memref<18x18x128xbf16, #tpu.memory_space<vmem>>, vector<16x16x128xbf16>
    %23 = vector.shape_cast %22 : vector<16x16x128xbf16> to vector<256x128xbf16>
    %c0_15 = arith.constant 0 : index
    %c0_16 = arith.constant 0 : index
    %c0_17 = arith.constant 0 : index
    %24 = vector.load %arg4[%c0_15, %c0_16, %c0_17] : memref<9x128x128xbf16, #tpu.memory_space<vmem>>, vector<1x128x128xbf16>
    %25 = vector.shape_cast %24 : vector<1x128x128xbf16> to vector<128x128xbf16>
    %cst_18 = arith.constant dense<0.000000e+00> : vector<256x128xf32>
    %26 = tpu.matmul %23, %25, %cst_18 {dimension_numbers = #tpu.dot_dimension_numbers<[1], [0], [0], [1], [0, 0, 1, 1], [], []>} : vector<256x128xbf16>, vector<128x128xbf16>, vector<256x128xf32> -> vector<256x128xf32>
    %c0_19 = arith.constant 0 : index
    %c1_20 = arith.constant 1 : index
    %c0_21 = arith.constant 0 : index
    %27 = vector.load %arg12[%c0_19, %c1_20, %c0_21] : memref<18x18x128xbf16, #tpu.memory_space<vmem>>, vector<16x16x128xbf16>
    %28 = vector.shape_cast %27 : vector<16x16x128xbf16> to vector<256x128xbf16>
    %c1_22 = arith.constant 1 : index
    %c0_23 = arith.constant 0 : index
    %c0_24 = arith.constant 0 : index
    %29 = vector.load %arg4[%c1_22, %c0_23, %c0_24] : memref<9x128x128xbf16, #tpu.memory_space<vmem>>, vector<1x128x128xbf16>
    %30 = vector.shape_cast %29 : vector<1x128x128xbf16> to vector<128x128xbf16>
    %cst_25 = arith.constant dense<0.000000e+00> : vector<256x128xf32>
    %31 = tpu.matmul %28, %30, %cst_25 {dimension_numbers = #tpu.dot_dimension_numbers<[1], [0], [0], [1], [0, 0, 1, 1], [], []>} : vector<256x128xbf16>, vector<128x128xbf16>, vector<256x128xf32> -> vector<256x128xf32>
    %32 = arith.addf %26, %31 : vector<256x128xf32>
    %c0_26 = arith.constant 0 : index
    %c2 = arith.constant 2 : index
    %c0_27 = arith.constant 0 : index
    %33 = vector.load %arg12[%c0_26, %c2, %c0_27] : memref<18x18x128xbf16, #tpu.memory_space<vmem>>, vector<16x16x128xbf16>
    %34 = vector.shape_cast %33 : vector<16x16x128xbf16> to vector<256x128xbf16>
    %c2_28 = arith.constant 2 : index
    %c0_29 = arith.constant 0 : index
    %c0_30 = arith.constant 0 : index
    %35 = vector.load %arg4[%c2_28, %c0_29, %c0_30] : memref<9x128x128xbf16, #tpu.memory_space<vmem>>, vector<1x128x128xbf16>
    %36 = vector.shape_cast %35 : vector<1x128x128xbf16> to vector<128x128xbf16>
    %cst_31 = arith.constant dense<0.000000e+00> : vector<256x128xf32>
    %37 = tpu.matmul %34, %36, %cst_31 {dimension_numbers = #tpu.dot_dimension_numbers<[1], [0], [0], [1], [0, 0, 1, 1], [], []>} : vector<256x128xbf16>, vector<128x128xbf16>, vector<256x128xf32> -> vector<256x128xf32>
    %38 = arith.addf %32, %37 : vector<256x128xf32>
    %c1_32 = arith.constant 1 : index
    %c0_33 = arith.constant 0 : index
    %c0_34 = arith.constant 0 : index
    %39 = vector.load %arg12[%c1_32, %c0_33, %c0_34] : memref<18x18x128xbf16, #tpu.memory_space<vmem>>, vector<16x16x128xbf16>
    %40 = vector.shape_cast %39 : vector<16x16x128xbf16> to vector<256x128xbf16>
    %c3 = arith.constant 3 : index
    %c0_35 = arith.constant 0 : index
    %c0_36 = arith.constant 0 : index
    %41 = vector.load %arg4[%c3, %c0_35, %c0_36] : memref<9x128x128xbf16, #tpu.memory_space<vmem>>, vector<1x128x128xbf16>
    %42 = vector.shape_cast %41 : vector<1x128x128xbf16> to vector<128x128xbf16>
    %cst_37 = arith.constant dense<0.000000e+00> : vector<256x128xf32>
    %43 = tpu.matmul %40, %42, %cst_37 {dimension_numbers = #tpu.dot_dimension_numbers<[1], [0], [0], [1], [0, 0, 1, 1], [], []>} : vector<256x128xbf16>, vector<128x128xbf16>, vector<256x128xf32> -> vector<256x128xf32>
    %44 = arith.addf %38, %43 : vector<256x128xf32>
    %c1_38 = arith.constant 1 : index
    %c1_39 = arith.constant 1 : index
    %c0_40 = arith.constant 0 : index
    %45 = vector.load %arg12[%c1_38, %c1_39, %c0_40] : memref<18x18x128xbf16, #tpu.memory_space<vmem>>, vector<16x16x128xbf16>
    %46 = vector.shape_cast %45 : vector<16x16x128xbf16> to vector<256x128xbf16>
    %c4 = arith.constant 4 : index
    %c0_41 = arith.constant 0 : index
    %c0_42 = arith.constant 0 : index
    %47 = vector.load %arg4[%c4, %c0_41, %c0_42] : memref<9x128x128xbf16, #tpu.memory_space<vmem>>, vector<1x128x128xbf16>
    %48 = vector.shape_cast %47 : vector<1x128x128xbf16> to vector<128x128xbf16>
    %cst_43 = arith.constant dense<0.000000e+00> : vector<256x128xf32>
    %49 = tpu.matmul %46, %48, %cst_43 {dimension_numbers = #tpu.dot_dimension_numbers<[1], [0], [0], [1], [0, 0, 1, 1], [], []>} : vector<256x128xbf16>, vector<128x128xbf16>, vector<256x128xf32> -> vector<256x128xf32>
    %50 = arith.addf %44, %49 : vector<256x128xf32>
    %c1_44 = arith.constant 1 : index
    %c2_45 = arith.constant 2 : index
    %c0_46 = arith.constant 0 : index
    %51 = vector.load %arg12[%c1_44, %c2_45, %c0_46] : memref<18x18x128xbf16, #tpu.memory_space<vmem>>, vector<16x16x128xbf16>
    %52 = vector.shape_cast %51 : vector<16x16x128xbf16> to vector<256x128xbf16>
    %c5 = arith.constant 5 : index
    %c0_47 = arith.constant 0 : index
    %c0_48 = arith.constant 0 : index
    %53 = vector.load %arg4[%c5, %c0_47, %c0_48] : memref<9x128x128xbf16, #tpu.memory_space<vmem>>, vector<1x128x128xbf16>
    %54 = vector.shape_cast %53 : vector<1x128x128xbf16> to vector<128x128xbf16>
    %cst_49 = arith.constant dense<0.000000e+00> : vector<256x128xf32>
    %55 = tpu.matmul %52, %54, %cst_49 {dimension_numbers = #tpu.dot_dimension_numbers<[1], [0], [0], [1], [0, 0, 1, 1], [], []>} : vector<256x128xbf16>, vector<128x128xbf16>, vector<256x128xf32> -> vector<256x128xf32>
    %56 = arith.addf %50, %55 : vector<256x128xf32>
    %c2_50 = arith.constant 2 : index
    %c0_51 = arith.constant 0 : index
    %c0_52 = arith.constant 0 : index
    %57 = vector.load %arg12[%c2_50, %c0_51, %c0_52] : memref<18x18x128xbf16, #tpu.memory_space<vmem>>, vector<16x16x128xbf16>
    %58 = vector.shape_cast %57 : vector<16x16x128xbf16> to vector<256x128xbf16>
    %c6 = arith.constant 6 : index
    %c0_53 = arith.constant 0 : index
    %c0_54 = arith.constant 0 : index
    %59 = vector.load %arg4[%c6, %c0_53, %c0_54] : memref<9x128x128xbf16, #tpu.memory_space<vmem>>, vector<1x128x128xbf16>
    %60 = vector.shape_cast %59 : vector<1x128x128xbf16> to vector<128x128xbf16>
    %cst_55 = arith.constant dense<0.000000e+00> : vector<256x128xf32>
    %61 = tpu.matmul %58, %60, %cst_55 {dimension_numbers = #tpu.dot_dimension_numbers<[1], [0], [0], [1], [0, 0, 1, 1], [], []>} : vector<256x128xbf16>, vector<128x128xbf16>, vector<256x128xf32> -> vector<256x128xf32>
    %62 = arith.addf %56, %61 : vector<256x128xf32>
    %c2_56 = arith.constant 2 : index
    %c1_57 = arith.constant 1 : index
    %c0_58 = arith.constant 0 : index
    %63 = vector.load %arg12[%c2_56, %c1_57, %c0_58] : memref<18x18x128xbf16, #tpu.memory_space<vmem>>, vector<16x16x128xbf16>
    %64 = vector.shape_cast %63 : vector<16x16x128xbf16> to vector<256x128xbf16>
    %c7 = arith.constant 7 : index
    %c0_59 = arith.constant 0 : index
    %c0_60 = arith.constant 0 : index
    %65 = vector.load %arg4[%c7, %c0_59, %c0_60] : memref<9x128x128xbf16, #tpu.memory_space<vmem>>, vector<1x128x128xbf16>
    %66 = vector.shape_cast %65 : vector<1x128x128xbf16> to vector<128x128xbf16>
    %cst_61 = arith.constant dense<0.000000e+00> : vector<256x128xf32>
    %67 = tpu.matmul %64, %66, %cst_61 {dimension_numbers = #tpu.dot_dimension_numbers<[1], [0], [0], [1], [0, 0, 1, 1], [], []>} : vector<256x128xbf16>, vector<128x128xbf16>, vector<256x128xf32> -> vector<256x128xf32>
    %68 = arith.addf %62, %67 : vector<256x128xf32>
    %c2_62 = arith.constant 2 : index
    %c2_63 = arith.constant 2 : index
    %c0_64 = arith.constant 0 : index
    %69 = vector.load %arg12[%c2_62, %c2_63, %c0_64] : memref<18x18x128xbf16, #tpu.memory_space<vmem>>, vector<16x16x128xbf16>
    %70 = vector.shape_cast %69 : vector<16x16x128xbf16> to vector<256x128xbf16>
    %c8 = arith.constant 8 : index
    %c0_65 = arith.constant 0 : index
    %c0_66 = arith.constant 0 : index
    %71 = vector.load %arg4[%c8, %c0_65, %c0_66] : memref<9x128x128xbf16, #tpu.memory_space<vmem>>, vector<1x128x128xbf16>
    %72 = vector.shape_cast %71 : vector<1x128x128xbf16> to vector<128x128xbf16>
    %cst_67 = arith.constant dense<0.000000e+00> : vector<256x128xf32>
    %73 = tpu.matmul %70, %72, %cst_67 {dimension_numbers = #tpu.dot_dimension_numbers<[1], [0], [0], [1], [0, 0, 1, 1], [], []>} : vector<256x128xbf16>, vector<128x128xbf16>, vector<256x128xf32> -> vector<256x128xf32>
    %74 = arith.addf %68, %73 : vector<256x128xf32>
    %c0_68 = arith.constant 0 : index
    %c0_69 = arith.constant 0 : index
    %c0_70 = arith.constant 0 : index
    %75 = vector.load %arg7[%c0_68, %c0_69, %c0_70] : memref<1x256x128xf32, #tpu.memory_space<vmem>>, vector<1x256x128xf32>
    %76 = vector.shape_cast %75 : vector<1x256x128xf32> to vector<256x128xf32>
    %77 = vector.shape_cast %74 : vector<256x128xf32> to vector<1x256x128xf32>
    tpu.vector_store %arg7[%c0_68, %c0_69, %c0_70], %77 {strides = array<i32>} : memref<1x256x128xf32, #tpu.memory_space<vmem>>, vector<1x256x128xf32>,
    %c0_71 = arith.constant 0 : index
    %c0_72 = arith.constant 0 : index
    %78 = vector.load %arg8[%c0_71, %c0_72] : memref<1x128xf32, #tpu.memory_space<vmem>>, vector<1x128xf32>
    %cst_73 = arith.constant dense<0.000000e+00> : vector<128xf32>
    %79 = vector.multi_reduction <add>, %74, %cst_73 [0] : vector<256x128xf32> to vector<128xf32>
    %80 = vector.shape_cast %79 : vector<128xf32> to vector<1x128xf32>
    %81 = arith.addf %78, %80 : vector<1x128xf32>
    %c0_74 = arith.constant 0 : index
    %c0_75 = arith.constant 0 : index
    %82 = vector.load %arg8[%c0_74, %c0_75] : memref<1x128xf32, #tpu.memory_space<vmem>>, vector<1x128xf32>
    tpu.vector_store %arg8[%c0_74, %c0_75], %81 {strides = array<i32>} : memref<1x128xf32, #tpu.memory_space<vmem>>, vector<1x128xf32>,
    %c0_76 = arith.constant 0 : index
    %c0_77 = arith.constant 0 : index
    %83 = vector.load %arg9[%c0_76, %c0_77] : memref<1x128xf32, #tpu.memory_space<vmem>>, vector<1x128xf32>
    %84 = arith.mulf %74, %74 : vector<256x128xf32>
    %cst_78 = arith.constant dense<0.000000e+00> : vector<128xf32>
    %85 = vector.multi_reduction <add>, %84, %cst_78 [0] : vector<256x128xf32> to vector<128xf32>
    %86 = vector.shape_cast %85 : vector<128xf32> to vector<1x128xf32>
    %87 = arith.addf %83, %86 : vector<1x128xf32>
    %c0_79 = arith.constant 0 : index
    %c0_80 = arith.constant 0 : index
    %88 = vector.load %arg9[%c0_79, %c0_80] : memref<1x128xf32, #tpu.memory_space<vmem>>, vector<1x128xf32>
    tpu.vector_store %arg9[%c0_79, %c0_80], %87 {strides = array<i32>} : memref<1x128xf32, #tpu.memory_space<vmem>>, vector<1x128xf32>,
    %c0_81 = arith.constant 0 : index
    %c0_82 = arith.constant 0 : index
    %c0_83 = arith.constant 0 : index
    %89 = vector.load %arg5[%c0_81, %c0_82, %c0_83] : memref<1x256x128xbf16, #tpu.memory_space<vmem>>, vector<1x256x128xbf16>
    %90 = vector.shape_cast %89 : vector<1x256x128xbf16> to vector<256x128xbf16>
    %c0_84 = arith.constant 0 : index
    %c0_85 = arith.constant 0 : index
    %91 = vector.load %arg6[%c0_84, %c0_85] : memref<128x128xbf16, #tpu.memory_space<vmem>>, vector<128x128xbf16>
    %cst_86 = arith.constant dense<0.000000e+00> : vector<256x128xf32>
    %92 = tpu.matmul %90, %91, %cst_86 {dimension_numbers = #tpu.dot_dimension_numbers<[1], [0], [0], [1], [0, 0, 1, 1], [], []>} : vector<256x128xbf16>, vector<128x128xbf16>, vector<256x128xf32> -> vector<256x128xf32>
    %c0_87 = arith.constant 0 : index
    %c0_88 = arith.constant 0 : index
    %93 = vector.load %arg10[%c0_87, %c0_88] : memref<1x128xf32, #tpu.memory_space<vmem>>, vector<1x128xf32>
    %cst_89 = arith.constant dense<0.000000e+00> : vector<128xf32>
    %94 = vector.multi_reduction <add>, %92, %cst_89 [0] : vector<256x128xf32> to vector<128xf32>
    %95 = vector.shape_cast %94 : vector<128xf32> to vector<1x128xf32>
    %96 = arith.addf %93, %95 : vector<1x128xf32>
    %c0_90 = arith.constant 0 : index
    %c0_91 = arith.constant 0 : index
    %97 = vector.load %arg10[%c0_90, %c0_91] : memref<1x128xf32, #tpu.memory_space<vmem>>, vector<1x128xf32>
    tpu.vector_store %arg10[%c0_90, %c0_91], %96 {strides = array<i32>} : memref<1x128xf32, #tpu.memory_space<vmem>>, vector<1x128xf32>,
    %c0_92 = arith.constant 0 : index
    %c0_93 = arith.constant 0 : index
    %98 = vector.load %arg11[%c0_92, %c0_93] : memref<1x128xf32, #tpu.memory_space<vmem>>, vector<1x128xf32>
    %99 = arith.mulf %92, %92 : vector<256x128xf32>
    %cst_94 = arith.constant dense<0.000000e+00> : vector<128xf32>
    %100 = vector.multi_reduction <add>, %99, %cst_94 [0] : vector<256x128xf32> to vector<128xf32>
    %101 = vector.shape_cast %100 : vector<128xf32> to vector<1x128xf32>
    %102 = arith.addf %98, %101 : vector<1x128xf32>
    %c0_95 = arith.constant 0 : index
    %c0_96 = arith.constant 0 : index
    %103 = vector.load %arg11[%c0_95, %c0_96] : memref<1x128xf32, #tpu.memory_space<vmem>>, vector<1x128xf32>
    tpu.vector_store %arg11[%c0_95, %c0_96], %102 {strides = array<i32>} : memref<1x128xf32, #tpu.memory_space<vmem>>, vector<1x128xf32>,
    return
  }
  func.func @transform_0(%arg0: i32) -> (i32, i32, i32) {
    %c0_i32 = arith.constant 0 : i32
    %c0_i32_0 = arith.constant 0 : i32
    %c0_i32_1 = arith.constant 0 : i32
    return %arg0, %c0_i32, %c0_i32_0 : i32, i32, i32
  }
  func.func @transform_1(%arg0: i32) -> (i32, i32) {
    %c0_i32 = arith.constant 0 : i32
    %c0_i32_0 = arith.constant 0 : i32
    %c0_i32_1 = arith.constant 0 : i32
    return %c0_i32, %c0_i32_0 : i32, i32
  }
  func.func @transform_2(%arg0: i32) -> (i32, i32) {
    %c0_i32 = arith.constant 0 : i32
    %c0_i32_0 = arith.constant 0 : i32
    %c0_i32_1 = arith.constant 0 : i32
    return %c0_i32, %c0_i32_0 : i32, i32
  }
  func.func @transform_3(%arg0: i32) -> (i32, i32, i32) {
    %c0_i32 = arith.constant 0 : i32
    %c0_i32_0 = arith.constant 0 : i32
    %c0_i32_1 = arith.constant 0 : i32
    %c0_i32_2 = arith.constant 0 : i32
    return %c0_i32, %c0_i32_0, %c0_i32_1 : i32, i32, i32
  }
  func.func @transform_4(%arg0: i32) -> (i32, i32, i32) {
    %c0_i32 = arith.constant 0 : i32
    %c0_i32_0 = arith.constant 0 : i32
    %c0_i32_1 = arith.constant 0 : i32
    return %arg0, %c0_i32, %c0_i32_0 : i32, i32, i32
  }
  func.func @transform_5(%arg0: i32) -> (i32, i32) {
    %c0_i32 = arith.constant 0 : i32
    %c0_i32_0 = arith.constant 0 : i32
    %c0_i32_1 = arith.constant 0 : i32
    return %c0_i32, %c0_i32_0 : i32, i32
  }
  func.func @transform_6(%arg0: i32) -> (i32, i32, i32) {
    %c0_i32 = arith.constant 0 : i32
    %c0_i32_0 = arith.constant 0 : i32
    %c0_i32_1 = arith.constant 0 : i32
    return %arg0, %c0_i32, %c0_i32_0 : i32, i32, i32
  }
  func.func @transform_7(%arg0: i32) -> (i32, i32) {
    %c0_i32 = arith.constant 0 : i32
    %c0_i32_0 = arith.constant 0 : i32
    %c0_i32_1 = arith.constant 0 : i32
    return %c0_i32, %c0_i32_0 : i32, i32
  }
  func.func @transform_8(%arg0: i32) -> (i32, i32) {
    %c0_i32 = arith.constant 0 : i32
    %c0_i32_0 = arith.constant 0 : i32
    %c0_i32_1 = arith.constant 0 : i32
    return %c0_i32, %c0_i32_0 : i32, i32
  }
  func.func @transform_9(%arg0: i32) -> (i32, i32) {
    %c0_i32 = arith.constant 0 : i32
    %c0_i32_0 = arith.constant 0 : i32
    %c0_i32_1 = arith.constant 0 : i32
    return %c0_i32, %c0_i32_0 : i32, i32
  }
  func.func @transform_10(%arg0: i32) -> (i32, i32) {
    %c0_i32 = arith.constant 0 : i32
    %c0_i32_0 = arith.constant 0 : i32
    %c0_i32_1 = arith.constant 0 : i32
    return %c0_i32, %c0_i32_0 : i32, i32
  }
}

module attributes {stable_mosaic.version = 11 : i64} {
  func.func @_final_kernel_convsc(%arg0: i32, %arg1: memref<1x256x128xf32, #tpu.memory_space<vmem>>, %arg2: memref<1x128xf32, #tpu.memory_space<vmem>>, %arg3: memref<1x128xf32, #tpu.memory_space<vmem>>, %arg4: memref<1x256x128xbf16, #tpu.memory_space<vmem>>, %arg5: memref<128x128xbf16, #tpu.memory_space<vmem>>, %arg6: memref<1x128xf32, #tpu.memory_space<vmem>>, %arg7: memref<1x256x128xf32, #tpu.memory_space<vmem>>) attributes {dimension_semantics = [#tpu.dimension_semantics<parallel>], iteration_bounds = array<i64: 2>, scalar_prefetch = 0 : i64, scratch_operands = 0 : i64, tpu.core_type = #tpu.core_type<tc>, window_params = [{transform_indices = @transform_0, window_bounds = array<i64: 1, 256, 128>}, {pipeline_mode = #tpu.pipeline_mode<synchronous>, transform_indices = @transform_1, window_bounds = array<i64: 1, 128>}, {pipeline_mode = #tpu.pipeline_mode<synchronous>, transform_indices = @transform_2, window_bounds = array<i64: 1, 128>}, {transform_indices = @transform_3, window_bounds = array<i64: 1, 256, 128>}, {pipeline_mode = #tpu.pipeline_mode<synchronous>, transform_indices = @transform_4, window_bounds = array<i64: 128, 128>}, {pipeline_mode = #tpu.pipeline_mode<synchronous>, transform_indices = @transform_5, window_bounds = array<i64: 1, 128>}, {transform_indices = @transform_6, window_bounds = array<i64: 1, 256, 128>}]} {
    %c0 = arith.constant 0 : index
    %c0_0 = arith.constant 0 : index
    %c0_1 = arith.constant 0 : index
    %0 = vector.load %arg1[%c0, %c0_0, %c0_1] : memref<1x256x128xf32, #tpu.memory_space<vmem>>, vector<1x256x128xf32>
    %1 = vector.shape_cast %0 : vector<1x256x128xf32> to vector<256x128xf32>
    %c0_2 = arith.constant 0 : index
    %c0_3 = arith.constant 0 : index
    %2 = vector.load %arg2[%c0_2, %c0_3] : memref<1x128xf32, #tpu.memory_space<vmem>>, vector<1x128xf32>
    %3 = vector.broadcast %2 : vector<1x128xf32> to vector<256x128xf32>
    %4 = arith.mulf %1, %3 : vector<256x128xf32>
    %c0_4 = arith.constant 0 : index
    %c0_5 = arith.constant 0 : index
    %5 = vector.load %arg3[%c0_4, %c0_5] : memref<1x128xf32, #tpu.memory_space<vmem>>, vector<1x128xf32>
    %6 = vector.broadcast %5 : vector<1x128xf32> to vector<256x128xf32>
    %7 = arith.addf %4, %6 : vector<256x128xf32>
    %c0_6 = arith.constant 0 : index
    %c0_7 = arith.constant 0 : index
    %c0_8 = arith.constant 0 : index
    %8 = vector.load %arg4[%c0_6, %c0_7, %c0_8] : memref<1x256x128xbf16, #tpu.memory_space<vmem>>, vector<1x256x128xbf16>
    %9 = vector.shape_cast %8 : vector<1x256x128xbf16> to vector<256x128xbf16>
    %c0_9 = arith.constant 0 : index
    %c0_10 = arith.constant 0 : index
    %10 = vector.load %arg5[%c0_9, %c0_10] : memref<128x128xbf16, #tpu.memory_space<vmem>>, vector<128x128xbf16>
    %cst = arith.constant dense<0.000000e+00> : vector<256x128xf32>
    %11 = tpu.matmul %9, %10, %cst {dimension_numbers = #tpu.dot_dimension_numbers<[1], [0], [0], [1], [0, 0, 1, 1], [], []>} : vector<256x128xbf16>, vector<128x128xbf16>, vector<256x128xf32> -> vector<256x128xf32>
    %c0_11 = arith.constant 0 : index
    %c0_12 = arith.constant 0 : index
    %12 = vector.load %arg6[%c0_11, %c0_12] : memref<1x128xf32, #tpu.memory_space<vmem>>, vector<1x128xf32>
    %13 = vector.broadcast %12 : vector<1x128xf32> to vector<256x128xf32>
    %14 = arith.addf %11, %13 : vector<256x128xf32>
    %15 = arith.addf %7, %14 : vector<256x128xf32>
    %cst_13 = arith.constant 0.000000e+00 : f32
    %16 = vector.broadcast %cst_13 : f32 to vector<256x128xf32>
    %17 = arith.cmpf oge, %15, %16 : vector<256x128xf32>
    %cst_14 = arith.constant 0.00999999977 : f32
    %18 = vector.broadcast %cst_14 : f32 to vector<256x128xf32>
    %19 = arith.mulf %18, %15 : vector<256x128xf32>
    %20 = arith.select %17, %15, %19 : vector<256x128xi1>, vector<256x128xf32>
    %c0_15 = arith.constant 0 : index
    %c0_16 = arith.constant 0 : index
    %c0_17 = arith.constant 0 : index
    %21 = vector.load %arg7[%c0_15, %c0_16, %c0_17] : memref<1x256x128xf32, #tpu.memory_space<vmem>>, vector<1x256x128xf32>
    %22 = vector.shape_cast %21 : vector<1x256x128xf32> to vector<256x128xf32>
    %23 = vector.shape_cast %20 : vector<256x128xf32> to vector<1x256x128xf32>
    tpu.vector_store %arg7[%c0_15, %c0_16, %c0_17], %23 {strides = array<i32>} : memref<1x256x128xf32, #tpu.memory_space<vmem>>, vector<1x256x128xf32>,
    return
  }
  func.func @transform_0(%arg0: i32) -> (i32, i32, i32) {
    %c0_i32 = arith.constant 0 : i32
    %c0_i32_0 = arith.constant 0 : i32
    %c0_i32_1 = arith.constant 0 : i32
    return %arg0, %c0_i32, %c0_i32_0 : i32, i32, i32
  }
  func.func @transform_1(%arg0: i32) -> (i32, i32) {
    %c0_i32 = arith.constant 0 : i32
    %c0_i32_0 = arith.constant 0 : i32
    %c0_i32_1 = arith.constant 0 : i32
    return %c0_i32, %c0_i32_0 : i32, i32
  }
  func.func @transform_2(%arg0: i32) -> (i32, i32) {
    %c0_i32 = arith.constant 0 : i32
    %c0_i32_0 = arith.constant 0 : i32
    %c0_i32_1 = arith.constant 0 : i32
    return %c0_i32, %c0_i32_0 : i32, i32
  }
  func.func @transform_3(%arg0: i32) -> (i32, i32, i32) {
    %c0_i32 = arith.constant 0 : i32
    %c0_i32_0 = arith.constant 0 : i32
    %c0_i32_1 = arith.constant 0 : i32
    return %arg0, %c0_i32, %c0_i32_0 : i32, i32, i32
  }
  func.func @transform_4(%arg0: i32) -> (i32, i32) {
    %c0_i32 = arith.constant 0 : i32
    %c0_i32_0 = arith.constant 0 : i32
    %c0_i32_1 = arith.constant 0 : i32
    return %c0_i32, %c0_i32_0 : i32, i32
  }
  func.func @transform_5(%arg0: i32) -> (i32, i32) {
    %c0_i32 = arith.constant 0 : i32
    %c0_i32_0 = arith.constant 0 : i32
    %c0_i32_1 = arith.constant 0 : i32
    return %c0_i32, %c0_i32_0 : i32, i32
  }
  func.func @transform_6(%arg0: i32) -> (i32, i32, i32) {
    %c0_i32 = arith.constant 0 : i32
    %c0_i32_0 = arith.constant 0 : i32
    %c0_i32_1 = arith.constant 0 : i32
    return %arg0, %c0_i32, %c0_i32_0 : i32, i32, i32
  }
}

</mosaic_0001>

<bundles_post_ra>
// kernel: wide_resnet_block_forward.5
= control target key start
LH: loop header
LB: loop body
LE: loop exit
PB: predicated region body
PF: predicated region fallthrough
CT: control target
= control target key end

     0   :  { %s1176_s21 = smov 0   ;;  %s1521_s0 = inlined_call_operand.vmem [shape: f32[2,256,128], index: 0, kind: input, shape index: {}]   ;;  %s1522_s1 = inlined_call_operand.vmem [shape: f32[1,128], index: 1, kind: input, shape index: {}]   ;;  %s1523_s2 = inlined_call_operand.vmem [shape: f32[1,128], index: 2, kind: input, shape index: {}]   ;;  %s1524_s3 = inlined_call_operand.vmem [shape: bf16[2,256,128], index: 3, kind: input, shape index: {}]   ;;  %s1525_s4 = inlined_call_operand.vmem [shape: bf16[128,128], index: 4, kind: input, shape index: {}]   ;;  %s1526_s5 = inlined_call_operand.vmem [shape: f32[1,128], index: 5, kind: input, shape index: {}]   ;;  %s1527_s6 = inlined_call_operand.vmem [shape: f32[2,256,128], index: 6, kind: output, shape index: {}]  }
   0x1 LB: > { %s970_s22 = sadd.s32 4294967295, %s1139_s21   ;;  %p974_p0 = scmp.ge.s32.totalorder %s1139_s21, 1  ;;  %s1139_s21 = sphi %s1176_s21, %s16_s21  }
   0x2   : > { %p222_p1 = scmp.lt.s32.totalorder %s1139_s21, 3 }
   0x4   : > { %p223_p2 = pnand %p974_p0, %p222_p1 }
   0x5   : > { %p257_p3 = scmp.lt.s32.totalorder (!%p223_p2), %s970_s22, 1 }
   0x6   : > { %226 = sbr.rel (%p223_p2) target bundleno = 282 (0x11a), region = 44 }
   0xb   : > { %v1109_v0 = vld [vmem:[%s1525_s4 + $0x38] sm:$0xff]   ;;  %v1110_v1 = vld [vmem:[%s1525_s4 + $0x30] sm:$0xff]   ;;  %s1529_s22 = smov (!%p257_p3, %s970_s22), 1  ;;  %v1111_v2 = vld [vmem:[%s1525_s4 + $0x28] sm:$0xff]  }
   0xc   : > { %1037 = vmatprep.subr.bf16.mxu0 %v1109_v0  ;;  %1085 = vmatprep.subr.bf16.mxu1 %v1109_v0  ;;  %s1011_s29 = sshll.u32 %s1529_s22, 7  ;;  %v1112_v3 = vld [vmem:[%s1525_s4 + $0x20] sm:$0xff]   ;;  %v1113_v6 = vld [vmem:[%s1525_s4 + $0x18] sm:$0xff]   ;;  %v1114_v7 = vld [vmem:[%s1525_s4 + $0x10] sm:$0xff]   ;;  %s1010_s19 = sshll.u32 %s1529_s22, 8 }
   0xd   : > { %1038 = vmatpush3.bf16.msra.mxu0 %v1109_v0  ;;  %1093 = vmatpush3.bf16.msra.mxu1 %v1109_v0  ;;  %s1199_s8 = scalar_lea.vmem %s1524_s3, %s1011_s29  ;;  %v1115_v8 = vld [vmem:[%s1525_s4 + $0x8] sm:$0xff]   ;;  %v1116_v9 = vld [vmem:[%s1525_s4] sm:$0xff]   ;;  %s1238_s24 = scalar_lea.vmem %s1521_s0, %s1010_s19 }
   0xe   : > { %1039 = vmatprep.subr.bf16.mxu0 %v1110_v1  ;;  %1086 = vmatprep.subr.bf16.mxu1 %v1110_v1  ;;  %v1117_v4 = vld [vmem:[%s1199_s8] sm:$0xff]   ;;  %v1119_v10 = vld [vmem:[%s1199_s8 + $0x8] sm:$0xff]   ;;  %v1121_v12 = vld [vmem:[%s1199_s8 + $0x10] sm:$0xff]   ;;  %s1426_s9 = scalar_lea.vmem %s1527_s6, %s1010_s19 }
   0xf   : > { %v1118_v5 = vld [vmem:[%s1199_s8 + $0x40] sm:$0xff]   ;;  %1053 = vmatprep.mubr.bf16.mxu0 %v1117_v4  ;;  %v1120_v11 = vld [vmem:[%s1199_s8 + $0x48] sm:$0xff]   ;;  %v1122_v13 = vld [vmem:[%s1199_s8 + $0x50] sm:$0xff]  }
  0x10   : > { %1069 = vmatprep.mubr.bf16.mxu1 %v1118_v5  ;;  %v1123_v14 = vld [vmem:[%s1199_s8 + $0x18] sm:$0xff]   ;;  %v1125_v16 = vld [vmem:[%s1199_s8 + $0x20] sm:$0xff]   ;;  %v1127_v18 = vld [vmem:[%s1199_s8 + $0x28] sm:$0xff]  }
  0x11   : > { %1040 = vmatpush3.bf16.msra.mxu0 %v1110_v1  ;;  %1094 = vmatpush3.bf16.msra.mxu1 %v1110_v1  ;;  %v1124_v15 = vld [vmem:[%s1199_s8 + $0x58] sm:$0xff]   ;;  %v1126_v17 = vld [vmem:[%s1199_s8 + $0x60] sm:$0xff]   ;;  %v1128_v19 = vld [vmem:[%s1199_s8 + $0x68] sm:$0xff]  }
  0x12   : > { %1041 = vmatprep.subr.bf16.mxu0 %v1111_v2  ;;  %1087 = vmatprep.subr.bf16.mxu1 %v1111_v2  ;;  %v1129_v20 = vld [vmem:[%s1199_s8 + $0x30] sm:$0xff]   ;;  %v1131_v22 = vld [vmem:[%s1199_s8 + $0x38] sm:$0xff]   ;;  %v1244_v25 = vld [vmem:[%s1522_s1] ss:$0 sm:$0xff] }
  0x13   : > { %v1130_v21 = vld [vmem:[%s1199_s8 + $0x70] sm:$0xff]   ;;  %v1132_v23 = vld [vmem:[%s1199_s8 + $0x78] sm:$0xff]   ;;  %v273_v27 = vld [vmem:[%s1238_s24] sm:$0xff] }
  0x14   : > { %v275_v24 = vld [vmem:[%s1238_s24 + $0x10] sm:$0xff]  ;;  %v289_v28 = vld [vmem:[%s1238_s24 + $0x80] sm:$0xff]  ;;  %v276_v29 = vld [vmem:[%s1238_s24 + $0x18] sm:$0xff]  ;;  %v312_v37 = vmul.f32 %v1244_v25, %v273_v27 }
  0x15   : > { %1042 = vmatpush3.bf16.msra.mxu0 %v1111_v2  ;;  %1095 = vmatpush3.bf16.msra.mxu1 %v1111_v2  ;;  %v291_v26 = vld [vmem:[%s1238_s24 + $0x90] sm:$0xff]  ;;  %v292_v30 = vld [vmem:[%s1238_s24 + $0x98] sm:$0xff]  ;;  %v314_v31 = vmul.f32 %v1244_v25, %v275_v24  ;;  %v1255_v32 = vld [vmem:[%s1523_s2] ss:$0 sm:$0xff]  ;;  %v328_v38 = vmul.f32 %v1244_v25, %v289_v28  ;;  %v315_v39 = vmul.f32 %v1244_v25, %v276_v29 }
  0x16   : > { %1043 = vmatprep.subr.bf16.mxu0 %v1112_v3  ;;  %1088 = vmatprep.subr.bf16.mxu1 %v1112_v3  ;;  %v330_v33 = vmul.f32 %v1244_v25, %v291_v26  ;;  %v274_v34 = vld [vmem:[%s1238_s24 + $0x8] sm:$0xff]  ;;  %v279_v36 = vld [vmem:[%s1238_s24 + $0x30] sm:$0xff]  ;;  %v331_v40 = vmul.f32 %v1244_v25, %v292_v30  ;;  %v277_v42 = vld [vmem:[%s1238_s24 + $0x20] sm:$0xff]  ;;  %v1287_v58 = vadd.f32 %v1255_v32, %v312_v37 }
  0x17   : > { %v290_v35 = vld [vmem:[%s1238_s24 + $0x88] sm:$0xff]  ;;  %v295_v41 = vld [vmem:[%s1238_s24 + $0xb0] sm:$0xff]  ;;  %v293_v43 = vld [vmem:[%s1238_s24 + $0xa0] sm:$0xff]  ;;  %v1270_v45 = vadd.f32 %v1255_v32, %v314_v31  ;;  %v313_v47 = vmul.f32 %v1244_v25, %v274_v34  ;;  %v318_v52 = vmul.f32 %v1244_v25, %v279_v36  ;;  %v316_v54 = vmul.f32 %v1244_v25, %v277_v42 }
  0x18   : > { %v280_v44 = vld [vmem:[%s1238_s24 + $0x38] sm:$0xff]  ;;  %v1273_v46 = vadd.f32 %v1255_v32, %v330_v33  ;;  %v329_v48 = vmul.f32 %v1244_v25, %v290_v35  ;;  %v278_v50 = vld [vmem:[%s1238_s24 + $0x28] sm:$0xff]  ;;  %v334_v53 = vmul.f32 %v1244_v25, %v295_v41  ;;  %v332_v55 = vmul.f32 %v1244_v25, %v293_v43  ;;  %v283_v56 = vld [vmem:[%s1238_s24 + $0x50] sm:$0xff] }
  0x19   : > { %1044 = vmatpush3.bf16.msra.mxu0 %v1112_v3  ;;  %1096 = vmatpush3.bf16.msra.mxu1 %v1112_v3  ;;  %v296_v49 = vld [vmem:[%s1238_s24 + $0xb8] sm:$0xff]  ;;  %v294_v51 = vld [vmem:[%s1238_s24 + $0xa8] sm:$0xff]  ;;  %v299_v57 = vld [vmem:[%s1238_s24 + $0xd0] sm:$0xff]  ;;  %v1290_v59 = vadd.f32 %v1255_v32, %v328_v38  ;;  %v1293_v60 = vadd.f32 %v1255_v32, %v315_v39  ;;  %v1296_v61 = vadd.f32 %v1255_v32, %v331_v40 }
  0x1a   : > { %1045 = vmatprep.subr.bf16.mxu0 %v1113_v6  ;;  %1089 = vmatprep.subr.bf16.mxu1 %v1113_v6  ;;  %v281_v62 = vld [vmem:[%s1238_s24 + $0x40] sm:$0xff]  ;;  %v319_v63 = vmul.f32 %v1244_v25, %v280_v44  ;;  %v335_v0 = vmul.f32 %v1244_v25, %v296_v49  ;;  %v317_v1 = vmul.f32 %v1244_v25, %v278_v50  ;;  %v284_v4 = vld [vmem:[%s1238_s24 + $0x58] sm:$0xff]  ;;  %v286_v36 = vld [vmem:[%s1238_s24 + $0x68] sm:$0xff] }
  0x1b   : > { %v333_v2 = vmul.f32 %v1244_v25, %v294_v51  ;;  %v297_v3 = vld [vmem:[%s1238_s24 + $0xc0] sm:$0xff]  ;;  %v300_v5 = vld [vmem:[%s1238_s24 + $0xd8] sm:$0xff]  ;;  %v302_v37 = vld [vmem:[%s1238_s24 + $0xe8] sm:$0xff] }
  0x1c   : > { %v1337_v24 = vadd.f32 %v1255_v32, %v319_v63  ;;  %v1340_v26 = vadd.f32 %v1255_v32, %v335_v0  ;;  %v1343_v27 = vadd.f32 %v1255_v32, %v317_v1  ;;  %v288_v29 = vld [vmem:[%s1238_s24 + $0x78] sm:$0xff]  ;;  %v1363_v38 = vld [vmem:[%s1526_s5] ss:$0 sm:$0xff] }
  0x1d   : > { %1046 = vmatpush3.bf16.msra.mxu0 %v1113_v6  ;;  %1097 = vmatpush3.bf16.msra.mxu1 %v1113_v6  ;;  %v1307_v6 = vadd.f32 %v1255_v32, %v313_v47  ;;  %v1346_v28 = vadd.f32 %v1255_v32, %v333_v2  ;;  %v304_v35 = vld [vmem:[%s1238_s24 + $0xf8] sm:$0xff]  ;;  %v327_v51 = vmul.f32 %v1244_v25, %v288_v29 }
  0x1e   : > { %1047 = vmatprep.subr.bf16.mxu0 %v1114_v7  ;;  %1090 = vmatprep.subr.bf16.mxu1 %v1114_v7 }
  0x21   : > { %1048 = vmatpush3.bf16.msra.mxu0 %v1114_v7  ;;  %1098 = vmatpush3.bf16.msra.mxu1 %v1114_v7  ;;  %v1310_v7 = vadd.f32 %v1255_v32, %v329_v48 }
  0x22   : > { %1049 = vmatprep.subr.bf16.mxu0 %v1115_v8  ;;  %1091 = vmatprep.subr.bf16.mxu1 %v1115_v8 }
  0x25   : > { %1050 = vmatpush3.bf16.msra.mxu0 %v1115_v8  ;;  %1099 = vmatpush3.bf16.msra.mxu1 %v1115_v8  ;;  %v322_v8 = vmul.f32 %v1244_v25, %v283_v56 }
  0x26   : > { %1051 = vmatprep.subr.bf16.mxu0 %v1116_v9  ;;  %1092 = vmatprep.subr.bf16.mxu1 %v1116_v9 }
  0x27   : > { %v1350_v30 = vadd.f32 %v1255_v32, %v322_v8 }
  0x29   : > { %1052 = vmatpush3.bf16.msra.mxu0 %v1116_v9  ;;  %1100 = vmatpush3.bf16.msra.mxu1 %v1116_v9  ;;  %v338_v9 = vmul.f32 %v1244_v25, %v299_v57 }
  0x2b   : > { %v1353_v31 = vadd.f32 %v1255_v32, %v338_v9 }
  0x2c   : > { %1054 = vmatmul.mubr.bf16.vlgmr.msra.gmra.mxu0 %v1119_v10  ;;  %1070 = vmatmul.mubr.bf16.vlgmr.msra.gmra.mxu1 %v1120_v11  ;;  %v1315_v10 = vadd.f32 %v1255_v32, %v318_v52  ;;  %v1318_v11 = vadd.f32 %v1255_v32, %v334_v53  ;;  %v343_v52 = vmul.f32 %v1244_v25, %v304_v35 }
  0x2d   : > { %1057 = vmatprep.mubr.bf16.mxu0 %v1121_v12  ;;  %1073 = vmatprep.mubr.bf16.mxu1 %v1122_v13  ;;  %v1321_v12 = vadd.f32 %v1255_v32, %v316_v54  ;;  %v1324_v13 = vadd.f32 %v1255_v32, %v332_v55  ;;  %v325_v53 = vmul.f32 %v1244_v25, %v286_v36 }
  0x2e   : > { %v341_v54 = vmul.f32 %v1244_v25, %v302_v37 }
  0x34   : > { %1058 = vmatmul.mubr.bf16.gmra.mxu0 %v1123_v14  ;;  %1074 = vmatmul.mubr.bf16.gmra.mxu1 %v1124_v15  ;;  %v282_v14 = vld [vmem:[%s1238_s24 + $0x48] sm:$0xff] }
  0x35   : > { %1061 = vmatprep.mubr.bf16.mxu0 %v1125_v16  ;;  %1077 = vmatprep.mubr.bf16.mxu1 %v1126_v17  ;;  %v298_v15 = vld [vmem:[%s1238_s24 + $0xc8] sm:$0xff]  ;;  %v287_v16 = vld [vmem:[%s1238_s24 + $0x70] sm:$0xff]  ;;  %v320_v17 = vmul.f32 %v1244_v25, %v281_v62  ;;  %v321_v33 = vmul.f32 %v1244_v25, %v282_v14 }
  0x36   : > { %v337_v34 = vmul.f32 %v1244_v25, %v298_v15  ;;  %v326_v39 = vmul.f32 %v1244_v25, %v287_v16  ;;  %v1410_v16 = vadd.f32 %v1255_v32, %v327_v51 }
  0x37   : > { %v1370_v43 = vadd.f32 %v1255_v32, %v320_v17  ;;  %v1388_v57 = vadd.f32 %v1255_v32, %v321_v33  ;;  %v1413_v17 = vadd.f32 %v1255_v32, %v343_v52 }
  0x38   : > { %v1391_v62 = vadd.f32 %v1255_v32, %v337_v34  ;;  %v1394_v1 = vadd.f32 %v1255_v32, %v326_v39 }
  0x3c   : > { %1062 = vmatmul.mubr.bf16.gmra.mxu0 %v1127_v18  ;;  %1078 = vmatmul.mubr.bf16.gmra.mxu1 %v1128_v19  ;;  %v336_v18 = vmul.f32 %v1244_v25, %v297_v3  ;;  %v323_v19 = vmul.f32 %v1244_v25, %v284_v4 }
  0x3d   : > { %1065 = vmatprep.mubr.bf16.mxu0 %v1129_v20  ;;  %1081 = vmatprep.mubr.bf16.mxu1 %v1130_v21  ;;  %v339_v20 = vmul.f32 %v1244_v25, %v300_v5  ;;  %v303_v21 = vld [vmem:[%s1238_s24 + $0xf0] sm:$0xff] }
  0x3e   : > { %v342_v40 = vmul.f32 %v1244_v25, %v303_v21  ;;  %v1373_v44 = vadd.f32 %v1255_v32, %v336_v18  ;;  %v1376_v47 = vadd.f32 %v1255_v32, %v323_v19  ;;  %v1416_v18 = vadd.f32 %v1255_v32, %v325_v53 }
  0x3f   : > { %v1379_v48 = vadd.f32 %v1255_v32, %v339_v20  ;;  %v1419_v19 = vadd.f32 %v1255_v32, %v341_v54 }
  0x40   : > { %v1397_v2 = vadd.f32 %v1255_v32, %v342_v40 }
  0x44   : > { %1066 = vmatmul.mubr.bf16.gmra.mxu0 %v1131_v22  ;;  %1082 = vmatmul.mubr.bf16.gmra.mxu1 %v1132_v23  ;;  %v285_v22 = vld [vmem:[%s1238_s24 + $0x60] sm:$0xff] }
  0x45   : > { %v301_v23 = vld [vmem:[%s1238_s24 + $0xe0] sm:$0xff]  ;;  %v324_v41 = vmul.f32 %v1244_v25, %v285_v22 }
  0x46   : > { %v340_v42 = vmul.f32 %v1244_v25, %v301_v23 }
  0x47   : > { %v1400_v25 = vadd.f32 %v1255_v32, %v324_v41 }
  0x48   : > { %v1403_v3 = vadd.f32 %v1255_v32, %v340_v42 }
  0xec   : > { %v1055_v49 = vpop.f32.mrf.mxu0  ;;  %v1071_v50 = vpop.f32.mrf.mxu1 }
  0xed   : > { %v625_v55 = vadd.f32 %v1055_v49, %v1363_v38  ;;  %v689_v56 = vadd.f32 %v1071_v50, %v1363_v38 }
  0xee   : > { %v616_v63 = vpop.f32.mrf.mxu0  ;;  %v680_v0 = vpop.f32.mrf.mxu1 }
  0xef   : > { %v745_v4 = vadd.f32 %v625_v55, %v1270_v45  ;;  %v761_v5 = vadd.f32 %v689_v56, %v1273_v46  ;;  %v617_v8 = vadd.f32 %v1363_v38, %v616_v63  ;;  %v681_v9 = vadd.f32 %v1363_v38, %v680_v0 }
  0xf0   : > { %v1056_v14 = vpop.f32.mrf.mxu0  ;;  %v1072_v15 = vpop.f32.mrf.mxu1 }
  0xf1   : > { %vm777_vm0 = vcmp.ge.f32.partialorder %v745_v4, 0.0  ;;  %v809_v45 = vmul.f32 0.01, %v745_v4  ;;  %vm793_vm1 = vcmp.ge.f32.partialorder %v761_v5, 0.0  ;;  %v825_v46 = vmul.f32 0.01, %v761_v5 }
  0xf2   : > { %v743_v20 = vadd.f32 %v617_v8, %v1287_v58  ;;  %v759_v21 = vadd.f32 %v681_v9, %v1290_v59  ;;  %v628_v22 = vadd.f32 %v1056_v14, %v1363_v38  ;;  %v692_v32 = vadd.f32 %v1072_v15, %v1363_v38  ;;  %v619_v23 = vpop.f32.mrf.mxu0  ;;  %v683_v29 = vpop.f32.mrf.mxu1 }
  0xf3   : > { %v841_v33 = vsel %vm777_vm0, %v745_v4, %v809_v45  ;;  %v857_v34 = vsel %vm793_vm1, %v761_v5, %v825_v46  ;;  %v620_v35 = vadd.f32 %v1363_v38, %v619_v23  ;;  %v684_v36 = vadd.f32 %v1363_v38, %v683_v29 }
  0xf4   : > { %873 = vst [vmem:[%s1426_s9 + $0x10] sm:$0xff] %v841_v33  ;;  %889 = vst [vmem:[%s1426_s9 + $0x90] sm:$0xff] %v857_v34  ;;  %vm775_vm2 = vcmp.ge.f32.partialorder %v743_v20, 0.0  ;;  %v807_v37 = vmul.f32 0.01, %v743_v20  ;;  %vm791_vm3 = vcmp.ge.f32.partialorder %v759_v21, 0.0  ;;  %v1059_v59 = vpop.f32.mrf.mxu0  ;;  %v1075_v39 = vpop.f32.mrf.mxu1  ;;  %v746_v40 = vadd.f32 %v628_v22, %v1293_v60 }
  0xf5   : > { %v823_v58 = vmul.f32 0.01, %v759_v21  ;;  %v762_v41 = vadd.f32 %v692_v32, %v1296_v61  ;;  %v744_v42 = vadd.f32 %v620_v35, %v1307_v6  ;;  %v760_v49 = vadd.f32 %v684_v36, %v1310_v7 }
  0xf6   : > { %v839_v50 = vsel %vm775_vm2, %v743_v20, %v807_v37  ;;  %v641_v52 = vadd.f32 %v1059_v59, %v1363_v38  ;;  %v705_v53 = vadd.f32 %v1075_v39, %v1363_v38  ;;  %v632_v54 = vpop.f32.mrf.mxu0  ;;  %v696_v55 = vpop.f32.mrf.mxu1  ;;  %vm778_vm4 = vcmp.ge.f32.partialorder %v746_v40, 0.0 }
  0xf7   : > { %v855_v51 = vsel %vm791_vm3, %v759_v21, %v823_v58  ;;  %871 = vst [vmem:[%s1426_s9] sm:$0xff] %v839_v50  ;;  %v810_v60 = vmul.f32 0.01, %v746_v40  ;;  %vm794_vm5 = vcmp.ge.f32.partialorder %v762_v41, 0.0  ;;  %v826_v61 = vmul.f32 0.01, %v762_v41 }
  0xf8   : > { %887 = vst [vmem:[%s1426_s9 + $0x80] sm:$0xff] %v855_v51  ;;  %vm776_vm6 = vcmp.ge.f32.partialorder %v744_v42, 0.0  ;;  %v808_v6 = vmul.f32 0.01, %v744_v42  ;;  %vm792_vm7 = vcmp.ge.f32.partialorder %v760_v49, 0.0  ;;  %v1060_v56 = vpop.f32.mrf.mxu0  ;;  %v1076_v63 = vpop.f32.mrf.mxu1  ;;  %v749_v5 = vadd.f32 %v641_v52, %v1315_v10 }
  0xf9   : > { %v824_v7 = vmul.f32 0.01, %v760_v49  ;;  %v842_v0 = vsel %vm778_vm4, %v746_v40, %v810_v60  ;;  %v858_v4 = vsel %vm794_vm5, %v762_v41, %v826_v61  ;;  %v765_v8 = vadd.f32 %v705_v53, %v1318_v11 }
  0xfa   : > { %874 = vst [vmem:[%s1426_s9 + $0x18] sm:$0xff] %v842_v0  ;;  %890 = vst [vmem:[%s1426_s9 + $0x98] sm:$0xff] %v858_v4  ;;  %v840_v9 = vsel %vm776_vm6, %v744_v42, %v808_v6  ;;  %v633_v15 = vadd.f32 %v1363_v38, %v632_v54  ;;  %v697_v45 = vadd.f32 %v1363_v38, %v696_v55  ;;  %v635_v46 = vpop.f32.mrf.mxu0  ;;  %v699_v20 = vpop.f32.mrf.mxu1  ;;  %vm781_vm8 = vcmp.ge.f32.partialorder %v749_v5, 0.0 }
  0xfb   : > { %v856_v14 = vsel %vm792_vm7, %v760_v49, %v824_v7  ;;  %872 = vst [vmem:[%s1426_s9 + $0x8] sm:$0xff] %v840_v9  ;;  %v813_v21 = vmul.f32 0.01, %v749_v5  ;;  %vm797_vm9 = vcmp.ge.f32.partialorder %v765_v8, 0.0  ;;  %v829_v10 = vmul.f32 0.01, %v765_v8 }
  0xfc   : > { %888 = vst [vmem:[%s1426_s9 + $0x88] sm:$0xff] %v856_v14  ;;  %v747_v11 = vadd.f32 %v633_v15, %v1321_v12  ;;  %v763_v22 = vadd.f32 %v697_v45, %v1324_v13  ;;  %v644_v32 = vadd.f32 %v1060_v56, %v1363_v38  ;;  %v708_v23 = vadd.f32 %v1076_v63, %v1363_v38  ;;  %v1063_v29 = vpop.f32.mrf.mxu0  ;;  %v1079_v33 = vpop.f32.mrf.mxu1 }
  0xfd   : > { %v845_v34 = vsel %vm781_vm8, %v749_v5, %v813_v21  ;;  %v861_v35 = vsel %vm797_vm9, %v765_v8, %v829_v10  ;;  %v636_v36 = vadd.f32 %v1363_v38, %v635_v46  ;;  %v700_v37 = vadd.f32 %v1363_v38, %v699_v20 }
  0xfe   : > { %877 = vst [vmem:[%s1426_s9 + $0x30] sm:$0xff] %v845_v34  ;;  %893 = vst [vmem:[%s1426_s9 + $0xb0] sm:$0xff] %v861_v35  ;;  %vm779_vm10 = vcmp.ge.f32.partialorder %v747_v11, 0.0  ;;  %v811_v58 = vmul.f32 0.01, %v747_v11  ;;  %vm795_vm11 = vcmp.ge.f32.partialorder %v763_v22, 0.0  ;;  %v648_v13 = vpop.f32.mrf.mxu0  ;;  %v712_v59 = vpop.f32.mrf.mxu1  ;;  %v750_v39 = vadd.f32 %v644_v32, %v1337_v24 }
  0xff   : > { %v827_v12 = vmul.f32 0.01, %v763_v22  ;;  %v766_v40 = vadd.f32 %v708_v23, %v1340_v26  ;;  %v748_v41 = vadd.f32 %v636_v36, %v1343_v27  ;;  %v764_v42 = vadd.f32 %v700_v37, %v1346_v28 }
 0x100   : > { %v843_v49 = vsel %vm779_vm10, %v747_v11, %v811_v58  ;;  %v657_v51 = vadd.f32 %v1063_v29, %v1363_v38  ;;  %v721_v52 = vadd.f32 %v1079_v33, %v1363_v38  ;;  %v1064_v53 = vpop.f32.mrf.mxu0  ;;  %v1080_v54 = vpop.f32.mrf.mxu1  ;;  %vm782_vm12 = vcmp.ge.f32.partialorder %v750_v39, 0.0 }
 0x101   : > { %v859_v50 = vsel %vm795_vm11, %v763_v22, %v827_v12  ;;  %875 = vst [vmem:[%s1426_s9 + $0x20] sm:$0xff] %v843_v49  ;;  %v814_v24 = vmul.f32 0.01, %v750_v39  ;;  %vm798_vm13 = vcmp.ge.f32.partialorder %v766_v40, 0.0  ;;  %v830_v26 = vmul.f32 0.01, %v766_v40 }
 0x102   : > { %891 = vst [vmem:[%s1426_s9 + $0xa0] sm:$0xff] %v859_v50  ;;  %vm780_vm14 = vcmp.ge.f32.partialorder %v748_v41, 0.0  ;;  %v812_v27 = vmul.f32 0.01, %v748_v41  ;;  %vm796_vm15 = vcmp.ge.f32.partialorder %v764_v42, 0.0  ;;  %v651_v55 = vpop.f32.mrf.mxu0  ;;  %v715_v60 = vpop.f32.mrf.mxu1  ;;  %v753_v7 = vadd.f32 %v657_v51, %v1350_v30 }
 0x103   : > { %v828_v28 = vmul.f32 0.01, %v764_v42  ;;  %v846_v61 = vsel %vm782_vm12, %v750_v39, %v814_v24  ;;  %v862_v6 = vsel %vm798_vm13, %v766_v40, %v830_v26  ;;  %v769_v56 = vadd.f32 %v721_v52, %v1353_v31 }
 0x104   : > { %878 = vst [vmem:[%s1426_s9 + $0x38] sm:$0xff] %v846_v61  ;;  %894 = vst [vmem:[%s1426_s9 + $0xb8] sm:$0xff] %v862_v6  ;;  %v844_v63 = vsel %vm780_vm14, %v748_v41, %v812_v27  ;;  %v649_v4 = vadd.f32 %v1363_v38, %v648_v13  ;;  %v713_v5 = vadd.f32 %v1363_v38, %v712_v59  ;;  %v1067_v8 = vpop.f32.mrf.mxu0  ;;  %v1083_v9 = vpop.f32.mrf.mxu1  ;;  %vm785_vm0 = vcmp.ge.f32.partialorder %v753_v7, 0.0 }
 0x105   : > { %v860_v0 = vsel %vm796_vm15, %v764_v42, %v828_v28  ;;  %876 = vst [vmem:[%s1426_s9 + $0x28] sm:$0xff] %v844_v63  ;;  %v817_v14 = vmul.f32 0.01, %v753_v7  ;;  %vm801_vm1 = vcmp.ge.f32.partialorder %v769_v56, 0.0  ;;  %v833_v30 = vmul.f32 0.01, %v769_v56 }
 0x106   : > { %892 = vst [vmem:[%s1426_s9 + $0xa8] sm:$0xff] %v860_v0  ;;  %v751_v31 = vadd.f32 %v649_v4, %v1370_v43  ;;  %v767_v15 = vadd.f32 %v713_v5, %v1373_v44  ;;  %v660_v45 = vadd.f32 %v1064_v53, %v1363_v38  ;;  %v724_v46 = vadd.f32 %v1080_v54, %v1363_v38  ;;  %v664_v20 = vpop.f32.mrf.mxu0  ;;  %v728_v21 = vpop.f32.mrf.mxu1 }
 0x107   : > { %v849_v10 = vsel %vm785_vm0, %v753_v7, %v817_v14  ;;  %v865_v11 = vsel %vm801_vm1, %v769_v56, %v833_v30  ;;  %v652_v22 = vadd.f32 %v1363_v38, %v651_v55  ;;  %v716_v32 = vadd.f32 %v1363_v38, %v715_v60 }
 0x108   : > { %881 = vst [vmem:[%s1426_s9 + $0x50] sm:$0xff] %v849_v10  ;;  %897 = vst [vmem:[%s1426_s9 + $0xd0] sm:$0xff] %v865_v11  ;;  %vm783_vm2 = vcmp.ge.f32.partialorder %v751_v31, 0.0  ;;  %v815_v43 = vmul.f32 0.01, %v751_v31  ;;  %vm799_vm3 = vcmp.ge.f32.partialorder %v767_v15, 0.0  ;;  %v754_v23 = vadd.f32 %v660_v45, %v1376_v47  ;;  %v1068_v12 = vpop.f32.mrf.mxu0  ;;  %v1084_v13 = vpop.f32.mrf.mxu1 }
 0x109   : > { %v831_v44 = vmul.f32 0.01, %v767_v15  ;;  %v770_v29 = vadd.f32 %v724_v46, %v1379_v48  ;;  %v752_v33 = vadd.f32 %v652_v22, %v1388_v57  ;;  %v768_v34 = vadd.f32 %v716_v32, %v1391_v62 }
 0x10a   : > { %v847_v35 = vsel %vm783_vm2, %v751_v31, %v815_v43  ;;  %v673_v37 = vadd.f32 %v1067_v8, %v1363_v38  ;;  %v737_v58 = vadd.f32 %v1083_v9, %v1363_v38  ;;  %vm786_vm4 = vcmp.ge.f32.partialorder %v754_v23, 0.0  ;;  %v667_v52 = vpop.f32.mrf.mxu0  ;;  %v731_v53 = vpop.f32.mrf.mxu1 }
 0x10b   : > { %v863_v36 = vsel %vm799_vm3, %v767_v15, %v831_v44  ;;  %879 = vst [vmem:[%s1426_s9 + $0x40] sm:$0xff] %v847_v35  ;;  %v818_v47 = vmul.f32 0.01, %v754_v23  ;;  %vm802_vm5 = vcmp.ge.f32.partialorder %v770_v29, 0.0  ;;  %v834_v48 = vmul.f32 0.01, %v770_v29 }
 0x10c   : > { %895 = vst [vmem:[%s1426_s9 + $0xc0] sm:$0xff] %v863_v36  ;;  %vm784_vm6 = vcmp.ge.f32.partialorder %v752_v33, 0.0  ;;  %v816_v57 = vmul.f32 0.01, %v752_v33  ;;  %vm800_vm7 = vcmp.ge.f32.partialorder %v768_v34, 0.0  ;;  %v757_v40 = vadd.f32 %v673_v37, %v1394_v1 }
 0x10d   : > { %v832_v62 = vmul.f32 0.01, %v768_v34  ;;  %v850_v59 = vsel %vm786_vm4, %v754_v23, %v818_v47  ;;  %v866_v39 = vsel %vm802_vm5, %v770_v29, %v834_v48  ;;  %v773_v41 = vadd.f32 %v737_v58, %v1397_v2 }
 0x10e   : > { %882 = vst [vmem:[%s1426_s9 + $0x58] sm:$0xff] %v850_v59  ;;  %898 = vst [vmem:[%s1426_s9 + $0xd8] sm:$0xff] %v866_v39  ;;  %v848_v42 = vsel %vm784_vm6, %v752_v33, %v816_v57  ;;  %v665_v50 = vadd.f32 %v1363_v38, %v664_v20  ;;  %v729_v51 = vadd.f32 %v1363_v38, %v728_v21  ;;  %vm789_vm8 = vcmp.ge.f32.partialorder %v757_v40, 0.0 }
 0x10f   : > { %v864_v49 = vsel %vm800_vm7, %v768_v34, %v832_v62  ;;  %880 = vst [vmem:[%s1426_s9 + $0x48] sm:$0xff] %v848_v42  ;;  %v821_v54 = vmul.f32 0.01, %v757_v40  ;;  %vm805_vm9 = vcmp.ge.f32.partialorder %v773_v41, 0.0  ;;  %v837_v1 = vmul.f32 0.01, %v773_v41 }
 0x110   : > { %896 = vst [vmem:[%s1426_s9 + $0xc8] sm:$0xff] %v864_v49  ;;  %v755_v2 = vadd.f32 %v665_v50, %v1400_v25  ;;  %v771_v24 = vadd.f32 %v729_v51, %v1403_v3  ;;  %v676_v26 = vadd.f32 %v1068_v12, %v1363_v38  ;;  %v740_v27 = vadd.f32 %v1084_v13, %v1363_v38 }
 0x111   : > { %v853_v28 = vsel %vm789_vm8, %v757_v40, %v821_v54  ;;  %v869_v55 = vsel %vm805_vm9, %v773_v41, %v837_v1  ;;  %v668_v60 = vadd.f32 %v1363_v38, %v667_v52  ;;  %v732_v61 = vadd.f32 %v1363_v38, %v731_v53 }
 0x112   : > { %885 = vst [vmem:[%s1426_s9 + $0x70] sm:$0xff] %v853_v28  ;;  %901 = vst [vmem:[%s1426_s9 + $0xf0] sm:$0xff] %v869_v55  ;;  %vm787_vm10 = vcmp.ge.f32.partialorder %v755_v2, 0.0  ;;  %v819_v6 = vmul.f32 0.01, %v755_v2  ;;  %vm803_vm11 = vcmp.ge.f32.partialorder %v771_v24, 0.0  ;;  %v758_v3 = vadd.f32 %v676_v26, %v1410_v16 }
 0x113   : > { %v835_v25 = vmul.f32 0.01, %v771_v24  ;;  %v774_v7 = vadd.f32 %v740_v27, %v1413_v17  ;;  %v756_v56 = vadd.f32 %v668_v60, %v1416_v18  ;;  %v772_v63 = vadd.f32 %v732_v61, %v1419_v19 }
 0x114   : > { %v851_v0 = vsel %vm787_vm10, %v755_v2, %v819_v6  ;;  %vm790_vm12 = vcmp.ge.f32.partialorder %v758_v3, 0.0  ;;  %v822_v38 = vmul.f32 0.01, %v758_v3 }
 0x115   : > { %v867_v4 = vsel %vm803_vm11, %v771_v24, %v835_v25  ;;  %883 = vst [vmem:[%s1426_s9 + $0x60] sm:$0xff] %v851_v0  ;;  %vm806_vm13 = vcmp.ge.f32.partialorder %v774_v7, 0.0  ;;  %v838_v5 = vmul.f32 0.01, %v774_v7  ;;  %vm788_vm14 = vcmp.ge.f32.partialorder %v756_v56, 0.0 }
 0x116   : > { %899 = vst [vmem:[%s1426_s9 + $0xe0] sm:$0xff] %v867_v4  ;;  %v820_v16 = vmul.f32 0.01, %v756_v56  ;;  %vm804_vm15 = vcmp.ge.f32.partialorder %v772_v63, 0.0  ;;  %v836_v17 = vmul.f32 0.01, %v772_v63  ;;  %v854_v8 = vsel %vm790_vm12, %v758_v3, %v822_v38 }
 0x117   : > { %v870_v18 = vsel %vm806_vm13, %v774_v7, %v838_v5  ;;  %886 = vst [vmem:[%s1426_s9 + $0x78] sm:$0xff] %v854_v8 }
 0x118   : > { %902 = vst [vmem:[%s1426_s9 + $0xf8] sm:$0xff] %v870_v18  ;;  %v852_v19 = vsel %vm788_vm14, %v756_v56, %v820_v16  ;;  %v868_v9 = vsel %vm804_vm15, %v772_v63, %v836_v17 }
 0x119   : > { %884 = vst [vmem:[%s1426_s9 + $0x68] sm:$0xff] %v852_v19  ;;  %900 = vst [vmem:[%s1426_s9 + $0xe8] sm:$0xff] %v868_v9 }
 0x11a PF: > { %s16_s21 = sadd.s32 1, %s1139_s21  }
 0x11b   : > { %p13_p4 = scmp.ge.s32.totalorder %s16_s21, 4  }
 0x11d   :  { %15 = sbr.rel (!%p13_p4) target bundleno = 1 (0x1), region = 77 }

// kernel: wide_resnet_block_forward.3
= control target key start
LH: loop header
LB: loop body
LE: loop exit
PB: predicated region body
PF: predicated region fallthrough
CT: control target
= control target key end

     0   :  { %s6653_s15 = smov 0   ;;  %s9352_s0 = inlined_call_operand.vmem [shape: bf16[2,18,18,128], index: 0, kind: input, shape index: {}]   ;;  %s9353_s1 = inlined_call_operand.vmem [shape: bf16[9,128,128], index: 1, kind: input, shape index: {}]   ;;  %s9354_s2 = inlined_call_operand.vmem [shape: f32[2,256,128], index: 2, kind: output, shape index: {0}]   ;;  %s9355_s3 = inlined_call_operand.vmem [shape: f32[1,128], index: 3, kind: output, shape index: {1}]   ;;  %s9356_s4 = inlined_call_operand.vmem [shape: f32[1,128], index: 4, kind: output, shape index: {2}]  }
   0x1 LB: > { %s5220_s16 = sadd.s32 4294967295, %s6625_s15   ;;  %p5224_p0 = scmp.ge.s32.totalorder %s6625_s15, 1  ;;  %s6625_s15 = sphi %s6653_s15, %s15_s15  }
   0x2   : > { %p157_p1 = scmp.lt.s32.totalorder %s6625_s15, 3 }
   0x4   : > { %p158_p2 = pnand %p5224_p0, %p157_p1 }
   0x6   : > { %161 = sbr.rel (%p158_p2) target bundleno = 583 (0x247), region = 28 }
   0xb   : > { %p183_p3 = scmp.lt.s32.totalorder %s5220_s16, 1  ;;  %p5228_p4 = scmp.ne.s32.totalorder %s5220_s16, 0 }
   0xd   : > { %s184_s17 = scalar_select %p183_p3, %s5220_s16, 1 }
   0xe   : > { %197 = sbr.rel (%p5228_p4) target bundleno = 21 (0x15), region = 32 }
   0xf   : > { %s6480_s18 = smul.u32 216, %s184_s17  ;;  %s5815_s19 = sshll.u32 %s184_s17, 8 }
  0x10   : > { %s6664_s22 = scalar_lea.vmem %s9354_s2, %s5815_s19 }
  0x11   : > { %s6669_s25 = scalar_lea.vmem %s9352_s0, %s6480_s18 }
  0x13   : > { %v6627_v0 = vmov 0.0  }
  0x14   : > { %198 = vst [vmem:[%s9355_s3] sm:$0x1] %v6627_v0  ;;  %199 = vst [vmem:[%s9356_s4] sm:$0x1] %v6627_v0 }
  0x15 PF: > { %v6490_v1 = vld [vmem:[%s9353_s1 + $0x78] sm:$0xff]   ;;  %v6491_v2 = vld [vmem:[%s9353_s1 + $0x70] sm:$0xff]   ;;  %v6492_v3 = vld [vmem:[%s9353_s1 + $0x68] sm:$0xff]   ;;  %vm264_vm0 = vsmask.f32 3328  ;;  %vm1294_vm3 = vcmask 1042432  }
  0x16   : > { %6032 = vmatprep.subr.bf16.mxu0 %v6490_v1  ;;  %6464 = vmatprep.subr.bf16.mxu1 %v6490_v1  ;;  %v6493_v4 = vld [vmem:[%s9353_s1 + $0x60] sm:$0xff]   ;;  %v6696_v7 = vld [vmem:[%s6669_s25 + $0x8] sm:$0x1]  ;;  %vm265_vm1 = vsmask.f32 7440  ;;  %v6494_v18 = vld [vmem:[%s9353_s1 + $0x58] sm:$0xff]  }
  0x17   : > { %6033 = vmatpush3.bf16.msra.mxu0 %v6490_v1  ;;  %6472 = vmatpush3.bf16.msra.mxu1 %v6490_v1  ;;  %v6690_v5 = vld [vmem:[%s6669_s25] sm:$0xf]  ;;  %v6693_v6 = vld [vmem:[%s6669_s25 + $0x4] sm:$0xf]  ;;  %v287_v12 = vshll.u32 %v6696_v7, 16  ;;  %vm6715_vm2 = vmor %vm264_vm0, %vm265_vm1  ;;  %vm1295_vm4 = vcmask 1046532  }
  0x18   : > { %6034 = vmatprep.subr.bf16.mxu0 %v6491_v2  ;;  %6465 = vmatprep.subr.bf16.mxu1 %v6491_v2  ;;  %v268_v8 = vshrl.u32 %v6690_v5, 16  ;;  %v271_v9 = vshll.u32 %v6690_v5, 16  ;;  %v277_v10 = vshll.u32 %v6693_v6, 16  ;;  %v281_v11 = vshrl.u32 %v6693_v6, 16  ;;  %v216_v13 = vld [vmem:[%s6669_s25 + $0x60] sm:$0xf]  ;;  %vm7026_vm5 = vmor %vm1294_vm3, %vm1295_vm4 }
  0x19   : > { %v217_v16 = vld [vmem:[%s6669_s25 + $0x64] sm:$0xf]  ;;  %v256_v17 = vld [vmem:[%s6669_s25 + $0x68] sm:$0x1]  ;;  %v460_v22 = vshrl.u32 %v216_v13, 16  ;;  %v463_v24 = vshll.u32 %v216_v13, 16 }
  0x1a   : > { %v270_v14 = vrot.slane %v268_v8, 4  ;;  %v273_v15 = vrot.slane %v271_v9, 5  ;;  %v279_v19 = vrot.slane %v277_v10, 5  ;;  %v283_v20 = vrot.slane %v281_v11, 4  ;;  %v6711_v27 = vld [vmem:[%s6669_s25 + $0xc] sm:$0xf] }
  0x1b   : > { %6035 = vmatpush3.bf16.msra.mxu0 %v6491_v2  ;;  %6473 = vmatpush3.bf16.msra.mxu1 %v6491_v2  ;;  %v469_v25 = vshll.u32 %v217_v16, 16  ;;  %v473_v26 = vshrl.u32 %v217_v16, 16  ;;  %v289_v30 = vrot.slane %v287_v12, 5  ;;  %v462_v31 = vrot.slane %v460_v22, 4  ;;  %v6720_v33 = vld [vmem:[%s6669_s25 + $0x10] sm:$0xf] }
  0x1c   : > { %6036 = vmatprep.subr.bf16.mxu0 %v6492_v3  ;;  %6466 = vmatprep.subr.bf16.mxu1 %v6492_v3  ;;  %v274_v23 = vor.u32 %v273_v15, %v270_v14  ;;  %v284_v29 = vor.u32 %v283_v20, %v279_v19  ;;  %v479_v32 = vshll.u32 %v256_v17, 16  ;;  %v6495_v34 = vld [vmem:[%s9353_s1 + $0x50] sm:$0xff]   ;;  %v465_v36 = vrot.slane %v463_v24, 5  ;;  %v218_v48 = vld [vmem:[%s6669_s25 + $0x6c] sm:$0xf]  ;;  %v6497_v16 = vld [vmem:[%s9353_s1 + $0x40] sm:$0xff]  }
  0x1d   : > { %v471_v37 = vrot.slane %v469_v25, 5  ;;  %v475_v38 = vrot.slane %v473_v26, 4  ;;  %v6726_v41 = vld [vmem:[%s6669_s25 + $0x14] sm:$0x1]  ;;  %v292_v42 = vshrl.u32 %v6711_v27, 16  ;;  %v295_v43 = vshll.u32 %v6711_v27, 16 }
  0x1e   : > { %v275_v35 = vrot.slane %v274_v23, 4  ;;  %v285_v39 = vrot.slane %v284_v29, 4  ;;  %v481_v40 = vrot.slane %v479_v32, 5  ;;  %v466_v45 = vor.u32 %v465_v36, %v462_v31  ;;  %v219_v53 = vld [vmem:[%s6669_s25 + $0x70] sm:$0xf]  ;;  %v6496_v59 = vld [vmem:[%s9353_s1 + $0x48] sm:$0xff]  }
  0x1f   : > { %6037 = vmatpush3.bf16.msra.mxu0 %v6492_v3  ;;  %6474 = vmatpush3.bf16.msra.mxu1 %v6492_v3  ;;  %v476_v46 = vor.u32 %v475_v38, %v471_v37  ;;  %v301_v47 = vshll.u32 %v6720_v33, 16  ;;  %v294_v50 = vrot.slane %v292_v42, 4  ;;  %v297_v51 = vrot.slane %v295_v43, 5  ;;  %v257_v58 = vld [vmem:[%s6669_s25 + $0x74] sm:$0x1]  ;;  %v6498_v42 = vld [vmem:[%s9353_s1 + $0x38] sm:$0xff]  }
  0x20   : > { %6038 = vmatprep.subr.bf16.mxu0 %v6493_v4  ;;  %6467 = vmatprep.subr.bf16.mxu1 %v6493_v4  ;;  %v280_v44 = vsel %vm6715_vm2, %v275_v35, %v279_v19  ;;  %v290_v49 = vsel %vm6715_vm2, %v285_v39, %v289_v30  ;;  %v305_v52 = vshrl.u32 %v6720_v33, 16  ;;  %v467_v55 = vrot.slane %v466_v45, 4  ;;  %v6749_v15 = vld [vmem:[%s6669_s25 + $0x18] sm:$0xf]  ;;  %v6757_v20 = vld [vmem:[%s6669_s25 + $0x1c] sm:$0xf] }
  0x21   : > { %v5245_v54 = vcombine.low %v280_v44, %v290_v49  ;;  %v477_v56 = vrot.slane %v476_v46, 4  ;;  %v303_v57 = vrot.slane %v301_v47, 5  ;;  %v298_v60 = vor.u32 %v297_v51, %v294_v50  ;;  %v6762_v26 = vld [vmem:[%s6669_s25 + $0x20] sm:$0x1]  ;;  %v220_v35 = vld [vmem:[%s6669_s25 + $0x78] sm:$0xf] }
  0x22   : > { %v307_v61 = vrot.slane %v305_v52, 4  ;;  %v311_v62 = vshll.u32 %v6726_v41, 16  ;;  %v472_v0 = vsel %vm6715_vm2, %v467_v55, %v471_v37  ;;  %v484_v2 = vshrl.u32 %v218_v48, 16  ;;  %v6499_v43 = vld [vmem:[%s9353_s1 + $0xb8] sm:$0xff]   ;;  %v258_v50 = vld [vmem:[%s6669_s25 + $0x80] sm:$0x1] }
  0x23   : > { %6039 = vmatpush3.bf16.msra.mxu0 %v6493_v4  ;;  %6475 = vmatpush3.bf16.msra.mxu1 %v6493_v4  ;;  %v482_v1 = vsel %vm6715_vm2, %v477_v56, %v481_v40  ;;  %v487_v3 = vshll.u32 %v218_v48, 16  ;;  %v299_v8 = vrot.slane %v298_v60, 4  ;;  %v493_v13 = vshll.u32 %v219_v53, 16  ;;  %v6771_v40 = vld [vmem:[%s6669_s25 + $0x7c] sm:$0xf]  ;;  %v6501_v60 = vld [vmem:[%s9353_s1 + $0xb0] sm:$0xff]  }
  0x24   : > { %6040 = vmatprep.subr.bf16.mxu0 %v6494_v18  ;;  %6468 = vmatprep.subr.bf16.mxu1 %v6494_v18  ;;  %v5253_v4 = vcombine.low %v472_v0, %v482_v1  ;;  %v308_v9 = vor.u32 %v307_v61, %v303_v57  ;;  %v313_v10 = vrot.slane %v311_v62, 5  ;;  %v486_v11 = vrot.slane %v484_v2, 4  ;;  %v6798_v1 = vld [vmem:[%s6669_s25 + $0x28] sm:$0xf] }
  0x25   : > { %6048 = vmatprep.mubr.bf16.mxu0 %v5245_v54  ;;  %v489_v12 = vrot.slane %v487_v3, 5  ;;  %v497_v14 = vshrl.u32 %v219_v53, 16  ;;  %v304_v17 = vsel %vm6715_vm2, %v299_v8, %v303_v57  ;;  %v503_v19 = vshll.u32 %v257_v58, 16  ;;  %v6500_v53 = vld [vmem:[%s9353_s1 + $0x30] sm:$0xff]   ;;  %v6789_v58 = vld [vmem:[%s6669_s25 + $0x24] sm:$0xf] }
  0x26   : > { %6064 = vmatprep.mubr.bf16.mxu1 %v5253_v4  ;;  %v495_v24 = vrot.slane %v493_v13, 5  ;;  %v316_v29 = vshrl.u32 %v6749_v15, 16  ;;  %v319_v32 = vshll.u32 %v6749_v15, 16  ;;  %v329_v46 = vshrl.u32 %v6757_v20, 16 }
  0x27   : > { %6041 = vmatpush3.bf16.msra.mxu0 %v6494_v18  ;;  %6476 = vmatpush3.bf16.msra.mxu1 %v6494_v18  ;;  %v309_v18 = vrot.slane %v308_v9, 4  ;;  %v490_v23 = vor.u32 %v489_v12, %v486_v11  ;;  %v499_v25 = vrot.slane %v497_v14, 4  ;;  %v505_v31 = vrot.slane %v503_v19, 5  ;;  %v6801_v9 = vld [vmem:[%s6669_s25 + $0x2c] sm:$0x1] }
  0x28   : > { %6042 = vmatprep.subr.bf16.mxu0 %v6495_v34  ;;  %6469 = vmatprep.subr.bf16.mxu1 %v6495_v34  ;;  %v318_v39 = vrot.slane %v316_v29, 4  ;;  %v321_v44 = vrot.slane %v319_v32, 5  ;;  %v335_v47 = vshll.u32 %v6762_v26, 16  ;;  %v508_v51 = vshrl.u32 %v220_v35, 16  ;;  %v6805_v14 = vld [vmem:[%s6669_s25 + $0x84] sm:$0xf] }
  0x29   : > { %v314_v30 = vsel %vm6715_vm2, %v309_v18, %v313_v10  ;;  %v491_v37 = vrot.slane %v490_v23, 4  ;;  %v500_v38 = vor.u32 %v499_v25, %v495_v24  ;;  %v511_v52 = vshll.u32 %v220_v35, 16  ;;  %v6812_v23 = vld [vmem:[%s6669_s25 + $0x88] sm:$0xf] }
  0x2a   : > { %v5246_v36 = vcombine.low %v304_v17, %v314_v30  ;;  %v322_v54 = vor.u32 %v321_v44, %v318_v39  ;;  %v331_v55 = vrot.slane %v329_v46, 4  ;;  %v337_v56 = vrot.slane %v335_v47, 5 }
  0x2b   : > { %6043 = vmatpush3.bf16.msra.mxu0 %v6495_v34  ;;  %6477 = vmatpush3.bf16.msra.mxu1 %v6495_v34  ;;  %v325_v34 = vshll.u32 %v6757_v20, 16  ;;  %v496_v48 = vsel %vm6715_vm2, %v491_v37, %v495_v24  ;;  %v501_v49 = vrot.slane %v500_v38, 4  ;;  %v517_v57 = vshll.u32 %v6771_v40, 16  ;;  %v6821_v37 = vld [vmem:[%s6669_s25 + $0x8c] sm:$0x1] }
  0x2c   : > { %6044 = vmatprep.subr.bf16.mxu0 %v6496_v59  ;;  %6470 = vmatprep.subr.bf16.mxu1 %v6496_v59  ;;  %v510_v61 = vrot.slane %v508_v51, 4  ;;  %v513_v62 = vrot.slane %v511_v52, 5  ;;  %v521_v0 = vshrl.u32 %v6771_v40, 16  ;;  %v323_v3 = vrot.slane %v322_v54, 4  ;;  %v6503_v38 = vld [vmem:[%s9353_s1 + $0xa8] sm:$0xff]  }
  0x2d   : > { %v327_v45 = vrot.slane %v325_v34, 5  ;;  %v519_v8 = vrot.slane %v517_v57, 5  ;;  %v527_v12 = vshll.u32 %v258_v50, 16  ;;  %v340_v13 = vshrl.u32 %v6789_v58, 16  ;;  %v6836_v54 = vld [vmem:[%s6669_s25 + $0x30] sm:$0xf] }
  0x2e   : > { %v514_v10 = vor.u32 %v513_v62, %v510_v61  ;;  %v523_v11 = vrot.slane %v521_v0, 4  ;;  %v343_v18 = vshll.u32 %v6789_v58, 16  ;;  %v349_v19 = vshll.u32 %v6798_v1, 16  ;;  %v6845_v61 = vld [vmem:[%s6669_s25 + $0x34] sm:$0xf] }
  0x2f   : > { %6045 = vmatpush3.bf16.msra.mxu0 %v6496_v59  ;;  %6478 = vmatpush3.bf16.msra.mxu1 %v6496_v59  ;;  %v506_v59 = vsel %vm6715_vm2, %v501_v49, %v505_v31  ;;  %v332_v4 = vor.u32 %v331_v55, %v327_v45  ;;  %v529_v29 = vrot.slane %v527_v12, 5  ;;  %v342_v30 = vrot.slane %v340_v13, 4  ;;  %v6502_v31 = vld [vmem:[%s9353_s1 + $0x28] sm:$0xff]  }
  0x30   : > { %6046 = vmatprep.subr.bf16.mxu0 %v6497_v16  ;;  %6471 = vmatprep.subr.bf16.mxu1 %v6497_v16  ;;  %v5254_v2 = vcombine.low %v496_v48, %v506_v59  ;;  %v515_v24 = vrot.slane %v514_v10, 4  ;;  %v524_v25 = vor.u32 %v523_v11, %v519_v8  ;;  %v345_v34 = vrot.slane %v343_v18, 5 }
  0x31   : > { %v333_v17 = vrot.slane %v332_v4, 4  ;;  %v351_v35 = vrot.slane %v349_v19, 5  ;;  %v359_v44 = vshll.u32 %v6801_v9, 16  ;;  %v532_v47 = vshrl.u32 %v6805_v14, 16  ;;  %v6857_v19 = vld [vmem:[%s6669_s25 + $0x90] sm:$0xf] }
  0x32   : > { %v535_v48 = vshll.u32 %v6805_v14, 16  ;;  %v541_v51 = vshll.u32 %v6812_v23, 16  ;;  %v545_v52 = vshrl.u32 %v6812_v23, 16  ;;  %v364_v10 = vshrl.u32 %v6836_v54, 16 }
  0x33   : > { %6047 = vmatpush3.bf16.msra.mxu0 %v6497_v16  ;;  %6479 = vmatpush3.bf16.msra.mxu1 %v6497_v16  ;;  %v328_v16 = vsel %vm6715_vm2, %v323_v3, %v327_v45  ;;  %v338_v32 = vsel %vm6715_vm2, %v333_v17, %v337_v56  ;;  %v346_v45 = vor.u32 %v345_v34, %v342_v30  ;;  %v361_v50 = vrot.slane %v359_v44, 5  ;;  %v6853_v17 = vld [vmem:[%s6669_s25 + $0x38] sm:$0x1] }
  0x34   : > { %6080 = vmatprep.subr.bf16.mxu1 %v6498_v42  ;;  %6128 = vmatprep.subr.bf16.mxu0 %v6499_v43  ;;  %v5247_v39 = vcombine.low %v328_v16, %v338_v32  ;;  %v534_v59 = vrot.slane %v532_v47, 4  ;;  %v537_v62 = vrot.slane %v535_v48, 5  ;;  %v543_v0 = vrot.slane %v541_v51, 5  ;;  %v6863_v32 = vld [vmem:[%s6669_s25 + $0x94] sm:$0xf] }
  0x35   : > { %v347_v56 = vrot.slane %v346_v45, 4  ;;  %v551_v3 = vshll.u32 %v6821_v37, 16  ;;  %v367_v11 = vshll.u32 %v6836_v54, 16  ;;  %v373_v18 = vshll.u32 %v6845_v61, 16  ;;  %v6873_v45 = vld [vmem:[%s6669_s25 + $0x98] sm:$0x1] }
  0x36   : > { %6049 = vmatmul.mubr.bf16.vlgmr.msra.gmra.mxu0 %v5246_v36  ;;  %6065 = vmatmul.mubr.bf16.vlgmr.msra.gmra.mxu1 %v5254_v2  ;;  %v353_v36 = vshrl.u32 %v6798_v1, 16  ;;  %v547_v2 = vrot.slane %v545_v52, 4  ;;  %v538_v12 = vor.u32 %v537_v62, %v534_v59  ;;  %v377_v30 = vshrl.u32 %v6845_v61, 16  ;;  %v6508_v47 = vld [vmem:[%s9353_s1 + $0x10] sm:$0xff]   ;;  %v6886_v52 = vld [vmem:[%s6669_s25 + $0x3c] sm:$0xf] }
  0x37   : > { %6081 = vmatpush3.bf16.msra.mxu1 %v6498_v42  ;;  %6129 = vmatpush3.bf16.msra.mxu0 %v6499_v43  ;;  %v520_v42 = vsel %vm6715_vm2, %v515_v24, %v519_v8  ;;  %v525_v43 = vrot.slane %v524_v25, 4  ;;  %v352_v4 = vsel %vm6715_vm2, %v347_v56, %v351_v35  ;;  %v553_v16 = vrot.slane %v551_v3, 5  ;;  %v6509_v56 = vld [vmem:[%s9353_s1 + $0x90] sm:$0xff]  }
  0x38   : > { %6082 = vmatprep.subr.bf16.mxu1 %v6500_v53  ;;  %6130 = vmatprep.subr.bf16.mxu0 %v6501_v60  ;;  %v355_v46 = vrot.slane %v353_v36, 4  ;;  %v548_v13 = vor.u32 %v547_v2, %v543_v0  ;;  %v366_v25 = vrot.slane %v364_v10, 4  ;;  %v383_v44 = vshll.u32 %v6853_v17, 16  ;;  %v6899_v10 = vld [vmem:[%s6669_s25 + $0x9c] sm:$0xf] }
  0x39   : > { %v530_v49 = vsel %vm6715_vm2, %v525_v43, %v529_v29  ;;  %6052 = vmatprep.mubr.bf16.mxu0 %v5247_v39  ;;  %v369_v29 = vrot.slane %v367_v11, 5  ;;  %v6507_v39 = vld [vmem:[%s9353_s1 + $0x98] sm:$0xff]   ;;  %v379_v43 = vrot.slane %v377_v30, 4  ;;  %v565_v51 = vshll.u32 %v6863_v32, 16  ;;  %v6510_v30 = vld [vmem:[%s9353_s1 + $0x8] sm:$0xff]  }
  0x3a   : > { %v5255_v55 = vcombine.low %v520_v42, %v530_v49  ;;  %v356_v57 = vor.u32 %v355_v46, %v351_v35  ;;  %v539_v35 = vrot.slane %v538_v12, 4  ;;  %v549_v36 = vrot.slane %v548_v13, 4 }
  0x3b   : > { %6083 = vmatpush3.bf16.msra.mxu1 %v6500_v53  ;;  %6131 = vmatpush3.bf16.msra.mxu0 %v6501_v60  ;;  %v6504_v53 = vld [vmem:[%s9353_s1 + $0x20] sm:$0xff]   ;;  %v370_v42 = vor.u32 %v369_v29, %v366_v25  ;;  %v556_v46 = vshrl.u32 %v6857_v19, 16  ;;  %v567_v3 = vrot.slane %v565_v51, 5  ;;  %v575_v12 = vshll.u32 %v6873_v45, 16 }
  0x3c   : > { %6084 = vmatprep.subr.bf16.mxu1 %v6502_v31  ;;  %v6505_v60 = vld [vmem:[%s9353_s1 + $0xa0] sm:$0xff]   ;;  %6132 = vmatprep.subr.bf16.mxu0 %v6503_v38  ;;  %v357_v8 = vrot.slane %v356_v57, 4  ;;  %v544_v48 = vsel %vm6715_vm2, %v539_v35, %v543_v0  ;;  %v554_v49 = vsel %vm6715_vm2, %v549_v36, %v553_v16  ;;  %v385_v0 = vrot.slane %v383_v44, 5 }
  0x3d   : > { %6068 = vmatprep.mubr.bf16.mxu1 %v5255_v55  ;;  %v6889_v55 = vld [vmem:[%s6669_s25 + $0x40] sm:$0xf]  ;;  %v5256_v57 = vcombine.low %v544_v48, %v554_v49  ;;  %v371_v59 = vrot.slane %v370_v42, 4  ;;  %v388_v13 = vshrl.u32 %v6886_v52, 16  ;;  %v577_v35 = vrot.slane %v575_v12, 5  ;;  %v6511_v42 = vld [vmem:[%s9353_s1 + $0x88] sm:$0xff]  }
  0x3e   : > { %v362_v24 = vsel %vm6715_vm2, %v357_v8, %v361_v50  ;;  %v559_v50 = vshll.u32 %v6857_v19, 16  ;;  %v6896_v8 = vld [vmem:[%s6669_s25 + $0x44] sm:$0x1]  ;;  %v397_v25 = vshll.u32 %v6889_v55, 16  ;;  %v6908_v29 = vld [vmem:[%s6669_s25 + $0xa0] sm:$0xf] }
  0x3f   : > { %6085 = vmatpush3.bf16.msra.mxu1 %v6502_v31  ;;  %6133 = vmatpush3.bf16.msra.mxu0 %v6503_v38  ;;  %v6506_v31 = vld [vmem:[%s9353_s1 + $0x18] sm:$0xff]   ;;  %v5248_v34 = vcombine.low %v352_v4, %v362_v24  ;;  %v375_v38 = vrot.slane %v373_v18, 5  ;;  %v569_v4 = vshrl.u32 %v6863_v32, 16  ;;  %v391_v24 = vshll.u32 %v6886_v52, 16 }
  0x40   : > { %6086 = vmatprep.subr.bf16.mxu1 %v6504_v53  ;;  %6134 = vmatprep.subr.bf16.mxu0 %v6505_v60  ;;  %v561_v2 = vrot.slane %v559_v50, 5  ;;  %v390_v36 = vrot.slane %v388_v13, 4  ;;  %v399_v48 = vrot.slane %v397_v25, 5  ;;  %v407_v50 = vshll.u32 %v6896_v8, 16 }
  0x41   : > { %6053 = vmatmul.mubr.bf16.gmra.mxu0 %v5248_v34  ;;  %v380_v62 = vor.u32 %v379_v43, %v375_v38  ;;  %6069 = vmatmul.mubr.bf16.gmra.mxu1 %v5256_v57  ;;  %v376_v11 = vsel %vm6715_vm2, %v371_v59, %v375_v38  ;;  %v571_v18 = vrot.slane %v569_v4, 4  ;;  %v401_v38 = vshrl.u32 %v6889_v55, 16 }
  0x42   : > { %v580_v51 = vshrl.u32 %v6899_v10, 16 }
  0x43   : > { %6087 = vmatpush3.bf16.msra.mxu1 %v6504_v53  ;;  %6135 = vmatpush3.bf16.msra.mxu0 %v6505_v60  ;;  %v558_v53 = vrot.slane %v556_v46, 4  ;;  %v381_v60 = vrot.slane %v380_v62, 4  ;;  %v572_v44 = vor.u32 %v571_v18, %v567_v3  ;;  %v393_v46 = vrot.slane %v391_v24, 5  ;;  %v6924_v62 = vld [vmem:[%s6669_s25 + $0xa4] sm:$0x1] }
  0x44   : > { %6088 = vmatprep.subr.bf16.mxu1 %v6506_v31  ;;  %6136 = vmatprep.subr.bf16.mxu0 %v6507_v39  ;;  %v403_v49 = vrot.slane %v401_v38, 4  ;;  %v582_v4 = vrot.slane %v580_v51, 4  ;;  %v6938_v18 = vld [vmem:[%s6669_s25 + $0x4c] sm:$0xf] }
  0x45   : > { %v562_v16 = vor.u32 %v561_v2, %v558_v53  ;;  %v386_v34 = vsel %vm6715_vm2, %v381_v60, %v385_v0  ;;  %v573_v57 = vrot.slane %v572_v44, 4  ;;  %v394_v59 = vor.u32 %v393_v46, %v390_v36  ;;  %v6929_v60 = vld [vmem:[%s6669_s25 + $0x48] sm:$0xf] }
  0x46   : > { %v5249_v43 = vcombine.low %v376_v11, %v386_v34  ;;  %v583_v0 = vshll.u32 %v6899_v10, 16  ;;  %v404_v53 = vor.u32 %v403_v49, %v399_v48  ;;  %v409_v2 = vrot.slane %v407_v50, 5 }
  0x47   : > { %6089 = vmatpush3.bf16.msra.mxu1 %v6506_v31  ;;  %6137 = vmatpush3.bf16.msra.mxu0 %v6507_v39  ;;  %v563_v31 = vrot.slane %v562_v16, 4  ;;  %v589_v11 = vshll.u32 %v6908_v29, 16  ;;  %v578_v12 = vsel %vm6715_vm2, %v573_v57, %v577_v35  ;;  %v395_v13 = vrot.slane %v394_v59, 4 }
  0x48   : > { %6090 = vmatprep.subr.bf16.mxu1 %v6508_v47  ;;  %6138 = vmatprep.subr.bf16.mxu0 %v6509_v56  ;;  %v585_v16 = vrot.slane %v583_v0, 5  ;;  %v405_v25 = vrot.slane %v404_v53, 4  ;;  %v599_v36 = vshll.u32 %v6924_v62, 16  ;;  %v412_v44 = vshrl.u32 %v6929_v60, 16  ;;  %v6963_v53 = vld [vmem:[%s6669_s25 + $0xac] sm:$0xf] }
  0x49   : > { %6056 = vmatprep.mubr.bf16.mxu0 %v5249_v43  ;;  %v568_v39 = vsel %vm6715_vm2, %v563_v31, %v567_v3  ;;  %v6512_v3 = vld [vmem:[%s9353_s1] sm:$0xff]   ;;  %v591_v34 = vrot.slane %v589_v11, 5  ;;  %v400_v35 = vsel %vm6715_vm2, %v395_v13, %v399_v48  ;;  %v6947_v31 = vld [vmem:[%s6669_s25 + $0x50] sm:$0x1]  ;;  %v415_v50 = vshll.u32 %v6929_v60, 16  ;;  %v6960_v48 = vld [vmem:[%s9353_s1 + $0xf8] sm:$0xff]  }
  0x4a   : > { %v5257_v24 = vcombine.low %v568_v39, %v578_v12  ;;  %v586_v38 = vor.u32 %v585_v16, %v582_v4  ;;  %v410_v46 = vsel %vm6715_vm2, %v405_v25, %v409_v2  ;;  %v601_v49 = vrot.slane %v599_v36, 5  ;;  %v6955_v39 = vld [vmem:[%s6669_s25 + $0xa8] sm:$0xf]  ;;  %v6968_v2 = vld [vmem:[%s9353_s1 + $0x138] sm:$0xff]   ;;  %v6973_v13 = vld [vmem:[%s6669_s25 + $0xb0] sm:$0x1] }
  0x4b   : > { %6091 = vmatpush3.bf16.msra.mxu1 %v6508_v47  ;;  %6139 = vmatpush3.bf16.msra.mxu0 %v6509_v56  ;;  %v593_v47 = vshrl.u32 %v6908_v29, 16  ;;  %v6513_v56 = vld [vmem:[%s9353_s1 + $0x80] sm:$0xff]   ;;  %v421_v51 = vshll.u32 %v6938_v18, 16  ;;  %9383 = vst [vmem:[#allocation2_spill] sm:$0xff] %v6955_v39  ;;  %v414_v0 = vrot.slane %v412_v44, 4  ;;  %v425_v11 = vshrl.u32 %v6938_v18, 16 }
  0x4c   : > { %6092 = vmatprep.subr.bf16.mxu1 %v6510_v30  ;;  %6140 = vmatprep.subr.bf16.mxu0 %v6511_v42  ;;  %v587_v57 = vrot.slane %v586_v38, 4  ;;  %v431_v12 = vshll.u32 %v6947_v31, 16  ;;  %9384 = vst [vmem:[#allocation3_spill] sm:$0xff] %v6973_v13  ;;  %v6976_v16 = vld [vmem:[%s6669_s25 + $0x54] sm:$0xf]  ;;  %v604_v25 = vshrl.u32 %v6955_v39, 16 }
  0x4d   : > { %v595_v43 = vrot.slane %v593_v47, 4  ;;  %6072 = vmatprep.mubr.bf16.mxu1 %v5257_v24  ;;  %v423_v4 = vrot.slane %v421_v51, 5  ;;  %v607_v36 = vshll.u32 %v6955_v39, 16  ;;  %v436_v22 = vshrl.u32 %v6976_v16, 16 }
  0x4e   : > { %v592_v47 = vsel %vm6715_vm2, %v587_v57, %v591_v34  ;;  %v433_v44 = vrot.slane %v431_v12, 5  ;;  %v623_v12 = vshll.u32 %v6973_v13, 16 }
  0x4f   : > { %6093 = vmatpush3.bf16.msra.mxu1 %v6510_v30  ;;  %6141 = vmatpush3.bf16.msra.mxu0 %v6511_v42  ;;  %v5250_v30 = vcombine.low %v400_v35, %v410_v46  ;;  %v596_v59 = vor.u32 %v595_v43, %v591_v34  ;;  %v417_v42 = vrot.slane %v415_v50, 5  ;;  %v6983_v35 = vld [vmem:[%s6669_s25 + $0x58] sm:$0xf]  ;;  %v427_v43 = vrot.slane %v425_v11, 4 }
  0x50   : > { %6094 = vmatprep.subr.bf16.mxu1 %v6512_v3  ;;  %6142 = vmatprep.subr.bf16.mxu0 %v6513_v56  ;;  %v613_v46 = vshll.u32 %v6963_v53, 16  ;;  %v606_v50 = vrot.slane %v604_v25, 4  ;;  %v609_v51 = vrot.slane %v607_v36, 5  ;;  %v445_v36 = vshll.u32 %v6983_v35, 16 }
  0x51   : > { %6057 = vmatmul.mubr.bf16.gmra.mxu0 %v5250_v30  ;;  %v597_v24 = vrot.slane %v596_v59, 4  ;;  %v418_v38 = vor.u32 %v417_v42, %v414_v0  ;;  %v617_v30 = vshrl.u32 %v6963_v53, 16  ;;  %v428_v59 = vor.u32 %v427_v43, %v423_v4 }
  0x52   : > { %v615_v0 = vrot.slane %v613_v46, 5  ;;  %v610_v42 = vor.u32 %v609_v51, %v606_v50  ;;  %v438_v50 = vrot.slane %v436_v22, 4  ;;  %v449_v63 = vshrl.u32 %v6983_v35, 16 }
  0x53   : > { %6095 = vmatpush3.bf16.msra.mxu1 %v6512_v3  ;;  %6143 = vmatpush3.bf16.msra.mxu0 %v6513_v56  ;;  %v602_v34 = vsel %vm6715_vm2, %v597_v24, %v601_v49  ;;  %v419_v57 = vrot.slane %v418_v38, 4  ;;  %v6992_v56 = vld [vmem:[%s6669_s25 + $0x5c] sm:$0x1]  ;;  %v619_v11 = vrot.slane %v617_v30, 4  ;;  %v6997_v49 = vld [vmem:[%s6669_s25 + $0xb4] sm:$0xf] }
  0x54   : > { %6176 = vmatprep.subr.bf16.mxu1 %v6960_v48  ;;  %6224 = vmatprep.subr.bf16.mxu0 %v6968_v2  ;;  %v5258_v3 = vcombine.low %v592_v47, %v602_v34  ;;  %9385 = vst [vmem:[#allocation4_spill] sm:$0xff] %v6997_v49  ;;  %v429_v25 = vrot.slane %v428_v59, 4  ;;  %v439_v47 = vshll.u32 %v6976_v16, 16  ;;  %v7004_v38 = vld [vmem:[%s6669_s25 + $0xb8] sm:$0xf]  ;;  %v611_v43 = vrot.slane %v610_v42, 4 }
  0x55   : > { %v424_v24 = vsel %vm6715_vm2, %v419_v57, %v423_v4  ;;  %9386 = vst [vmem:[#allocation5_spill] sm:$0xff] %v7004_v38  ;;  %v620_v46 = vor.u32 %v619_v11, %v615_v0  ;;  %v625_v34 = vrot.slane %v623_v12, 5  ;;  %v7010_v4 = vld [vmem:[%s6669_s25 + $0xbc] sm:$0x1]  ;;  %v455_v42 = vshll.u32 %v6992_v56, 16 }
  0x56   : > { %6073 = vmatmul.mubr.bf16.gmra.mxu1 %v5258_v3  ;;  %v434_v51 = vsel %vm6715_vm2, %v429_v25, %v433_v44  ;;  %v441_v30 = vrot.slane %v439_v47, 5  ;;  %v447_v3 = vrot.slane %v445_v36, 5  ;;  %9387 = vst [vmem:[#allocation6_spill] sm:$0xff] %v7010_v4  ;;  %v616_v59 = vsel %vm6715_vm2, %v611_v43, %v615_v0  ;;  %v1246_v11 = vld [vmem:[%s6669_s25] sm:$0xe] }
  0x57   : > { %v5251_v57 = vcombine.low %v424_v24, %v434_v51  ;;  %v621_v21 = vrot.slane %v620_v46, 4  ;;  %v451_v22 = vrot.slane %v449_v63, 4  ;;  %v628_v13 = vshrl.u32 %v6997_v49, 16 }
  0x58   : > { %v442_v12 = vor.u32 %v441_v30, %v438_v50  ;;  %v631_v44 = vshll.u32 %v6997_v49, 16  ;;  %v457_v24 = vrot.slane %v455_v42, 5  ;;  %v637_v47 = vshll.u32 %v7004_v38, 16  ;;  %v1247_v50 = vld [vmem:[%s6669_s25 + $0xc] sm:$0xe] }
  0x59   : > { %6060 = vmatprep.mubr.bf16.mxu0 %v5251_v57  ;;  %v626_v25 = vsel %vm6715_vm2, %v621_v21, %v625_v34  ;;  %v641_v0 = vshrl.u32 %v7004_v38, 16  ;;  %v452_v46 = vor.u32 %v451_v22, %v447_v3  ;;  %v630_v51 = vrot.slane %v628_v13, 4  ;;  %v1248_v21 = vld [vmem:[%s6669_s25 + $0x18] sm:$0xe] }
  0x5a   : > { %v5259_v36 = vcombine.low %v616_v59, %v626_v25  ;;  %v443_v43 = vrot.slane %v442_v12, 4  ;;  %v633_v63 = vrot.slane %v631_v44, 5  ;;  %v639_v30 = vrot.slane %v637_v47, 5 }
  0x5b   : > { %v643_v39 = vrot.slane %v641_v0, 4  ;;  %v647_v49 = vshll.u32 %v7010_v4, 16  ;;  %v453_v59 = vrot.slane %v452_v46, 4  ;;  %v5293_v42 = vrot.slane %v1246_v11, 9 }
  0x5c   : > { %6076 = vmatprep.mubr.bf16.mxu1 %v5259_v36  ;;  %v448_v34 = vsel %vm6715_vm2, %v443_v43, %v447_v3  ;;  %v1299_v13 = vrot.slane %v6693_v6, 5  ;;  %v634_v12 = vor.u32 %v633_v63, %v630_v51  ;;  %v5294_v25 = vrot.slane %v1247_v50, 9 }
  0x5d   : > { %v644_v22 = vor.u32 %v643_v39, %v639_v30  ;;  %v649_v44 = vrot.slane %v647_v49, 5  ;;  %v458_v47 = vsel %vm6715_vm2, %v453_v59, %v457_v24  ;;  %v1306_v36 = vrot.slane %v6720_v33, 5 }
  0x5e   : > { %v1300_v0 = vsel %vm7026_vm5, %v5293_v42, %v1299_v13  ;;  %v1301_v4 = vrot.slane %v1299_v13, 4  ;;  %v5252_v38 = vcombine.low %v448_v34, %v458_v47  ;;  %v635_v3 = vrot.slane %v634_v12, 4  ;;  %v1250_v13 = vld [vmem:[%s6669_s25 + $0x30] sm:$0xe]  ;;  %v1252_v47 = vld [vmem:[%s6669_s25 + $0x48] sm:$0xe] }
  0x5f   : > { %v645_v43 = vrot.slane %v644_v22, 4  ;;  %v5269_v11 = vcombine.low %v6690_v5, %v6693_v6  ;;  %v9390_v39 = vrot.slane %v6696_v7, 5  ;;  %v1308_v46 = vrot.slane %v1306_v36, 4 }
  0x60   : > { %v5295_v24 = vrot.slane %v1248_v21, 9  ;;  %6061 = vmatmul.mubr.bf16.gmra.mxu0 %v5252_v38  ;;  %v640_v51 = vsel %vm6715_vm2, %v635_v3, %v639_v30  ;;  %v1313_v34 = vrot.slane %v6757_v20, 5  ;;  %v1307_v5 = vsel %vm7026_vm5, %v5294_v25, %v1306_v36  ;;  %v1251_v25 = vld [vmem:[%s6669_s25 + $0x3c] sm:$0xe] }
  0x61   : > { %v1303_v49 = vsel %vm7026_vm5, %v1301_v4, %v9390_v39  ;;  %v650_v50 = vsel %vm6715_vm2, %v645_v43, %v649_v44  ;;  %v9391_v6 = vrot.slane %v6726_v41, 5  ;;  %v1316_v38 = vrot.slane %v6762_v26, 5  ;;  %v1249_v4 = vld [vmem:[%s6669_s25 + $0x24] sm:$0xe]  ;;  %v6521_v26 = vld [vmem:[%s9353_s1 + $0x130] sm:$0xff]  }
  0x62   : > { %v5325_v63 = vcombine.low %v1300_v0, %v1303_v49  ;;  %v5260_v59 = vcombine.low %v640_v51, %v650_v50  ;;  %v1314_v30 = vsel %vm7026_vm5, %v5295_v24, %v1313_v34  ;;  %v1315_v21 = vrot.slane %v1313_v34, 4  ;;  %v6520_v24 = vld [vmem:[%s9353_s1 + $0xf0] sm:$0xff]  }
  0x63   : > { %v1310_v7 = vsel %vm7026_vm5, %v1308_v46, %v9391_v6  ;;  %v1320_v42 = vrot.slane %v6798_v1, 5  ;;  %v5296_v22 = vrot.slane %v1249_v4, 9  ;;  %v1327_v44 = vrot.slane %v6845_v61, 5  ;;  %v7101_v4 = vld [vmem:[%s6669_s25 + $0x68] sm:$0x1] }
  0x64   : > { %6144 = vmatprep.mubr.bf16.mxu0 %v5325_v63  ;;  %6077 = vmatmul.mubr.bf16.gmra.mxu1 %v5260_v59  ;;  %v5326_v12 = vcombine.low %v1307_v5, %v1310_v7  ;;  %v1317_v41 = vsel %vm7026_vm5, %v1315_v21, %v1316_v38  ;;  %v1323_v3 = vrot.slane %v6801_v9, 5  ;;  %v5297_v43 = vrot.slane %v1250_v13, 9  ;;  %v1253_v38 = vld [vmem:[%s6669_s25 + $0x54] sm:$0xe]  ;;  %v7125_v13 = vld [vmem:[%s6669_s25 + $0x60] sm:$0xe] }
  0x65   : > { %6096 = vmatprep.mubr.bf16.mxu1 %v5269_v11  ;;  %v5327_v0 = vcombine.low %v1314_v30, %v1317_v41  ;;  %v1322_v36 = vrot.slane %v1320_v42, 4  ;;  %v1329_v39 = vrot.slane %v1327_v44, 4  ;;  %v1330_v11 = vrot.slane %v6853_v17, 5 }
  0x66   : > { %v1334_v49 = vrot.slane %v6889_v55, 5  ;;  %v5271_v46 = vcombine.low %v6749_v15, %v6757_v20  ;;  %v1341_v51 = vrot.slane %v6938_v18, 5  ;;  %v5298_v50 = vrot.slane %v1251_v25, 9  ;;  %v6529_v25 = vld [vmem:[%s9353_s1 + $0x120] sm:$0xff]  }
  0x67   : > { %v1337_v9 = vrot.slane %v6896_v8, 5  ;;  %v5299_v34 = vrot.slane %v1252_v47, 9  ;;  %v1321_v15 = vsel %vm7026_vm5, %v5296_v22, %v1320_v42  ;;  %v1324_v20 = vsel %vm7026_vm5, %v1322_v36, %v1323_v3  ;;  %v7137_v47 = vld [vmem:[%s6669_s25 + $0x78] sm:$0xe]  ;;  %v6528_v3 = vld [vmem:[%s9353_s1 + $0xe0] sm:$0xff]  }
  0x68   : > { %6145 = vmatmul.mubr.bf16.vlgmr.msra.gmra.mxu0 %v5326_v12  ;;  %v1336_v63 = vrot.slane %v1334_v49, 4  ;;  %v1343_v17 = vrot.slane %v1341_v51, 4  ;;  %v1344_v59 = vrot.slane %v6947_v31, 5  ;;  %v1328_v5 = vsel %vm7026_vm5, %v5297_v43, %v1327_v44  ;;  %v7128_v12 = vld [vmem:[%s6669_s25 + $0x6c] sm:$0xe] }
  0x69   : > { %6225 = vmatpush3.bf16.msra.mxu0 %v6968_v2  ;;  %6148 = vmatprep.mubr.bf16.mxu0 %v5327_v0  ;;  %v1331_v8 = vsel %vm7026_vm5, %v1329_v39, %v1330_v11  ;;  %v6525_v2 = vld [vmem:[%s9353_s1 + $0x128] sm:$0xff]   ;;  %v1348_v6 = vrot.slane %v6983_v35, 5  ;;  %v9392_v7 = vcombine.low %v6711_v27, %v6720_v33  ;;  %v5272_v31 = vcombine.low %v6789_v58, %v6798_v1  ;;  %v1257_v0 = vld [vmem:[%s6669_s25 + $0x84] sm:$0xe]  ;;  %v1258_v43 = vld [vmem:[%s6669_s25 + $0x90] sm:$0xe] }
  0x6a   : > { %6226 = vmatprep.subr.bf16.mxu0 %v6521_v26  ;;  %v1358_v30 = vrot.slane %v7101_v4, 5  ;;  %v5328_v21 = vcombine.low %v1321_v15, %v1324_v20  ;;  %v7107_v42 = vsel %vm7026_vm5, %v5298_v50, %v1334_v49  ;;  %v7111_v27 = vsel %vm7026_vm5, %v1336_v63, %v1337_v9  ;;  %v6524_v33 = vld [vmem:[%s9353_s1 + $0xe8] sm:$0xff]   ;;  %v7156_v49 = vld [vmem:[%s6669_s25 + $0x64] sm:$0xf]  ;;  %v1259_v50 = vld [vmem:[%s6669_s25 + $0x9c] sm:$0xe] }
  0x6b   : > { %v5329_v58 = vcombine.low %v1328_v5, %v1331_v8  ;;  %v7118_v1 = vsel %vm7026_vm5, %v5299_v34, %v1341_v51  ;;  %v5273_v41 = vcombine.low %v6836_v54, %v6845_v61  ;;  %v5300_v22 = vrot.slane %v1253_v38, 9  ;;  %v7178_v5 = vld [vmem:[%s6669_s25 + $0x74] sm:$0x1] }
  0x6c   : > { %6097 = vmatmul.mubr.bf16.vlgmr.msra.gmra.mxu1 %v9392_v7  ;;  %v1351_v44 = vrot.slane %v6992_v56, 5  ;;  %v5274_v36 = vcombine.low %v6886_v52, %v6889_v55  ;;  %v5330_v54 = vcombine.low %v7107_v42, %v7111_v27  ;;  %v5275_v61 = vcombine.low %v6929_v60, %v6938_v18  ;;  %v6614_v55 = vld [vmem:[%s6669_s25 + $0x80] sm:$0x1] }
  0x6d   : > { %6177 = vmatpush3.bf16.msra.mxu1 %v6960_v48  ;;  %6100 = vmatprep.mubr.bf16.mxu1 %v5271_v46  ;;  %v7122_v48 = vsel %vm7026_vm5, %v1343_v17, %v1344_v59  ;;  %v5276_v56 = vcombine.low %v6976_v16, %v6983_v35  ;;  %v5301_v11 = vrot.slane %v7125_v13, 9  ;;  %v1355_v46 = vrot.slane %v7156_v49, 5  ;;  %v7174_v17 = vld [vmem:[%s6669_s25 + $0x70] sm:$0xf]  ;;  %v6615_v18 = vld [vmem:[%s6669_s25 + $0x60] sm:$0xf] }
  0x6e   : > { %6178 = vmatprep.subr.bf16.mxu1 %v6520_v24  ;;  %6227 = vmatpush3.bf16.msra.mxu0 %v6521_v26  ;;  %v1350_v26 = vrot.slane %v1348_v6, 4  ;;  %v5331_v39 = vcombine.low %v7118_v1, %v7122_v48  ;;  %v5302_v63 = vrot.slane %v7128_v12, 9  ;;  %v1376_v9 = vrot.slane %v6812_v23, 5  ;;  %v1260_v1 = vld [vmem:[%s6669_s25 + $0xa8] sm:$0xe]  ;;  %v7358_v16 = vld [vmem:[%s9353_s1 + $0x1b8] sm:$0xff]  }
  0x6f   : > { %6228 = vmatprep.subr.bf16.mxu0 %v6525_v2  ;;  %v1379_v34 = vrot.slane %v6821_v37, 5  ;;  %v7167_v15 = vsel %vm7026_vm5, %v5300_v22, %v1348_v6  ;;  %v1362_v59 = vrot.slane %v7174_v17, 5  ;;  %v1365_v8 = vrot.slane %v7178_v5, 5  ;;  %v6532_v37 = vld [vmem:[%s9353_s1 + $0xd8] sm:$0xff]  }
  0x70   : > { %6149 = vmatmul.mubr.bf16.gmra.mxu0 %v5328_v21  ;;  %v7171_v20 = vsel %vm7026_vm5, %v1350_v26, %v1351_v44  ;;  %v5303_v6 = vrot.slane %v7137_v47, 9  ;;  %v1378_v38 = vrot.slane %v1376_v9, 4  ;;  %v5305_v42 = vrot.slane %v1258_v43, 9  ;;  %v5421_v43 = vld [vmem:[%s6669_s25 + $0xc] sm:$0xf] }
  0x71   : > { %6179 = vmatpush3.bf16.msra.mxu1 %v6520_v24  ;;  %6152 = vmatprep.mubr.bf16.mxu0 %v5329_v58  ;;  %v5304_v24 = vrot.slane %v1257_v0, 9  ;;  %v1383_v27 = vrot.slane %v6863_v32, 5  ;;  %v1386_v58 = vrot.slane %v6873_v45, 5  ;;  %v1369_v48 = vrot.slane %v6771_v40, 5 }
  0x72   : > { %6180 = vmatprep.subr.bf16.mxu1 %v6524_v33  ;;  %6229 = vmatpush3.bf16.msra.mxu0 %v6525_v2  ;;  %v6533_v2 = vld [vmem:[%s9353_s1 + $0x118] sm:$0xff]   ;;  %v7202_v22 = vsel %vm7026_vm5, %v1378_v38, %v1379_v34  ;;  %v1390_v0 = vrot.slane %v6908_v29, 5  ;;  %v5307_v34 = vrot.slane %v1260_v1, 9  ;;  %v1397_v38 = vrot.slane %v6963_v53, 5  ;;  %v6536_v1 = vld [vmem:[%s9353_s1 + $0xd0] sm:$0xff]  }
  0x73   : > { %6230 = vmatprep.subr.bf16.mxu0 %v6529_v25  ;;  %v7190_v7 = vsel %vm7026_vm5, %v5304_v24, %v1376_v9  ;;  %v7210_v45 = vsel %vm7026_vm5, %v5305_v42, %v1383_v27  ;;  %v1385_v44 = vrot.slane %v1383_v27, 4  ;;  %v6537_v24 = vld [vmem:[%s9353_s1 + $0x110] sm:$0xff]   ;;  %v1393_v9 = vrot.slane %v6924_v62, 5  ;;  %v9394_v62 = vld [vmem:[#allocation3_spill] sm:$0xff] }
  0x74   : > { %6101 = vmatmul.mubr.bf16.gmra.mxu1 %v5272_v31  ;;  %v1357_v31 = vrot.slane %v1355_v46, 4  ;;  %v1392_v21 = vrot.slane %v1390_v0, 4  ;;  %v1400_v51 = vrot.slane %v9394_v62, 5  ;;  %v1356_v62 = vsel %vm7026_vm5, %v5301_v11, %v1355_v46  ;;  %v5424_v46 = vld [vmem:[%s6669_s25 + $0x18] sm:$0xf] }
  0x75   : > { %6104 = vmatprep.mubr.bf16.mxu1 %v5273_v41  ;;  %6181 = vmatpush3.bf16.msra.mxu1 %v6524_v33  ;;  %v5306_v41 = vrot.slane %v1259_v50, 9  ;;  %v7222_v33 = vld [vmem:[%s6669_s25 + $0x10] sm:$0xf]  ;;  %v7226_v42 = vsel %vm7026_vm5, %v1385_v44, %v1386_v58  ;;  %v1399_v58 = vrot.slane %v1397_v38, 4  ;;  %v2167_v13 = vshrl.u32 %v5421_v43, 16 }
  0x76   : > { %6182 = vmatprep.subr.bf16.mxu1 %v6528_v3  ;;  %6231 = vmatpush3.bf16.msra.mxu0 %v6529_v25  ;;  %v9393_v25 = vld [vmem:[#allocation2_spill] sm:$0xff]  ;;  %v9396_v44 = vld [vmem:[#allocation4_spill] sm:$0xff]  ;;  %v2170_v11 = vshll.u32 %v5421_v43, 16  ;;  %v1364_v52 = vrot.slane %v1362_v59, 4  ;;  %v2176_v60 = vshll.u32 %v7222_v33, 16  ;;  %v1370_v5 = vsel %vm7026_vm5, %v5303_v6, %v1369_v48 }
  0x77   : > { %6232 = vmatprep.subr.bf16.mxu0 %v6533_v2  ;;  %v7230_v27 = vsel %vm7026_vm5, %v5306_v41, %v1390_v0  ;;  %v9395_v41 = vld [vmem:[#allocation5_spill] sm:$0xff]  ;;  %v7296_v43 = vld [vmem:[%s6669_s25 + $0x14] sm:$0x1]  ;;  %v2169_v0 = vrot.slane %v2167_v13, 4  ;;  %v9398_v6 = vld [vmem:[#allocation6_spill] sm:$0xff] }
  0x78   : > { %6153 = vmatmul.mubr.bf16.gmra.mxu0 %v5330_v54  ;;  %v2172_v50 = vrot.slane %v2170_v11, 5  ;;  %v5427_v54 = vld [vmem:[%s6669_s25 + $0x24] sm:$0xf]  ;;  %v1366_v12 = vsel %vm7026_vm5, %v1364_v52, %v1365_v8 }
  0x79   : > { %6183 = vmatpush3.bf16.msra.mxu1 %v6528_v3  ;;  %6156 = vmatprep.mubr.bf16.mxu0 %v5331_v39  ;;  %v7240_v3 = vsel %vm7026_vm5, %v5307_v34, %v1397_v38  ;;  %v5332_v39 = vcombine.low %v7167_v15, %v7171_v20  ;;  %v1359_v34 = vsel %vm7026_vm5, %v1357_v31, %v1358_v30  ;;  %v6541_v15 = vld [vmem:[%s9353_s1 + $0x108] sm:$0xff]   ;;  %v6545_v31 = vld [vmem:[%s9353_s1 + $0x100] sm:$0xff]   ;;  %v7315_v20 = vrot.slane %v2176_v60, 5 }
  0x7a   : > { %6184 = vmatprep.subr.bf16.mxu1 %v6532_v37  ;;  %6233 = vmatpush3.bf16.msra.mxu0 %v6533_v2  ;;  %v7258_v38 = vsel %vm7026_vm5, %v1392_v21, %v1393_v9  ;;  %v7270_v30 = vsel %vm7026_vm5, %v1399_v58, %v1400_v51  ;;  %v6540_v51 = vld [vmem:[%s9353_s1 + $0xc8] sm:$0xff]   ;;  %v7285_v2 = vld [vmem:[%s6669_s25 + $0xb4] sm:$0xe]  ;;  %v5333_v21 = vcombine.low %v1356_v62, %v1359_v34  ;;  %v2180_v9 = vshrl.u32 %v7222_v33, 16  ;;  %v7313_v62 = vld [vmem:[%s6669_s25 + $0x1c] sm:$0xf] }
  0x7b   : > { %6234 = vmatprep.subr.bf16.mxu0 %v6537_v24  ;;  %v7300_v58 = vld [vmem:[%s6669_s25 + $0x6c] sm:$0xf]  ;;  %v2191_v34 = vshrl.u32 %v5424_v46, 16  ;;  %v2200_v52 = vshll.u32 %v7313_v62, 16  ;;  %v2204_v40 = vshrl.u32 %v7313_v62, 16  ;;  %v2215_v60 = vshrl.u32 %v5427_v54, 16 }
  0x7c   : > { %6105 = vmatmul.mubr.bf16.gmra.mxu1 %v5274_v36  ;;  %v1372_v36 = vrot.slane %v6614_v55, 5  ;;  %v5278_v55 = vcombine.low %v7300_v58, %v7174_v17  ;;  %v2182_v4 = vrot.slane %v2180_v9, 4  ;;  %v2218_v47 = vshll.u32 %v5427_v54, 16  ;;  %v6618_v9 = vld [vmem:[%s6669_s25 + $0x7c] sm:$0xf] }
  0x7d   : > { %6108 = vmatprep.mubr.bf16.mxu1 %v5275_v61  ;;  %6185 = vmatpush3.bf16.msra.mxu1 %v6532_v37  ;;  %v5277_v61 = vcombine.low %v6615_v18, %v7156_v49  ;;  %v1371_v37 = vrot.slane %v1369_v48, 4  ;;  %v7310_v49 = vsel %vm7026_vm5, %v5302_v63, %v1362_v59  ;;  %v2194_v18 = vshll.u32 %v5424_v46, 16  ;;  %v6544_v59 = vld [vmem:[%s9353_s1 + $0xc0] sm:$0xff]   ;;  %v7340_v46 = vld [vmem:[%s6669_s25 + $0x28] sm:$0xf] }
  0x7e   : > { %6186 = vmatprep.subr.bf16.mxu1 %v6536_v1  ;;  %6235 = vmatpush3.bf16.msra.mxu0 %v6537_v24  ;;  %v9366_v63 = vrot.slane %v9395_v41, 5  ;;  %v7327_v24 = vld [vmem:[%s6669_s25 + $0x20] sm:$0x1]  ;;  %v2193_v13 = vrot.slane %v2191_v34, 4  ;;  %9397 = vst [vmem:[#allocation2_spill] sm:$0xff] %v7340_v46  ;;  %v5334_v35 = vcombine.low %v7310_v49, %v1366_v12  ;;  %v2224_v54 = vshll.u32 %v7340_v46, 16 }
  0x7f   : > { %6236 = vmatprep.subr.bf16.mxu0 %v6541_v15  ;;  %v2196_v11 = vrot.slane %v2194_v18, 5  ;;  %v1373_v8 = vsel %vm7026_vm5, %v1371_v37, %v1372_v36  ;;  %v2173_v36 = vor.u32 %v2172_v50, %v2169_v0  ;;  %v7353_v37 = vld [vmem:[%s9353_s1 + $0x178] sm:$0xff]   ;;  %v5430_v0 = vld [vmem:[%s6669_s25 + $0x30] sm:$0xf]  ;;  %v7374_v49 = vld [vmem:[%s6669_s25 + $0x34] sm:$0xf] }
  0x80   : > { %6157 = vmatmul.mubr.bf16.gmra.mxu0 %v5332_v39  ;;  %v2186_v39 = vshll.u32 %v7296_v43, 16  ;;  %v5335_v18 = vcombine.low %v1370_v5, %v1373_v8  ;;  %9400 = vst [vmem:[#allocation5_spill] sm:$0xff] %v7374_v49  ;;  %v7376_v12 = vrot.slane %v2200_v52, 5  ;;  %v2220_v48 = vrot.slane %v2218_v47, 5  ;;  %v7395_v47 = vld [vmem:[%s6669_s25 + $0x40] sm:$0xf] }
  0x81   : > { %6187 = vmatpush3.bf16.msra.mxu1 %v6536_v1  ;;  %6160 = vmatprep.mubr.bf16.mxu0 %v5333_v21  ;;  %v2183_v21 = vor.u32 %v2182_v4, %v7315_v20  ;;  %v2197_v50 = vor.u32 %v2196_v11, %v2193_v13  ;;  %v6617_v4 = vld [vmem:[%s6669_s25 + $0x78] sm:$0xf]  ;;  %v2206_v13 = vrot.slane %v2204_v40, 4  ;;  %v2217_v11 = vrot.slane %v2215_v60, 4  ;;  %9401 = vst [vmem:[#allocation4_spill] sm:$0xff] %v7395_v47 }
  0x82   : > { %6188 = vmatprep.subr.bf16.mxu1 %v6540_v51  ;;  %6237 = vmatpush3.bf16.msra.mxu0 %v6541_v15  ;;  %v2210_v15 = vshll.u32 %v7327_v24, 16  ;;  %v5279_v34 = vcombine.low %v6617_v4, %v6618_v9  ;;  %v7367_v26 = vrot.slane %v2186_v39, 5  ;;  %v7379_v1 = vld [vmem:[%s6669_s25 + $0x38] sm:$0x1]  ;;  %v7381_v5 = vrot.slane %v2173_v36, 4 }
  0x83   : > { %6238 = vmatprep.subr.bf16.mxu0 %v6545_v31  ;;  %v7383_v8 = vrot.slane %v2183_v21, 4  ;;  %v2239_v4 = vshrl.u32 %v5430_v0, 16  ;;  %v5433_v9 = vld [vmem:[%s6669_s25 + $0x3c] sm:$0xf]  ;;  %v7391_v52 = vrot.slane %v2224_v54, 5  ;;  %v2242_v40 = vshll.u32 %v5430_v0, 16 }
  0x84   : > { %6109 = vmatmul.mubr.bf16.gmra.mxu1 %v5276_v56  ;;  %v1406_v56 = vrot.slane %v9366_v63, 4  ;;  %v7385_v39 = vrot.slane %v2210_v15, 5  ;;  %v2248_v60 = vshll.u32 %v7374_v49, 16  ;;  %v2252_v21 = vshrl.u32 %v7374_v49, 16 }
  0x85   : > { %6112 = vmatprep.mubr.bf16.mxu1 %v5277_v61  ;;  %6189 = vmatpush3.bf16.msra.mxu1 %v6540_v51  ;;  %v7370_v61 = vld [vmem:[%s6669_s25 + $0x2c] sm:$0x1]  ;;  %v2228_v51 = vshrl.u32 %v7340_v46, 16  ;;  %v2207_v15 = vor.u32 %v2206_v13, %v7376_v12  ;;  %v2241_v54 = vrot.slane %v2239_v4, 4  ;;  %v2244_v0 = vrot.slane %v2242_v40, 5 }
  0x86   : > { %6190 = vmatprep.subr.bf16.mxu1 %v6544_v59  ;;  %9399 = vst [vmem:[#allocation3_spill] sm:$0xff] %v7370_v61  ;;  %6239 = vmatpush3.bf16.msra.mxu0 %v6545_v31  ;;  %v7389_v31 = vrot.slane %v2197_v50, 4  ;;  %v2263_v50 = vshrl.u32 %v5433_v9, 16  ;;  %v2266_v63 = vshll.u32 %v5433_v9, 16  ;;  %v2254_v49 = vrot.slane %v2252_v21, 4 }
  0x87   : > { %6320 = vmatprep.subr.bf16.mxu0 %v7358_v16  ;;  %v2230_v36 = vrot.slane %v2228_v51, 4  ;;  %v7405_v51 = vrot.slane %v2248_v60, 5  ;;  %v7408_v46 = vld [vmem:[%s6669_s25 + $0x44] sm:$0x1]  ;;  %v2276_v13 = vshrl.u32 %v7395_v47, 16  ;;  %v9402_v17 = vrot.slane %v9395_v41, 5 }
  0x88   : > { %6161 = vmatmul.mubr.bf16.gmra.mxu0 %v5334_v35  ;;  %v2234_v35 = vshll.u32 %v7370_v61, 16  ;;  %v9403_v58 = vrot.slane %v7285_v2, 9  ;;  %v7429_v40 = vld [vmem:[%s6669_s25 + $0x4c] sm:$0xf]  ;;  %v2265_v60 = vrot.slane %v2263_v50, 4  ;;  %v2268_v21 = vrot.slane %v2266_v63, 5 }
  0x89   : > { %6191 = vmatpush3.bf16.msra.mxu1 %v6544_v59  ;;  %6164 = vmatprep.mubr.bf16.mxu0 %v5335_v18  ;;  %v2221_v59 = vor.u32 %v2220_v48, %v2217_v11  ;;  %v2258_v18 = vshll.u32 %v7379_v1, 16  ;;  %v2272_v48 = vshll.u32 %v7395_v47, 16  ;;  %v5436_v11 = vld [vmem:[%s6669_s25 + $0x48] sm:$0xf]  ;;  %v2231_v9 = vor.u32 %v2230_v36, %v7391_v52 }
  0x8a   : > { %6272 = vmatprep.subr.bf16.mxu1 %v7353_v37  ;;  %v2278_v2 = vrot.slane %v2276_v13, 4  ;;  %v7433_v47 = vrot.slane %v2207_v15, 4  ;;  %v2179_v63 = vsel %vm6715_vm2, %v7381_v5, %v7315_v20  ;;  %v2189_v36 = vsel %vm6715_vm2, %v7383_v8, %v7367_v26  ;;  %v5439_v5 = vld [vmem:[%s6669_s25 + $0x54] sm:$0xf] }
  0x8b   : > { %v7431_v61 = vrot.slane %v2272_v48, 5  ;;  %v2290_v15 = vshll.u32 %v5436_v11, 16  ;;  %v2282_v50 = vshll.u32 %v7408_v46, 16  ;;  %v2300_v20 = vshrl.u32 %v7429_v40, 16 }
  0x8c   : > { %6113 = vmatmul.mubr.bf16.gmra.mxu1 %v5278_v55  ;;  %v7419_v55 = vsel %vm7026_vm5, %v9403_v58, %v9402_v17  ;;  %v7435_v17 = vrot.slane %v2221_v59, 4  ;;  %v7437_v58 = vrot.slane %v2234_v35, 5  ;;  %v2296_v59 = vshll.u32 %v7429_v40, 16 }
  0x8d   : > { %6116 = vmatprep.mubr.bf16.mxu1 %v5279_v34  ;;  %v9404_v34 = vrot.slane %v9398_v6, 5  ;;  %v2287_v6 = vshrl.u32 %v5436_v11, 16  ;;  %v9406_v35 = vcombine.low %v7210_v45, %v7226_v42  ;;  %v7458_v48 = vrot.slane %v2231_v9, 4  ;;  %v7464_v11 = vld [vmem:[%s6669_s25 + $0x58] sm:$0xf] }
  0x8e   : > { %v7460_v13 = vrot.slane %v2258_v18, 5  ;;  %v2269_v26 = vor.u32 %v2268_v21, %v2265_v60  ;;  %v2279_v8 = vor.u32 %v2278_v2, %v7431_v61  ;;  %v9407_v45 = vcombine.low %v6805_v14, %v6812_v23  ;;  %v7470_v42 = vld [vmem:[%s6669_s25 + $0x50] sm:$0x1] }
  0x8f   : > { %v7425_v4 = vsel %vm7026_vm5, %v1406_v56, %v9404_v34  ;;  %v9405_v56 = vcombine.low %v7190_v7, %v7202_v22  ;;  %v2245_v7 = vor.u32 %v2244_v0, %v2241_v54  ;;  %v2255_v22 = vor.u32 %v2254_v49, %v7405_v51 }
  0x90   : > { %v2289_v49 = vrot.slane %v2287_v6, 4  ;;  %v2292_v54 = vrot.slane %v2290_v15, 5  ;;  %v7472_v0 = vrot.slane %v2296_v59, 5  ;;  %v2302_v18 = vrot.slane %v2300_v20, 4  ;;  %v5442_v6 = vld [vmem:[%s6669_s25 + $0x60] sm:$0xf] }
  0x91   : > { %6165 = vmatmul.mubr.bf16.gmra.mxu0 %v9405_v56  ;;  %v9408_v34 = vcombine.low %v6857_v19, %v6863_v32  ;;  %v2311_v9 = vshrl.u32 %v5439_v5, 16  ;;  %v2314_v60 = vshll.u32 %v5439_v5, 16  ;;  %v7477_v21 = vrot.slane %v2245_v7, 4  ;;  %v7494_v32 = vld [vmem:[%s6669_s25 + $0x64] sm:$0xf] }
  0x92   : > { %6168 = vmatprep.mubr.bf16.mxu0 %v9406_v35  ;;  %v7479_v2 = vrot.slane %v2255_v22, 4  ;;  %v7481_v14 = vrot.slane %v2282_v50, 5  ;;  %v2320_v23 = vshll.u32 %v7464_v11, 16  ;;  %v5340_v56 = vcombine.low %v7419_v55, %v7425_v4  ;;  %v7490_v35 = vld [vmem:[%s6669_s25 + $0x5c] sm:$0x1] }
  0x93   : > { %v5485_v15 = vcombine.low %v2179_v63, %v2189_v36  ;;  %v7487_v59 = vrot.slane %v2269_v26, 4  ;;  %v2324_v19 = vshrl.u32 %v7464_v11, 16  ;;  %v7496_v7 = vrot.slane %v2279_v8, 4 }
  0x94   : > { %6117 = vmatmul.mubr.bf16.gmra.mxu1 %v9407_v45  ;;  %v2306_v22 = vshll.u32 %v7470_v42, 16  ;;  %v2335_v50 = vshrl.u32 %v5442_v6, 16  ;;  %v2338_v20 = vshll.u32 %v5442_v6, 16  ;;  %v9409_v5 = vcombine.low %v7230_v27, %v7258_v38 }
  0x95   : > { %6120 = vmatprep.mubr.bf16.mxu1 %v9408_v34  ;;  %v2293_v55 = vor.u32 %v2292_v54, %v2289_v49  ;;  %v2303_v4 = vor.u32 %v2302_v18, %v7472_v0  ;;  %v2313_v63 = vrot.slane %v2311_v9, 4  ;;  %v2316_v36 = vrot.slane %v2314_v60, 5  ;;  %v7534_v9 = vld [vmem:[%s6669_s25 + $0x70] sm:$0xf] }
  0x96   : > { %v9410_v26 = vcombine.low %v7240_v3, %v7270_v30  ;;  %v7506_v8 = vrot.slane %v2320_v23, 5  ;;  %v2326_v45 = vrot.slane %v2324_v19, 4  ;;  %v2330_v34 = vshll.u32 %v7490_v35, 16 }
  0x97   : > { %v2344_v27 = vshll.u32 %v7494_v32, 16  ;;  %v2203_v38 = vsel %vm6715_vm2, %v7389_v31, %v7376_v12  ;;  %v2213_v3 = vsel %vm6715_vm2, %v7433_v47, %v7385_v39  ;;  %v2337_v30 = vrot.slane %v2335_v50, 4  ;;  %v5445_v47 = vld [vmem:[%s6669_s25 + $0x6c] sm:$0xf] }
  0x98   : > { %v2340_v49 = vrot.slane %v2338_v20, 5  ;;  %v9411_v54 = vcombine.low %v6899_v10, %v6908_v29  ;;  %v2227_v18 = vsel %vm6715_vm2, %v7435_v17, %v7391_v52  ;;  %v2237_v12 = vsel %vm6715_vm2, %v7458_v48, %v7437_v58  ;;  %v7542_v17 = vld [vmem:[%s6669_s25 + $0x68] sm:$0x1] }
  0x99   : > { %6169 = vmatmul.mubr.bf16.gmra.mxu0 %v9409_v5  ;;  %v7529_v31 = vrot.slane %v2306_v22, 5  ;;  %v2348_v39 = vshrl.u32 %v7494_v32, 16  ;;  %v9412_v10 = vcombine.low %v9393_v25, %v6963_v53  ;;  %v7539_v29 = vrot.slane %v2293_v55, 4  ;;  %v6546_v53 = vld [vmem:[%s6669_s25 + $0xc] sm:$0xff]  }
  0x9a   : > { %6172 = vmatprep.mubr.bf16.mxu0 %v9410_v26  ;;  %v2317_v52 = vor.u32 %v2316_v36, %v2313_v63  ;;  %v2359_v60 = vshrl.u32 %v5445_v47, 16  ;;  %v2362_v58 = vshll.u32 %v5445_v47, 16  ;;  %v7544_v48 = vrot.slane %v2303_v4, 4  ;;  %v7555_v63 = vld [vmem:[%s6669_s25 + $0x74] sm:$0x1] }
  0x9b   : > { %v2327_v23 = vor.u32 %v2326_v45, %v7506_v8  ;;  %v7547_v6 = vrot.slane %v2330_v34, 5  ;;  %v2368_v19 = vshll.u32 %v7534_v9, 16  ;;  %v2341_v25 = vor.u32 %v2340_v49, %v2337_v30  ;;  %v5448_v26 = vld [vmem:[%s6669_s25 + $0x78] sm:$0xf]  ;;  %v7559_v45 = vld [vmem:[%s6669_s25 + $0x7c] sm:$0xf] }
  0x9c   : > { %6121 = vmatmul.mubr.bf16.gmra.mxu1 %v9411_v54  ;;  %v7551_v22 = vrot.slane %v2344_v27, 5  ;;  %v2350_v50 = vrot.slane %v2348_v39, 4  ;;  %v2372_v20 = vshrl.u32 %v7534_v9, 16  ;;  %v5486_v5 = vcombine.low %v2203_v38, %v2213_v3  ;;  %v7566_v27 = vld [vmem:[%s6669_s25 + $0x80] sm:$0x1] }
  0x9d   : > { %6124 = vmatprep.mubr.bf16.mxu1 %v9412_v10  ;;  %v5487_v55 = vcombine.low %v2227_v18, %v2237_v12  ;;  %v2361_v4 = vrot.slane %v2359_v60, 4  ;;  %v2364_v36 = vrot.slane %v2362_v58, 5  ;;  %v7561_v34 = vrot.slane %v2317_v52, 4 }
  0x9e   : > { %v7563_v54 = vrot.slane %v2368_v19, 5  ;;  %v2374_v30 = vrot.slane %v2372_v20, 4  ;;  %v2383_v49 = vshrl.u32 %v5448_v26, 16  ;;  %v2354_v38 = vshll.u32 %v7542_v17, 16  ;;  %v5451_v20 = vld [vmem:[%s6669_s25 + $0x84] sm:$0xf] }
  0x9f   : > { %v2386_v3 = vshll.u32 %v5448_v26, 16  ;;  %v2392_v18 = vshll.u32 %v7559_v45, 16  ;;  %v2396_v12 = vshrl.u32 %v7559_v45, 16  ;;  %v7571_v39 = vrot.slane %v2327_v23, 4  ;;  %v6550_v26 = vld [vmem:[%s6669_s25 + $0x24] sm:$0xff]  }
  0xa0   : > { %v7573_v47 = vrot.slane %v2341_v25, 4  ;;  %v2385_v10 = vrot.slane %v2383_v49, 4  ;;  %v9413_v52 = vcombine.low %v9396_v44, %v9395_v41  ;;  %v2251_v23 = vsel %vm6715_vm2, %v7477_v21, %v7405_v51 }
  0xa1   : > { %6173 = vmatmul.mubr.bf16.gmra.mxu0 %v5340_v56  ;;  %v2351_v56 = vor.u32 %v2350_v50, %v7551_v22  ;;  %v2388_v60 = vrot.slane %v2386_v3, 5  ;;  %v7579_v58 = vrot.slane %v2392_v18, 5  ;;  %v2398_v19 = vrot.slane %v2396_v12, 4  ;;  %v7628_v18 = vld [vmem:[%s6669_s25 + $0x8c] sm:$0x1] }
  0xa2   : > { %6240 = vmatprep.mubr.bf16.mxu0 %v5485_v15  ;;  %v2365_v15 = vor.u32 %v2364_v36, %v2361_v4  ;;  %v2375_v25 = vor.u32 %v2374_v30, %v7563_v54  ;;  %v2378_v50 = vshll.u32 %v7555_v63, 16  ;;  %v2402_v41 = vshll.u32 %v7566_v27, 16  ;;  %v7602_v4 = vld [vmem:[%s6669_s25 + $0x88] sm:$0xf]  ;;  %v6547_v36 = vld [vmem:[%s6669_s25 + $0x18] sm:$0xff]  }
  0xa3   : > { %v2261_v44 = vsel %vm6715_vm2, %v7479_v2, %v7460_v13  ;;  %v2285_v51 = vsel %vm6715_vm2, %v7496_v7, %v7481_v14  ;;  %v2389_v21 = vor.u32 %v2388_v60, %v2385_v10  ;;  %v6553_v13 = vld [vmem:[%s9353_s1 + $0x1b0] sm:$0xff]   ;;  %v7609_v2 = vrot.slane %v2354_v38, 5  ;;  %v7633_v12 = vld [vmem:[%s9353_s1 + $0x1a8] sm:$0xff]  }
  0xa4   : > { %6125 = vmatmul.mubr.bf16.gmra.mxu1 %v9413_v52  ;;  %v2410_v30 = vshll.u32 %v5451_v20, 16  ;;  %v6552_v14 = vld [vmem:[%s9353_s1 + $0x170] sm:$0xff]   ;;  %v2299_v7 = vsel %vm6715_vm2, %v7539_v29, %v7472_v0  ;;  %v2309_v49 = vsel %vm6715_vm2, %v7544_v48, %v7529_v31  ;;  %v7623_v38 = vrot.slane %v2351_v56, 4 }
  0xa5   : > { %6192 = vmatprep.mubr.bf16.mxu1 %v6546_v53  ;;  %v2275_v53 = vsel %vm6715_vm2, %v7487_v59, %v7431_v61  ;;  %v2399_v61 = vor.u32 %v2398_v19, %v7579_v58  ;;  %v2407_v59 = vshrl.u32 %v5451_v20, 16  ;;  %v7625_v3 = vrot.slane %v2365_v15, 4  ;;  %v5454_v15 = vld [vmem:[%s6669_s25 + $0x90] sm:$0xf]  ;;  %v7656_v60 = vld [vmem:[%s6669_s25 + $0x94] sm:$0xf] }
  0xa6   : > { %v7635_v0 = vrot.slane %v2375_v25, 4  ;;  %v7637_v29 = vrot.slane %v2378_v50, 5  ;;  %v2416_v31 = vshll.u32 %v7602_v4, 16  ;;  %v2420_v48 = vshrl.u32 %v7602_v4, 16  ;;  %9414 = vst [vmem:[#allocation6_spill] sm:$0xff] %v7656_v60 }
  0xa7   : > { %v2333_v56 = vsel %vm6715_vm2, %v7571_v39, %v7547_v6  ;;  %v7650_v10 = vrot.slane %v2389_v21, 4  ;;  %v7652_v52 = vrot.slane %v2402_v41, 5  ;;  %v2412_v19 = vrot.slane %v2410_v30, 5  ;;  %v6556_v6 = vld [vmem:[%s9353_s1 + $0x168] sm:$0xff]  }
  0xa8   : > { %v2434_v39 = vshll.u32 %v5454_v15, 16  ;;  %v2440_v25 = vshll.u32 %v7656_v60, 16  ;;  %v2444_v50 = vshrl.u32 %v7656_v60, 16  ;;  %v5488_v41 = vcombine.low %v2251_v23, %v2261_v44 }
  0xa9   : > { %6241 = vmatmul.mubr.bf16.vlgmr.msra.gmra.mxu0 %v5486_v5  ;;  %v2323_v5 = vsel %vm6715_vm2, %v7561_v34, %v7506_v8  ;;  %v2426_v8 = vshll.u32 %v7628_v18, 16  ;;  %v2431_v34 = vshrl.u32 %v5454_v15, 16  ;;  %v5489_v21 = vcombine.low %v2275_v53, %v2285_v51 }
  0xaa   : > { %6321 = vmatpush3.bf16.msra.mxu0 %v7358_v16  ;;  %6244 = vmatprep.mubr.bf16.mxu0 %v5487_v55  ;;  %v7658_v16 = vrot.slane %v2399_v61, 4  ;;  %v2409_v55 = vrot.slane %v2407_v59, 4  ;;  %v7667_v20 = vrot.slane %v2416_v31, 5  ;;  %v6551_v61 = vld [vmem:[%s6669_s25 + $0x30] sm:$0xff]   ;;  %v6561_v59 = vld [vmem:[%s9353_s1 + $0x1a0] sm:$0xff]   ;;  %v2436_v15 = vrot.slane %v2434_v39, 5 }
  0xab   : > { %6322 = vmatprep.subr.bf16.mxu0 %v6553_v13  ;;  %v2433_v30 = vrot.slane %v2431_v34, 4  ;;  %v2446_v23 = vrot.slane %v2444_v50, 4  ;;  %v7675_v44 = vcombine.low %v2299_v7, %v2309_v49  ;;  %v7678_v53 = vcombine.low %v2323_v5, %v2333_v56  ;;  %v5457_v31 = vld [vmem:[%s6669_s25 + $0x9c] sm:$0xf]  ;;  %v7700_v5 = vld [vmem:[%s6669_s25 + $0xa4] sm:$0x1] }
  0xac   : > { %6193 = vmatmul.mubr.bf16.vlgmr.msra.gmra.mxu1 %v6547_v36  ;;  %v2422_v36 = vrot.slane %v2420_v48, 4  ;;  %v2413_v49 = vor.u32 %v2412_v19, %v2409_v55  ;;  %v7697_v48 = vld [vmem:[%s6669_s25 + $0xa0] sm:$0xf]  ;;  %9417 = vst [vmem:[#allocation9_spill] sm:$0xff] %v7700_v5  ;;  %v2455_v56 = vshrl.u32 %v5457_v31, 16  ;;  %v2458_v34 = vshll.u32 %v5457_v31, 16 }
  0xad   : > { %6273 = vmatpush3.bf16.msra.mxu1 %v7353_v37  ;;  %6196 = vmatprep.mubr.bf16.mxu1 %v6550_v26  ;;  %v7673_v37 = vrot.slane %v2440_v25, 5  ;;  %v2357_v26 = vsel %vm6715_vm2, %v7623_v38, %v7609_v2  ;;  %9416 = vst [vmem:[#allocation8_spill] sm:$0xff] %v7697_v48  ;;  %v6554_v39 = vld [vmem:[%s6669_s25 + $0x3c] sm:$0xff]   ;;  %v2464_v38 = vshll.u32 %v7697_v48, 16  ;;  %v2468_v25 = vshrl.u32 %v7697_v48, 16 }
  0xae   : > { %6274 = vmatprep.subr.bf16.mxu1 %v6552_v14  ;;  %6323 = vmatpush3.bf16.msra.mxu0 %v6553_v13  ;;  %v7689_v13 = vld [vmem:[%s6669_s25 + $0x98] sm:$0x1]  ;;  %v2423_v2 = vor.u32 %v2422_v36, %v7667_v20  ;;  %v6560_v55 = vld [vmem:[%s9353_s1 + $0x160] sm:$0xff]   ;;  %v2437_v19 = vor.u32 %v2436_v15, %v2433_v30  ;;  %v2457_v31 = vrot.slane %v2455_v56, 4  ;;  %v2460_v50 = vrot.slane %v2458_v34, 5 }
  0xaf   : > { %6324 = vmatprep.subr.bf16.mxu0 %v7633_v12  ;;  %9415 = vst [vmem:[#allocation7_spill] sm:$0xff] %v7689_v13  ;;  %v2450_v36 = vshll.u32 %v7689_v13, 16  ;;  %v2470_v7 = vrot.slane %v2468_v25, 4  ;;  %v2474_v51 = vshll.u32 %v7700_v5, 16  ;;  %v5460_v48 = vld [vmem:[%s6669_s25 + $0xa8] sm:$0xf] }
  0xb0   : > { %v6564_v30 = vld [vmem:[%s9353_s1 + $0x158] sm:$0xff]   ;;  %v7723_v15 = vrot.slane %v2413_v49, 4  ;;  %v2479_v56 = vshrl.u32 %v5460_v48, 16  ;;  %v2482_v34 = vshll.u32 %v5460_v48, 16  ;;  %v7736_v5 = vld [vmem:[%s6669_s25 + $0xb0] sm:$0x1] }
  0xb1   : > { %6245 = vmatmul.mubr.bf16.gmra.mxu0 %v5488_v41  ;;  %6275 = vmatpush3.bf16.msra.mxu1 %v6552_v14  ;;  %v6565_v14 = vld [vmem:[%s9353_s1 + $0x198] sm:$0xff]   ;;  %v2447_v41 = vor.u32 %v2446_v23, %v7673_v37  ;;  %v7725_v23 = vrot.slane %v2426_v8, 5  ;;  %v6555_v49 = vld [vmem:[%s6669_s25 + $0x48] sm:$0xff]   ;;  %v7739_v8 = vrot.slane %v2423_v2, 4  ;;  %v7741_v13 = vrot.slane %v2437_v19, 4 }
  0xb2   : > { %6248 = vmatprep.mubr.bf16.mxu0 %v5489_v21  ;;  %6276 = vmatprep.subr.bf16.mxu1 %v6556_v6  ;;  %v7716_v21 = vrot.slane %v2464_v38, 5  ;;  %v2461_v38 = vor.u32 %v2460_v50, %v2457_v31  ;;  %v7743_v60 = vrot.slane %v2450_v36, 5  ;;  %v6568_v50 = vld [vmem:[%s9353_s1 + $0x150] sm:$0xff]   ;;  %v7760_v19 = vrot.slane %v2482_v34, 5 }
  0xb3   : > { %6325 = vmatpush3.bf16.msra.mxu0 %v7633_v12  ;;  %v7728_v12 = vld [vmem:[%s6669_s25 + $0xac] sm:$0xf]  ;;  %v2498_v36 = vshll.u32 %v7736_v5, 16 }
  0xb4   : > { %6197 = vmatmul.mubr.bf16.gmra.mxu1 %v6551_v61  ;;  %6326 = vmatprep.subr.bf16.mxu0 %v6561_v59  ;;  %9418 = vst [vmem:[#allocation10_spill] sm:$0xff] %v7728_v12  ;;  %v2381_v61 = vsel %vm6715_vm2, %v7635_v0, %v7637_v29  ;;  %v2471_v25 = vor.u32 %v2470_v7, %v7716_v21  ;;  %v2488_v48 = vshll.u32 %v7728_v12, 16  ;;  %v6558_v0 = vld [vmem:[%s6669_s25 + $0x54] sm:$0xff]   ;;  %v7750_v29 = vrot.slane %v2447_v41, 4 }
  0xb5   : > { %6200 = vmatprep.mubr.bf16.mxu1 %v6554_v39  ;;  %6277 = vmatpush3.bf16.msra.mxu1 %v6556_v6  ;;  %v6569_v6 = vld [vmem:[%s9353_s1 + $0x190] sm:$0xff]   ;;  %v7752_v7 = vrot.slane %v2474_v51, 5  ;;  %v7754_v39 = vrot.slane %v2479_v56, 4  ;;  %v2492_v2 = vshrl.u32 %v7728_v12, 16  ;;  %v7769_v41 = vrot.slane %v2461_v38, 4 }
  0xb6   : > { %6278 = vmatprep.subr.bf16.mxu1 %v6560_v55  ;;  %v7771_v31 = vrot.slane %v2471_v25, 4  ;;  %v5463_v56 = vld [vmem:[%s6669_s25 + $0xb4] sm:$0xf]  ;;  %v7775_v12 = vld [vmem:[%s6669_s25 + $0xb8] sm:$0xf]  ;;  %v6572_v25 = vld [vmem:[%s9353_s1 + $0x148] sm:$0xff]  }
  0xb7   : > { %6327 = vmatpush3.bf16.msra.mxu0 %v6561_v59  ;;  %v9419_v59 = vsel %vm6715_vm2, %v7573_v47, %v7551_v22  ;;  %9420 = vst [vmem:[#allocation11_spill] sm:$0xff] %v7775_v12  ;;  %v2395_v22 = vsel %vm6715_vm2, %v7650_v10, %v7579_v58  ;;  %v7787_v47 = vrot.slane %v2488_v48, 5  ;;  %v5466_v38 = vld [vmem:[%s6669_s25 + $0xc0] sm:$0xf]  ;;  %v2405_v58 = vsel %vm6715_vm2, %v7658_v16, %v7652_v52  ;;  %v7814_v48 = vld [vmem:[%s6669_s25 + $0xc4] sm:$0xf] }
  0xb8   : > { %6328 = vmatprep.subr.bf16.mxu0 %v6565_v14  ;;  %v5492_v51 = vcombine.low %v9419_v59, %v2357_v26  ;;  %v2503_v26 = vshrl.u32 %v5463_v56, 16  ;;  %v2419_v10 = vsel %vm6715_vm2, %v7723_v15, %v7667_v20  ;;  %9423 = vst [vmem:[#allocation13_spill] sm:$0xff] %v7814_v48  ;;  %v7817_v52 = vld [vmem:[%s6669_s25 + $0xc8] sm:$0x1]  ;;  %v2536_v59 = vshll.u32 %v7814_v48, 16 }
  0xb9   : > { %6249 = vmatmul.mubr.bf16.gmra.mxu0 %v7675_v44  ;;  %6279 = vmatpush3.bf16.msra.mxu1 %v6560_v55  ;;  %v9421_v44 = vsel %vm6715_vm2, %v7625_v3, %v7563_v54  ;;  %v2494_v55 = vrot.slane %v2492_v2, 4  ;;  %v2506_v54 = vshll.u32 %v5463_v56, 16  ;;  %v2512_v3 = vshll.u32 %v7775_v12, 16 }
  0xba   : > { %6252 = vmatprep.mubr.bf16.mxu0 %v7678_v53  ;;  %v5493_v34 = vcombine.low %v9421_v44, %v2381_v61  ;;  %6280 = vmatprep.subr.bf16.mxu1 %v6564_v30  ;;  %v6573_v53 = vld [vmem:[%s9353_s1 + $0x188] sm:$0xff]   ;;  %v2516_v61 = vshrl.u32 %v7775_v12, 16  ;;  %v2505_v16 = vrot.slane %v2503_v26, 4  ;;  %v9424_v56 = vrot.slane %v7222_v33, 5 }
  0xbb   : > { %6329 = vmatpush3.bf16.msra.mxu0 %v6565_v14  ;;  %v2429_v14 = vsel %vm6715_vm2, %v7739_v8, %v7725_v23  ;;  %v2508_v20 = vrot.slane %v2506_v54, 5  ;;  %v7819_v15 = vrot.slane %v2512_v3, 5  ;;  %v2527_v23 = vshrl.u32 %v5466_v38, 16  ;;  %v6559_v3 = vld [vmem:[%s6669_s25 + $0x60] sm:$0xff]  }
  0xbc   : > { %6201 = vmatmul.mubr.bf16.gmra.mxu1 %v6555_v49  ;;  %6330 = vmatprep.subr.bf16.mxu0 %v6569_v6  ;;  %v7811_v49 = vld [vmem:[%s6669_s25 + $0xbc] sm:$0x1]  ;;  %v2518_v2 = vrot.slane %v2516_v61, 4  ;;  %v2530_v8 = vshll.u32 %v5466_v38, 16  ;;  %v7824_v44 = vrot.slane %v9424_v56, 4  ;;  %v7829_v26 = vrot.slane %v2498_v36, 5 }
  0xbd   : > { %9422 = vst [vmem:[#allocation12_spill] sm:$0xff] %v7811_v49  ;;  %6204 = vmatprep.mubr.bf16.mxu1 %v6558_v0  ;;  %6281 = vmatpush3.bf16.msra.mxu1 %v6564_v30  ;;  %v2485_v0 = vor.u32 %v7760_v19, %v7754_v39  ;;  %v2495_v30 = vor.u32 %v2494_v55, %v7787_v47  ;;  %v2540_v54 = vshrl.u32 %v7814_v48, 16  ;;  %v2522_v61 = vshll.u32 %v7811_v49, 16  ;;  %v6562_v39 = vld [vmem:[%s6669_s25 + $0x6c] sm:$0xff]   ;;  %v7849_v49 = vld [vmem:[%s6669_s25 + $0x18] sm:$0xe] }
  0xbe   : > { %6282 = vmatprep.subr.bf16.mxu1 %v6568_v50  ;;  %v2529_v38 = vrot.slane %v2527_v23, 4  ;;  %v2532_v12 = vrot.slane %v2530_v8, 5  ;;  %v7834_v56 = vrot.slane %v2536_v59, 5  ;;  %v2509_v19 = vor.u32 %v2508_v20, %v2505_v16  ;;  %v6576_v23 = vld [vmem:[%s9353_s1 + $0x140] sm:$0xff]   ;;  %v7846_v59 = vld [vmem:[%s6669_s25 + $0xc] sm:$0xe] }
  0xbf   : > { %6331 = vmatpush3.bf16.msra.mxu0 %v6569_v6  ;;  %v6577_v6 = vld [vmem:[%s9353_s1 + $0x180] sm:$0xff]   ;;  %v2519_v36 = vor.u32 %v2518_v2, %v7819_v15  ;;  %v2542_v55 = vrot.slane %v2540_v54, 4  ;;  %v2546_v48 = vshll.u32 %v7817_v52, 16  ;;  %v5494_v16 = vcombine.low %v2395_v22, %v2405_v58 }
  0xc0   : > { %6332 = vmatprep.subr.bf16.mxu0 %v6573_v53  ;;  %v2533_v8 = vor.u32 %v2532_v12, %v2529_v38  ;;  %v5495_v20 = vcombine.low %v2419_v10, %v2429_v14  ;;  %v7857_v2 = vrot.slane %v2485_v0, 4  ;;  %v7859_v12 = vrot.slane %v2495_v30, 4  ;;  %v6563_v10 = vld [vmem:[%s6669_s25 + $0x78] sm:$0xff]   ;;  %v6566_v38 = vld [vmem:[%s6669_s25 + $0x84] sm:$0xff]  }
  0xc1   : > { %6253 = vmatmul.mubr.bf16.gmra.mxu0 %v5492_v51  ;;  %6283 = vmatpush3.bf16.msra.mxu1 %v6568_v50  ;;  %v7854_v50 = vld [vmem:[%s9353_s1 + $0x238] sm:$0xff]   ;;  %v2543_v51 = vor.u32 %v2542_v55, %v7834_v56  ;;  %v7868_v54 = vrot.slane %v2519_v36, 4  ;;  %v7870_v22 = vrot.slane %v2522_v61, 5  ;;  %v7876_v0 = vrot.slane %v2546_v48, 5  ;;  %v5512_v61 = vld [vmem:[%s6669_s25 + $0x30] sm:$0xe] }
  0xc2   : > { %6256 = vmatprep.mubr.bf16.mxu0 %v5493_v34  ;;  %6284 = vmatprep.subr.bf16.mxu1 %v6572_v25  ;;  %v7864_v34 = vld [vmem:[%s9353_s1 + $0x1f8] sm:$0xff]   ;;  %v7874_v14 = vrot.slane %v2533_v8, 4  ;;  %v2941_v30 = vrot.slane %v7296_v43, 5  ;;  %v9425_v36 = vld [vmem:[#allocation2_spill] sm:$0xff]  ;;  %v5528_v48 = vrot.slane %v5512_v61, 9  ;;  %v9428_v61 = vld [vmem:[#allocation3_spill] sm:$0xff] }
  0xc3   : > { %6333 = vmatpush3.bf16.msra.mxu0 %v6573_v53  ;;  %v7866_v53 = vrot.slane %v2509_v19, 4  ;;  %v9426_v8 = vld [vmem:[#allocation5_spill] sm:$0xff]  ;;  %v2962_v19 = vrot.slane %v7379_v1, 5  ;;  %v2477_v1 = vsel %vm6715_vm2, %v7771_v31, %v7752_v7  ;;  %v2976_v31 = vrot.slane %v7470_v42, 5 }
  0xc4   : > { %6205 = vmatmul.mubr.bf16.gmra.mxu1 %v6559_v3  ;;  %6334 = vmatprep.subr.bf16.mxu0 %v6577_v6  ;;  %v2959_v58 = vrot.slane %v9426_v8, 5  ;;  %v9427_v3 = vld [vmem:[#allocation4_spill] sm:$0xff] }
  0xc5   : > { %6208 = vmatprep.mubr.bf16.mxu1 %v6562_v39  ;;  %6285 = vmatpush3.bf16.msra.mxu1 %v6572_v25  ;;  %v7881_v25 = vrot.slane %v2543_v51, 4  ;;  %v2945_v39 = vrot.slane %v7313_v62, 5  ;;  %v2443_v51 = vsel %vm6715_vm2, %v7741_v13, %v7673_v37  ;;  %v2966_v55 = vrot.slane %v9427_v3, 5  ;;  %v5513_v13 = vld [vmem:[%s6669_s25 + $0x3c] sm:$0xe] }
  0xc6   : > { %6286 = vmatprep.subr.bf16.mxu1 %v6576_v23  ;;  %v7903_v8 = vsel %vm7026_vm5, %v5528_v48, %v2959_v58  ;;  %v2961_v37 = vrot.slane %v2959_v58, 4  ;;  %v5529_v3 = vrot.slane %v5513_v13, 9  ;;  %v6567_v48 = vld [vmem:[%s6669_s25 + $0x90] sm:$0xff]   ;;  %v2983_v13 = vrot.slane %v7490_v35, 5 }
  0xc7   : > { %6335 = vmatpush3.bf16.msra.mxu0 %v6577_v6  ;;  %v2453_v6 = vsel %vm6715_vm2, %v7750_v29, %v7743_v60  ;;  %v2467_v60 = vsel %vm6715_vm2, %v7769_v41, %v7716_v21  ;;  %v2968_v29 = vrot.slane %v2966_v55, 4  ;;  %v2973_v21 = vrot.slane %v7429_v40, 5 }
  0xc8   : > { %6416 = vmatprep.subr.bf16.mxu0 %v7854_v50  ;;  %v7917_v58 = vsel %vm7026_vm5, %v2961_v37, %v2962_v19  ;;  %v5497_v19 = vcombine.low %v2467_v60, %v2477_v1  ;;  %v7932_v40 = vsel %vm7026_vm5, %v5529_v3, %v2966_v55  ;;  %v2491_v37 = vsel %vm6715_vm2, %v7857_v2, %v7787_v47  ;;  %v5515_v55 = vld [vmem:[%s6669_s25 + $0x54] sm:$0xe] }
  0xc9   : > { %6257 = vmatmul.mubr.bf16.gmra.mxu0 %v5494_v16  ;;  %6287 = vmatpush3.bf16.msra.mxu1 %v6576_v23  ;;  %v2955_v16 = vrot.slane %v9428_v61, 5  ;;  %v2969_v23 = vrot.slane %v7408_v46, 5  ;;  %v5560_v41 = vcombine.low %v7903_v8, %v7917_v58  ;;  %v5514_v46 = vld [vmem:[%s6669_s25 + $0x48] sm:$0xe]  ;;  %v2501_v47 = vsel %vm6715_vm2, %v7859_v12, %v7829_v26  ;;  %v6587_v8 = vld [vmem:[%s6669_s25 + $0x54] sm:$0xff]  }
  0xca   : > { %6260 = vmatprep.mubr.bf16.mxu0 %v5495_v20  ;;  %6368 = vmatprep.subr.bf16.mxu1 %v7864_v34  ;;  %v5496_v20 = vcombine.low %v2443_v51, %v2453_v6  ;;  %v2975_v51 = vrot.slane %v2973_v21, 4  ;;  %v6570_v6 = vld [vmem:[%s6669_s25 + $0x9c] sm:$0xff]   ;;  %v2987_v3 = vrot.slane %v7494_v32, 5  ;;  %v2515_v35 = vsel %vm6715_vm2, %v7866_v53, %v7819_v15 }
  0xcb   : > { %v7924_v7 = vsel %vm7026_vm5, %v2968_v29, %v2969_v23  ;;  %v5531_v29 = vrot.slane %v5515_v55, 9  ;;  %v5516_v23 = vld [vmem:[%s6669_s25 + $0x60] sm:$0xe]  ;;  %v2990_v26 = vrot.slane %v7542_v17, 5  ;;  %v2525_v12 = vsel %vm6715_vm2, %v7868_v54, %v7870_v22 }
  0xcc   : > { %6209 = vmatmul.mubr.bf16.gmra.mxu1 %v6563_v10  ;;  %v2980_v10 = vrot.slane %v7464_v11, 5  ;;  %v5561_v42 = vcombine.low %v7932_v40, %v7924_v7  ;;  %v7947_v60 = vsel %vm7026_vm5, %v2975_v51, %v2976_v31  ;;  %v2994_v15 = vrot.slane %v7534_v9, 5  ;;  %v5742_v7 = vld [vmem:[%s6669_s25 + $0x24] sm:$0xe] }
  0xcd   : > { %6212 = vmatprep.mubr.bf16.mxu1 %v6566_v38  ;;  %v5530_v38 = vrot.slane %v5514_v46, 9  ;;  %v2989_v46 = vrot.slane %v2987_v3, 4  ;;  %v5498_v53 = vcombine.low %v2491_v37, %v2501_v47  ;;  %v2997_v9 = vrot.slane %v7555_v63, 5  ;;  %v5518_v37 = vld [vmem:[%s6669_s25 + $0x78] sm:$0xe] }
  0xce   : > { %v2982_v1 = vrot.slane %v2980_v10, 4  ;;  %v7974_v32 = vsel %vm7026_vm5, %v5531_v29, %v2980_v10  ;;  %v2996_v10 = vrot.slane %v2994_v15, 4  ;;  %v3001_v55 = vrot.slane %v7559_v45, 5 }
  0xcf   : > { %v7943_v11 = vsel %vm7026_vm5, %v5530_v38, %v2973_v21  ;;  %v5532_v21 = vrot.slane %v5516_v23, 9  ;;  %v7986_v54 = vsel %vm7026_vm5, %v2989_v46, %v2990_v26  ;;  %v5499_v38 = vcombine.low %v2515_v35, %v2525_v12 }
  0xd0   : > { %v8002_v47 = vsel %vm7026_vm5, %v2996_v10, %v2997_v9  ;;  %v5534_v63 = vrot.slane %v5518_v37, 9  ;;  %v3008_v29 = vrot.slane %v7602_v4, 5  ;;  %v3003_v45 = vrot.slane %v3001_v55, 4  ;;  %v6578_v9 = vld [vmem:[%s6669_s25 + $0x18] sm:$0xff]   ;;  %v9433_v37 = vld [vmem:[#allocation8_spill] sm:$0xff] }
  0xd1   : > { %6261 = vmatmul.mubr.bf16.gmra.mxu0 %v5496_v20  ;;  %v7965_v20 = vsel %vm7026_vm5, %v2982_v1, %v2983_v13  ;;  %v7981_v17 = vsel %vm7026_vm5, %v5532_v21, %v2987_v3  ;;  %v3004_v1 = vrot.slane %v7566_v27, 5  ;;  %v3011_v27 = vrot.slane %v7628_v18, 5  ;;  %v5519_v21 = vld [vmem:[%s6669_s25 + $0x84] sm:$0xe] }
  0xd2   : > { %6264 = vmatprep.mubr.bf16.mxu0 %v5497_v19  ;;  %v5517_v19 = vld [vmem:[%s6669_s25 + $0x6c] sm:$0xe]  ;;  %v2539_v3 = vsel %vm6715_vm2, %v7874_v14, %v7834_v56  ;;  %v8014_v35 = vsel %vm7026_vm5, %v5534_v63, %v3001_v55  ;;  %v2549_v4 = vsel %vm6715_vm2, %v7881_v25, %v7876_v0  ;;  %v5535_v26 = vrot.slane %v5519_v21, 9  ;;  %v9431_v0 = vld [vmem:[#allocation6_spill] sm:$0xff] }
  0xd3   : > { %v5533_v22 = vrot.slane %v5517_v19, 9  ;;  %v8023_v18 = vsel %vm7026_vm5, %v3003_v45, %v3004_v1  ;;  %v3010_v12 = vrot.slane %v3008_v29, 4  ;;  %v9429_v46 = vrot.slane %v7222_v33, 5  ;;  %v5520_v19 = vld [vmem:[%s6669_s25 + $0x90] sm:$0xe]  ;;  %v6590_v63 = vld [vmem:[%s6669_s25 + $0x60] sm:$0xff]  }
  0xd4   : > { %6213 = vmatmul.mubr.bf16.gmra.mxu1 %v6567_v48  ;;  %v6571_v48 = vld [vmem:[%s6669_s25 + $0xa8] sm:$0xff]   ;;  %v9430_v56 = vrot.slane %v7846_v59, 9  ;;  %v3015_v25 = vrot.slane %v9431_v0, 5  ;;  %v8040_v33 = vsel %vm7026_vm5, %v5535_v26, %v3008_v29  ;;  %v3022_v55 = vrot.slane %v9433_v37, 5 }
  0xd5   : > { %6216 = vmatprep.mubr.bf16.mxu1 %v6570_v6  ;;  %v6574_v6 = vld [vmem:[%s6669_s25 + $0xb4] sm:$0xff]   ;;  %v7998_v13 = vsel %vm7026_vm5, %v5533_v22, %v2994_v15  ;;  %v5511_v15 = vld [vmem:[%s6669_s25 + $0x24] sm:$0xe]  ;;  %v9432_v22 = vld [vmem:[#allocation7_spill] sm:$0xff]  ;;  %v8044_v59 = vsel %vm7026_vm5, %v3010_v12, %v3011_v27  ;;  %v5500_v1 = vcombine.low %v2539_v3, %v2549_v4  ;;  %v2942_v29 = vsel %vm7026_vm5, %v7824_v44, %v2941_v30 }
  0xd6   : > { %v2939_v14 = vsel %vm7026_vm5, %v9430_v56, %v9429_v46  ;;  %v3018_v10 = vrot.slane %v9432_v22, 5  ;;  %v3017_v45 = vrot.slane %v3015_v25, 4  ;;  %v6575_v46 = vld [vmem:[%s6669_s25 + $0xc0] sm:$0xff]   ;;  %v2947_v27 = vrot.slane %v2945_v39, 4  ;;  %v5521_v3 = vld [vmem:[%s6669_s25 + $0x9c] sm:$0xe] }
  0xd7   : > { %v3024_v4 = vrot.slane %v3022_v55, 4  ;;  %v5537_v12 = vrot.slane %v5521_v3, 9  ;;  %v9435_v56 = vld [vmem:[#allocation10_spill] sm:$0xff]  ;;  %v5522_v0 = vld [vmem:[%s6669_s25 + $0xa8] sm:$0xe]  ;;  %v5557_v22 = vcombine.low %v2939_v14, %v2942_v29  ;;  %v9439_v29 = vrot.slane %v7849_v49, 9 }
  0xd8   : > { %v8065_v26 = vsel %vm7026_vm5, %v3017_v45, %v3018_v10  ;;  %v3029_v43 = vrot.slane %v9435_v56, 5  ;;  %v8188_v44 = vld [vmem:[%s6669_s25 + $0x34] sm:$0xf] }
  0xd9   : > { %6265 = vmatmul.mubr.bf16.gmra.mxu0 %v5498_v53  ;;  %v8078_v10 = vsel %vm7026_vm5, %v5537_v12, %v3022_v55  ;;  %v5523_v55 = vld [vmem:[%s6669_s25 + $0xb4] sm:$0xe]  ;;  %v3863_v40 = vshll.u32 %v8188_v44, 16 }
  0xda   : > { %6268 = vmatprep.mubr.bf16.mxu0 %v5499_v38  ;;  %v5536_v38 = vrot.slane %v5520_v19, 9  ;;  %v5527_v19 = vrot.slane %v5511_v15, 9  ;;  %v3031_v37 = vrot.slane %v3029_v43, 4  ;;  %v9436_v15 = vrot.slane %v9425_v36, 5 }
  0xdb   : > { %v5539_v56 = vrot.slane %v5523_v55, 9 }
  0xdc   : > { %6217 = vmatmul.mubr.bf16.gmra.mxu1 %v6571_v48  ;;  %v9434_v48 = vld [vmem:[#allocation9_spill] sm:$0xff]  ;;  %v2954_v45 = vrot.slane %v9436_v15, 4  ;;  %v9441_v62 = vmov %v9436_v15  ;;  %v3046_v15 = vrot.slane %v7817_v52, 5  ;;  %v5659_v52 = vld [vmem:[%s6669_s25 + $0x30] sm:$0xf] }
  0xdd   : > { %6220 = vmatprep.mubr.bf16.mxu1 %v6574_v6  ;;  %v3025_v21 = vrot.slane %v9434_v48, 5  ;;  %v8060_v6 = vsel %vm7026_vm5, %v5536_v38, %v3015_v25  ;;  %v3032_v25 = vrot.slane %v7736_v5, 5  ;;  %v5538_v38 = vrot.slane %v5522_v0, 9 }
  0xde   : > { %v9440_v0 = vrot.slane %v7327_v24, 5  ;;  %v2953_v49 = vsel %vm7026_vm5, %v5527_v19, %v9441_v62  ;;  %v2956_v24 = vsel %vm7026_vm5, %v2954_v45, %v2955_v16  ;;  %v8158_v62 = vld [vmem:[%s6669_s25 + $0x28] sm:$0xf] }
  0xdf   : > { %v8072_v30 = vsel %vm7026_vm5, %v3024_v4, %v3025_v21  ;;  %v9437_v21 = vld [vmem:[#allocation11_spill] sm:$0xff]  ;;  %v8087_v5 = vsel %vm7026_vm5, %v5538_v38, %v3029_v43  ;;  %v8091_v14 = vsel %vm7026_vm5, %v3031_v37, %v3032_v25  ;;  %v2946_v4 = vsel %vm7026_vm5, %v9439_v29, %v2945_v39  ;;  %v5524_v38 = vld [vmem:[%s6669_s25 + $0xc0] sm:$0xe]  ;;  %v9442_v39 = vld [vmem:[#allocation13_spill] sm:$0xff] }
  0xe0   : > { %v3036_v3 = vrot.slane %v9437_v21, 5  ;;  %v2949_v25 = vsel %vm7026_vm5, %v2947_v27, %v9440_v0  ;;  %v3043_v37 = vrot.slane %v9442_v39, 5  ;;  %v5540_v19 = vrot.slane %v5524_v38, 9  ;;  %v6585_v21 = vld [vmem:[%s9353_s1 + $0x230] sm:$0xff]   ;;  %v5656_v0 = vld [vmem:[%s6669_s25 + $0x24] sm:$0xf] }
  0xe1   : > { %6269 = vmatmul.mubr.bf16.gmra.mxu0 %v5500_v1  ;;  %v5558_v16 = vcombine.low %v2946_v4, %v2949_v25  ;;  %v5559_v55 = vcombine.low %v2953_v49, %v2956_v24  ;;  %v6584_v29 = vld [vmem:[%s9353_s1 + $0x1f0] sm:$0xff]   ;;  %v6583_v49 = vld [vmem:[%s6669_s25 + $0x3c] sm:$0xff]   ;;  %v3830_v38 = vshrl.u32 %v5656_v0, 16  ;;  %v6586_v39 = vld [vmem:[%s6669_s25 + $0x48] sm:$0xff]   ;;  %v3839_v24 = vshll.u32 %v8158_v62, 16 }
  0xe2   : > { %6336 = vmatprep.mubr.bf16.mxu0 %v6578_v9  ;;  %v9438_v9 = vld [vmem:[#allocation12_spill] sm:$0xff]  ;;  %v3038_v43 = vrot.slane %v3036_v3, 4  ;;  %v8122_v27 = vsel %vm7026_vm5, %v5539_v56, %v3036_v3  ;;  %v3045_v61 = vrot.slane %v3043_v37, 4  ;;  %v8135_v45 = vsel %vm7026_vm5, %v5540_v19, %v3043_v37  ;;  %v5653_v3 = vld [vmem:[%s6669_s25 + $0x18] sm:$0xf]  ;;  %v6589_v56 = vld [vmem:[%s9353_s1 + $0x228] sm:$0xff]  }
  0xe3   : > { %v3039_v1 = vrot.slane %v9438_v9, 5  ;;  %v3809_v25 = vshll.u32 %v5653_v3, 16  ;;  %v6588_v37 = vld [vmem:[%s9353_s1 + $0x1e8] sm:$0xff]   ;;  %v5655_v19 = vld [vmem:[%s6669_s25 + $0x20] sm:$0x1]  ;;  %v3832_v12 = vrot.slane %v3830_v38, 4 }
  0xe4   : > { %6221 = vmatmul.mubr.bf16.gmra.mxu1 %v6575_v46  ;;  %v6579_v46 = vld [vmem:[%s6669_s25 + $0x24] sm:$0xff]   ;;  %v8140_v9 = vsel %vm7026_vm5, %v3045_v61, %v3046_v15  ;;  %v3833_v15 = vshll.u32 %v5656_v0, 16  ;;  %v8178_v0 = vld [vmem:[%s6669_s25 + $0x2c] sm:$0x1]  ;;  %v3854_v38 = vshrl.u32 %v5659_v52, 16 }
  0xe5   : > { %6288 = vmatprep.mubr.bf16.mxu1 %v5557_v22  ;;  %v6582_v22 = vld [vmem:[%s6669_s25 + $0x30] sm:$0xff]   ;;  %v8126_v36 = vsel %vm7026_vm5, %v3038_v43, %v3039_v1  ;;  %v8143_v1 = vld [vmem:[%s6669_s25 + $0x1c] sm:$0xf]  ;;  %v3806_v43 = vshrl.u32 %v5653_v3, 16 }
  0xe6   : > { %v4577_v4 = vrot.slane %v8143_v1, 5  ;;  %v3835_v48 = vrot.slane %v3833_v15, 5 }
  0xe7   : > { %v3808_v61 = vrot.slane %v3806_v43, 4  ;;  %v6592_v43 = vld [vmem:[%s9353_s1 + $0x1e0] sm:$0xff]  }
  0xe9   : > { %6337 = vmatmul.mubr.bf16.vlgmr.msra.gmra.mxu0 %v6579_v46  ;;  %v3819_v46 = vshrl.u32 %v8143_v1, 16 }
  0xea   : > { %6417 = vmatpush3.bf16.msra.mxu0 %v7854_v50  ;;  %6340 = vmatprep.mubr.bf16.mxu0 %v6582_v22  ;;  %v3815_v50 = vshll.u32 %v8143_v1, 16  ;;  %v3843_v22 = vshrl.u32 %v8158_v62, 16 }
  0xeb   : > { %6418 = vmatprep.subr.bf16.mxu0 %v6585_v21 }
  0xec   : > { %6289 = vmatmul.mubr.bf16.vlgmr.msra.gmra.mxu1 %v5558_v16  ;;  %v5741_v16 = vld [vmem:[%s6669_s25 + $0x18] sm:$0xe]  ;;  %v8173_v3 = vrot.slane %v3815_v50, 5  ;;  %v3825_v50 = vshll.u32 %v5655_v19, 16  ;;  %v3845_v1 = vrot.slane %v3843_v22, 4 }
  0xed   : > { %6369 = vmatpush3.bf16.msra.mxu1 %v7864_v34  ;;  %6292 = vmatprep.mubr.bf16.mxu1 %v5559_v55  ;;  %v6593_v34 = vld [vmem:[%s9353_s1 + $0x220] sm:$0xff]   ;;  %v3821_v55 = vrot.slane %v3819_v46, 4  ;;  %v8185_v46 = vrot.slane %v3839_v24, 5  ;;  %v6597_v24 = vld [vmem:[%s9353_s1 + $0x218] sm:$0xff]  }
  0xee   : > { %6370 = vmatprep.subr.bf16.mxu1 %v6584_v29  ;;  %6419 = vmatpush3.bf16.msra.mxu0 %v6585_v21  ;;  %v3811_v21 = vrot.slane %v3809_v25, 5 }
  0xef   : > { %6420 = vmatprep.subr.bf16.mxu0 %v6589_v56  ;;  %v3822_v22 = vor.u32 %v3821_v55, %v8173_v3  ;;  %v3846_v55 = vor.u32 %v3845_v1, %v8185_v46 }
  0xf1   : > { %6341 = vmatmul.mubr.bf16.gmra.mxu0 %v6583_v49  ;;  %6371 = vmatpush3.bf16.msra.mxu1 %v6584_v29  ;;  %v5757_v49 = vrot.slane %v5741_v16, 9  ;;  %v4580_v29 = vrot.slane %v5655_v19, 5  ;;  %v4579_v19 = vrot.slane %v4577_v4, 4  ;;  %v3849_v16 = vshll.u32 %v8178_v0, 16 }
  0xf2   : > { %6344 = vmatprep.mubr.bf16.mxu0 %v6586_v39  ;;  %6372 = vmatprep.subr.bf16.mxu1 %v6588_v37  ;;  %v3857_v39 = vshll.u32 %v5659_v52, 16  ;;  %v4584_v52 = vrot.slane %v8158_v62, 5  ;;  %v3867_v62 = vshrl.u32 %v8188_v44, 16 }
  0xf3   : > { %6421 = vmatpush3.bf16.msra.mxu0 %v6589_v56  ;;  %v3812_v56 = vor.u32 %v3811_v21, %v3808_v61  ;;  %v6596_v61 = vld [vmem:[%s9353_s1 + $0x1d8] sm:$0xff]   ;;  %v8211_v21 = vrot.slane %v3825_v50, 5  ;;  %v6601_v50 = vld [vmem:[%s9353_s1 + $0x210] sm:$0xff]  }
  0xf4   : > { %6293 = vmatmul.mubr.bf16.gmra.mxu1 %v5560_v41  ;;  %6422 = vmatprep.subr.bf16.mxu0 %v6593_v34  ;;  %v3836_v41 = vor.u32 %v3835_v48, %v3832_v12  ;;  %v3856_v48 = vrot.slane %v3854_v38, 4  ;;  %v3859_v12 = vrot.slane %v3857_v39, 5  ;;  %v8238_v38 = vld [vmem:[%s6669_s25 + $0x40] sm:$0xf]  ;;  %v4586_v51 = vrot.slane %v4584_v52, 4 }
  0xf5   : > { %6296 = vmatprep.mubr.bf16.mxu1 %v5561_v42  ;;  %6373 = vmatpush3.bf16.msra.mxu1 %v6588_v37  ;;  %v8218_v42 = vsel %vm7026_vm5, %v5757_v49, %v4577_v4  ;;  %v5662_v37 = vld [vmem:[%s6669_s25 + $0x3c] sm:$0xf]  ;;  %v8227_v1 = vrot.slane %v3812_v56, 4  ;;  %v8233_v4 = vsel %vm7026_vm5, %v4579_v19, %v4580_v29  ;;  %v8235_v49 = vrot.slane %v3849_v16, 5  ;;  %v6600_v56 = vld [vmem:[%s9353_s1 + $0x1d0] sm:$0xff]  }
  0xf6   : > { %v8183_v25 = vpop.f32.mrf.mxu0  ;;  %v8193_v15 = vpop.f32.mrf.mxu1  ;;  %6374 = vmatprep.subr.bf16.mxu1 %v6592_v43  ;;  %v8245_v23 = vrot.slane %v3836_v41, 4  ;;  %v4587_v29 = vrot.slane %v8178_v0, 5  ;;  %v3847_v19 = vrot.slane %v3846_v55, 4  ;;  %v8249_v16 = vld [vmem:[%s6669_s25 + $0x38] sm:$0x1]  ;;  %v3881_v31 = vshll.u32 %v5662_v37, 16 }
  0xf7   : > { %9443 = vst [vmem:[#allocation2_spill] sm:$0xff] %v8193_v15  ;;  %6423 = vmatpush3.bf16.msra.mxu0 %v6593_v34  ;;  %v8229_v34 = vrot.slane %v3822_v22, 4  ;;  %v5758_v22 = vrot.slane %v5742_v7, 9  ;;  %v3860_v2 = vor.u32 %v3859_v12, %v3856_v48  ;;  %v5743_v41 = vld [vmem:[%s6669_s25 + $0x30] sm:$0xe]  ;;  %v3887_v7 = vshll.u32 %v8238_v38, 16 }
  0xf8   : > { %v8204_v58 = vpop.f32.mrf.mxu0  ;;  %v8222_v53 = vpop.f32.mrf.mxu1  ;;  %6424 = vmatprep.subr.bf16.mxu0 %v6597_v24  ;;  %v3891_v0 = vshrl.u32 %v8238_v38, 16  ;;  %v9447_v12 = vcombine.low %v7974_v32, %v7965_v20  ;;  %v8294_v20 = vsel %vm7026_vm5, %v4586_v51, %v4587_v29  ;;  %v3873_v32 = vshll.u32 %v8249_v16, 16  ;;  %v8312_v29 = vld [vmem:[%s6669_s25 + $0x44] sm:$0x1]  ;;  %v5744_v15 = vld [vmem:[%s6669_s25 + $0x3c] sm:$0xe] }
  0xf9   : > { %9444 = vst [vmem:[#allocation5_spill] sm:$0xff] %v8222_v53  ;;  %6345 = vmatmul.mubr.bf16.gmra.mxu0 %v6587_v8  ;;  %6375 = vmatpush3.bf16.msra.mxu1 %v6592_v43  ;;  %v8251_v8 = vrot.slane %v3863_v40, 5  ;;  %v3878_v43 = vshrl.u32 %v5662_v37, 16  ;;  %v8253_v53 = vrot.slane %v3867_v62, 4  ;;  %v3818_v40 = vsel %vm6715_vm2, %v8227_v1, %v8173_v3  ;;  %v6591_v62 = vld [vmem:[%s6669_s25 + $0x6c] sm:$0xff]   ;;  %v6594_v37 = vld [vmem:[%s6669_s25 + $0x78] sm:$0xff]  }
  0xfa   : > { %v8240_v39 = vpop.f32.mrf.mxu0  ;;  %6348 = vmatprep.mubr.bf16.mxu0 %v6590_v63  ;;  %6376 = vmatprep.subr.bf16.mxu1 %v6596_v61  ;;  %v9445_v63 = vcombine.low %v7943_v11, %v7947_v60  ;;  %v8261_v55 = vpop.f32.mrf.mxu1  ;;  %v3828_v48 = vsel %vm6715_vm2, %v8229_v34, %v8211_v21  ;;  %v4591_v60 = vrot.slane %v8188_v44, 5  ;;  %v3842_v3 = vsel %vm6715_vm2, %v8245_v23, %v8185_v46  ;;  %v5665_v44 = vld [vmem:[%s6669_s25 + $0x48] sm:$0xf]  ;;  %v8305_v34 = vld [vmem:[%s6669_s25 + $0x4c] sm:$0xf] }
  0xfb   : > { %6425 = vmatpush3.bf16.msra.mxu0 %v6597_v24  ;;  %9446 = vst [vmem:[#allocation4_spill] sm:$0xff] %v8261_v55  ;;  %v6605_v24 = vld [vmem:[%s9353_s1 + $0x208] sm:$0xff]   ;;  %v8290_v21 = vsel %vm7026_vm5, %v5758_v22, %v4584_v52  ;;  %v3852_v23 = vsel %vm6715_vm2, %v3847_v19, %v8235_v49  ;;  %v5759_v46 = vrot.slane %v5743_v41, 9  ;;  %v3880_v1 = vrot.slane %v3878_v43, 4  ;;  %v6608_v43 = vld [vmem:[%s9353_s1 + $0x1c0] sm:$0xff]  }
  0xfc   : > { %6297 = vmatmul.mubr.bf16.gmra.mxu1 %v9445_v63  ;;  %6426 = vmatprep.subr.bf16.mxu0 %v6601_v50  ;;  %v8282_v63 = vpop.f32.mrf.mxu0  ;;  %v3883_v52 = vrot.slane %v3881_v31, 5  ;;  %v8307_v51 = vrot.slane %v3860_v2, 4  ;;  %v3870_v22 = vor.u32 %v8253_v53, %v8251_v8  ;;  %v3893_v11 = vrot.slane %v3891_v0, 4  ;;  %v8316_v55 = vpop.f32.mrf.mxu1  ;;  %v6609_v31 = vld [vmem:[%s9353_s1 + $0x200] sm:$0xff]  }
  0xfd   : > { %6300 = vmatprep.mubr.bf16.mxu1 %v9447_v12  ;;  %6377 = vmatpush3.bf16.msra.mxu1 %v6596_v61  ;;  %9448 = vst [vmem:[#allocation3_spill] sm:$0xff] %v8282_v63  ;;  %v6604_v61 = vld [vmem:[%s9353_s1 + $0x1c8] sm:$0xff]   ;;  %v8314_v12 = vrot.slane %v3887_v7, 5  ;;  %9449 = vst [vmem:[#allocation6_spill] sm:$0xff] %v8316_v55  ;;  %v4593_v49 = vrot.slane %v4591_v60, 4  ;;  %v3902_v2 = vshrl.u32 %v5665_v44, 16  ;;  %v8327_v41 = vcombine.low %v3818_v40, %v3828_v48 }
  0xfe   : > { %6378 = vmatprep.subr.bf16.mxu1 %v6600_v56  ;;  %v3905_v19 = vshll.u32 %v5665_v44, 16  ;;  %v3915_v0 = vshrl.u32 %v8305_v34, 16  ;;  %v8335_v44 = vrot.slane %v3873_v32, 5  ;;  %v3897_v55 = vshll.u32 %v8312_v29, 16  ;;  %v5668_v40 = vld [vmem:[%s6669_s25 + $0x54] sm:$0xf] }
  0xff   : > { %6427 = vmatpush3.bf16.msra.mxu0 %v6601_v50  ;;  %v4594_v50 = vrot.slane %v8249_v16, 5  ;;  %v3911_v16 = vshll.u32 %v8305_v34, 16  ;;  %v4598_v32 = vrot.slane %v8238_v38, 5  ;;  %v9453_v38 = vcombine.low %v7998_v13, %v8002_v47  ;;  %v6595_v7 = vld [vmem:[%s6669_s25 + $0x84] sm:$0xff]   ;;  %v6598_v48 = vld [vmem:[%s6669_s25 + $0x90] sm:$0xff]  }
 0x100   : > { %6428 = vmatprep.subr.bf16.mxu0 %v6605_v24 }
 0x101   : > { %6349 = vmatmul.mubr.bf16.gmra.mxu0 %v6591_v62  ;;  %v8322_v53 = vpop.f32.mrf.mxu0  ;;  %6379 = vmatpush3.bf16.msra.mxu1 %v6600_v56  ;;  %v8333_v62 = vcombine.low %v3842_v3, %v3852_v23  ;;  %v3884_v56 = vor.u32 %v3883_v52, %v3880_v1  ;;  %v3894_v3 = vor.u32 %v3893_v11, %v8314_v12  ;;  %v8351_v23 = vld [vmem:[%s6669_s25 + $0x58] sm:$0xf]  ;;  %v8358_v52 = vrot.slane %v3870_v22, 4 }
 0x102   : > { %9450 = vst [vmem:[#allocation7_spill] sm:$0xff] %v8322_v53  ;;  %6352 = vmatprep.mubr.bf16.mxu0 %v6594_v37  ;;  %6380 = vmatprep.subr.bf16.mxu1 %v6604_v61  ;;  %v8346_v37 = vsel %vm7026_vm5, %v5759_v46, %v4591_v60  ;;  %v9451_v1 = vcombine.low %v7981_v17, %v7986_v54  ;;  %v3904_v46 = vrot.slane %v3902_v2, 4  ;;  %v3907_v11 = vrot.slane %v3905_v19, 5  ;;  %v5667_v2 = vld [vmem:[%s6669_s25 + $0x50] sm:$0x1] }
 0x103   : > { %6429 = vmatpush3.bf16.msra.mxu0 %v6605_v24  ;;  %v8356_v24 = vpop.f32.mrf.mxu1  ;;  %v8362_v60 = vsel %vm7026_vm5, %v4593_v49, %v4594_v50  ;;  %v8369_v17 = vpop.f32.mrf.mxu0  ;;  %v5760_v54 = vrot.slane %v5744_v15, 9  ;;  %v3917_v22 = vrot.slane %v3915_v0, 4  ;;  %v3885_v49 = vrot.slane %v3884_v56, 4  ;;  %v5671_v56 = vld [vmem:[%s6669_s25 + $0x60] sm:$0xf] }
 0x104   : > { %6301 = vmatmul.mubr.bf16.gmra.mxu1 %v9451_v1  ;;  %9452 = vst [vmem:[#allocation8_spill] sm:$0xff] %v8356_v24  ;;  %6430 = vmatprep.subr.bf16.mxu0 %v6609_v31  ;;  %9454 = vst [vmem:[#allocation9_spill] sm:$0xff] %v8369_v17  ;;  %v8371_v1 = vrot.slane %v3911_v16, 5  ;;  %v3926_v24 = vshrl.u32 %v5668_v40, 16  ;;  %v3899_v50 = vrot.slane %v3897_v55, 5  ;;  %v3929_v19 = vshll.u32 %v5668_v40, 16 }
 0x105   : > { %6304 = vmatprep.mubr.bf16.mxu1 %v9453_v38  ;;  %6381 = vmatpush3.bf16.msra.mxu1 %v6604_v61  ;;  %v3935_v53 = vshll.u32 %v8351_v23, 16  ;;  %v3895_v13 = vrot.slane %v3894_v3, 4  ;;  %v4600_v47 = vrot.slane %v4598_v32, 4  ;;  %v4601_v38 = vrot.slane %v8312_v29, 5  ;;  %v8377_v61 = vpop.f32.mrf.mxu1  ;;  %v8387_v40 = vpop.f32.mrf.mxu0 }
 0x106   : > { %6382 = vmatprep.subr.bf16.mxu1 %v6608_v43  ;;  %v3939_v15 = vshrl.u32 %v8351_v23, 16  ;;  %9455 = vst [vmem:[#allocation10_spill] sm:$0xff] %v8377_v61  ;;  %v3876_v16 = vsel %vm6715_vm2, %v8358_v52, %v8335_v44  ;;  %v3908_v0 = vor.u32 %v3907_v11, %v3904_v46  ;;  %v3918_v29 = vor.u32 %v3917_v22, %v8371_v1  ;;  %v5745_v61 = vld [vmem:[%s6669_s25 + $0x48] sm:$0xe] }
 0x107   : > { %6431 = vmatpush3.bf16.msra.mxu0 %v6609_v31  ;;  %v4605_v31 = vrot.slane %v8305_v34, 5  ;;  %v3921_v3 = vshll.u32 %v5667_v2, 16  ;;  %v3928_v17 = vrot.slane %v3926_v24, 4  ;;  %v3931_v63 = vrot.slane %v3929_v19, 5  ;;  %v8412_v11 = vpop.f32.mrf.mxu1 }
 0x108   : > { %v3890_v44 = vsel %vm6715_vm2, %v3885_v49, %v8314_v12  ;;  %v8396_v34 = vsel %vm7026_vm5, %v5760_v54, %v4598_v32  ;;  %v3900_v52 = vsel %vm6715_vm2, %v3895_v13, %v3899_v50  ;;  %v8404_v24 = vsel %vm7026_vm5, %v4600_v47, %v4601_v38  ;;  %9457 = vst [vmem:[#allocation11_spill] sm:$0xff] %v8412_v11  ;;  %v8415_v50 = vld [vmem:[%s6669_s25 + $0x64] sm:$0xf]  ;;  %v6599_v13 = vld [vmem:[%s6669_s25 + $0x9c] sm:$0xff]   ;;  %v8421_v47 = vpop.f32.mrf.mxu0 }
 0x109   : > { %6353 = vmatmul.mubr.bf16.gmra.mxu0 %v6595_v7  ;;  %6383 = vmatpush3.bf16.msra.mxu1 %v6608_v43  ;;  %v8398_v7 = vrot.slane %v3935_v53, 5  ;;  %v3941_v43 = vrot.slane %v3939_v15, 4  ;;  %v3950_v46 = vshrl.u32 %v5671_v56, 16  ;;  %v3953_v12 = vshll.u32 %v5671_v56, 16  ;;  %v6602_v56 = vld [vmem:[%s6669_s25 + $0xa8] sm:$0xff]  }
 0x10a   : > { %6356 = vmatprep.mubr.bf16.mxu0 %v6598_v48  ;;  %v8407_v48 = vld [vmem:[%s6669_s25 + $0x5c] sm:$0x1]  ;;  %v9456_v32 = vcombine.low %v8014_v35, %v8023_v18  ;;  %v3909_v53 = vrot.slane %v3908_v0, 4  ;;  %v5761_v54 = vrot.slane %v5745_v61, 9  ;;  %v4607_v22 = vrot.slane %v4605_v31, 4 }
 0x10b   : > { %v4608_v49 = vrot.slane %v5667_v2, 5  ;;  %v9458_v19 = vcombine.low %v8040_v33, %v8044_v59  ;;  %v3919_v38 = vrot.slane %v3918_v29, 4  ;;  %v3923_v15 = vrot.slane %v3921_v3, 5  ;;  %v5746_v0 = vld [vmem:[%s6669_s25 + $0x54] sm:$0xe]  ;;  %v8439_v29 = vpop.f32.mrf.mxu1 }
 0x10c   : > { %6305 = vmatmul.mubr.bf16.gmra.mxu1 %v9456_v32  ;;  %v3932_v35 = vor.u32 %v3931_v63, %v3928_v17  ;;  %v4612_v18 = vrot.slane %v8351_v23, 5  ;;  %v3942_v61 = vor.u32 %v3941_v43, %v8398_v7  ;;  %v3945_v2 = vshll.u32 %v8407_v48, 16  ;;  %9460 = vst [vmem:[#allocation12_spill] sm:$0xff] %v8439_v29  ;;  %v5747_v63 = vld [vmem:[%s6669_s25 + $0x60] sm:$0xe] }
 0x10d   : > { %6308 = vmatprep.mubr.bf16.mxu1 %v9458_v19  ;;  %v3952_v32 = vrot.slane %v3950_v46, 4  ;;  %v3955_v55 = vrot.slane %v3953_v12, 5  ;;  %v9459_v33 = vsel %vm6715_vm2, %v8307_v51, %v8251_v8  ;;  %v3959_v23 = vshll.u32 %v8415_v50, 16 }
 0x10e   : > { %v8433_v59 = vcombine.low %v9459_v33, %v3876_v16  ;;  %v3963_v17 = vshrl.u32 %v8415_v50, 16  ;;  %v8441_v3 = vcombine.low %v3890_v44, %v3900_v52  ;;  %v3914_v43 = vsel %vm6715_vm2, %v3909_v53, %v8371_v1  ;;  %v5674_v16 = vld [vmem:[%s6669_s25 + $0x6c] sm:$0xf]  ;;  %v8459_v33 = vld [vmem:[%s6669_s25 + $0x70] sm:$0xf] }
 0x10f   : > { %v8448_v8 = vsel %vm7026_vm5, %v5761_v54, %v4605_v31  ;;  %v8452_v51 = vsel %vm7026_vm5, %v4607_v22, %v4608_v49  ;;  %v3933_v44 = vrot.slane %v3932_v35, 4  ;;  %v5762_v52 = vrot.slane %v5746_v0, 9  ;;  %v5673_v54 = vld [vmem:[%s6669_s25 + $0x68] sm:$0x1] }
 0x110   : > { %v4614_v12 = vrot.slane %v4612_v18, 4  ;;  %v4615_v19 = vrot.slane %v8407_v48, 5  ;;  %v3924_v1 = vsel %vm6715_vm2, %v3919_v38, %v3923_v15  ;;  %v3943_v31 = vrot.slane %v3942_v61, 4 }
 0x111   : > { %6357 = vmatmul.mubr.bf16.gmra.mxu0 %v6599_v13  ;;  %v8455_v46 = vpop.f32.mrf.mxu0  ;;  %v3947_v53 = vrot.slane %v3945_v2, 5  ;;  %v3956_v22 = vor.u32 %v3955_v55, %v3952_v32  ;;  %v8464_v49 = vrot.slane %v3959_v23, 5  ;;  %v3965_v13 = vrot.slane %v3963_v17, 4  ;;  %v6603_v32 = vld [vmem:[%s6669_s25 + $0xb4] sm:$0xff]  }
 0x112   : > { %9461 = vst [vmem:[#allocation13_spill] sm:$0xff] %v8455_v46  ;;  %6360 = vmatprep.mubr.bf16.mxu0 %v6602_v56  ;;  %v3974_v35 = vshrl.u32 %v5674_v16, 16  ;;  %v3977_v0 = vshll.u32 %v5674_v16, 16  ;;  %v9462_v48 = vcombine.low %v8060_v6, %v8065_v26  ;;  %v4619_v15 = vrot.slane %v8415_v50, 5  ;;  %v5749_v46 = vld [vmem:[%s6669_s25 + $0x78] sm:$0xe] }
 0x113   : > { %v3983_v55 = vshll.u32 %v8459_v33, 16  ;;  %v3987_v61 = vshrl.u32 %v8459_v33, 16  ;;  %v9464_v2 = vcombine.low %v8078_v10, %v8072_v30  ;;  %v8481_v6 = vpop.f32.mrf.mxu0  ;;  %v8483_v26 = vcombine.low %v3914_v43, %v3924_v1  ;;  %v5677_v30 = vld [vmem:[%s6669_s25 + $0x78] sm:$0xf]  ;;  %v6606_v10 = vld [vmem:[%s6669_s25 + $0xc0] sm:$0xff]  }
 0x114   : > { %6309 = vmatmul.mubr.bf16.gmra.mxu1 %v9462_v48  ;;  %9465 = vst [vmem:[#allocation15_spill] sm:$0xff] %v8481_v6  ;;  %v3938_v23 = vsel %vm6715_vm2, %v3933_v44, %v8398_v7  ;;  %v8490_v50 = vsel %vm7026_vm5, %v5762_v52, %v4612_v18  ;;  %v8494_v17 = vsel %vm7026_vm5, %v4614_v12, %v4615_v19  ;;  %v8500_v48 = vrot.slane %v3956_v22, 4  ;;  %v8507_v44 = vld [vmem:[%s6669_s25 + $0x74] sm:$0x1]  ;;  %v8564_v6 = vld [vmem:[%s6669_s25 + $0x8c] sm:$0x1] }
 0x115   : > { %6312 = vmatprep.mubr.bf16.mxu1 %v9464_v2  ;;  %v3948_v16 = vsel %vm6715_vm2, %v3943_v31, %v3947_v53  ;;  %v3969_v43 = vshll.u32 %v5673_v54, 16  ;;  %v5763_v1 = vrot.slane %v5747_v63, 9  ;;  %v8503_v2 = vld [vmem:[%s6669_s25 + $0x7c] sm:$0xf]  ;;  %v3966_v7 = vor.u32 %v3965_v13, %v8464_v49  ;;  %v8513_v22 = vpop.f32.mrf.mxu0  ;;  %v5680_v63 = vld [vmem:[%s6669_s25 + $0x84] sm:$0xf] }
 0x116   : > { %v8470_v56 = vpop.f32.mrf.mxu1  ;;  %v4622_v18 = vrot.slane %v5673_v54, 5  ;;  %v3976_v52 = vrot.slane %v3974_v35, 4  ;;  %v3979_v12 = vrot.slane %v3977_v0, 5  ;;  %v4621_v38 = vrot.slane %v4619_v15, 4  ;;  %9467 = vst [vmem:[#allocation17_spill] sm:$0xff] %v8513_v22 }
 0x117   : > { %9463 = vst [vmem:[#allocation14_spill] sm:$0xff] %v8470_v56  ;;  %v8511_v56 = vrot.slane %v3983_v55, 5  ;;  %v3989_v31 = vrot.slane %v3987_v61, 4  ;;  %v3998_v53 = vshrl.u32 %v5677_v30, 16  ;;  %v5748_v54 = vld [vmem:[%s6669_s25 + $0x6c] sm:$0xe]  ;;  %v8526_v61 = vsel %vm7026_vm5, %v5763_v1, %v4619_v15 }
 0x118   : > { %v8509_v19 = vpop.f32.mrf.mxu1  ;;  %v4001_v13 = vshll.u32 %v5677_v30, 16  ;;  %v4007_v35 = vshll.u32 %v8503_v2, 16  ;;  %v4011_v0 = vshrl.u32 %v8503_v2, 16  ;;  %v8522_v55 = vrot.slane %v3969_v43, 5  ;;  %v6607_v1 = vld [vmem:[%s6669_s25 + $0xcc] sm:$0xff]  }
 0x119   : > { %9466 = vst [vmem:[#allocation16_spill] sm:$0xff] %v8509_v19  ;;  %6361 = vmatmul.mubr.bf16.gmra.mxu0 %v6603_v32  ;;  %v8520_v19 = vcombine.low %v3938_v23, %v3948_v16  ;;  %v3993_v32 = vshll.u32 %v8507_v44, 16  ;;  %v8534_v29 = vrot.slane %v3966_v7, 4  ;;  %v4626_v23 = vrot.slane %v8459_v33, 5  ;;  %v8538_v16 = vld [vmem:[%s6669_s25 + $0x88] sm:$0xf] }
 0x11a   : > { %6364 = vmatprep.mubr.bf16.mxu0 %v6606_v10  ;;  %v3980_v10 = vor.u32 %v3979_v12, %v3976_v52  ;;  %v9469_v15 = vcombine.low %v8087_v5, %v8091_v14  ;;  %v8543_v43 = vpop.f32.mrf.mxu1  ;;  %v8548_v11 = vsel %vm7026_vm5, %v4621_v38, %v4622_v18  ;;  %v3990_v30 = vor.u32 %v3989_v31, %v8511_v56  ;;  %v8551_v12 = vpop.f32.mrf.mxu0  ;;  %v8557_v5 = vld [vmem:[%s6669_s25 + $0x80] sm:$0x1] }
 0x11b   : > { %9468 = vst [vmem:[#allocation18_spill] sm:$0xff] %v8520_v19  ;;  %9470 = vst [vmem:[#allocation19_spill] sm:$0xff] %v8543_v43  ;;  %v5764_v7 = vrot.slane %v5748_v54, 9  ;;  %v4000_v52 = vrot.slane %v3998_v53, 4  ;;  %v9472_v33 = vcombine.low %v8122_v27, %v8126_v36  ;;  %v4003_v14 = vrot.slane %v4001_v13, 5 }
 0x11c   : > { %6313 = vmatmul.mubr.bf16.gmra.mxu1 %v9469_v15  ;;  %9471 = vst [vmem:[#allocation20_spill] sm:$0xff] %v8551_v12  ;;  %v8559_v15 = vrot.slane %v4007_v35, 5  ;;  %v4013_v43 = vrot.slane %v4011_v0, 4  ;;  %v4022_v22 = vshrl.u32 %v5680_v63, 16  ;;  %v3995_v38 = vrot.slane %v3993_v32, 5 }
 0x11d   : > { %6316 = vmatprep.mubr.bf16.mxu1 %v9472_v33  ;;  %v4629_v18 = vrot.slane %v8507_v44, 5  ;;  %v4025_v31 = vshll.u32 %v5680_v63, 16  ;;  %v4031_v53 = vshll.u32 %v8538_v16, 16  ;;  %v3981_v54 = vrot.slane %v3980_v10, 4  ;;  %v8567_v33 = vpop.f32.mrf.mxu1 }
 0x11e   : > { %v4628_v12 = vrot.slane %v4626_v23, 4  ;;  %v4024_v27 = vrot.slane %v4022_v22, 4  ;;  %v4035_v36 = vshrl.u32 %v8538_v16, 16  ;;  %v3991_v13 = vrot.slane %v3990_v30, 4 }
 0x11f   : > { %v4017_v35 = vshll.u32 %v8557_v5, 16  ;;  %v4027_v0 = vrot.slane %v4025_v31, 5  ;;  %v8570_v32 = vrot.slane %v4031_v53, 5  ;;  %v4004_v63 = vor.u32 %v4003_v14, %v4000_v52  ;;  %v5750_v53 = vld [vmem:[%s6669_s25 + $0x84] sm:$0xe] }
 0x120   : > { %v8572_v44 = vpop.f32.mrf.mxu0  ;;  %v4014_v10 = vor.u32 %v4013_v43, %v8559_v15  ;;  %v4633_v22 = vrot.slane %v8503_v2, 5  ;;  %v4037_v19 = vrot.slane %v4035_v36, 4  ;;  %v9473_v30 = vcombine.low %v8218_v42, %v8233_v4 }
 0x121   : > { %6365 = vmatmul.mubr.bf16.gmra.mxu0 %v6607_v1  ;;  %v3972_v31 = vsel %vm6715_vm2, %v8534_v29, %v8522_v55  ;;  %v8588_v52 = vsel %vm7026_vm5, %v5764_v7, %v4626_v23  ;;  %v4041_v43 = vshll.u32 %v8564_v6, 16  ;;  %v3986_v42 = vsel %vm6715_vm2, %v3981_v54, %v8511_v56  ;;  %v5683_v55 = vld [vmem:[%s6669_s25 + $0x90] sm:$0xf] }
 0x122   : > { %6432 = vmatprep.mubr.bf16.mxu0 %v9473_v30  ;;  %v8591_v2 = vpop.f32.mrf.mxu0  ;;  %v4028_v4 = vor.u32 %v4027_v0, %v4024_v27  ;;  %v4038_v14 = vor.u32 %v4037_v19, %v8570_v32  ;;  %v4640_v29 = vrot.slane %v8538_v16, 5  ;;  %v9475_v23 = vcombine.low %v8135_v45, %v8140_v9 }
 0x123   : > { %v3996_v7 = vsel %vm6715_vm2, %v3991_v13, %v3995_v38  ;;  %v8609_v56 = vsel %vm7026_vm5, %v4628_v12, %v4629_v18  ;;  %v4019_v54 = vrot.slane %v4017_v35, 5  ;;  %v5765_v19 = vrot.slane %v5749_v46, 9  ;;  %v8618_v13 = vld [vmem:[%s6669_s25 + $0x94] sm:$0xf] }
 0x124   : > { %v8600_v36 = vpop.f32.mrf.mxu1  ;;  %6317 = vmatmul.mubr.bf16.gmra.mxu1 %v9475_v23  ;;  %v8611_v27 = vpop.f32.mrf.mxu0  ;;  %v4005_v16 = vrot.slane %v4004_v63, 4  ;;  %v4015_v0 = vrot.slane %v4014_v10, 4  ;;  %v4635_v30 = vrot.slane %v4633_v22, 4  ;;  %v4636_v1 = vrot.slane %v8557_v5, 5 }
 0x125   : > { %9474 = vst [vmem:[#allocation21_spill] sm:$0xff] %v8600_v36  ;;  %6384 = vmatprep.mubr.bf16.mxu1 %v8327_v41  ;;  %v4043_v9 = vrot.slane %v4041_v43, 5  ;;  %v5766_v38 = vrot.slane %v5750_v53, 9  ;;  %v4046_v12 = vshrl.u32 %v5683_v55, 16  ;;  %v4049_v18 = vshll.u32 %v5683_v55, 16 }
 0x126   : > { %v8615_v45 = vpop.f32.mrf.mxu1  ;;  %v8620_v35 = vpop.f32.mrf.mxu0  ;;  %v4029_v46 = vrot.slane %v4028_v4, 4  ;;  %v4039_v23 = vrot.slane %v4038_v14, 4  ;;  %v4642_v41 = vrot.slane %v4640_v29, 4  ;;  %v4643_v63 = vrot.slane %v8564_v6, 5  ;;  %v8641_v55 = vld [vmem:[%s6669_s25 + $0x98] sm:$0x1] }
 0x127   : > { %9476 = vst [vmem:[#allocation22_spill] sm:$0xff] %v8615_v45  ;;  %v9478_v5 = vsel %vm6715_vm2, %v8500_v48, %v8464_v49  ;;  %v8632_v53 = vcombine.low %v3986_v42, %v3996_v7  ;;  %v8638_v14 = vsel %vm7026_vm5, %v5765_v19, %v4633_v22  ;;  %v4010_v49 = vsel %vm6715_vm2, %v4005_v16, %v8559_v15  ;;  %v5686_v42 = vld [vmem:[%s6669_s25 + $0x9c] sm:$0xf]  ;;  %v8658_v7 = vld [vmem:[%s6669_s25 + $0xa0] sm:$0xf] }
 0x128   : > { %v8623_v10 = vpop.f32.mrf.mxu1  ;;  %v8630_v43 = vcombine.low %v9478_v5, %v3972_v31  ;;  %v6146_v6 = vpop.f32.mrf.mxu0  ;;  %v4020_v48 = vsel %vm6715_vm2, %v4015_v0, %v4019_v54  ;;  %v8653_v31 = vsel %vm7026_vm5, %v4635_v30, %v4636_v1  ;;  %v4055_v22 = vshll.u32 %v8618_v13, 16  ;;  %v8745_v36 = vld [vmem:[%s6669_s25 + $0xb0] sm:$0x1] }
 0x129   : > { %9477 = vst [vmem:[#allocation23_spill] sm:$0xff] %v8623_v10  ;;  %v9479_v10 = vcombine.low %v8290_v21, %v8294_v20  ;;  %v9481_v21 = vcombine.low %v8346_v37, %v8362_v60  ;;  %v8667_v20 = vsel %vm7026_vm5, %v5766_v38, %v4640_v29  ;;  %v4048_v15 = vrot.slane %v4046_v12, 4  ;;  %v8682_v38 = vld [vmem:[%s6669_s25 + $0x90] sm:$0xe] }
 0x12a   : > { %v8660_v19 = vpop.f32.mrf.mxu1  ;;  %v4051_v54 = vrot.slane %v4049_v18, 5  ;;  %v4059_v1 = vshrl.u32 %v8618_v13, 16  ;;  %v1572_v16 = vpop.f32.mrf.mxu0  ;;  %v4034_v0 = vsel %vm6715_vm2, %v4029_v46, %v8570_v32  ;;  %v4044_v30 = vsel %vm6715_vm2, %v4039_v23, %v4043_v9 }
 0x12b   : > { %6433 = vmatmul.mubr.bf16.vlgmr.msra.gmra.mxu0 %v9479_v10  ;;  %9480 = vst [vmem:[#allocation24_spill] sm:$0xff] %v8660_v19  ;;  %v8677_v37 = vsel %vm7026_vm5, %v4642_v41, %v4643_v63  ;;  %v4065_v60 = vshll.u32 %v8641_v55, 16  ;;  %v4070_v12 = vshrl.u32 %v5686_v42, 16  ;;  %v4073_v18 = vshll.u32 %v5686_v42, 16 }
 0x12c   : > { %6436 = vmatprep.mubr.bf16.mxu0 %v9481_v21  ;;  %v6098_v29 = vpop.f32.mrf.mxu1  ;;  %6385 = vmatmul.mubr.bf16.vlgmr.msra.gmra.mxu1 %v8333_v62  ;;  %v4079_v10 = vshll.u32 %v8658_v7, 16  ;;  %v4083_v32 = vshrl.u32 %v8658_v7, 16  ;;  %v6147_v46 = vpop.f32.mrf.mxu0  ;;  %v8688_v23 = vcombine.low %v4010_v49, %v4020_v48  ;;  %v8692_v41 = vrot.slane %v4055_v22, 5  ;;  %v8706_v62 = vld [vmem:[%s6669_s25 + $0xa4] sm:$0x1] }
 0x12d   : > { %v1128_v9 = vadd.f32 %v6098_v29, %v8183_v25  ;;  %6388 = vmatprep.mubr.bf16.mxu1 %v8433_v59  ;;  %v8694_v5 = vcombine.low %v4034_v0, %v4044_v30  ;;  %v4052_v21 = vor.u32 %v4051_v54, %v4048_v15  ;;  %v4061_v25 = vrot.slane %v4059_v1, 4  ;;  %v5689_v29 = vld [vmem:[%s6669_s25 + $0xa8] sm:$0xf]  ;;  %v8711_v15 = vld [vmem:[%s6669_s25 + $0xac] sm:$0xf] }
 0x12e   : > { %v1119_v63 = vpop.f32.mrf.mxu1  ;;  %v1575_v49 = vpop.f32.mrf.mxu0  ;;  %v8702_v48 = vrot.slane %v4065_v60, 5  ;;  %v5767_v22 = vrot.slane %v8682_v38, 9  ;;  %v4072_v30 = vrot.slane %v4070_v12, 4  ;;  %v4075_v19 = vrot.slane %v4073_v18, 5 }
 0x12f   : > { %v8699_v4 = vadd.f32 %v6146_v6, %v1128_v9  ;;  %v1120_v59 = vadd.f32 %v1119_v63, %v8204_v58  ;;  %v8708_v45 = vrot.slane %v4079_v10, 5  ;;  %v4085_v42 = vrot.slane %v4083_v32, 4  ;;  %v9487_v63 = vld [vmem:[#allocation3_spill] sm:$0xff] }
 0x130   : > { %v6099_v0 = vpop.f32.mrf.mxu1  ;;  %v6150_v6 = vpop.f32.mrf.mxu0  ;;  %v9484_v1 = vcombine.low %v8396_v34, %v8404_v24  ;;  %v4094_v60 = vshrl.u32 %v5689_v29, 16  ;;  %v4097_v38 = vshll.u32 %v5689_v29, 16  ;;  %v9485_v12 = vcombine.low %v8448_v8, %v8452_v51 }
 0x131   : > { %9482 = vst [vmem:[#allocation25_spill] sm:$0xff] %v8699_v4  ;;  %v8713_v54 = vadd.f32 %v1572_v16, %v1120_v59  ;;  %v1131_v58 = vadd.f32 %v6099_v0, %v8240_v39  ;;  %v8722_v18 = vrot.slane %v4052_v21, 4  ;;  %v4062_v16 = vor.u32 %v4061_v25, %v8692_v41  ;;  %v5752_v59 = vld [vmem:[%s6669_s25 + $0x9c] sm:$0xe] }
 0x132   : > { %v1122_v9 = vpop.f32.mrf.mxu1  ;;  %v4647_v10 = vrot.slane %v8618_v13, 5  ;;  %v4089_v39 = vshll.u32 %v8706_v62, 16  ;;  %v1588_v24 = vpop.f32.mrf.mxu0  ;;  %v4650_v29 = vrot.slane %v8641_v55, 5  ;;  %v4103_v0 = vshll.u32 %v8711_v15, 16 }
 0x133   : > { %9483 = vst [vmem:[#allocation26_spill] sm:$0xff] %v8713_v54  ;;  %6437 = vmatmul.mubr.bf16.gmra.mxu0 %v9484_v1  ;;  %v8727_v32 = vadd.f32 %v6147_v46, %v1131_v58  ;;  %v1123_v34 = vadd.f32 %v1122_v9, %v9487_v63  ;;  %v4076_v51 = vor.u32 %v4075_v19, %v4072_v30  ;;  %v4654_v13 = vrot.slane %v8658_v7, 5  ;;  %v9488_v58 = vld [vmem:[#allocation7_spill] sm:$0xff]  ;;  %v9489_v7 = vld [vmem:[#allocation9_spill] sm:$0xff] }
 0x134   : > { %6440 = vmatprep.mubr.bf16.mxu0 %v9485_v12  ;;  %v6102_v8 = vpop.f32.mrf.mxu1  ;;  %6389 = vmatmul.mubr.bf16.gmra.mxu1 %v8441_v3  ;;  %v4086_v21 = vor.u32 %v4085_v42, %v8708_v45  ;;  %v4107_v46 = vshrl.u32 %v8711_v15, 16  ;;  %v6151_v9 = vpop.f32.mrf.mxu0  ;;  %v4096_v55 = vrot.slane %v4094_v60, 4  ;;  %v4099_v12 = vrot.slane %v4097_v38, 5 }
 0x135   : > { %9486 = vst [vmem:[#allocation27_spill] sm:$0xff] %v8727_v32  ;;  %v8737_v25 = vadd.f32 %v1575_v49, %v1123_v34  ;;  %v1144_v1 = vadd.f32 %v6102_v8, %v9488_v58  ;;  %6392 = vmatprep.mubr.bf16.mxu1 %v8483_v26  ;;  %v4063_v32 = vrot.slane %v4062_v16, 4  ;;  %v4649_v3 = vrot.slane %v4647_v10, 4 }
 0x136   : > { %v1135_v63 = vpop.f32.mrf.mxu1  ;;  %v4091_v19 = vrot.slane %v4089_v39, 5  ;;  %v5768_v30 = vrot.slane %v5752_v59, 9  ;;  %v1591_v4 = vpop.f32.mrf.mxu0  ;;  %v8747_v49 = vrot.slane %v4103_v0, 5  ;;  %v4109_v34 = vrot.slane %v4107_v46, 4 }
 0x137   : > { %v8741_v42 = vadd.f32 %v6150_v6, %v1144_v1  ;;  %v1136_v54 = vadd.f32 %v1135_v63, %v9489_v7  ;;  %v4077_v58 = vrot.slane %v4076_v51, 4  ;;  %v4087_v26 = vrot.slane %v4086_v21, 4 }
 0x138   : > { %v6103_v8 = vpop.f32.mrf.mxu1  ;;  %v4656_v60 = vrot.slane %v4654_v13, 4  ;;  %v4657_v38 = vrot.slane %v8706_v62, 5  ;;  %v6154_v39 = vpop.f32.mrf.mxu0  ;;  %v9490_v59 = vcombine.low %v8490_v50, %v8494_v17  ;;  %v8758_v0 = vsel %vm7026_vm5, %v5767_v22, %v4647_v10  ;;  %v5753_v22 = vld [vmem:[%s6669_s25 + $0xa8] sm:$0xe] }
 0x139   : > { %v8750_v16 = vadd.f32 %v1588_v24, %v1136_v54  ;;  %v1147_v6 = vadd.f32 %v6103_v8, %v8387_v40  ;;  %v4100_v51 = vor.u32 %v4099_v12, %v4096_v55  ;;  %v9491_v21 = vcombine.low %v8526_v61, %v8548_v11 }
 0x13a   : > { %v1138_v46 = vpop.f32.mrf.mxu1  ;;  %v4058_v40 = vsel %vm6715_vm2, %v8722_v18, %v8692_v41  ;;  %v4068_v50 = vsel %vm6715_vm2, %v4063_v32, %v8702_v48  ;;  %v8772_v17 = vsel %vm7026_vm5, %v4649_v3, %v4650_v29  ;;  %v4113_v62 = vshll.u32 %v8745_v36, 16  ;;  %v1604_v61 = vpop.f32.mrf.mxu0  ;;  %v5692_v18 = vld [vmem:[%s6669_s25 + $0xb4] sm:$0xf]  ;;  %v9492_v48 = vld [vmem:[#allocation18_spill] sm:$0xff]  ;;  %v8801_v3 = vld [vmem:[%s6669_s25 + $0xb8] sm:$0xf] }
 0x13b   : > { %6441 = vmatmul.mubr.bf16.gmra.mxu0 %v9490_v59  ;;  %v8776_v54 = vadd.f32 %v6151_v9, %v1147_v6  ;;  %v1139_v11 = vadd.f32 %v1138_v46, %v8421_v47  ;;  %v4110_v10 = vor.u32 %v4109_v34, %v8747_v49  ;;  %v4661_v41 = vrot.slane %v8711_v15, 5  ;;  %v9493_v9 = vld [vmem:[#allocation13_spill] sm:$0xff] }
 0x13c   : > { %6444 = vmatprep.mubr.bf16.mxu0 %v9491_v21  ;;  %v6106_v24 = vpop.f32.mrf.mxu1  ;;  %6393 = vmatmul.mubr.bf16.gmra.mxu1 %v9492_v48  ;;  %v4082_v32 = vsel %vm6715_vm2, %v4077_v58, %v8708_v45  ;;  %v4092_v29 = vsel %vm6715_vm2, %v4087_v26, %v4091_v19  ;;  %v8790_v47 = vsel %vm7026_vm5, %v5768_v30, %v4654_v13  ;;  %v6155_v12 = vpop.f32.mrf.mxu0  ;;  %v4101_v63 = vrot.slane %v4100_v51, 4  ;;  %v9494_v58 = vld [vmem:[#allocation15_spill] sm:$0xff]  ;;  %v9498_v48 = vld [vmem:[#allocation20_spill] sm:$0xff] }
 0x13d   : > { %v8794_v1 = vsel %vm7026_vm5, %v4656_v60, %v4657_v38  ;;  %v8796_v15 = vadd.f32 %v1591_v4, %v1139_v11  ;;  %v1160_v55 = vadd.f32 %v6106_v24, %v9493_v9  ;;  %6396 = vmatprep.mubr.bf16.mxu1 %v8630_v43  ;;  %v5769_v45 = vrot.slane %v5753_v22, 9 }
 0x13e   : > { %v1151_v19 = vpop.f32.mrf.mxu1  ;;  %v4115_v7 = vrot.slane %v4113_v62, 5  ;;  %v4664_v13 = vrot.slane %v8745_v36, 5  ;;  %v4118_v30 = vshrl.u32 %v5692_v18, 16  ;;  %v4121_v34 = vshll.u32 %v5692_v18, 16  ;;  %v1607_v26 = vpop.f32.mrf.mxu0 }
 0x13f   : > { %v8804_v8 = vadd.f32 %v6154_v39, %v1160_v55  ;;  %v1152_v4 = vadd.f32 %v1151_v19, %v9494_v58  ;;  %v4111_v60 = vrot.slane %v4110_v10, 4  ;;  %v4663_v38 = vrot.slane %v4661_v41, 4  ;;  %v9495_v39 = vld [vmem:[#allocation17_spill] sm:$0xff] }
 0x140   : > { %v6107_v43 = vpop.f32.mrf.mxu1  ;;  %v8807_v6 = vcombine.low %v4058_v40, %v4068_v50  ;;  %v5799_v59 = vcombine.low %v8758_v0, %v8772_v17  ;;  %v8811_v51 = vcombine.low %v4082_v32, %v4092_v29  ;;  %v4127_v36 = vshll.u32 %v8801_v3, 16  ;;  %v6158_v62 = vpop.f32.mrf.mxu0  ;;  %v5695_v50 = vld [vmem:[%s6669_s25 + $0xc0] sm:$0xf]  ;;  %v8825_v17 = vld [vmem:[%s6669_s25 + $0xc4] sm:$0xf] }
 0x141   : > { %v8814_v46 = vadd.f32 %v1604_v61, %v1152_v4  ;;  %v1163_v21 = vadd.f32 %v6107_v43, %v9495_v39  ;;  %v9496_v22 = vcombine.low %v8588_v52, %v8609_v56  ;;  %v5800_v40 = vcombine.low %v8790_v47, %v8794_v1  ;;  %v9503_v47 = vld [vmem:[#allocation6_spill] sm:$0xff] }
 0x142   : > { %v4131_v0 = vshrl.u32 %v8801_v3, 16  ;;  %v1154_v11 = vpop.f32.mrf.mxu1  ;;  %v9497_v61 = vcombine.low %v8638_v14, %v8653_v31  ;;  %v4106_v52 = vsel %vm6715_vm2, %v4101_v63, %v8747_v49  ;;  %v8835_v56 = vsel %vm7026_vm5, %v5769_v45, %v4661_v41  ;;  %v1620_v29 = vpop.f32.mrf.mxu0  ;;  %v8847_v31 = vld [vmem:[%s6669_s25 + $0xbc] sm:$0x1]  ;;  %v5754_v49 = vld [vmem:[%s6669_s25 + $0xb4] sm:$0xe] }
 0x143   : > { %6445 = vmatmul.mubr.bf16.gmra.mxu0 %v9496_v22  ;;  %v4120_v10 = vrot.slane %v4118_v30, 4  ;;  %v4123_v18 = vrot.slane %v4121_v34, 5  ;;  %v8837_v24 = vadd.f32 %v6155_v12, %v1163_v21  ;;  %v1155_v32 = vadd.f32 %v1154_v11, %v9498_v48  ;;  %v8869_v21 = vld [vmem:[%s6669_s25 + $0xc8] sm:$0x1] }
 0x144   : > { %6448 = vmatprep.mubr.bf16.mxu0 %v9497_v61  ;;  %v4116_v9 = vsel %vm6715_vm2, %v4111_v60, %v4115_v7  ;;  %v8844_v14 = vsel %vm7026_vm5, %v4663_v38, %v4664_v13  ;;  %v6110_v55 = vpop.f32.mrf.mxu1  ;;  %6397 = vmatmul.mubr.bf16.gmra.mxu1 %v8632_v53  ;;  %v8851_v41 = vrot.slane %v4127_v36, 5  ;;  %v4142_v12 = vshrl.u32 %v5695_v50, 16  ;;  %v6159_v30 = vpop.f32.mrf.mxu0 }
 0x145   : > { %v4145_v63 = vshll.u32 %v5695_v50, 16  ;;  %v4151_v45 = vshll.u32 %v8825_v17, 16  ;;  %v8854_v19 = vadd.f32 %v1607_v26, %v1155_v32  ;;  %v1176_v7 = vadd.f32 %v6110_v55, %v8572_v44  ;;  %6400 = vmatprep.mubr.bf16.mxu1 %v8688_v23 }
 0x146   : > { %v4133_v13 = vrot.slane %v4131_v0, 4  ;;  %v4155_v34 = vshrl.u32 %v8825_v17, 16  ;;  %v1167_v58 = vpop.f32.mrf.mxu1  ;;  %v4124_v4 = vor.u32 %v4123_v18, %v4120_v10  ;;  %v4137_v53 = vshll.u32 %v8847_v31, 16  ;;  %v1623_v44 = vpop.f32.mrf.mxu0  ;;  %v5698_v10 = vld [vmem:[%s6669_s25 + $0xcc] sm:$0xf] }
 0x147   : > { %v5770_v60 = vrot.slane %v5754_v49, 9  ;;  %v4668_v38 = vrot.slane %v8801_v3, 5  ;;  %v8861_v43 = vadd.f32 %v6158_v62, %v1176_v7  ;;  %v1168_v26 = vadd.f32 %v1167_v58, %v8591_v2  ;;  %v5755_v49 = vld [vmem:[%s6669_s25 + $0xc0] sm:$0xe] }
 0x148   : > { %v8864_v36 = vcombine.low %v4106_v52, %v4116_v9  ;;  %v5801_v23 = vcombine.low %v8835_v56, %v8844_v14  ;;  %v6111_v39 = vpop.f32.mrf.mxu1  ;;  %v4144_v22 = vrot.slane %v4142_v12, 4  ;;  %v4147_v0 = vrot.slane %v4145_v63, 5  ;;  %v6162_v11 = vpop.f32.mrf.mxu0  ;;  %v8891_v9 = vld [vmem:[%s6669_s25 + $0xd0] sm:$0xf] }
 0x149   : > { %v8871_v50 = vrot.slane %v4151_v45, 5  ;;  %v4157_v3 = vrot.slane %v4155_v34, 4  ;;  %v8873_v62 = vadd.f32 %v1620_v29, %v1168_v26  ;;  %v1179_v2 = vadd.f32 %v6111_v39, %v8611_v27 }
 0x14a   : > { %v9499_v61 = vcombine.low %v8667_v20, %v8677_v37  ;;  %v4134_v52 = vor.u32 %v4133_v13, %v8851_v41  ;;  %v4671_v56 = vrot.slane %v8847_v31, 5  ;;  %v1170_v18 = vpop.f32.mrf.mxu1  ;;  %v8882_v48 = vrot.slane %v4124_v4, 4  ;;  %v1636_v14 = vpop.f32.mrf.mxu0 }
 0x14b   : > { %v8884_v32 = vrot.slane %v4137_v53, 5  ;;  %v8888_v27 = vsel %vm7026_vm5, %v5770_v60, %v4668_v38  ;;  %v4670_v29 = vrot.slane %v4668_v38, 4  ;;  %v8893_v20 = vadd.f32 %v6159_v30, %v1179_v2  ;;  %v9500_v30 = vld [vmem:[#allocation2_spill] sm:$0xff] }
 0x14c   : > { %6449 = vmatmul.mubr.bf16.gmra.mxu0 %v9499_v61  ;;  %v1171_v37 = vadd.f32 %v1170_v18, %v8620_v35  ;;  %v4161_v31 = vshll.u32 %v8869_v21, 16  ;;  %v6114_v55 = vpop.f32.mrf.mxu1  ;;  %6401 = vmatmul.mubr.bf16.gmra.mxu1 %v8694_v5  ;;  %v4148_v12 = vor.u32 %v4147_v0, %v4144_v22  ;;  %v4158_v63 = vor.u32 %v4157_v3, %v8871_v50  ;;  %v6163_v58 = vpop.f32.mrf.mxu0 }
 0x14d   : > { %6452 = vmatprep.mubr.bf16.mxu0 %v5799_v59  ;;  %v4675_v59 = vrot.slane %v8825_v17, 5  ;;  %v4166_v45 = vshrl.u32 %v5698_v10, 16  ;;  %v4169_v7 = vshll.u32 %v5698_v10, 16  ;;  %v1192_v34 = vadd.f32 %v6114_v55, %v9500_v30  ;;  %6404 = vmatprep.mubr.bf16.mxu1 %v8807_v6 }
 0x14e   : > { %v8901_v13 = vadd.f32 %v1623_v44, %v1171_v37  ;;  %v4175_v35 = vshll.u32 %v8891_v9, 16  ;;  %v4179_v4 = vshrl.u32 %v8891_v9, 16  ;;  %v1183_v17 = vpop.f32.mrf.mxu1  ;;  %v4135_v53 = vrot.slane %v4134_v52, 4  ;;  %v9501_v44 = vld [vmem:[#allocation5_spill] sm:$0xff]  ;;  %v1639_v22 = vpop.f32.mrf.mxu0  ;;  %v9502_v37 = vld [vmem:[#allocation4_spill] sm:$0xff] }
 0x14f   : > { %v4672_v5 = vsel %vm7026_vm5, %v4670_v29, %v4671_v56  ;;  %v5771_v60 = vrot.slane %v5755_v49, 9  ;;  %v4678_v38 = vrot.slane %v8869_v21, 5  ;;  %v8910_v26 = vadd.f32 %v6162_v11, %v1192_v34  ;;  %v5700_v21 = vld [vmem:[%s6669_s25 + $0xd4] sm:$0x1] }
 0x150   : > { %v1184_v39 = vadd.f32 %v1183_v17, %v9501_v44  ;;  %v4163_v0 = vrot.slane %v4161_v31, 5  ;;  %v4677_v6 = vrot.slane %v4675_v59, 4  ;;  %v6115_v3 = vpop.f32.mrf.mxu1  ;;  %v4149_v2 = vrot.slane %v4148_v12, 4 }
 0x151   : > { %v4159_v61 = vrot.slane %v4158_v63, 4  ;;  %v4168_v10 = vrot.slane %v4166_v45, 4  ;;  %v4171_v18 = vrot.slane %v4169_v7, 5  ;;  %v1195_v56 = vadd.f32 %v6115_v3, %v9502_v37  ;;  %v6166_v29 = vpop.f32.mrf.mxu0  ;;  %v5756_v7 = vld [vmem:[%s6669_s25 + $0xcc] sm:$0xe] }
 0x152   : > { %v8913_v52 = vadd.f32 %v1636_v14, %v1184_v39  ;;  %v8920_v11 = vrot.slane %v4175_v35, 5  ;;  %v4181_v31 = vrot.slane %v4179_v4, 4  ;;  %v1186_v49 = vpop.f32.mrf.mxu1  ;;  %v4130_v14 = vsel %vm6715_vm2, %v8882_v48, %v8851_v41 }
 0x153   : > { %v4140_v55 = vsel %vm6715_vm2, %v4135_v53, %v8884_v32  ;;  %v4682_v12 = vrot.slane %v8891_v9, 5  ;;  %v8930_v63 = vadd.f32 %v6163_v58, %v1195_v56  ;;  %v1187_v1 = vadd.f32 %v1186_v49, %v9503_v47  ;;  %v9504_v58 = vld [vmem:[#allocation8_spill] sm:$0xff] }
 0x154   : > { %6453 = vmatmul.mubr.bf16.gmra.mxu0 %v5800_v40  ;;  %v1652_v40 = vpop.f32.mrf.mxu0  ;;  %v4676_v45 = vsel %vm7026_vm5, %v5771_v60, %v4675_v59  ;;  %v6118_v30 = vpop.f32.mrf.mxu1  ;;  %6405 = vmatmul.mubr.bf16.gmra.mxu1 %v8811_v51  ;;  %v5802_v41 = vcombine.low %v8888_v27, %v4672_v5  ;;  %v4154_v48 = vsel %vm6715_vm2, %v4149_v2, %v8871_v50  ;;  %v4185_v9 = vshll.u32 %v5700_v21, 16  ;;  %v9507_v49 = vld [vmem:[#allocation12_spill] sm:$0xff] }
 0x155   : > { %6456 = vmatprep.mubr.bf16.mxu0 %v5801_v23  ;;  %v4679_v23 = vsel %vm7026_vm5, %v4677_v6, %v4678_v38  ;;  %v4172_v32 = vor.u32 %v4171_v18, %v4168_v10  ;;  %v8943_v34 = vadd.f32 %v1639_v22, %v1187_v1  ;;  %v1208_v35 = vadd.f32 %v6118_v30, %v9504_v58  ;;  %v9505_v38 = vld [vmem:[#allocation10_spill] sm:$0xff]  ;;  %v9506_v10 = vld [vmem:[#allocation11_spill] sm:$0xff] }
 0x156   : > { %v6167_v59 = vpop.f32.mrf.mxu0  ;;  %6408 = vmatprep.mubr.bf16.mxu1 %v8864_v36  ;;  %v4164_v4 = vsel %vm6715_vm2, %v4159_v61, %v4163_v0  ;;  %v4182_v51 = vor.u32 %v4181_v31, %v8920_v11  ;;  %v1199_v17 = vpop.f32.mrf.mxu1  ;;  %v5803_v27 = vcombine.low %v4676_v45, %v4679_v23  ;;  %v5772_v53 = vrot.slane %v5756_v7, 9  ;;  %v9508_v45 = vld [vmem:[#allocation14_spill] sm:$0xff] }
 0x157   : > { %v4684_v5 = vrot.slane %v4682_v12, 4  ;;  %v4685_v60 = vrot.slane %v5700_v21, 5  ;;  %v8950_v50 = vadd.f32 %v6166_v29, %v1208_v35  ;;  %v1200_v44 = vadd.f32 %v1199_v17, %v9505_v38  ;;  %v9511_v38 = vld [vmem:[#allocation21_spill] sm:$0xff] }
 0x158   : > { %v1655_v39 = vpop.f32.mrf.mxu0  ;;  %v6119_v22 = vpop.f32.mrf.mxu1  ;;  %v5730_v6 = vcombine.low %v4130_v14, %v4140_v55  ;;  %v5731_v3 = vcombine.low %v4154_v48, %v4164_v4  ;;  %v4173_v2 = vrot.slane %v4172_v32, 4  ;;  %v4183_v18 = vrot.slane %v4182_v51, 4  ;;  %v9509_v48 = vld [vmem:[#allocation16_spill] sm:$0xff] }
 0x159   : > { %v8953_v36 = vadd.f32 %v1652_v40, %v1200_v44  ;;  %v1211_v0 = vadd.f32 %v6119_v22, %v9506_v10  ;;  %v4187_v37 = vrot.slane %v4185_v9, 5  ;;  %v4683_v29 = vsel %vm7026_vm5, %v5772_v53, %v4682_v12 }
 0x15a   : > { %v6170_v61 = vpop.f32.mrf.mxu0  ;;  %v1202_v56 = vpop.f32.mrf.mxu1  ;;  %v4686_v21 = vsel %vm7026_vm5, %v4684_v5, %v4685_v60  ;;  %v4178_v1 = vsel %vm6715_vm2, %v4173_v2, %v8920_v11  ;;  %v9510_v11 = vld [vmem:[#allocation19_spill] sm:$0xff] }
 0x15b   : > { %v8960_v31 = vadd.f32 %v6167_v59, %v1211_v0  ;;  %v1203_v14 = vadd.f32 %v1202_v56, %v9507_v49  ;;  %v4188_v57 = vsel %vm6715_vm2, %v4183_v18, %v4187_v37  ;;  %v5804_v12 = vcombine.low %v4683_v29, %v4686_v21  ;;  %v9513_v18 = vld [vmem:[#allocation23_spill] sm:$0xff]  ;;  %v9514_v21 = vld [vmem:[#allocation24_spill] sm:$0xff] }
 0x15c   : > { %6457 = vmatmul.mubr.bf16.gmra.mxu0 %v5802_v41  ;;  %v1668_v55 = vpop.f32.mrf.mxu0  ;;  %v6122_v47 = vpop.f32.mrf.mxu1  ;;  %6409 = vmatmul.mubr.bf16.gmra.mxu1 %v5730_v6  ;;  %v5732_v35 = vcombine.low %v4178_v1, %v4188_v57  ;;  %v9515_v1 = vld [vmem:[#allocation25_spill] sm:$0xff] }
 0x15d   : > { %6460 = vmatprep.mubr.bf16.mxu0 %v5803_v27  ;;  %v8966_v40 = vadd.f32 %v1655_v39, %v1203_v14  ;;  %v1224_v23 = vadd.f32 %v6122_v47, %v9508_v45  ;;  %6412 = vmatprep.mubr.bf16.mxu1 %v5731_v3  ;;  %v9512_v3 = vld [vmem:[#allocation22_spill] sm:$0xff] }
 0x15e   : > { %v6171_v7 = vpop.f32.mrf.mxu0  ;;  %v1215_v30 = vpop.f32.mrf.mxu1 }
 0x15f   : > { %v8971_v41 = vadd.f32 %v6170_v61, %v1224_v23  ;;  %v1216_v32 = vadd.f32 %v1215_v30, %v9509_v48 }
 0x160   : > { %v1671_v9 = vpop.f32.mrf.mxu0  ;;  %v6123_v58 = vpop.f32.mrf.mxu1 }
 0x161   : > { %v8974_v59 = vadd.f32 %v1668_v55, %v1216_v32  ;;  %v1227_v4 = vadd.f32 %v6123_v58, %v9510_v11  ;;  %v9517_v58 = vld [vmem:[#allocation27_spill] sm:$0xff] }
 0x162   : > { %v6174_v51 = vpop.f32.mrf.mxu0  ;;  %v1218_v17 = vpop.f32.mrf.mxu1 }
 0x163   : > { %v8977_v27 = vadd.f32 %v6171_v7, %v1227_v4  ;;  %v1219_v28 = vadd.f32 %v1218_v17, %v8567_v33 }
 0x164   : > { %6461 = vmatmul.mubr.bf16.gmra.mxu0 %v5804_v12  ;;  %v1684_v53 = vpop.f32.mrf.mxu0  ;;  %v6126_v5 = vpop.f32.mrf.mxu1  ;;  %6413 = vmatmul.mubr.bf16.gmra.mxu1 %v5732_v35  ;;  %v9516_v12 = vld [vmem:[#allocation26_spill] sm:$0xff] }
 0x165   : > { %v8980_v60 = vadd.f32 %v1671_v9, %v1219_v28  ;;  %v1240_v44 = vadd.f32 %v6126_v5, %v9511_v38 }
 0x166   : > { %v6175_v39 = vpop.f32.mrf.mxu0  ;;  %v1231_v22 = vpop.f32.mrf.mxu1 }
 0x167   : > { %v8983_v6 = vadd.f32 %v6174_v51, %v1240_v44  ;;  %v1232_v2 = vadd.f32 %v1231_v22, %v9512_v3 }
 0x168   : > { %v1687_v10 = vpop.f32.mrf.mxu0  ;;  %v6127_v0 = vpop.f32.mrf.mxu1 }
 0x169   : > { %v8986_v61 = vadd.f32 %v1684_v53, %v1232_v2  ;;  %v1243_v37 = vadd.f32 %v6127_v0, %v9513_v18 }
 0x16a   : > { %v6242_v33 = vpop.f32.mrf.mxu0  ;;  %v1234_v56 = vpop.f32.mrf.mxu1 }
 0x16b   : > { %v8989_v29 = vadd.f32 %v6175_v39, %v1243_v37  ;;  %v1235_v49 = vadd.f32 %v1234_v56, %v9514_v21 }
 0x16c   : > { %v2713_v14 = vpop.f32.mrf.mxu0  ;;  %v6194_v55 = vpop.f32.mrf.mxu1 }
 0x16d   : > { %v8992_v47 = vadd.f32 %v1687_v10, %v1235_v49  ;;  %v2088_v45 = vadd.f32 %v6194_v55, %v9515_v1 }
 0x16e   : > { %v6243_v23 = vpop.f32.mrf.mxu0  ;;  %v1959_v7 = vpop.f32.mrf.mxu1 }
 0x16f   : > { %v8995_v57 = vadd.f32 %v6242_v33, %v2088_v45  ;;  %v2086_v30 = vadd.f32 %v1959_v7, %v9516_v12 }
 0x170   : > { %v2716_v48 = vpop.f32.mrf.mxu0  ;;  %v6195_v32 = vpop.f32.mrf.mxu1 }
 0x171   : > { %v8998_v9 = vadd.f32 %v2713_v14, %v2086_v30  ;;  %v2089_v35 = vadd.f32 %v6195_v32, %v9517_v58 }
 0x172   : > { %v6246_v11 = vpop.f32.mrf.mxu0  ;;  %v1962_v4 = vpop.f32.mrf.mxu1 }
 0x173   : > { %v9001_v51 = vadd.f32 %v6243_v23, %v2089_v35  ;;  %v2087_v17 = vadd.f32 %v1962_v4, %v8737_v25 }
 0x174   : > { %v2729_v28 = vpop.f32.mrf.mxu0  ;;  %v6198_v53 = vpop.f32.mrf.mxu1 }
 0x175   : > { %v9004_v5 = vadd.f32 %v2716_v48, %v2087_v17  ;;  %v2092_v38 = vadd.f32 %v6198_v53, %v8741_v42 }
 0x176   : > { %v6247_v44 = vpop.f32.mrf.mxu0  ;;  %v1975_v39 = vpop.f32.mrf.mxu1 }
 0x177   : > { %v9007_v22 = vadd.f32 %v6246_v11, %v2092_v38  ;;  %v2090_v3 = vadd.f32 %v1975_v39, %v8750_v16 }
 0x178   : > { %v2732_v2 = vpop.f32.mrf.mxu0  ;;  %v6199_v10 = vpop.f32.mrf.mxu1 }
 0x179   : > { %v9010_v0 = vadd.f32 %v2729_v28, %v2090_v3  ;;  %v2093_v18 = vadd.f32 %v6199_v10, %v8776_v54 }
 0x17a   : > { %v6250_v37 = vpop.f32.mrf.mxu0  ;;  %v1978_v25 = vpop.f32.mrf.mxu1 }
 0x17b   : > { %v9013_v33 = vadd.f32 %v6247_v44, %v2093_v18  ;;  %v2091_v56 = vadd.f32 %v1978_v25, %v8796_v15 }
 0x17c   : > { %v2745_v21 = vpop.f32.mrf.mxu0  ;;  %v6202_v42 = vpop.f32.mrf.mxu1 }
 0x17d   : > { %v9016_v49 = vadd.f32 %v2732_v2, %v2091_v56  ;;  %v2096_v14 = vadd.f32 %v6202_v42, %v8804_v8 }
 0x17e   : > { %v6251_v55 = vpop.f32.mrf.mxu0  ;;  %v1991_v16 = vpop.f32.mrf.mxu1 }
 0x17f   : > { %v9019_v1 = vadd.f32 %v6250_v37, %v2096_v14  ;;  %v2094_v45 = vadd.f32 %v1991_v16, %v8814_v46 }
 0x180   : > { %v2748_v23 = vpop.f32.mrf.mxu0  ;;  %v6203_v54 = vpop.f32.mrf.mxu1 }
 0x181   : > { %v9022_v7 = vadd.f32 %v2745_v21, %v2094_v45  ;;  %v2097_v12 = vadd.f32 %v6203_v54, %v8837_v24 }
 0x182   : > { %v6254_v30 = vpop.f32.mrf.mxu0  ;;  %v1994_v15 = vpop.f32.mrf.mxu1 }
 0x183   : > { %v9025_v48 = vadd.f32 %v6251_v55, %v2097_v12  ;;  %v2095_v32 = vadd.f32 %v1994_v15, %v8854_v19 }
 0x184   : > { %v2761_v58 = vpop.f32.mrf.mxu0  ;;  %v6206_v8 = vpop.f32.mrf.mxu1 }
 0x185   : > { %v9028_v35 = vadd.f32 %v2748_v23, %v2095_v32  ;;  %v2100_v11 = vadd.f32 %v6206_v8, %v8861_v43 }
 0x186   : > { %v6255_v4 = vpop.f32.mrf.mxu0  ;;  %v2007_v46 = vpop.f32.mrf.mxu1 }
 0x187   : > { %v9031_v17 = vadd.f32 %v6254_v30, %v2100_v11  ;;  %v2098_v28 = vadd.f32 %v2007_v46, %v8873_v62 }
 0x188   : > { %v2764_v53 = vpop.f32.mrf.mxu0  ;;  %v6207_v24 = vpop.f32.mrf.mxu1 }
 0x189   : > { %v9034_v38 = vadd.f32 %v2761_v58, %v2098_v28  ;;  %v2101_v44 = vadd.f32 %v6207_v24, %v8893_v20 }
 0x18a   : > { %v6258_v39 = vpop.f32.mrf.mxu0  ;;  %v2010_v19 = vpop.f32.mrf.mxu1 }
 0x18b   : > { %v9037_v3 = vadd.f32 %v6255_v4, %v2101_v44  ;;  %v2099_v2 = vadd.f32 %v2010_v19, %v8901_v13 }
 0x18c   : > { %v2777_v10 = vpop.f32.mrf.mxu0  ;;  %v6210_v43 = vpop.f32.mrf.mxu1 }
 0x18d   : > { %v9040_v18 = vadd.f32 %v2764_v53, %v2099_v2  ;;  %v2104_v37 = vadd.f32 %v6210_v43, %v8910_v26 }
 0x18e   : > { %v6259_v25 = vpop.f32.mrf.mxu0  ;;  %v2023_v62 = vpop.f32.mrf.mxu1 }
 0x18f   : > { %v9043_v56 = vadd.f32 %v6258_v39, %v2104_v37  ;;  %v2102_v21 = vadd.f32 %v2023_v62, %v8913_v52 }
 0x190   : > { %v2780_v42 = vpop.f32.mrf.mxu0  ;;  %v6211_v20 = vpop.f32.mrf.mxu1 }
 0x191   : > { %v9046_v14 = vadd.f32 %v2777_v10, %v2102_v21  ;;  %v2105_v55 = vadd.f32 %v6211_v20, %v8930_v63 }
 0x192   : > { %v6262_v16 = vpop.f32.mrf.mxu0  ;;  %v2026_v13 = vpop.f32.mrf.mxu1 }
 0x193   : > { %v9049_v45 = vadd.f32 %v6259_v25, %v2105_v55  ;;  %v2103_v23 = vadd.f32 %v2026_v13, %v8943_v34 }
 0x194   : > { %v2793_v54 = vpop.f32.mrf.mxu0  ;;  %v6214_v26 = vpop.f32.mrf.mxu1 }
 0x195   : > { %9518 = vst [vmem:[#allocation3_spill] sm:$0xff] %v9049_v45  ;;  %v9052_v12 = vadd.f32 %v2780_v42, %v2103_v23  ;;  %v2108_v30 = vadd.f32 %v6214_v26, %v8950_v50 }
 0x196   : > { %v6263_v15 = vpop.f32.mrf.mxu0  ;;  %v2039_v52 = vpop.f32.mrf.mxu1 }
 0x197   : > { %9519 = vst [vmem:[#allocation7_spill] sm:$0xff] %v9052_v12  ;;  %v9055_v32 = vadd.f32 %v6262_v16, %v2108_v30  ;;  %v2106_v58 = vadd.f32 %v2039_v52, %v8953_v36 }
 0x198   : > { %v2796_v8 = vpop.f32.mrf.mxu0  ;;  %v6215_v63 = vpop.f32.mrf.mxu1 }
 0x199   : > { %9520 = vst [vmem:[#allocation9_spill] sm:$0xff] %v9055_v32  ;;  %v9058_v11 = vadd.f32 %v2793_v54, %v2106_v58  ;;  %v2109_v4 = vadd.f32 %v6215_v63, %v8960_v31 }
 0x19a   : > { %v6266_v46 = vpop.f32.mrf.mxu0  ;;  %v2042_v34 = vpop.f32.mrf.mxu1 }
 0x19b   : > { %9521 = vst [vmem:[#allocation18_spill] sm:$0xff] %v9058_v11  ;;  %v9061_v28 = vadd.f32 %v6263_v15, %v2109_v4  ;;  %v2107_v53 = vadd.f32 %v2042_v34, %v8966_v40 }
 0x19c   : > { %v2809_v24 = vpop.f32.mrf.mxu0  ;;  %v6218_v50 = vpop.f32.mrf.mxu1 }
 0x19d   : > { %9522 = vst [vmem:[#allocation13_spill] sm:$0xff] %v9061_v28  ;;  %v9064_v44 = vadd.f32 %v2796_v8, %v2107_v53  ;;  %v2112_v39 = vadd.f32 %v6218_v50, %v8971_v41 }
 0x19e   : > { %v6267_v19 = vpop.f32.mrf.mxu0  ;;  %v2055_v36 = vpop.f32.mrf.mxu1 }
 0x19f   : > { %9523 = vst [vmem:[#allocation15_spill] sm:$0xff] %v9064_v44  ;;  %v9067_v2 = vadd.f32 %v6266_v46, %v2112_v39  ;;  %v2110_v10 = vadd.f32 %v2055_v36, %v8974_v59 }
 0x1a0   : > { %v2812_v43 = vpop.f32.mrf.mxu0  ;;  %v6219_v31 = vpop.f32.mrf.mxu1 }
 0x1a1   : > { %9524 = vst [vmem:[#allocation17_spill] sm:$0xff] %v9067_v2  ;;  %v9070_v37 = vadd.f32 %v2809_v24, %v2110_v10  ;;  %v2113_v25 = vadd.f32 %v6219_v31, %v8977_v27 }
 0x1a2   : > { %v6270_v62 = vpop.f32.mrf.mxu0  ;;  %v2058_v40 = vpop.f32.mrf.mxu1 }
 0x1a3   : > { %9525 = vst [vmem:[#allocation20_spill] sm:$0xff] %v9070_v37  ;;  %v9073_v21 = vadd.f32 %v6267_v19, %v2113_v25  ;;  %v2111_v42 = vadd.f32 %v2058_v40, %v8980_v60 }
 0x1a4   : > { %v2825_v20 = vpop.f32.mrf.mxu0  ;;  %v6222_v41 = vpop.f32.mrf.mxu1 }
 0x1a5   : > { %9526 = vst [vmem:[#allocation2_spill] sm:$0xff] %v9073_v21  ;;  %v9076_v55 = vadd.f32 %v2812_v43, %v2111_v42  ;;  %v2116_v16 = vadd.f32 %v6222_v41, %v8983_v6 }
 0x1a6   : > { %v6271_v13 = vpop.f32.mrf.mxu0  ;;  %v2071_v59 = vpop.f32.mrf.mxu1 }
 0x1a7   : > { %9527 = vst [vmem:[#allocation5_spill] sm:$0xff] %v9076_v55  ;;  %v9079_v23 = vadd.f32 %v6270_v62, %v2116_v16  ;;  %v2114_v54 = vadd.f32 %v2071_v59, %v8986_v61 }
 0x1a8   : > { %v2828_v26 = vpop.f32.mrf.mxu0  ;;  %v6223_v27 = vpop.f32.mrf.mxu1 }
 0x1a9   : > { %9528 = vst [vmem:[#allocation4_spill] sm:$0xff] %v9079_v23  ;;  %v9082_v30 = vadd.f32 %v2825_v20, %v2114_v54  ;;  %v2117_v15 = vadd.f32 %v6223_v27, %v8989_v29 }
 0x1aa   : > { %v9085_v52 = vpop.f32.mrf.mxu0  ;;  %v2074_v60 = vpop.f32.mrf.mxu1 }
 0x1ab   : > { %9529 = vst [vmem:[#allocation6_spill] sm:$0xff] %v9082_v30  ;;  %v9087_v58 = vadd.f32 %v6271_v13, %v2117_v15  ;;  %v2115_v8 = vadd.f32 %v2074_v60, %v8992_v47 }
 0x1ac   : > { %v9090_v6 = vpop.f32.mrf.mxu0  ;;  %v6290_v63 = vpop.f32.mrf.mxu1 }
 0x1ad   : > { %9530 = vst [vmem:[#allocation8_spill] sm:$0xff] %v9087_v58  ;;  %v9092_v4 = vadd.f32 %v2828_v26, %v2115_v8 }
 0x1ae   : > { %v9094_v46 = vpop.f32.mrf.mxu0  ;;  %v3211_v61 = vpop.f32.mrf.mxu1 }
 0x1af   : > { %9531 = vst [vmem:[#allocation10_spill] sm:$0xff] %v9092_v4 }
 0x1b0   : > { %v9096_v34 = vpop.f32.mrf.mxu0  ;;  %v6291_v53 = vpop.f32.mrf.mxu1 }
 0x1b2   : > { %v9098_v24 = vpop.f32.mrf.mxu0  ;;  %v9100_v29 = vpop.f32.mrf.mxu1 }
 0x1b4   : > { %v9102_v50 = vpop.f32.mrf.mxu0  ;;  %v9104_v39 = vpop.f32.mrf.mxu1 }
 0x1b6   : > { %v9106_v47 = vpop.f32.mrf.mxu0  ;;  %v9108_v19 = vpop.f32.mrf.mxu1 }
 0x1b8   : > { %v9110_v36 = vpop.f32.mrf.mxu0  ;;  %v9112_v10 = vpop.f32.mrf.mxu1 }
 0x1ba   : > { %v9114_v43 = vpop.f32.mrf.mxu0  ;;  %v9116_v31 = vpop.f32.mrf.mxu1 }
 0x1bc   : > { %v9118_v25 = vpop.f32.mrf.mxu0  ;;  %v9120_v62 = vpop.f32.mrf.mxu1 }
 0x1be   : > { %v9122_v40 = vpop.f32.mrf.mxu0  ;;  %v9124_v42 = vpop.f32.mrf.mxu1 }
 0x1c0   : > { %v9126_v20 = vpop.f32.mrf.mxu0  ;;  %v9128_v41 = vpop.f32.mrf.mxu1 }
 0x1c2   : > { %v9130_v16 = vpop.f32.mrf.mxu0  ;;  %v9132_v13 = vpop.f32.mrf.mxu1 }
 0x1c4   : > { %v9134_v59 = vpop.f32.mrf.mxu0  ;;  %v9136_v54 = vpop.f32.mrf.mxu1 }
 0x1c6   : > { %v9138_v26 = vpop.f32.mrf.mxu0  ;;  %v9140_v27 = vpop.f32.mrf.mxu1 }
 0x1c8   : > { %v9142_v15 = vpop.f32.mrf.mxu0  ;;  %v9144_v60 = vpop.f32.mrf.mxu1 }
 0x1ca   : > { %v9146_v8 = vpop.f32.mrf.mxu0  ;;  %v9148_v4 = vpop.f32.mrf.mxu1 }
 0x1cc   : > { %v9150_v58 = vpop.f32.mrf.mxu0  ;;  %v9152_v30 = vpop.f32.mrf.mxu1 }
 0x1cd   : > { %9532 = vst [vmem:[#allocation11_spill] sm:$0xff] %v9150_v58 }
 0x1ce   : > { %v9154_v23 = vpop.f32.mrf.mxu0  ;;  %v9156_v55 = vpop.f32.mrf.mxu1 }
 0x1cf   : > { %9533 = vst [vmem:[#allocation12_spill] sm:$0xff] %v9154_v23 }
 0x1d0   : > { %v9158_v21 = vpop.f32.mrf.mxu0  ;;  %v9160_v37 = vpop.f32.mrf.mxu1 }
 0x1d1   : > { %9534 = vst [vmem:[#allocation14_spill] sm:$0xff] %v9158_v21  ;;  %9535 = vst [vmem:[#allocation16_spill] sm:$0xff] %v9160_v37 }
 0x1d2   : > { %v9162_v2 = vpop.f32.mrf.mxu0  ;;  %v9164_v44 = vpop.f32.mrf.mxu1 }
 0x1d3   : > { %9536 = vst [vmem:[#allocation19_spill] sm:$0xff] %v9162_v2  ;;  %9537 = vst [vmem:[#allocation21_spill] sm:$0xff] %v9164_v44 }
 0x1d4   : > { %v9166_v28 = vpop.f32.mrf.mxu0  ;;  %v9168_v11 = vpop.f32.mrf.mxu1 }
 0x1d5   : > { %9538 = vst [vmem:[#allocation22_spill] sm:$0xff] %v9166_v28  ;;  %9539 = vst [vmem:[#allocation23_spill] sm:$0xff] %v9168_v11 }
 0x1d6   : > { %v9170_v32 = vpop.f32.mrf.mxu0  ;;  %v9172_v12 = vpop.f32.mrf.mxu1 }
 0x1d7   : > { %9540 = vst [vmem:[#allocation24_spill] sm:$0xff] %v9170_v32  ;;  %9541 = vst [vmem:[#allocation25_spill] sm:$0xff] %v9172_v12 }
 0x1d8   : > { %v9174_v58 = vpop.f32.mrf.mxu0  ;;  %v9176_v23 = vpop.f32.mrf.mxu1 }
 0x1d9   : > { %9542 = vst [vmem:[#allocation26_spill] sm:$0xff] %v9174_v58  ;;  %9543 = vst [vmem:[#allocation27_spill] sm:$0xff] %v9176_v23 }
 0x1da   : > { %v9178_v45 = vpop.f32.mrf.mxu0  ;;  %v9180_v21 = vpop.f32.mrf.mxu1 }
 0x1db   : > { %9544 = vst [vmem:[#allocation28_spill] sm:$0xff] %v9178_v45  ;;  %9545 = vst [vmem:[#allocation29_spill] sm:$0xff] %v9180_v21 }
 0x1dc   : > { %v9182_v37 = vpop.f32.mrf.mxu0  ;;  %v9184_v2 = vpop.f32.mrf.mxu1 }
 0x1dd   : > { %9546 = vst [vmem:[#allocation30_spill] sm:$0xff] %v9182_v37  ;;  %9547 = vst [vmem:[#allocation31_spill] sm:$0xff] %v9184_v2 }
 0x1de   : > { %v9186_v44 = vpop.f32.mrf.mxu0  ;;  %v9188_v28 = vpop.f32.mrf.mxu1 }
 0x1df   : > { %9548 = vst [vmem:[#allocation32_spill] sm:$0xff] %v9186_v44  ;;  %9549 = vst [vmem:[#allocation33_spill] sm:$0xff] %v9188_v28  ;;  %v3340_v44 = vadd.f32 %v6290_v63, %v8995_v57  ;;  %v3339_v57 = vadd.f32 %v9100_v29, %v9004_v5 }
 0x1e0   : > { %v9190_v11 = vpop.f32.mrf.mxu0  ;;  %v9192_v32 = vpop.f32.mrf.mxu1 }
 0x1e1   : > { %9550 = vst [vmem:[#allocation34_spill] sm:$0xff] %v9190_v11  ;;  %9551 = vst [vmem:[#allocation35_spill] sm:$0xff] %v9192_v32  ;;  %v3338_v11 = vadd.f32 %v3211_v61, %v8998_v9  ;;  %v3344_v61 = vadd.f32 %v9104_v39, %v9007_v22 }
 0x1e2   : > { %v9194_v12 = vpop.f32.mrf.mxu0  ;;  %v9196_v58 = vpop.f32.mrf.mxu1 }
 0x1e3   : > { %9552 = vst [vmem:[#allocation36_spill] sm:$0xff] %v9194_v12  ;;  %9553 = vst [vmem:[#allocation37_spill] sm:$0xff] %v9196_v58  ;;  %v3727_v58 = vadd.f32 %v9085_v52, %v3340_v44 }
 0x1e4   : > { %v9198_v23 = vpop.f32.mrf.mxu0  ;;  %v9200_v45 = vpop.f32.mrf.mxu1 }
 0x1e5   : > { %9554 = vst [vmem:[#allocation38_spill] sm:$0xff] %v9198_v23  ;;  %9555 = vst [vmem:[#allocation39_spill] sm:$0xff] %v9200_v45  ;;  %v3341_v23 = vadd.f32 %v6291_v53, %v9001_v51 }
 0x1e6   : > { %v9202_v21 = vpop.f32.mrf.mxu0  ;;  %v9204_v37 = vpop.f32.mrf.mxu1 }
 0x1e7   : > { %9556 = vst [vmem:[#allocation40_spill] sm:$0xff] %v9202_v21  ;;  %9557 = vst [vmem:[#allocation41_spill] sm:$0xff] %v9204_v37  ;;  %v3725_v37 = vadd.f32 %v9090_v6, %v3338_v11  ;;  %v3728_v9 = vadd.f32 %v9094_v46, %v3341_v23  ;;  %v3342_v11 = vadd.f32 %v9108_v19, %v9010_v0 }
 0x1e8   : > { %v9207_v2 = vpop.f32.mrf.mxu0  ;;  %v9209_v28 = vpop.f32.mrf.mxu1  ;;  %v3731_v23 = vadd.f32 %v9098_v24, %v3344_v61  ;;  %v3343_v46 = vadd.f32 %v9116_v31, %v9016_v49  ;;  %v3348_v24 = vadd.f32 %v9120_v62, %v9019_v1 }
 0x1e9   : > { %9558 = vst [vmem:[#allocation42_spill] sm:$0xff] %v9207_v2  ;;  %9559 = vst [vmem:[#allocation43_spill] sm:$0xff] %v9209_v28  ;;  %v3729_v0 = vadd.f32 %v9102_v50, %v3342_v11  ;;  %v3349_v11 = vadd.f32 %v9128_v41, %v9025_v48 }
 0x1ea   : > { %v9212_v12 = vpop.f32.mrf.mxu1  ;;  %v3730_v50 = vadd.f32 %v9110_v36, %v3343_v46  ;;  %v3735_v62 = vadd.f32 %v9114_v43, %v3348_v24  ;;  %v3352_v24 = vadd.f32 %v9136_v54, %v9031_v17 }
 0x1eb   : > { %v6434_v32 = vpop.f32.mrf.mxu0  ;;  %9560 = vst [vmem:[#allocation44_spill] sm:$0xff] %v9212_v12  ;;  %v3726_v12 = vadd.f32 %v9096_v34, %v3339_v57 }
 0x1ec   : > { %v6386_v21 = vpop.f32.mrf.mxu1 }
 0x1ed   : > { %v4850_v45 = vpop.f32.mrf.mxu0  ;;  %v4481_v63 = vadd.f32 %v6386_v21, %v3727_v58 }
 0x1ee   : > { %v4352_v28 = vpop.f32.mrf.mxu1 }
 0x1ef   : > { %v6435_v2 = vpop.f32.mrf.mxu0  ;;  %v4979_v44 = vadd.f32 %v6434_v32, %v4481_v63  ;;  %v4479_v52 = vadd.f32 %v4352_v28, %v3725_v37  ;;  %v3345_v37 = vadd.f32 %v9112_v10, %v9013_v33 }
 0x1f0   : > { %v6387_v53 = vpop.f32.mrf.mxu1 }
 0x1f1   : > { %v4853_v51 = vpop.f32.mrf.mxu0  ;;  %5011 = vst [vmem:[%s6664_s22 + $0x10] sm:$0xff] %v4979_v44  ;;  %v4977_v5 = vadd.f32 %v4850_v45, %v4479_v52  ;;  %v4482_v21 = vadd.f32 %v6387_v53, %v3728_v9  ;;  %v3732_v49 = vadd.f32 %v9106_v47, %v3345_v37  ;;  %v5084_v9 = vmul.f32 %v4979_v44, %v4979_v44 }
 0x1f2   : > { %v4355_v6 = vpop.f32.mrf.mxu1  ;;  %v3346_v53 = vadd.f32 %v9124_v42, %v9022_v7 }
 0x1f3   : > { %v6438_v58 = vpop.f32.mrf.mxu0  ;;  %5009 = vst [vmem:[%s6664_s22] sm:$0xff] %v4977_v5  ;;  %v4980_v22 = vadd.f32 %v6435_v2, %v4482_v21  ;;  %v4480_v32 = vadd.f32 %v4355_v6, %v3726_v12  ;;  %v5082_v2 = vmul.f32 %v4977_v5, %v4977_v5 }
 0x1f4   : > { %v6390_v34 = vpop.f32.mrf.mxu1  ;;  %v3733_v46 = vadd.f32 %v9118_v25, %v3346_v53 }
 0x1f5   : > { %v4866_v28 = vpop.f32.mrf.mxu0  ;;  %5012 = vst [vmem:[%s6664_s22 + $0x18] sm:$0xff] %v4980_v22  ;;  %v4978_v45 = vadd.f32 %v4853_v51, %v4480_v32  ;;  %v4485_v29 = vadd.f32 %v6390_v34, %v3731_v23  ;;  %v5085_v21 = vmul.f32 %v4980_v22, %v4980_v22  ;;  %v3347_v23 = vadd.f32 %v9132_v13, %v9028_v35 }
 0x1f6   : > { %v4368_v12 = vpop.f32.mrf.mxu1  ;;  %v3736_v34 = vadd.f32 %v9122_v40, %v3349_v11  ;;  %v3351_v11 = vadd.f32 %v9148_v4, %v9040_v18 }
 0x1f7   : > { %v6439_v39 = vpop.f32.mrf.mxu0  ;;  %5010 = vst [vmem:[%s6664_s22 + $0x8] sm:$0xff] %v4978_v45  ;;  %v5042_v19 = vadd.f32 %v4978_v45, %v4977_v5  ;;  %v5083_v57 = vmul.f32 %v4978_v45, %v4978_v45  ;;  %v4983_v33 = vadd.f32 %v6438_v58, %v4485_v29  ;;  %v4483_v10 = vadd.f32 %v4368_v12, %v3729_v0 }
 0x1f8   : > { %v6391_v31 = vpop.f32.mrf.mxu1 }
 0x1f9   : > { %v4869_v63 = vpop.f32.mrf.mxu0  ;;  %v5043_v61 = vadd.f32 %v5042_v19, %v4979_v44  ;;  %v5114_v52 = vadd.f32 %v5083_v57, %v5082_v2  ;;  %5015 = vst [vmem:[%s6664_s22 + $0x30] sm:$0xff] %v4983_v33  ;;  %v4981_v51 = vadd.f32 %v4866_v28, %v4483_v10  ;;  %v4486_v5 = vadd.f32 %v6391_v31, %v3732_v49 }
 0x1fa   : > { %v4371_v47 = vpop.f32.mrf.mxu1  ;;  %v3350_v2 = vadd.f32 %v9140_v27, %v9034_v38  ;;  %v5088_v40 = vmul.f32 %v4983_v33, %v4983_v33  ;;  %v3353_v49 = vadd.f32 %v9144_v60, %v9037_v3 }
 0x1fb   : > { %v6442_v1 = vpop.f32.mrf.mxu0  ;;  %v5115_v58 = vadd.f32 %v5114_v52, %v5084_v9  ;;  %5013 = vst [vmem:[%s6664_s22 + $0x20] sm:$0xff] %v4981_v51  ;;  %v5044_v36 = vadd.f32 %v5043_v61, %v4980_v22  ;;  %v4484_v44 = vadd.f32 %v4371_v47, %v3730_v50  ;;  %v5086_v43 = vmul.f32 %v4981_v51, %v4981_v51 }
 0x1fc   : > { %v4984_v32 = vadd.f32 %v6439_v39, %v4486_v5  ;;  %v6394_v28 = vpop.f32.mrf.mxu1  ;;  %v3734_v39 = vadd.f32 %v9126_v20, %v3347_v23  ;;  %v3739_v61 = vadd.f32 %v9130_v16, %v3352_v24  ;;  %v3740_v53 = vadd.f32 %v9138_v26, %v3353_v49  ;;  %v9568_v49 = vld [vmem:[#allocation23_spill] sm:$0xff] }
 0x1fd   : > { %v4882_v6 = vpop.f32.mrf.mxu0  ;;  %v5045_v7 = vadd.f32 %v5044_v36, %v4981_v51  ;;  %v5116_v42 = vadd.f32 %v5115_v58, %v5085_v21  ;;  %v4982_v37 = vadd.f32 %v4869_v63, %v4484_v44  ;;  %v4489_v48 = vadd.f32 %v6394_v28, %v3735_v62 }
 0x1fe   : > { %5016 = vst [vmem:[%s6664_s22 + $0x38] sm:$0xff] %v4984_v32  ;;  %v4384_v22 = vpop.f32.mrf.mxu1  ;;  %v5089_v20 = vmul.f32 %v4984_v32, %v4984_v32  ;;  %v3356_v5 = vadd.f32 %v9152_v30, %v9043_v56  ;;  %v3738_v28 = vadd.f32 %v9142_v15, %v3351_v11  ;;  %v9573_v11 = vld [vmem:[#allocation27_spill] sm:$0xff] }
 0x1ff   : > { %v6443_v41 = vpop.f32.mrf.mxu0  ;;  %v5117_v0 = vadd.f32 %v5116_v42, %v5086_v43  ;;  %5014 = vst [vmem:[%s6664_s22 + $0x28] sm:$0xff] %v4982_v37  ;;  %v5046_v45 = vadd.f32 %v5045_v7, %v4982_v37  ;;  %v5087_v29 = vmul.f32 %v4982_v37, %v4982_v37  ;;  %v4987_v35 = vadd.f32 %v6442_v1, %v4489_v48  ;;  %v9561_v42 = vld [vmem:[#allocation3_spill] sm:$0xff]  ;;  %v9562_v37 = vld [vmem:[#allocation16_spill] sm:$0xff] }
 0x200   : > { %v4487_v25 = vadd.f32 %v4384_v22, %v3733_v46  ;;  %v6395_v12 = vpop.f32.mrf.mxu1  ;;  %v3743_v7 = vadd.f32 %v9146_v8, %v3356_v5  ;;  %v3357_v48 = vadd.f32 %v9562_v37, %v9561_v42 }
 0x201   : > { %v4885_v13 = vpop.f32.mrf.mxu0  ;;  %v5047_v19 = vadd.f32 %v5046_v45, %v4983_v33  ;;  %v5118_v57 = vadd.f32 %v5117_v0, %v5087_v29  ;;  %5019 = vst [vmem:[%s6664_s22 + $0x50] sm:$0xff] %v4987_v35  ;;  %v4490_v10 = vadd.f32 %v6395_v12, %v3736_v34  ;;  %v3737_v33 = vadd.f32 %v9134_v59, %v3350_v2  ;;  %v9563_v0 = vld [vmem:[#allocation11_spill] sm:$0xff] }
 0x202   : > { %v4985_v50 = vadd.f32 %v4882_v6, %v4487_v25  ;;  %v4387_v31 = vpop.f32.mrf.mxu1  ;;  %v3354_v6 = vadd.f32 %v9156_v55, %v9046_v14  ;;  %v5092_v26 = vmul.f32 %v4987_v35, %v4987_v35  ;;  %v9564_v29 = vld [vmem:[#allocation7_spill] sm:$0xff] }
 0x203   : > { %v6446_v63 = vpop.f32.mrf.mxu0  ;;  %v5119_v17 = vadd.f32 %v5118_v57, %v5088_v40  ;;  %v5048_v54 = vadd.f32 %v5047_v19, %v4984_v32  ;;  %v4988_v9 = vadd.f32 %v6443_v41, %v4490_v10  ;;  %v4488_v38 = vadd.f32 %v4387_v31, %v3734_v39  ;;  %v9566_v40 = vld [vmem:[#allocation12_spill] sm:$0xff] }
 0x204   : > { %5017 = vst [vmem:[%s6664_s22 + $0x40] sm:$0xff] %v4985_v50  ;;  %v6398_v52 = vpop.f32.mrf.mxu1  ;;  %v5090_v1 = vmul.f32 %v4985_v50, %v4985_v50  ;;  %v3741_v45 = vadd.f32 %v9563_v0, %v3354_v6  ;;  %v3744_v19 = vadd.f32 %v9566_v40, %v3357_v48  ;;  %v9582_v40 = vld [vmem:[#allocation20_spill] sm:$0xff] }
 0x205   : > { %v4898_v27 = vpop.f32.mrf.mxu0  ;;  %v5049_v51 = vadd.f32 %v5048_v54, %v4985_v50  ;;  %v5120_v62 = vadd.f32 %v5119_v17, %v5089_v20  ;;  %5020 = vst [vmem:[%s6664_s22 + $0x58] sm:$0xff] %v4988_v9  ;;  %v4986_v3 = vadd.f32 %v4885_v13, %v4488_v38  ;;  %v4493_v16 = vadd.f32 %v6398_v52, %v3739_v61  ;;  %v9569_v61 = vld [vmem:[#allocation14_spill] sm:$0xff] }
 0x206   : > { %v4400_v47 = vpop.f32.mrf.mxu1  ;;  %v5093_v14 = vmul.f32 %v4988_v9, %v4988_v9  ;;  %v9570_v52 = vld [vmem:[#allocation18_spill] sm:$0xff] }
 0x207   : > { %v6447_v60 = vpop.f32.mrf.mxu0  ;;  %v5121_v21 = vadd.f32 %v5120_v62, %v5090_v1  ;;  %5018 = vst [vmem:[%s6664_s22 + $0x48] sm:$0xff] %v4986_v3  ;;  %v5050_v59 = vadd.f32 %v5049_v51, %v4986_v3  ;;  %v5091_v58 = vmul.f32 %v4986_v3, %v4986_v3  ;;  %v4491_v36 = vadd.f32 %v4400_v47, %v3737_v33  ;;  %v9571_v51 = vld [vmem:[#allocation25_spill] sm:$0xff] }
 0x208   : > { %v4991_v23 = vadd.f32 %v6446_v63, %v4493_v16  ;;  %v6399_v43 = vpop.f32.mrf.mxu1  ;;  %v9567_v63 = vld [vmem:[#allocation9_spill] sm:$0xff]  ;;  %v3358_v1 = vadd.f32 %v9571_v51, %v9570_v52 }
 0x209   : > { %v4901_v44 = vpop.f32.mrf.mxu0  ;;  %v5051_v18 = vadd.f32 %v5050_v59, %v4987_v35  ;;  %v5122_v4 = vadd.f32 %v5121_v21, %v5091_v58  ;;  %v4989_v32 = vadd.f32 %v4898_v27, %v4491_v36  ;;  %v4494_v56 = vadd.f32 %v6399_v43, %v3740_v53  ;;  %v9565_v35 = vld [vmem:[#allocation21_spill] sm:$0xff]  ;;  %v9574_v58 = vld [vmem:[#allocation19_spill] sm:$0xff] }
 0x20a   : > { %5023 = vst [vmem:[%s6664_s22 + $0x70] sm:$0xff] %v4991_v23  ;;  %v4403_v41 = vpop.f32.mrf.mxu1  ;;  %v3355_v13 = vadd.f32 %v9565_v35, %v9564_v29  ;;  %v3360_v20 = vadd.f32 %v9568_v49, %v9567_v63  ;;  %v9572_v53 = vld [vmem:[#allocation13_spill] sm:$0xff]  ;;  %v5096_v16 = vmul.f32 %v4991_v23, %v4991_v23  ;;  %v9580_v29 = vld [vmem:[#allocation31_spill] sm:$0xff] }
 0x20b   : > { %v5123_v55 = vadd.f32 %v5122_v4, %v5092_v26  ;;  %5021 = vst [vmem:[%s6664_s22 + $0x60] sm:$0xff] %v4989_v32  ;;  %v5052_v46 = vadd.f32 %v5051_v18, %v4988_v9  ;;  %v4992_v34 = vadd.f32 %v6447_v60, %v4494_v56  ;;  %v4492_v15 = vadd.f32 %v4403_v41, %v3738_v28  ;;  %v9575_v56 = vld [vmem:[#allocation22_spill] sm:$0xff]  ;;  %v9576_v28 = vld [vmem:[#allocation15_spill] sm:$0xff]  ;;  %v9578_v41 = vld [vmem:[#allocation24_spill] sm:$0xff] }
 0x20c   : > { %v6450_v30 = vpop.f32.mrf.mxu0  ;;  %v6402_v8 = vpop.f32.mrf.mxu1  ;;  %v5094_v24 = vmul.f32 %v4989_v32, %v4989_v32  ;;  %v3742_v33 = vadd.f32 %v9569_v61, %v3355_v13  ;;  %v3361_v5 = vadd.f32 %v9573_v11, %v9572_v53  ;;  %v3747_v36 = vadd.f32 %v9574_v58, %v3360_v20  ;;  %v9584_v20 = vld [vmem:[#allocation2_spill] sm:$0xff]  ;;  %v9586_v61 = vld [vmem:[#allocation28_spill] sm:$0xff] }
 0x20d   : > { %v5053_v39 = vadd.f32 %v5052_v46, %v4989_v32  ;;  %v5124_v2 = vadd.f32 %v5123_v55, %v5093_v14  ;;  %5024 = vst [vmem:[%s6664_s22 + $0x78] sm:$0xff] %v4992_v34  ;;  %v4497_v25 = vadd.f32 %v6402_v8, %v3743_v7  ;;  %v4990_v57 = vadd.f32 %v4901_v44, %v4492_v15  ;;  %v9577_v7 = vld [vmem:[#allocation29_spill] sm:$0xff]  ;;  %v9587_v11 = vld [vmem:[#allocation30_spill] sm:$0xff] }
 0x20e   : > { %v4914_v22 = vpop.f32.mrf.mxu0  ;;  %v4416_v10 = vpop.f32.mrf.mxu1  ;;  %v5097_v43 = vmul.f32 %v4992_v34, %v4992_v34  ;;  %v3359_v42 = vadd.f32 %v9577_v7, %v9576_v28  ;;  %v3748_v14 = vadd.f32 %v9578_v41, %v3361_v5  ;;  %v9593_v41 = vld [vmem:[#allocation34_spill] sm:$0xff] }
 0x20f   : > { %v5125_v50 = vadd.f32 %v5124_v2, %v5094_v24  ;;  %v4995_v31 = vadd.f32 %v6450_v30, %v4497_v25  ;;  %v4495_v17 = vadd.f32 %v4416_v10, %v3741_v45  ;;  %5022 = vst [vmem:[%s6664_s22 + $0x68] sm:$0xff] %v4990_v57  ;;  %v5054_v9 = vadd.f32 %v5053_v39, %v4990_v57  ;;  %v9579_v45 = vld [vmem:[#allocation17_spill] sm:$0xff]  ;;  %v9581_v25 = vld [vmem:[#allocation26_spill] sm:$0xff] }
 0x210   : > { %v6451_v12 = vpop.f32.mrf.mxu0  ;;  %v5095_v38 = vmul.f32 %v4990_v57, %v4990_v57  ;;  %v6403_v27 = vpop.f32.mrf.mxu1  ;;  %v3745_v30 = vadd.f32 %v9575_v56, %v3358_v1  ;;  %v9592_v56 = vld [vmem:[#allocation39_spill] sm:$0xff] }
 0x211   : > { %5027 = vst [vmem:[%s6664_s22 + $0x90] sm:$0xff] %v4995_v31  ;;  %v4993_v62 = vadd.f32 %v4914_v22, %v4495_v17  ;;  %v4498_v3 = vadd.f32 %v6403_v27, %v3744_v19  ;;  %v5055_v47 = vadd.f32 %v5054_v9, %v4991_v23  ;;  %v9583_v19 = vld [vmem:[#allocation33_spill] sm:$0xff] }
 0x212   : > { %v4917_v54 = vpop.f32.mrf.mxu0  ;;  %v5126_v21 = vadd.f32 %v5125_v50, %v5095_v38  ;;  %v4419_v59 = vpop.f32.mrf.mxu1  ;;  %v3362_v57 = vadd.f32 %v9583_v19, %v9582_v40  ;;  %v9585_v50 = vld [vmem:[#allocation35_spill] sm:$0xff] }
 0x213   : > { %5025 = vst [vmem:[%s6664_s22 + $0x80] sm:$0xff] %v4993_v62  ;;  %v4996_v44 = vadd.f32 %v6451_v12, %v4498_v3  ;;  %v4496_v6 = vadd.f32 %v4419_v59, %v3742_v33  ;;  %v5056_v4 = vadd.f32 %v5055_v47, %v4992_v34  ;;  %v5098_v46 = vmul.f32 %v4993_v62, %v4993_v62  ;;  %v9589_v47 = vld [vmem:[#allocation37_spill] sm:$0xff] }
 0x214   : > { %v6454_v60 = vpop.f32.mrf.mxu0  ;;  %v5127_v18 = vadd.f32 %v5126_v21, %v5096_v16  ;;  %v6406_v32 = vpop.f32.mrf.mxu1  ;;  %v3364_v34 = vadd.f32 %v9580_v29, %v9579_v45  ;;  %v3746_v12 = vadd.f32 %v9581_v25, %v3359_v42  ;;  %v3365_v17 = vadd.f32 %v9585_v50, %v9584_v20  ;;  %v9588_v16 = vld [vmem:[#allocation5_spill] sm:$0xff]  ;;  %v9598_v25 = vld [vmem:[#allocation43_spill] sm:$0xff]  ;;  %v9599_v50 = vld [vmem:[#allocation38_spill] sm:$0xff] }
 0x215   : > { %5028 = vst [vmem:[%s6664_s22 + $0x98] sm:$0xff] %v4996_v44  ;;  %v4994_v23 = vadd.f32 %v4917_v54, %v4496_v6  ;;  %v4501_v37 = vadd.f32 %v6406_v32, %v3747_v36  ;;  %v5057_v55 = vadd.f32 %v5056_v4, %v4993_v62  ;;  %v5100_v54 = vmul.f32 %v4995_v31, %v4995_v31  ;;  %v9590_v36 = vld [vmem:[#allocation32_spill] sm:$0xff] }
 0x216   : > { %v4930_v26 = vpop.f32.mrf.mxu0  ;;  %v5128_v22 = vadd.f32 %v5127_v18, %v5097_v43  ;;  %v4432_v0 = vpop.f32.mrf.mxu1  ;;  %v3751_v33 = vadd.f32 %v9586_v61, %v3364_v34  ;;  %v5101_v62 = vmul.f32 %v4996_v44, %v4996_v44  ;;  %v3749_v5 = vadd.f32 %v9587_v11, %v3362_v57  ;;  %v9591_v32 = vld [vmem:[#allocation4_spill] sm:$0xff] }
 0x217   : > { %5026 = vst [vmem:[%s6664_s22 + $0x88] sm:$0xff] %v4994_v23  ;;  %v5099_v35 = vmul.f32 %v4994_v23, %v4994_v23  ;;  %v4999_v13 = vadd.f32 %v6454_v60, %v4501_v37  ;;  %v4499_v15 = vadd.f32 %v4432_v0, %v3745_v30  ;;  %v5058_v24 = vadd.f32 %v5057_v55, %v4994_v23  ;;  %v9594_v55 = vld [vmem:[#allocation6_spill] sm:$0xff] }
 0x218   : > { %v6455_v48 = vpop.f32.mrf.mxu0  ;;  %v5129_v39 = vadd.f32 %v5128_v22, %v5098_v46  ;;  %v6407_v2 = vpop.f32.mrf.mxu1  ;;  %v3363_v21 = vadd.f32 %v9589_v47, %v9588_v16  ;;  %v3752_v6 = vadd.f32 %v9590_v36, %v3365_v17  ;;  %v9595_v46 = vld [vmem:[#allocation41_spill] sm:$0xff] }
 0x219   : > { %5031 = vst [vmem:[%s6664_s22 + $0xb0] sm:$0xff] %v4999_v13  ;;  %v4997_v10 = vadd.f32 %v4930_v26, %v4499_v15  ;;  %v4502_v63 = vadd.f32 %v6407_v2, %v3748_v14  ;;  %v5059_v9 = vadd.f32 %v5058_v24, %v4995_v31  ;;  %v3366_v22 = vadd.f32 %v9595_v46, %v9594_v55  ;;  %v9597_v2 = vld [vmem:[#allocation8_spill] sm:$0xff] }
 0x21a   : > { %v4933_v8 = vpop.f32.mrf.mxu0  ;;  %v5130_v38 = vadd.f32 %v5129_v39, %v5099_v35  ;;  %v4435_v27 = vpop.f32.mrf.mxu1  ;;  %v3750_v14 = vadd.f32 %v9593_v41, %v3363_v21  ;;  %v5104_v34 = vmul.f32 %v4999_v13, %v4999_v13  ;;  %v9596_v39 = vld [vmem:[#allocation36_spill] sm:$0xff]  ;;  %v9603_v21 = vld [vmem:[#allocation42_spill] sm:$0xff] }
 0x21b   : > { %5029 = vst [vmem:[%s6664_s22 + $0xa0] sm:$0xff] %v4997_v10  ;;  %v5000_v52 = vadd.f32 %v6455_v48, %v4502_v63  ;;  %v4500_v51 = vadd.f32 %v4435_v27, %v3746_v12  ;;  %v5060_v60 = vadd.f32 %v5059_v9, %v4996_v44  ;;  %v5102_v43 = vmul.f32 %v4997_v10, %v4997_v10 }
 0x21c   : > { %v6458_v49 = vpop.f32.mrf.mxu0  ;;  %v5131_v3 = vadd.f32 %v5130_v38, %v5100_v54  ;;  %v6410_v53 = vpop.f32.mrf.mxu1  ;;  %v3368_v44 = vadd.f32 %v9592_v56, %v9591_v32  ;;  %v3369_v12 = vadd.f32 %v9598_v25, %v9597_v2  ;;  %v3753_v17 = vadd.f32 %v9599_v50, %v3366_v22  ;;  %v9600_v54 = vld [vmem:[#allocation10_spill] sm:$0xff] }
 0x21d   : > { %5032 = vst [vmem:[%s6664_s22 + $0xb8] sm:$0xff] %v5000_v52  ;;  %v4998_v31 = vadd.f32 %v4933_v8, %v4500_v51  ;;  %v4505_v59 = vadd.f32 %v6410_v53, %v3751_v33  ;;  %v5061_v26 = vadd.f32 %v5060_v60, %v4997_v10  ;;  %v5105_v57 = vmul.f32 %v5000_v52, %v5000_v52 }
 0x21e   : > { %v4946_v1 = vpop.f32.mrf.mxu0  ;;  %v5132_v18 = vadd.f32 %v5131_v3, %v5101_v62  ;;  %v4448_v4 = vpop.f32.mrf.mxu1  ;;  %v3755_v24 = vadd.f32 %v9596_v39, %v3368_v44  ;;  %v9602_v62 = vld [vmem:[#allocation40_spill] sm:$0xff] }
 0x21f   : > { %5030 = vst [vmem:[%s6664_s22 + $0xa8] sm:$0xff] %v4998_v31  ;;  %v5103_v30 = vmul.f32 %v4998_v31, %v4998_v31  ;;  %v5003_v28 = vadd.f32 %v6458_v49, %v4505_v59  ;;  %v4503_v7 = vadd.f32 %v4448_v4, %v3749_v5  ;;  %v5062_v37 = vadd.f32 %v5061_v26, %v4998_v31 }
 0x220   : > { %v6459_v58 = vpop.f32.mrf.mxu0  ;;  %v5133_v23 = vadd.f32 %v5132_v18, %v5102_v43  ;;  %v6411_v48 = vpop.f32.mrf.mxu1  ;;  %v3756_v3 = vadd.f32 %v9602_v62, %v3369_v12 }
 0x221   : > { %5035 = vst [vmem:[%s6664_s22 + $0xd0] sm:$0xff] %v5003_v28  ;;  %v5001_v0 = vadd.f32 %v4946_v1, %v4503_v7  ;;  %v4506_v45 = vadd.f32 %v6411_v48, %v3752_v6  ;;  %v5063_v35 = vadd.f32 %v5062_v37, %v4999_v13  ;;  %v9601_v13 = vld [vmem:[#allocation44_spill] sm:$0xff]  ;;  %v5108_v36 = vmul.f32 %v5003_v28, %v5003_v28 }
 0x222   : > { %v4949_v42 = vpop.f32.mrf.mxu0  ;;  %v5134_v15 = vadd.f32 %v5133_v23, %v5103_v30  ;;  %v4451_v8 = vpop.f32.mrf.mxu1  ;;  %v3367_v9 = vadd.f32 %v9601_v13, %v9600_v54 }
 0x223   : > { %5033 = vst [vmem:[%s6664_s22 + $0xc0] sm:$0xff] %v5001_v0  ;;  %v5004_v40 = vadd.f32 %v6459_v58, %v4506_v45  ;;  %v4504_v19 = vadd.f32 %v4451_v8, %v3750_v14  ;;  %v5064_v63 = vadd.f32 %v5063_v35, %v5000_v52  ;;  %v5106_v33 = vmul.f32 %v5001_v0, %v5001_v0 }
 0x224   : > { %v6462_v29 = vpop.f32.mrf.mxu0  ;;  %v5135_v10 = vadd.f32 %v5134_v15, %v5104_v34  ;;  %v6414_v49 = vpop.f32.mrf.mxu1  ;;  %v3754_v31 = vadd.f32 %v9603_v21, %v3367_v9 }
 0x225   : > { %5036 = vst [vmem:[%s6664_s22 + $0xd8] sm:$0xff] %v5004_v40  ;;  %v5002_v38 = vadd.f32 %v4949_v42, %v4504_v19  ;;  %v4509_v27 = vadd.f32 %v6414_v49, %v3755_v24  ;;  %v5065_v61 = vadd.f32 %v5064_v63, %v5001_v0  ;;  %v5109_v32 = vmul.f32 %v5004_v40, %v5004_v40 }
 0x226   : > { %v4962_v20 = vpop.f32.mrf.mxu0  ;;  %v5136_v51 = vadd.f32 %v5135_v10, %v5105_v57  ;;  %v4464_v1 = vpop.f32.mrf.mxu1  ;;  %v5081_v10 = vld [vmem:[%s9356_s4] sm:$0x1] }
 0x227   : > { %5034 = vst [vmem:[%s6664_s22 + $0xc8] sm:$0xff] %v5002_v38  ;;  %v5107_v52 = vmul.f32 %v5002_v38, %v5002_v38  ;;  %v5007_v60 = vadd.f32 %v6462_v29, %v4509_v27  ;;  %v4507_v53 = vadd.f32 %v4464_v1, %v3753_v17  ;;  %v5066_v5 = vadd.f32 %v5065_v61, %v5002_v38 }
 0x228   : > { %v5137_v11 = vadd.f32 %v5136_v51, %v5106_v33  ;;  %v6415_v16 = vpop.f32.mrf.mxu1  ;;  %v6463_v47 = vpop.f32.mrf.mxu0 }
 0x229   : > { %5039 = vst [vmem:[%s6664_s22 + $0xf0] sm:$0xff] %v5007_v60  ;;  %v5005_v59 = vadd.f32 %v4962_v20, %v4507_v53  ;;  %v4510_v58 = vadd.f32 %v6415_v16, %v3756_v3  ;;  %v5067_v6 = vadd.f32 %v5066_v5, %v5003_v28  ;;  %v5112_v55 = vmul.f32 %v5007_v60, %v5007_v60 }
 0x22a   : > { %v5138_v26 = vadd.f32 %v5137_v11, %v5107_v52  ;;  %v4467_v43 = vpop.f32.mrf.mxu1  ;;  %v4965_v30 = vpop.f32.mrf.mxu0 }
 0x22b   : > { %5037 = vst [vmem:[%s6664_s22 + $0xe0] sm:$0xff] %v5005_v59  ;;  %v5008_v18 = vadd.f32 %v6463_v47, %v4510_v58  ;;  %v4508_v4 = vadd.f32 %v4467_v43, %v3754_v31  ;;  %v5068_v44 = vadd.f32 %v5067_v6, %v5004_v40  ;;  %v5110_v23 = vmul.f32 %v5005_v59, %v5005_v59  ;;  %v5041_v40 = vld [vmem:[%s9355_s3] sm:$0x1] }
 0x22c   : > { %v5139_v56 = vadd.f32 %v5138_v26, %v5108_v36 }
 0x22d   : > { %5040 = vst [vmem:[%s6664_s22 + $0xf8] sm:$0xff] %v5008_v18  ;;  %v5006_v7 = vadd.f32 %v4965_v30, %v4508_v4  ;;  %v5069_v42 = vadd.f32 %v5068_v44, %v5005_v59  ;;  %v5113_v22 = vmul.f32 %v5008_v18, %v5008_v18 }
 0x22e   : > { %v5140_v37 = vadd.f32 %v5139_v56, %v5109_v32 }
 0x22f   : > { %5038 = vst [vmem:[%s6664_s22 + $0xe8] sm:$0xff] %v5006_v7  ;;  %v5111_v48 = vmul.f32 %v5006_v7, %v5006_v7  ;;  %v5070_v14 = vadd.f32 %v5069_v42, %v5006_v7 }
 0x230   : > { %v5141_v41 = vadd.f32 %v5140_v37, %v5110_v23 }
 0x231   : > { %v5071_v28 = vadd.f32 %v5070_v14, %v5007_v60 }
 0x232   : > { %v5142_v46 = vadd.f32 %v5141_v41, %v5111_v48 }
 0x233   : > { %v5072_v0 = vadd.f32 %v5071_v28, %v5008_v18 }
 0x234   : > { %v5143_v45 = vadd.f32 %v5142_v46, %v5112_v55 }
 0x235   : > { %v5073_v29 = vrot.slane %v5072_v0, 4 }
 0x236   : > { %v5144_v34 = vadd.f32 %v5143_v45, %v5113_v22 }
 0x237   : > { %v5074_v35 = vadd.f32 %v5073_v29, %v5072_v0 }
 0x238   : > { %v5145_v15 = vrot.slane %v5144_v34, 4 }
 0x239   : > { %v5075_v8 = vrot.slane %v5074_v35, 2 }
 0x23a   : > { %v5146_v39 = vadd.f32 %v5145_v15, %v5144_v34 }
 0x23b   : > { %v5076_v24 = vadd.f32 %v5075_v8, %v5074_v35 }
 0x23c   : > { %v5147_v2 = vrot.slane %v5146_v39, 2 }
 0x23d   : > { %v5077_v25 = vrot.slane %v5076_v24, 1 }
 0x23e   : > { %v5148_v12 = vadd.f32 %v5147_v2, %v5146_v39 }
 0x23f   : > { %v5078_v19 = vadd.f32 %v5077_v25, %v5076_v24 }
 0x240   : > { %v5149_v57 = vrot.slane %v5148_v12, 1 }
 0x241   : > { %v5079_v63 = vadd.f32 %v5078_v19, %v5041_v40 }
 0x242   : > { %v5150_v49 = vadd.f32 %v5149_v57, %v5148_v12 }
 0x243   : > { %5080 = vst [vmem:[%s9355_s3] sm:$0x1] %v5079_v63 }
 0x244   : > { %v5151_v20 = vadd.f32 %v5150_v49, %v5081_v10 }
 0x246   : > { %5152 = vst [vmem:[%s9356_s4] sm:$0x1] %v5151_v20 }
 0x247 PF: > { %s15_s15 = sadd.s32 1, %s6625_s15  }
 0x248   : > { %p12_p5 = scmp.ge.s32.totalorder %s15_s15, 4  }
 0x24a   :  { %14 = sbr.rel (!%p12_p5) target bundleno = 1 (0x1), region = 88 }

// kernel: wide_resnet_block_forward.4
= control target key start
LH: loop header
LB: loop body
LE: loop exit
PB: predicated region body
PF: predicated region fallthrough
CT: control target
= control target key end

     0   :  { %s8141_s13 = smov 0   ;;  %s10609_s0 = inlined_call_operand.vmem [shape: f32[2,256,128], index: 0, kind: input, shape index: {}]   ;;  %s10610_s1 = inlined_call_operand.vmem [shape: f32[1,128], index: 1, kind: input, shape index: {}]   ;;  %s10611_s2 = inlined_call_operand.vmem [shape: f32[1,128], index: 2, kind: input, shape index: {}]   ;;  %s10612_s3 = inlined_call_operand.vmem [shape: bf16[9,128,128], index: 3, kind: input, shape index: {}]   ;;  %s10613_s4 = inlined_call_operand.vmem [shape: bf16[2,256,128], index: 4, kind: input, shape index: {}]   ;;  %s10614_s5 = inlined_call_operand.vmem [shape: bf16[128,128], index: 5, kind: input, shape index: {}]   ;;  %s10615_s6 = inlined_call_operand.vmem [shape: f32[2,256,128], index: 6, kind: output, shape index: {0}]   ;;  %s10616_s7 = inlined_call_operand.vmem [shape: f32[1,128], index: 7, kind: output, shape index: {1}]   ;;  %s10617_s8 = inlined_call_operand.vmem [shape: f32[1,128], index: 8, kind: output, shape index: {2}]   ;;  %s10618_s9 = inlined_call_operand.vmem [shape: f32[1,128], index: 9, kind: output, shape index: {3}]   ;;  %s10619_s10 = inlined_call_operand.vmem [shape: f32[1,128], index: 10, kind: output, shape index: {4}]  }
   0x1 LB: > { %s6683_s14 = sadd.s32 4294967295, %s8082_s13   ;;  %p6687_p0 = scmp.ge.s32.totalorder %s8082_s13, 1  ;;  %s8082_s13 = sphi %s8141_s13, %s21_s13  }
   0x2   : > { %p311_p1 = scmp.lt.s32.totalorder %s8082_s13, 3 }
   0x4   : > { %p312_p2 = pnand %p6687_p0, %p311_p1 }
   0x6   : > { %315 = sbr.rel (%p312_p2) target bundleno = 727 (0x2d7), region = 44 }
   0xb   : > { %p354_p3 = scmp.lt.s32.totalorder %s6683_s14, 1  ;;  %p6694_p4 = scmp.ne.s32.totalorder %s6683_s14, 0 }
   0xd   : > { %s355_s15 = scalar_select %p354_p3, %s6683_s14, 1 }
   0xe   : > { %373 = sbr.rel (%p6694_p4) target bundleno = 49 (0x31), region = 48 }
   0xf   : > { %s7147_s16 = sshll.u32 %s355_s15, 8  ;;  %s7148_s17 = sshll.u32 %s355_s15, 7 }
  0x10   : > { %s8152_s20 = scalar_lea.vmem %s10609_s0, %s7147_s16  ;;  %s8157_s23 = scalar_lea.vmem %s10613_s4, %s7148_s17 }
  0x11   : > { %s8162_s26 = scalar_lea.vmem %s10615_s6, %s7147_s16 }
  0x13   : > { %v8084_v0 = vmov 0.0   ;;  %v8085_v1 = vmov 0  }
  0x14   : > { %374 = vst [vmem:[%s10618_s9] sm:$0x1] %v8084_v0  ;;  %375 = vst [vmem:[%s10619_s10] sm:$0x1] %v8084_v0 }
  0x15   : > { %376 = vst [vmem:[%s10616_s7] sm:$0x1] %v8084_v0  ;;  %377 = vst [vmem:[%s10617_s8] sm:$0x1] %v8084_v0 }
  0x16   : > { %378 = vst [vmem:[#allocation2] sm:$0xf] %v8085_v1  ;;  %379 = vst [vmem:[#allocation2 + $0x4] sm:$0xf] %v8085_v1 }
  0x17   : > { %380 = vst [vmem:[#allocation2 + $0x8] sm:$0x1] %v8085_v1  ;;  %381 = vst [vmem:[#allocation2 + $0xc] sm:$0xf] %v8085_v1 }
  0x18   : > { %382 = vst [vmem:[#allocation2 + $0x10] sm:$0xf] %v8085_v1  ;;  %383 = vst [vmem:[#allocation2 + $0x14] sm:$0x1] %v8085_v1 }
  0x19   : > { %384 = vst [vmem:[#allocation2 + $0x18] sm:$0xf] %v8085_v1  ;;  %385 = vst [vmem:[#allocation2 + $0x1c] sm:$0xf] %v8085_v1 }
  0x1a   : > { %386 = vst [vmem:[#allocation2 + $0x20] sm:$0x1] %v8085_v1  ;;  %387 = vst [vmem:[#allocation2 + $0x24] sm:$0xf] %v8085_v1 }
  0x1b   : > { %388 = vst [vmem:[#allocation2 + $0x28] sm:$0xf] %v8085_v1  ;;  %389 = vst [vmem:[#allocation2 + $0x2c] sm:$0x1] %v8085_v1 }
  0x1c   : > { %390 = vst [vmem:[#allocation2 + $0x30] sm:$0xf] %v8085_v1  ;;  %391 = vst [vmem:[#allocation2 + $0x34] sm:$0xf] %v8085_v1 }
  0x1d   : > { %392 = vst [vmem:[#allocation2 + $0x38] sm:$0x1] %v8085_v1  ;;  %393 = vst [vmem:[#allocation2 + $0x3c] sm:$0xf] %v8085_v1 }
  0x1e   : > { %394 = vst [vmem:[#allocation2 + $0x40] sm:$0xf] %v8085_v1  ;;  %395 = vst [vmem:[#allocation2 + $0x44] sm:$0x1] %v8085_v1 }
  0x1f   : > { %396 = vst [vmem:[#allocation2 + $0x48] sm:$0xf] %v8085_v1  ;;  %397 = vst [vmem:[#allocation2 + $0x4c] sm:$0xf] %v8085_v1 }
  0x20   : > { %398 = vst [vmem:[#allocation2 + $0x50] sm:$0x1] %v8085_v1  ;;  %399 = vst [vmem:[#allocation2 + $0x54] sm:$0xf] %v8085_v1 }
  0x21   : > { %400 = vst [vmem:[#allocation2 + $0x58] sm:$0xf] %v8085_v1  ;;  %401 = vst [vmem:[#allocation2 + $0x5c] sm:$0x1] %v8085_v1 }
  0x22   : > { %402 = vst [vmem:[#allocation2 + $0x60] sm:$0xf] %v8085_v1  ;;  %403 = vst [vmem:[#allocation2 + $0x64] sm:$0xf] %v8085_v1 }
  0x23   : > { %404 = vst [vmem:[#allocation2 + $0x68] sm:$0x1] %v8085_v1  ;;  %405 = vst [vmem:[#allocation2 + $0x6c] sm:$0xf] %v8085_v1 }
  0x24   : > { %406 = vst [vmem:[#allocation2 + $0x70] sm:$0xf] %v8085_v1  ;;  %407 = vst [vmem:[#allocation2 + $0x74] sm:$0x1] %v8085_v1 }
  0x25   : > { %408 = vst [vmem:[#allocation2 + $0x78] sm:$0xf] %v8085_v1  ;;  %409 = vst [vmem:[#allocation2 + $0x7c] sm:$0xf] %v8085_v1 }
  0x26   : > { %410 = vst [vmem:[#allocation2 + $0x80] sm:$0x1] %v8085_v1  ;;  %411 = vst [vmem:[#allocation2 + $0x84] sm:$0xf] %v8085_v1 }
  0x27   : > { %412 = vst [vmem:[#allocation2 + $0x88] sm:$0xf] %v8085_v1  ;;  %413 = vst [vmem:[#allocation2 + $0x8c] sm:$0x1] %v8085_v1 }
  0x28   : > { %414 = vst [vmem:[#allocation2 + $0x90] sm:$0xf] %v8085_v1  ;;  %415 = vst [vmem:[#allocation2 + $0x94] sm:$0xf] %v8085_v1 }
  0x29   : > { %416 = vst [vmem:[#allocation2 + $0x98] sm:$0x1] %v8085_v1  ;;  %417 = vst [vmem:[#allocation2 + $0x9c] sm:$0xf] %v8085_v1 }
  0x2a   : > { %418 = vst [vmem:[#allocation2 + $0xa0] sm:$0xf] %v8085_v1  ;;  %419 = vst [vmem:[#allocation2 + $0xa4] sm:$0x1] %v8085_v1 }
  0x2b   : > { %420 = vst [vmem:[#allocation2 + $0xa8] sm:$0xf] %v8085_v1  ;;  %421 = vst [vmem:[#allocation2 + $0xac] sm:$0xf] %v8085_v1 }
  0x2c   : > { %422 = vst [vmem:[#allocation2 + $0xb0] sm:$0x1] %v8085_v1  ;;  %423 = vst [vmem:[#allocation2 + $0xb4] sm:$0xf] %v8085_v1 }
  0x2d   : > { %424 = vst [vmem:[#allocation2 + $0xb8] sm:$0xf] %v8085_v1  ;;  %425 = vst [vmem:[#allocation2 + $0xbc] sm:$0x1] %v8085_v1 }
  0x2e   : > { %426 = vst [vmem:[#allocation2 + $0xc0] sm:$0xf] %v8085_v1  ;;  %427 = vst [vmem:[#allocation2 + $0xc4] sm:$0xf] %v8085_v1 }
  0x2f   : > { %428 = vst [vmem:[#allocation2 + $0xc8] sm:$0x1] %v8085_v1  ;;  %429 = vst [vmem:[#allocation2 + $0xcc] sm:$0xf] %v8085_v1 }
  0x30   : > { %430 = vst [vmem:[#allocation2 + $0xd0] sm:$0xf] %v8085_v1  ;;  %431 = vst [vmem:[#allocation2 + $0xd4] sm:$0x1] %v8085_v1 }
  0x31 PF: > { %v7912_v2 = vld [vmem:[%s10612_s3 + $0x78] sm:$0xff]   ;;  %v7914_v4 = vld [vmem:[%s10612_s3 + $0x70] sm:$0xff]   ;;  %v7916_v6 = vld [vmem:[%s10612_s3 + $0x68] sm:$0xff]   ;;  %vm1239_vm0 = vsmask.f32 3328  ;;  %vm1058_vm2 = vcmask 1043456  }
  0x32   : > { %v7913_v3 = vld [vmem:[%s10612_s3 + $0x38] sm:$0xff]   ;;  %7422 = vmatprep.subr.bf16.mxu0 %v7912_v2  ;;  %v7915_v5 = vld [vmem:[%s10612_s3 + $0x30] sm:$0xff]   ;;  %v7917_v7 = vld [vmem:[%s10612_s3 + $0x28] sm:$0xff]   ;;  %vm1240_vm1 = vsmask.f32 7440  ;;  %vm1065_vm5 = vcmask 1040384  }
  0x33   : > { %7470 = vmatprep.subr.bf16.mxu1 %v7913_v3  ;;  %7423 = vmatpush3.bf16.msra.mxu0 %v7912_v2  ;;  %v7918_v8 = vld [vmem:[%s10612_s3 + $0x60] sm:$0xff]   ;;  %v7920_v10 = vld [vmem:[%s10612_s3 + $0x58] sm:$0xff]   ;;  %v7922_v12 = vld [vmem:[%s10612_s3 + $0x50] sm:$0xff]   ;;  %vm734_vm4 = vsmask.f32 256 }
  0x34   : > { %7471 = vmatpush3.bf16.msra.mxu1 %v7913_v3  ;;  %7424 = vmatprep.subr.bf16.mxu0 %v7914_v4  ;;  %v7919_v9 = vld [vmem:[%s10612_s3 + $0x20] sm:$0xff]   ;;  %v7921_v11 = vld [vmem:[%s10612_s3 + $0x18] sm:$0xff]   ;;  %v8211_v15 = vld [vmem:[#allocation2 + $0x8] sm:$0x1]  ;;  %vm735_vm6 = vsmask.f32 4368 }
  0x35   : > { %7472 = vmatprep.subr.bf16.mxu1 %v7915_v5  ;;  %v1175_v13 = vld [vmem:[#allocation2] sm:$0xf]  ;;  %v8209_v14 = vld [vmem:[#allocation2 + $0x4] sm:$0xf]  ;;  %v7923_v16 = vld [vmem:[%s10612_s3 + $0x10] sm:$0xff]   ;;  %v1262_v27 = vshll.u32 %v8211_v15, 16 }
  0x36   : > { %v1243_v17 = vshrl.u32 %v1175_v13, 16  ;;  %v1246_v18 = vshll.u32 %v1175_v13, 16  ;;  %v1256_v19 = vshrl.u32 %v8209_v14, 16  ;;  %v6769_v20 = vcombine.low %v1175_v13, %v8209_v14  ;;  %v432_v21 = vld [vmem:[%s8152_s20] sm:$0xff]  ;;  %v433_v22 = vld [vmem:[%s8152_s20 + $0x8] sm:$0xff]  ;;  %vm8245_vm3 = vmor %vm1239_vm0, %vm1240_vm1 }
  0x37   : > { %7425 = vmatpush3.bf16.msra.mxu0 %v7914_v4  ;;  %v1252_v23 = vshll.u32 %v8209_v14, 16  ;;  %v8225_v28 = vld [vmem:[%s10610_s1] ss:$0 sm:$0xff]  ;;  %v7924_v29 = vld [vmem:[%s10612_s3 + $0x48] sm:$0xff]   ;;  %v1264_v36 = vrot.slane %v1262_v27, 5  ;;  %v2274_v43 = vrot.slane %v8209_v14, 5  ;;  %vm8283_vm12 = vmor %vm734_vm4, %vm735_vm6 }
  0x38   : > { %7473 = vmatpush3.bf16.msra.mxu1 %v7915_v5  ;;  %7426 = vmatprep.subr.bf16.mxu0 %v7916_v6  ;;  %v1245_v24 = vrot.slane %v1243_v17, 4  ;;  %v1248_v25 = vrot.slane %v1246_v18, 5  ;;  %v1258_v26 = vrot.slane %v1256_v19, 4  ;;  %v471_v31 = vmul.f32 %v8225_v28, %v432_v21  ;;  %v8235_v33 = vld [vmem:[%s10611_s2] ss:$0 sm:$0xff]  ;;  %v7925_v34 = vld [vmem:[%s10612_s3 + $0x8] sm:$0xff]   ;;  %vm8299_vm14 = vmand %vm1065_vm5, %vm734_vm4 }
  0x39   : > { %7474 = vmatprep.subr.bf16.mxu1 %v7917_v7  ;;  %7486 = vmatprep.mubr.bf16.mxu1 %v6769_v20  ;;  %v1254_v30 = vrot.slane %v1252_v23, 5  ;;  %v472_v32 = vmul.f32 %v8225_v28, %v433_v22  ;;  %v7926_v37 = vld [vmem:[%s10612_s3 + $0x40] sm:$0xff]   ;;  %v434_v47 = vld [vmem:[%s8152_s20 + $0x10] sm:$0xff]  ;;  %v435_v50 = vld [vmem:[%s8152_s20 + $0x18] sm:$0xff]  ;;  %vm1059_vm9 = vsmask.f32 7938 }
  0x3a   : > { %v1249_v35 = vor.u32 %v1248_v25, %v1245_v24  ;;  %v510_v40 = vadd.f32 %v8235_v33, %v471_v31  ;;  %v7927_v42 = vld [vmem:[%s10612_s3] sm:$0xff]   ;;  %v473_v51 = vmul.f32 %v8225_v28, %v434_v47  ;;  %v474_v55 = vmul.f32 %v8225_v28, %v435_v50  ;;  %v437_v56 = vld [vmem:[%s8152_s20 + $0x28] sm:$0xff]  ;;  %v8271_v63 = vld [vmem:[%s10612_s3 + $0xb8] sm:$0xff]  }
  0x3b   : > { %7427 = vmatpush3.bf16.msra.mxu0 %v7916_v6  ;;  %v1259_v39 = vor.u32 %v1258_v26, %v1254_v30  ;;  %v511_v41 = vadd.f32 %v8235_v33, %v472_v32  ;;  %v436_v52 = vld [vmem:[%s8152_s20 + $0x20] sm:$0xff]  ;;  %v476_v1 = vmul.f32 %v8225_v28, %v437_v56  ;;  %v8278_v4 = vld [vmem:[%s10612_s3 + $0xf8] sm:$0xff]   ;;  %vm8291_vm13 = vmand %vm1058_vm2, %vm1059_vm9 }
  0x3c   : > { %7475 = vmatpush3.bf16.msra.mxu1 %v7917_v7  ;;  %7428 = vmatprep.subr.bf16.mxu0 %v7918_v8  ;;  %v1250_v44 = vrot.slane %v1249_v35, 4  ;;  %vm542_vm7 = vcmp.ge.f32.partialorder %v510_v40, 0.0  ;;  %v574_v46 = vmul.f32 0.01, %v510_v40  ;;  %v475_v57 = vmul.f32 %v8225_v28, %v436_v52  ;;  %v1061_v19 = vld [vmem:[#allocation2 + $0xc] sm:$0xf] }
  0x3d   : > { %7476 = vmatprep.subr.bf16.mxu1 %v7919_v9  ;;  %v1260_v45 = vrot.slane %v1259_v39, 4  ;;  %vm543_vm8 = vcmp.ge.f32.partialorder %v511_v41, 0.0  ;;  %v575_v49 = vmul.f32 0.01, %v511_v41  ;;  %v512_v61 = vadd.f32 %v8235_v33, %v473_v51  ;;  %v1067_v26 = vld [vmem:[#allocation2 + $0x14] sm:$0x1] }
  0x3e   : > { %v1255_v48 = vsel %vm8245_vm3, %v1250_v44, %v1254_v30  ;;  %v606_v54 = vsel %vm542_vm7, %v510_v40, %v574_v46  ;;  %v513_v0 = vadd.f32 %v8235_v33, %v474_v55  ;;  %v514_v13 = vadd.f32 %v8235_v33, %v475_v57  ;;  %v1070_v39 = vld [vmem:[#allocation2 + $0x18] sm:$0xf]  ;;  %v440_v40 = vld [vmem:[%s8152_s20 + $0x40] sm:$0xff] }
  0x3f   : > { %7429 = vmatpush3.bf16.msra.mxu0 %v7918_v8  ;;  %v1265_v53 = vsel %vm8245_vm3, %v1260_v45, %v1264_v36  ;;  %v607_v59 = vsel %vm543_vm8, %v511_v41, %v575_v49  ;;  %v7150_v60 = vpack.c.bf16 %v606_v54, %v606_v54  ;;  %vm544_vm10 = vcmp.ge.f32.partialorder %v512_v61, 0.0  ;;  %v1074_v52 = vld [vmem:[#allocation2 + $0x20] sm:$0x1] }
  0x40   : > { %7477 = vmatpush3.bf16.msra.mxu1 %v7919_v9  ;;  %7430 = vmatprep.subr.bf16.mxu0 %v7920_v10  ;;  %v6745_v58 = vcombine.low %v1255_v48, %v1265_v53  ;;  %v7151_v62 = vpack.c.bf16 %v607_v59, %v607_v59  ;;  %v576_v5 = vmul.f32 0.01, %v512_v61  ;;  %vm545_vm11 = vcmp.ge.f32.partialorder %v513_v0, 0.0  ;;  %v438_v9 = vld [vmem:[%s8152_s20 + $0x30] sm:$0xff] }
  0x41   : > { %7478 = vmatprep.subr.bf16.mxu1 %v7921_v11  ;;  %v738_v2 = vshrl.u32 %v7150_v60, 16  ;;  %v741_v3 = vshll.u32 %v7150_v60, 16  ;;  %v577_v8 = vmul.f32 0.01, %v513_v0  ;;  %v477_v22 = vmul.f32 %v8225_v28, %v438_v9 }
  0x42   : > { %7438 = vmatprep.mubr.bf16.mxu0 %v6745_v58  ;;  %v746_v6 = vshrl.u32 %v7151_v62, 16  ;;  %v749_v7 = vshll.u32 %v7151_v62, 16  ;;  %vm546_vm15 = vcmp.ge.f32.partialorder %v514_v13, 0.0  ;;  %v578_v45 = vmul.f32 0.01, %v514_v13 }
  0x43   : > { %7431 = vmatpush3.bf16.msra.mxu0 %v7920_v10  ;;  %v609_v20 = vsel %vm545_vm11, %v513_v0, %v577_v8  ;;  %v516_v49 = vadd.f32 %v8235_v33, %v477_v22  ;;  %v479_v54 = vmul.f32 %v8225_v28, %v440_v40  ;;  %v2277_v59 = vrot.slane %v8211_v15, 5  ;;  %v441_v0 = vld [vmem:[%s8152_s20 + $0x48] sm:$0xff] }
  0x44   : > { %7479 = vmatpush3.bf16.msra.mxu1 %v7921_v11  ;;  %7432 = vmatprep.subr.bf16.mxu0 %v7922_v12  ;;  %v740_v11 = vrot.slane %v738_v2, 7  ;;  %v748_v17 = vrot.slane %v746_v6, 7  ;;  %v7153_v27 = vpack.c.bf16 %v609_v20, %v609_v20  ;;  %v610_v53 = vsel %vm546_vm15, %v514_v13, %v578_v45 }
  0x45   : > { %7480 = vmatprep.subr.bf16.mxu1 %v7923_v16  ;;  %v7154_v58 = vpack.c.bf16 %v610_v53, %v610_v53  ;;  %vm548_vm1 = vcmp.ge.f32.partialorder %v516_v49, 0.0  ;;  %v580_v9 = vmul.f32 0.01, %v516_v49 }
  0x46   : > { %v743_v23 = vor.u32 %v741_v3, %v740_v11  ;;  %v744_v24 = vrot.slane %v740_v11, 4  ;;  %v753_v30 = vrot.slane %v748_v17, 4  ;;  %v763_v36 = vshrl.u32 %v7153_v27, 16 }
  0x47   : > { %7433 = vmatpush3.bf16.msra.mxu0 %v7922_v12  ;;  %v608_v12 = vsel %vm544_vm10, %v512_v61, %v576_v5  ;;  %v772_v5 = vshrl.u32 %v7154_v58, 16  ;;  %v775_v6 = vshll.u32 %v7154_v58, 16 }
  0x48   : > { %7481 = vmatpush3.bf16.msra.mxu1 %v7923_v16  ;;  %7434 = vmatprep.subr.bf16.mxu0 %v7924_v29  ;;  %v515_v16 = vadd.f32 %v8235_v33, %v476_v1  ;;  %v7152_v21 = vpack.c.bf16 %v608_v12, %v608_v12  ;;  %v1062_v35 = vsel %vm8291_vm13, %v743_v23, %v1061_v19  ;;  %v765_v46 = vrot.slane %v763_v36, 7  ;;  %v442_v1 = vld [vmem:[%s8152_s20 + $0x50] sm:$0xff] }
  0x49   : > { %7482 = vmatprep.subr.bf16.mxu1 %v7925_v34  ;;  %1063 = vst [vmem:[#allocation2 + $0xc] sm:$0xf] %v1062_v35  ;;  %v8333_v12 = vrot.slane %v772_v5, 7  ;;  %v612_v23 = vsel %vm548_vm1, %v516_v49, %v580_v9  ;;  %v7939_v49 = vld [vmem:[%s10612_s3 + $0xe8] sm:$0xff]   ;;  %v7943_v9 = vld [vmem:[%s10612_s3 + $0xe0] sm:$0xff]  }
  0x4a   : > { %v755_v31 = vshrl.u32 %v7152_v21, 16  ;;  %v758_v32 = vshll.u32 %v7152_v21, 16  ;;  %vm547_vm0 = vcmp.ge.f32.partialorder %v515_v16, 0.0  ;;  %v579_v47 = vmul.f32 0.01, %v515_v16 }
  0x4b   : > { %7435 = vmatpush3.bf16.msra.mxu0 %v7924_v29  ;;  %v751_v29 = vor.u32 %v749_v7, %v748_v17  ;;  %v770_v56 = vrot.slane %v765_v46, 4  ;;  %v8343_v17 = vadd.f32 %v8235_v33, %v479_v54 }
  0x4c   : > { %7483 = vmatpush3.bf16.msra.mxu1 %v7925_v34  ;;  %7436 = vmatprep.subr.bf16.mxu0 %v7926_v37  ;;  %v439_v34 = vld [vmem:[%s8152_s20 + $0x38] sm:$0xff]  ;;  %v757_v44 = vrot.slane %v755_v31, 7  ;;  %v611_v57 = vsel %vm547_vm0, %v515_v16, %v579_v47  ;;  %v8340_v16 = vmul.f32 %v8225_v28, %v441_v0  ;;  %v7935_v31 = vld [vmem:[%s10612_s3 + $0xf0] sm:$0xff]   ;;  %v778_v47 = vrot.slane %v8333_v12, 4 }
  0x4d   : > { %7484 = vmatprep.subr.bf16.mxu1 %v7927_v42  ;;  %v752_v41 = vsel %vm8283_vm12, %v744_v24, %v751_v29  ;;  %v478_v48 = vmul.f32 %v8225_v28, %v439_v34  ;;  %v8320_v61 = vpack.c.bf16 %v611_v57, %v611_v57  ;;  %v1075_v3 = vsel %vm8299_vm14, %v770_v56, %v1074_v52 }
  0x4e   : > { %1064 = vst [vmem:[#allocation2 + $0x10] sm:$0xf] %v752_v41  ;;  %v760_v50 = vor.u32 %v758_v32, %v757_v44  ;;  %v761_v51 = vrot.slane %v757_v44, 4  ;;  %1076 = vst [vmem:[#allocation2 + $0x20] sm:$0x1] %v1075_v3  ;;  %v8351_v24 = vmul.f32 %v8225_v28, %v442_v1  ;;  %vm550_vm4 = vcmp.ge.f32.partialorder %v8343_v17, 0.0 }
  0x4f   : > { %7437 = vmatpush3.bf16.msra.mxu0 %v7926_v37  ;;  %v766_v37 = vshll.u32 %v7153_v27, 16  ;;  %v8323_v62 = vadd.f32 %v8235_v33, %v478_v48  ;;  %v780_v7 = vshrl.u32 %v8320_v61, 16  ;;  %v783_v8 = vshll.u32 %v8320_v61, 16 }
  0x50   : > { %7485 = vmatpush3.bf16.msra.mxu1 %v7927_v42  ;;  %7518 = vmatprep.subr.bf16.mxu0 %v8271_v63  ;;  %v1068_v42 = vsel %vm8299_vm14, %v753_v30, %v1067_v26  ;;  %v1071_v60 = vsel %vm8291_vm13, %v760_v50, %v1070_v39  ;;  %v1177_v11 = vld [vmem:[#allocation2 + $0xc] sm:$0xf] }
  0x51   : > { %7566 = vmatprep.subr.bf16.mxu1 %v8278_v4  ;;  %1069 = vst [vmem:[#allocation2 + $0x14] sm:$0x1] %v1068_v42  ;;  %v768_v55 = vor.u32 %v766_v37, %v765_v46  ;;  %1072 = vst [vmem:[#allocation2 + $0x18] sm:$0xf] %v1071_v60  ;;  %vm549_vm2 = vcmp.ge.f32.partialorder %v8323_v62, 0.0  ;;  %v1267_v20 = vshrl.u32 %v1177_v11, 16  ;;  %v777_v42 = vor.u32 %v775_v6, %v8333_v12 }
  0x52   : > { %v8337_v13 = vmul.f32 0.01, %v8323_v62  ;;  %v1270_v21 = vshll.u32 %v1177_v11, 16  ;;  %v1077_v37 = vld [vmem:[#allocation2 + $0x24] sm:$0xf]  ;;  %v782_v48 = vrot.slane %v780_v7, 7 }
  0x53   : > { %v769_v2 = vsel %vm8283_vm12, %v761_v51, %v768_v55  ;;  %v1269_v32 = vrot.slane %v1267_v20, 4  ;;  %v1078_v55 = vsel %vm8291_vm13, %v777_v42, %v1077_v37  ;;  %v1081_v60 = vld [vmem:[#allocation2 + $0x2c] sm:$0x1]  ;;  %v582_v42 = vmul.f32 0.01, %v8343_v17 }
  0x54   : > { %1073 = vst [vmem:[#allocation2 + $0x1c] sm:$0xf] %v769_v2  ;;  %v1272_v34 = vrot.slane %v1270_v21, 5  ;;  %1079 = vst [vmem:[#allocation2 + $0x24] sm:$0xf] %v1078_v55  ;;  %v785_v7 = vor.u32 %v783_v8, %v782_v48  ;;  %v787_v21 = vrot.slane %v782_v48, 4 }
  0x55   : > { %v8345_v19 = vld [vmem:[#allocation2 + $0x10] sm:$0xf]  ;;  %v1225_v54 = vld [vmem:[#allocation2 + $0x20] sm:$0x1] }
  0x56   : > { %v1280_v26 = vshrl.u32 %v8345_v19, 16  ;;  %v6770_v27 = vcombine.low %v1177_v11, %v8345_v19  ;;  %v2281_v29 = vrot.slane %v8345_v19, 5  ;;  %v1276_v30 = vshll.u32 %v8345_v19, 16  ;;  %v7934_v8 = vld [vmem:[%s10612_s3 + $0xb0] sm:$0xff]  }
  0x57   : > { %v1273_v44 = vor.u32 %v1272_v34, %v1269_v32  ;;  %v1310_v2 = vshll.u32 %v1225_v54, 16  ;;  %v1082_v34 = vsel %vm8299_vm14, %v787_v21, %v1081_v60  ;;  %v7947_v54 = vld [vmem:[%s10612_s3 + $0xd8] sm:$0xff]  }
  0x58   : > { %v8347_v22 = vld [vmem:[#allocation2 + $0x14] sm:$0x1]  ;;  %7487 = vmatmul.mubr.bf16.vlgmr.msra.gmra.mxu1 %v6770_v27  ;;  %v8364_v39 = vrot.slane %v2281_v29, 4  ;;  %v1278_v40 = vrot.slane %v1276_v30, 5  ;;  %v1282_v41 = vrot.slane %v1280_v26, 4  ;;  %v786_v30 = vsel %vm8283_vm12, %v778_v47, %v785_v7 }
  0x59   : > { %v1286_v35 = vshll.u32 %v8347_v22, 16  ;;  %v2284_v36 = vrot.slane %v8347_v22, 5  ;;  %7567 = vmatpush3.bf16.msra.mxu1 %v8278_v4  ;;  %v1179_v46 = vld [vmem:[#allocation2 + $0x18] sm:$0xf]  ;;  %v1274_v56 = vrot.slane %v1273_v44, 4  ;;  %v1312_v20 = vrot.slane %v1310_v2, 5 }
  0x5a   : > { %v1283_v50 = vor.u32 %v1282_v41, %v1278_v40  ;;  %v1291_v52 = vshrl.u32 %v1179_v46, 16  ;;  %v1294_v53 = vshll.u32 %v1179_v46, 16  ;;  %7568 = vmatprep.subr.bf16.mxu1 %v7935_v31  ;;  %1080 = vst [vmem:[#allocation2 + $0x28] sm:$0xf] %v786_v30  ;;  %1083 = vst [vmem:[#allocation2 + $0x2c] sm:$0x1] %v1082_v34  ;;  %v519_v41 = vadd.f32 %v8235_v33, %v8340_v16 }
  0x5b   : > { %v1288_v45 = vrot.slane %v1286_v35, 5  ;;  %v1180_v51 = vld [vmem:[#allocation2 + $0x1c] sm:$0xf]  ;;  %v1279_v3 = vsel %vm8245_vm3, %v1274_v56, %v1278_v40  ;;  %v7156_v35 = vpack.c.bf16 %v612_v23, %v612_v23  ;;  %v3848_v18 = vld [vmem:[#allocation2 + $0x24] sm:$0xe] }
  0x5c   : > { %v1304_v57 = vshrl.u32 %v1180_v51, 16  ;;  %v6771_v4 = vcombine.low %v1179_v46, %v1180_v51  ;;  %v1300_v58 = vshll.u32 %v1180_v51, 16  ;;  %v1284_v61 = vrot.slane %v1283_v50, 4 }
  0x5d   : > { %v1293_v0 = vrot.slane %v1291_v52, 4  ;;  %v1296_v1 = vrot.slane %v1294_v53, 5  ;;  %7569 = vmatpush3.bf16.msra.mxu1 %v7935_v31  ;;  %v613_v31 = vsel %vm549_vm2, %v8323_v62, %v8337_v13  ;;  %v1181_v13 = vld [vmem:[#allocation2 + $0x24] sm:$0xf]  ;;  %v789_v23 = vshrl.u32 %v7156_v35, 16  ;;  %v443_v53 = vld [vmem:[%s8152_s20 + $0x58] sm:$0xff] }
  0x5e   : > { %7490 = vmatprep.mubr.bf16.mxu1 %v6771_v4  ;;  %v1302_v5 = vrot.slane %v1300_v58, 5  ;;  %v1306_v6 = vrot.slane %v1304_v57, 4  ;;  %v1289_v11 = vsel %vm8245_vm3, %v1284_v61, %v1288_v45  ;;  %7570 = vmatprep.subr.bf16.mxu1 %v7939_v49  ;;  %v7157_v37 = vpack.c.bf16 %v613_v31, %v613_v31  ;;  %v1084_v52 = vld [vmem:[#allocation2 + $0x30] sm:$0xf] }
  0x5f   : > { %v1297_v12 = vor.u32 %v1296_v1, %v1293_v0  ;;  %v6746_v26 = vcombine.low %v1279_v3, %v1289_v11  ;;  %v792_v44 = vshll.u32 %v7156_v35, 16  ;;  %v1315_v16 = vshrl.u32 %v1181_v13, 16  ;;  %v1088_v1 = vld [vmem:[#allocation2 + $0x38] sm:$0x1] }
  0x60   : > { %v1307_v27 = vor.u32 %v1306_v6, %v1302_v5  ;;  %v797_v45 = vshrl.u32 %v7157_v37, 16  ;;  %v1318_v47 = vshll.u32 %v1181_v13, 16  ;;  %v800_v48 = vshll.u32 %v7157_v37, 16 }
  0x61   : > { %v1298_v32 = vrot.slane %v1297_v12, 4  ;;  %7439 = vmatmul.mubr.bf16.vlgmr.msra.gmra.mxu0 %v6746_v26  ;;  %7571 = vmatpush3.bf16.msra.mxu1 %v7939_v49  ;;  %v791_v50 = vrot.slane %v789_v23, 7  ;;  %vm551_vm5 = vcmp.ge.f32.partialorder %v519_v41, 0.0  ;;  %v1317_v55 = vrot.slane %v1315_v16, 4  ;;  %v1182_v2 = vld [vmem:[#allocation2 + $0x28] sm:$0xf] }
  0x62   : > { %v1308_v40 = vrot.slane %v1307_v27, 4  ;;  %7519 = vmatpush3.bf16.msra.mxu0 %v8271_v63  ;;  %7572 = vmatprep.subr.bf16.mxu1 %v7943_v9  ;;  %v7938_v63 = vld [vmem:[%s10612_s3 + $0xa8] sm:$0xff]   ;;  %v799_v51 = vrot.slane %v797_v45, 7  ;;  %v1320_v56 = vrot.slane %v1318_v47, 5  ;;  %v583_v57 = vmul.f32 0.01, %v519_v41 }
  0x63   : > { %v1303_v62 = vsel %vm8245_vm3, %v1298_v32, %v1302_v5  ;;  %7520 = vmatprep.subr.bf16.mxu0 %v7934_v8  ;;  %v614_v4 = vsel %vm550_vm4, %v8343_v17, %v582_v42  ;;  %v794_v58 = vor.u32 %v792_v44, %v791_v50  ;;  %v795_v60 = vrot.slane %v791_v50, 4  ;;  %v7942_v17 = vld [vmem:[%s10612_s3 + $0xa0] sm:$0xff]   ;;  %v7946_v44 = vld [vmem:[%s10612_s3 + $0x98] sm:$0xff]  }
  0x64   : > { %v1313_v46 = vsel %vm8245_vm3, %v1308_v40, %v1312_v20  ;;  %v802_v61 = vor.u32 %v800_v48, %v799_v51  ;;  %v804_v0 = vrot.slane %v799_v51, 4  ;;  %v1321_v3 = vor.u32 %v1320_v56, %v1317_v55  ;;  %v1226_v20 = vld [vmem:[#allocation2 + $0x2c] sm:$0x1]  ;;  %v444_v48 = vld [vmem:[%s8152_s20 + $0x60] sm:$0xff] }
  0x65   : > { %v6747_v49 = vcombine.low %v1303_v62, %v1313_v46  ;;  %7573 = vmatpush3.bf16.msra.mxu1 %v7943_v9  ;;  %v615_v5 = vsel %vm551_vm5, %v519_v41, %v583_v57  ;;  %v7158_v6 = vpack.c.bf16 %v614_v4, %v614_v4  ;;  %v482_v7 = vmul.f32 %v8225_v28, %v443_v53  ;;  %v7951_v9 = vld [vmem:[%s10612_s3 + $0xd0] sm:$0xff]   ;;  %v7955_v40 = vld [vmem:[%s10612_s3 + $0xc8] sm:$0xff]   ;;  %v1091_v62 = vld [vmem:[#allocation2 + $0x3c] sm:$0xf] }
  0x66   : > { %7521 = vmatpush3.bf16.msra.mxu0 %v7934_v8  ;;  %v1328_v11 = vshrl.u32 %v1182_v2, 16  ;;  %v6772_v12 = vcombine.low %v1181_v13, %v1182_v2  ;;  %v1324_v21 = vshll.u32 %v1182_v2, 16  ;;  %v803_v26 = vsel %vm8283_vm12, %v795_v60, %v802_v61  ;;  %7574 = vmatprep.subr.bf16.mxu1 %v7947_v54 }
  0x67   : > { %7442 = vmatprep.mubr.bf16.mxu0 %v6747_v49  ;;  %7522 = vmatprep.subr.bf16.mxu0 %v7938_v63  ;;  %v1322_v27 = vrot.slane %v1321_v3, 4  ;;  %v1334_v30 = vshll.u32 %v1226_v20, 16  ;;  %v1085_v8 = vsel %vm8291_vm13, %v794_v58, %v1084_v52  ;;  %1087 = vst [vmem:[#allocation2 + $0x34] sm:$0xf] %v803_v26  ;;  %v1089_v31 = vsel %vm8299_vm14, %v804_v0, %v1088_v1  ;;  %v7950_v58 = vld [vmem:[%s10612_s3 + $0x90] sm:$0xff]  }
  0x68   : > { %7491 = vmatmul.mubr.bf16.gmra.mxu1 %v6772_v12  ;;  %v1326_v32 = vrot.slane %v1324_v21, 5  ;;  %v1330_v34 = vrot.slane %v1328_v11, 4  ;;  %1086 = vst [vmem:[#allocation2 + $0x30] sm:$0xf] %v1085_v8  ;;  %1090 = vst [vmem:[#allocation2 + $0x38] sm:$0x1] %v1089_v31  ;;  %v7159_v35 = vpack.c.bf16 %v615_v5, %v615_v5  ;;  %v520_v13 = vadd.f32 %v8235_v33, %v8351_v24 }
  0x69   : > { %7575 = vmatpush3.bf16.msra.mxu1 %v7947_v54  ;;  %v806_v37 = vshrl.u32 %v7158_v6, 16  ;;  %v1336_v41 = vrot.slane %v1334_v30, 5  ;;  %v809_v42 = vshll.u32 %v7158_v6, 16  ;;  %v521_v23 = vadd.f32 %v8235_v33, %v482_v7  ;;  %v1095_v54 = vld [vmem:[#allocation2 + $0x44] sm:$0x1]  ;;  %v446_v31 = vld [vmem:[%s8152_s20 + $0x70] sm:$0xff] }
  0x6a   : > { %7523 = vmatpush3.bf16.msra.mxu0 %v7938_v63  ;;  %7576 = vmatprep.subr.bf16.mxu1 %v7951_v9  ;;  %v1327_v45 = vsel %vm8245_vm3, %v1322_v27, %v1326_v32  ;;  %v1331_v46 = vor.u32 %v1330_v34, %v1326_v32  ;;  %v814_v47 = vshrl.u32 %v7159_v35, 16  ;;  %v445_v63 = vld [vmem:[%s8152_s20 + $0x68] sm:$0xff]  ;;  %v817_v49 = vshll.u32 %v7159_v35, 16 }
  0x6b   : > { %7524 = vmatprep.subr.bf16.mxu0 %v7942_v17  ;;  %v808_v16 = vrot.slane %v806_v37, 7  ;;  %vm552_vm6 = vcmp.ge.f32.partialorder %v520_v13, 0.0  ;;  %vm553_vm7 = vcmp.ge.f32.partialorder %v521_v23, 0.0  ;;  %v584_v24 = vmul.f32 0.01, %v520_v13  ;;  %v7954_v32 = vld [vmem:[%s10612_s3 + $0x88] sm:$0xff]  }
  0x6c   : > { %v1332_v50 = vrot.slane %v1331_v46, 4  ;;  %v816_v53 = vrot.slane %v814_v47, 7  ;;  %v585_v55 = vmul.f32 0.01, %v521_v23  ;;  %v483_v57 = vmul.f32 %v8225_v28, %v444_v48  ;;  %v7958_v48 = vld [vmem:[%s10612_s3 + $0x80] sm:$0xff]  }
  0x6d   : > { %7577 = vmatpush3.bf16.msra.mxu1 %v7951_v9  ;;  %v811_v51 = vor.u32 %v809_v42, %v808_v16  ;;  %v812_v52 = vrot.slane %v808_v16, 4  ;;  %v616_v56 = vsel %vm552_vm6, %v520_v13, %v584_v24  ;;  %v484_v4 = vmul.f32 %v8225_v28, %v445_v63 }
  0x6e   : > { %7525 = vmatpush3.bf16.msra.mxu0 %v7942_v17  ;;  %7578 = vmatprep.subr.bf16.mxu1 %v7955_v40  ;;  %v1337_v60 = vsel %vm8245_vm3, %v1332_v50, %v1336_v41  ;;  %v1184_v61 = vld [vmem:[#allocation2 + $0x34] sm:$0xf]  ;;  %v819_v0 = vor.u32 %v817_v49, %v816_v53  ;;  %v821_v2 = vrot.slane %v816_v53, 4  ;;  %v617_v9 = vsel %vm553_vm7, %v521_v23, %v585_v55  ;;  %v447_v41 = vld [vmem:[%s8152_s20 + $0x78] sm:$0xff]  ;;  %v1098_v53 = vld [vmem:[#allocation2 + $0x48] sm:$0xf] }
  0x6f   : > { %7526 = vmatprep.subr.bf16.mxu0 %v7946_v44  ;;  %v1092_v1 = vsel %vm8291_vm13, %v811_v51, %v1091_v62  ;;  %v6748_v3 = vcombine.low %v1327_v45, %v1337_v60  ;;  %v1183_v5 = vld [vmem:[#allocation2 + $0x30] sm:$0xf]  ;;  %v1352_v6 = vshrl.u32 %v1184_v61, 16  ;;  %v1227_v7 = vld [vmem:[#allocation2 + $0x38] sm:$0x1]  ;;  %v1348_v17 = vshll.u32 %v1184_v61, 16 }
  0x70   : > { %1093 = vst [vmem:[#allocation2 + $0x3c] sm:$0xf] %v1092_v1  ;;  %v1339_v11 = vshrl.u32 %v1183_v5, 16  ;;  %v1342_v12 = vshll.u32 %v1183_v5, 16  ;;  %v6773_v20 = vcombine.low %v1183_v5, %v1184_v61  ;;  %v1358_v21 = vshll.u32 %v1227_v7, 16 }
  0x71   : > { %7579 = vmatpush3.bf16.msra.mxu1 %v7955_v40  ;;  %7443 = vmatmul.mubr.bf16.gmra.mxu0 %v6748_v3  ;;  %v1350_v26 = vrot.slane %v1348_v17, 5  ;;  %v1354_v27 = vrot.slane %v1352_v6, 4  ;;  %v820_v30 = vsel %vm8283_vm12, %v812_v52, %v819_v0  ;;  %v1096_v8 = vsel %vm8299_vm14, %v821_v2, %v1095_v54  ;;  %v1102_v0 = vld [vmem:[#allocation2 + $0x50] sm:$0x1]  ;;  %v7962_v2 = vld [vmem:[%s10612_s3 + $0x138] sm:$0xff]  }
  0x72   : > { %7527 = vmatpush3.bf16.msra.mxu0 %v7946_v44  ;;  %v1341_v34 = vrot.slane %v1339_v11, 4  ;;  %v1344_v35 = vrot.slane %v1342_v12, 5  ;;  %7494 = vmatprep.mubr.bf16.mxu1 %v6773_v20  ;;  %v1360_v37 = vrot.slane %v1358_v21, 5  ;;  %1094 = vst [vmem:[#allocation2 + $0x40] sm:$0xf] %v820_v30  ;;  %v7160_v40 = vpack.c.bf16 %v616_v56, %v616_v56  ;;  %v7959_v44 = vld [vmem:[%s10612_s3 + $0xc0] sm:$0xff]  }
  0x73   : > { %7528 = vmatprep.subr.bf16.mxu0 %v7950_v58  ;;  %1097 = vst [vmem:[#allocation2 + $0x44] sm:$0x1] %v1096_v8  ;;  %v1355_v42 = vor.u32 %v1354_v27, %v1350_v26  ;;  %v7161_v62 = vpack.c.bf16 %v617_v9, %v617_v9  ;;  %v522_v13 = vadd.f32 %v8235_v33, %v483_v57 }
  0x74   : > { %v8459_v23 = vadd.f32 %v8235_v33, %v484_v4  ;;  %v1345_v45 = vor.u32 %v1344_v35, %v1341_v34  ;;  %v823_v46 = vshrl.u32 %v7160_v40, 16  ;;  %v826_v16 = vshll.u32 %v7160_v40, 16  ;;  %7580 = vmatprep.subr.bf16.mxu1 %v7959_v44 }
  0x75   : > { %v485_v47 = vmul.f32 %v8225_v28, %v446_v31  ;;  %v1356_v63 = vrot.slane %v1355_v42, 4  ;;  %v831_v49 = vshrl.u32 %v7161_v62, 16  ;;  %v834_v24 = vshll.u32 %v7161_v62, 16  ;;  %7581 = vmatpush3.bf16.msra.mxu1 %v7959_v44 }
  0x76   : > { %7529 = vmatpush3.bf16.msra.mxu0 %v7950_v58  ;;  %vm554_vm8 = vcmp.ge.f32.partialorder %v522_v13, 0.0  ;;  %v1346_v50 = vrot.slane %v1345_v45, 4  ;;  %v825_v52 = vrot.slane %v823_v46, 7  ;;  %vm555_vm9 = vcmp.ge.f32.partialorder %v8459_v23, 0.0 }
  0x77   : > { %7530 = vmatprep.subr.bf16.mxu0 %v7954_v32  ;;  %v1185_v51 = vld [vmem:[#allocation2 + $0x3c] sm:$0xf]  ;;  %v486_v54 = vmul.f32 %v8225_v28, %v447_v41  ;;  %v1361_v55 = vsel %vm8245_vm3, %v1356_v63, %v1360_v37  ;;  %v833_v4 = vrot.slane %v831_v49, 7  ;;  %v586_v1 = vmul.f32 0.01, %v522_v13 }
  0x78   : > { %v1363_v56 = vshrl.u32 %v1185_v51, 16  ;;  %v1366_v57 = vshll.u32 %v1185_v51, 16  ;;  %v1351_v58 = vsel %vm8245_vm3, %v1346_v50, %v1350_v26  ;;  %v828_v60 = vor.u32 %v826_v16, %v825_v52  ;;  %v7963_v37 = vld [vmem:[%s10612_s3 + $0x178] sm:$0xff]  }
  0x79   : > { %v829_v61 = vrot.slane %v825_v52, 4  ;;  %v6749_v3 = vcombine.low %v1351_v58, %v1361_v55  ;;  %v1186_v5 = vld [vmem:[#allocation2 + $0x40] sm:$0xf]  ;;  %v836_v9 = vor.u32 %v834_v24, %v833_v4  ;;  %v838_v8 = vrot.slane %v833_v4, 4  ;;  %7662 = vmatprep.subr.bf16.mxu1 %v7963_v37  ;;  %v449_v24 = vld [vmem:[%s8152_s20 + $0x88] sm:$0xff] }
  0x7a   : > { %7531 = vmatpush3.bf16.msra.mxu0 %v7954_v32  ;;  %v1365_v6 = vrot.slane %v1363_v56, 4  ;;  %v1368_v7 = vrot.slane %v1366_v57, 5  ;;  %v1228_v17 = vld [vmem:[#allocation2 + $0x44] sm:$0x1]  ;;  %v1376_v11 = vshrl.u32 %v1186_v5, 16  ;;  %v6774_v12 = vcombine.low %v1185_v51, %v1186_v5 }
  0x7b   : > { %7532 = vmatprep.subr.bf16.mxu0 %v7958_v48  ;;  %v1372_v20 = vshll.u32 %v1186_v5, 16  ;;  %v1382_v21 = vshll.u32 %v1228_v17, 16  ;;  %7446 = vmatprep.mubr.bf16.mxu0 %v6749_v3  ;;  %v837_v27 = vsel %vm8283_vm12, %v829_v61, %v836_v9  ;;  %v1099_v30 = vsel %vm8291_vm13, %v828_v60, %v1098_v53  ;;  %v1105_v56 = vld [vmem:[#allocation2 + $0x54] sm:$0xf]  ;;  %v1109_v17 = vld [vmem:[#allocation2 + $0x5c] sm:$0x1] }
  0x7c   : > { %v1369_v26 = vor.u32 %v1368_v7, %v1365_v6  ;;  %7495 = vmatmul.mubr.bf16.gmra.mxu1 %v6774_v12  ;;  %v1378_v32 = vrot.slane %v1376_v11, 4  ;;  %1100 = vst [vmem:[#allocation2 + $0x48] sm:$0xf] %v1099_v30  ;;  %1101 = vst [vmem:[#allocation2 + $0x4c] sm:$0xf] %v837_v27  ;;  %v1103_v41 = vsel %vm8299_vm14, %v838_v8, %v1102_v0 }
  0x7d   : > { %v1374_v31 = vrot.slane %v1372_v20, 5  ;;  %v1384_v34 = vrot.slane %v1382_v21, 5  ;;  %v587_v35 = vmul.f32 0.01, %v8459_v23  ;;  %v618_v42 = vsel %vm554_vm8, %v522_v13, %v586_v1  ;;  %1104 = vst [vmem:[#allocation2 + $0x50] sm:$0x1] %v1103_v41 }
  0x7e   : > { %7533 = vmatpush3.bf16.msra.mxu0 %v7958_v48  ;;  %v1370_v40 = vrot.slane %v1369_v26, 4  ;;  %v524_v62 = vadd.f32 %v8235_v33, %v485_v47  ;;  %v7162_v46 = vpack.c.bf16 %v618_v42, %v618_v42  ;;  %v525_v16 = vadd.f32 %v8235_v33, %v486_v54  ;;  %v448_v48 = vld [vmem:[%s8152_s20 + $0x80] sm:$0xff] }
  0x7f   : > { %7614 = vmatprep.subr.bf16.mxu0 %v7962_v2  ;;  %v1379_v44 = vor.u32 %v1378_v32, %v1374_v31  ;;  %v619_v45 = vsel %vm555_vm9, %v8459_v23, %v587_v35  ;;  %v487_v4 = vmul.f32 %v8225_v28, %v448_v48  ;;  %v488_v2 = vmul.f32 %v8225_v28, %v449_v24 }
  0x80   : > { %v1375_v63 = vsel %vm8245_vm3, %v1370_v40, %v1374_v31  ;;  %v7163_v49 = vpack.c.bf16 %v619_v45, %v619_v45  ;;  %vm556_vm10 = vcmp.ge.f32.partialorder %v524_v62, 0.0  ;;  %v588_v13 = vmul.f32 0.01, %v524_v62  ;;  %v8510_v45 = vld [vmem:[%s10611_s2] ss:$0 sm:$0xff] }
  0x81   : > { %v1380_v47 = vrot.slane %v1379_v44, 4  ;;  %v840_v50 = vshrl.u32 %v7162_v46, 16  ;;  %v843_v51 = vshll.u32 %v7162_v46, 16  ;;  %vm557_vm11 = vcmp.ge.f32.partialorder %v525_v16, 0.0 }
  0x82   : > { %v848_v52 = vshrl.u32 %v7163_v49, 16  ;;  %v851_v53 = vshll.u32 %v7163_v49, 16  ;;  %v589_v55 = vmul.f32 0.01, %v525_v16  ;;  %v620_v23 = vsel %vm556_vm10, %v524_v62, %v588_v13  ;;  %v1112_v13 = vld [vmem:[#allocation2 + $0x60] sm:$0xf] }
  0x83   : > { %v1385_v33 = vsel %vm8245_vm3, %v1380_v47, %v1384_v34  ;;  %v842_v54 = vrot.slane %v840_v50, 7  ;;  %v7164_v57 = vpack.c.bf16 %v620_v23, %v620_v23  ;;  %v1187_v60 = vld [vmem:[#allocation2 + $0x48] sm:$0xf]  ;;  %v1188_v61 = vld [vmem:[#allocation2 + $0x4c] sm:$0xf]  ;;  %v526_v46 = vadd.f32 %v8510_v45, %v487_v4  ;;  %v450_v23 = vld [vmem:[%s8152_s20 + $0x90] sm:$0xff] }
  0x84   : > { %v6750_v58 = vcombine.low %v1375_v63, %v1385_v33  ;;  %v850_v0 = vrot.slane %v848_v52, 7  ;;  %v621_v1 = vsel %vm557_vm11, %v525_v16, %v589_v55  ;;  %v1387_v3 = vshrl.u32 %v1187_v60, 16  ;;  %v1229_v9 = vld [vmem:[#allocation2 + $0x50] sm:$0x1]  ;;  %v451_v33 = vld [vmem:[%s8152_s20 + $0x98] sm:$0xff] }
  0x85   : > { %v1390_v5 = vshll.u32 %v1187_v60, 16  ;;  %v1400_v6 = vshrl.u32 %v1188_v61, 16  ;;  %v6775_v7 = vcombine.low %v1187_v60, %v1188_v61  ;;  %v1396_v11 = vshll.u32 %v1188_v61, 16 }
  0x86   : > { %7447 = vmatmul.mubr.bf16.gmra.mxu0 %v6750_v58  ;;  %v845_v12 = vor.u32 %v843_v51, %v842_v54  ;;  %v846_v20 = vrot.slane %v842_v54, 4  ;;  %v853_v21 = vor.u32 %v851_v53, %v850_v0  ;;  %v1389_v26 = vrot.slane %v1387_v3, 4 }
  0x87   : > { %v1392_v27 = vrot.slane %v1390_v5, 5  ;;  %7498 = vmatprep.mubr.bf16.mxu1 %v6775_v7  ;;  %v1402_v30 = vrot.slane %v1400_v6, 4  ;;  %v1406_v8 = vshll.u32 %v1229_v9, 16  ;;  %v1398_v31 = vrot.slane %v1396_v11, 5  ;;  %v8525_v6 = vld [vmem:[%s10610_s1] ss:$0 sm:$0xff] }
  0x88   : > { %v854_v28 = vsel %vm8283_vm12, %v846_v20, %v853_v21  ;;  %v1106_v32 = vsel %vm8291_vm13, %v845_v12, %v1105_v56  ;;  %v855_v34 = vrot.slane %v850_v0, 4  ;;  %v7165_v40 = vpack.c.bf16 %v621_v1, %v621_v1  ;;  %v1116_v56 = vld [vmem:[#allocation2 + $0x68] sm:$0x1] }
  0x89   : > { %v1393_v35 = vor.u32 %v1392_v27, %v1389_v26  ;;  %v1408_v37 = vrot.slane %v1406_v8, 5  ;;  %1107 = vst [vmem:[#allocation2 + $0x54] sm:$0xf] %v1106_v32  ;;  %1108 = vst [vmem:[#allocation2 + $0x58] sm:$0xf] %v854_v28  ;;  %v857_v41 = vshrl.u32 %v7164_v57, 16  ;;  %v1403_v42 = vor.u32 %v1402_v30, %v1398_v31 }
  0x8a   : > { %v1110_v62 = vsel %vm8299_vm14, %v855_v34, %v1109_v17  ;;  %v860_v44 = vshll.u32 %v7164_v57, 16  ;;  %v865_v63 = vshrl.u32 %v7165_v40, 16  ;;  %v868_v49 = vshll.u32 %v7165_v40, 16 }
  0x8b   : > { %v1394_v16 = vrot.slane %v1393_v35, 4  ;;  %1111 = vst [vmem:[#allocation2 + $0x5c] sm:$0x1] %v1110_v62  ;;  %v859_v48 = vrot.slane %v857_v41, 7  ;;  %v1404_v24 = vrot.slane %v1403_v42, 4  ;;  %v527_v47 = vadd.f32 %v8510_v45, %v488_v2 }
  0x8c   : > { %vm558_vm15 = vcmp.ge.f32.partialorder %v526_v46, 0.0  ;;  %v590_v50 = vmul.f32 0.01, %v526_v46  ;;  %v867_v55 = vrot.slane %v865_v63, 7  ;;  %v489_v7 = vmul.f32 %v8525_v6, %v450_v23 }
  0x8d   : > { %v1399_v51 = vsel %vm8245_vm3, %v1394_v16, %v1398_v31  ;;  %v862_v52 = vor.u32 %v860_v44, %v859_v48  ;;  %v863_v53 = vrot.slane %v859_v48, 4  ;;  %v1409_v54 = vsel %vm8245_vm3, %v1404_v24, %v1408_v37  ;;  %v452_v31 = vld [vmem:[%s8152_s20 + $0xa0] sm:$0xff]  ;;  %v1119_v16 = vld [vmem:[#allocation2 + $0x6c] sm:$0xf] }
  0x8e   : > { %vm559_vm0 = vcmp.ge.f32.partialorder %v527_v47, 0.0  ;;  %v591_v57 = vmul.f32 0.01, %v527_v47  ;;  %v622_v4 = vsel %vm558_vm15, %v526_v46, %v590_v50  ;;  %v6751_v58 = vcombine.low %v1399_v51, %v1409_v54 }
  0x8f   : > { %v870_v60 = vor.u32 %v868_v49, %v867_v55  ;;  %v1113_v61 = vsel %vm8291_vm13, %v862_v52, %v1112_v13  ;;  %v872_v0 = vrot.slane %v867_v55, 4  ;;  %v7166_v5 = vpack.c.bf16 %v622_v4, %v622_v4 }
  0x90   : > { %v1189_v1 = vld [vmem:[#allocation2 + $0x54] sm:$0xf]  ;;  %v1190_v2 = vld [vmem:[#allocation2 + $0x58] sm:$0xf]  ;;  %1114 = vst [vmem:[#allocation2 + $0x60] sm:$0xf] %v1113_v61  ;;  %v623_v3 = vsel %vm559_vm0, %v527_v47, %v591_v57  ;;  %v490_v17 = vmul.f32 %v8525_v6, %v451_v33  ;;  %7450 = vmatprep.mubr.bf16.mxu0 %v6751_v58  ;;  %v528_v48 = vadd.f32 %v8510_v45, %v489_v7 }
  0x91   : > { %v1411_v9 = vshrl.u32 %v1189_v1, 16  ;;  %v1414_v11 = vshll.u32 %v1189_v1, 16  ;;  %v1424_v12 = vshrl.u32 %v1190_v2, 16  ;;  %v6776_v20 = vcombine.low %v1189_v1, %v1190_v2  ;;  %v1123_v58 = vld [vmem:[#allocation2 + $0x74] sm:$0x1] }
  0x92   : > { %v1230_v21 = vld [vmem:[#allocation2 + $0x5c] sm:$0x1]  ;;  %v1420_v26 = vshll.u32 %v1190_v2, 16  ;;  %v871_v27 = vsel %vm8283_vm12, %v863_v53, %v870_v60  ;;  %v1117_v30 = vsel %vm8299_vm14, %v872_v0, %v1116_v56  ;;  %v7167_v8 = vpack.c.bf16 %v623_v3, %v623_v3 }
  0x93   : > { %v1413_v28 = vrot.slane %v1411_v9, 4  ;;  %v1416_v32 = vrot.slane %v1414_v11, 5  ;;  %7499 = vmatmul.mubr.bf16.gmra.mxu1 %v6776_v20  ;;  %v1426_v34 = vrot.slane %v1424_v12, 4  ;;  %v1430_v35 = vshll.u32 %v1230_v21, 16  ;;  %1115 = vst [vmem:[#allocation2 + $0x64] sm:$0xf] %v871_v27 }
  0x94   : > { %1118 = vst [vmem:[#allocation2 + $0x68] sm:$0x1] %v1117_v30  ;;  %v1422_v37 = vrot.slane %v1420_v26, 5  ;;  %v874_v40 = vshrl.u32 %v7166_v5, 16  ;;  %v877_v41 = vshll.u32 %v7166_v5, 16  ;;  %v882_v42 = vshrl.u32 %v7167_v8, 16 }
  0x95   : > { %v1417_v62 = vor.u32 %v1416_v32, %v1413_v28  ;;  %v1432_v44 = vrot.slane %v1430_v35, 5  ;;  %v885_v46 = vshll.u32 %v7167_v8, 16  ;;  %v529_v24 = vadd.f32 %v8510_v45, %v490_v17  ;;  %v453_v11 = vld [vmem:[%s8152_s20 + $0xa8] sm:$0xff]  ;;  %v454_v27 = vld [vmem:[%s8152_s20 + $0xb0] sm:$0xff]  ;;  %v455_v28 = vld [vmem:[%s8152_s20 + $0xb8] sm:$0xff] }
  0x96   : > { %v1427_v63 = vor.u32 %v1426_v34, %v1422_v37  ;;  %v876_v49 = vrot.slane %v874_v40, 7  ;;  %v884_v13 = vrot.slane %v882_v42, 7  ;;  %vm560_vm1 = vcmp.ge.f32.partialorder %v528_v48, 0.0 }
  0x97   : > { %v1418_v47 = vrot.slane %v1417_v62, 4  ;;  %v1191_v50 = vld [vmem:[#allocation2 + $0x60] sm:$0xf]  ;;  %v592_v51 = vmul.f32 0.01, %v528_v48  ;;  %v491_v52 = vmul.f32 %v8525_v6, %v452_v31  ;;  %vm561_vm2 = vcmp.ge.f32.partialorder %v529_v24, 0.0 }
  0x98   : > { %v1428_v53 = vrot.slane %v1427_v63, 4  ;;  %v1435_v55 = vshrl.u32 %v1191_v50, 16  ;;  %v1438_v23 = vshll.u32 %v1191_v50, 16  ;;  %v879_v33 = vor.u32 %v877_v41, %v876_v49 }
  0x99   : > { %v1423_v54 = vsel %vm8245_vm3, %v1418_v47, %v1422_v37  ;;  %v880_v56 = vrot.slane %v876_v49, 4  ;;  %v887_v57 = vor.u32 %v885_v46, %v884_v13  ;;  %v889_v4 = vrot.slane %v884_v13, 4 }
  0x9a   : > { %v1433_v60 = vsel %vm8245_vm3, %v1428_v53, %v1432_v44  ;;  %v8541_v61 = vld [vmem:[#allocation2 + $0x64] sm:$0xf]  ;;  %v1437_v0 = vrot.slane %v1435_v55, 4  ;;  %v1440_v1 = vrot.slane %v1438_v23, 5  ;;  %v1120_v3 = vsel %vm8291_vm13, %v879_v33, %v1119_v16  ;;  %v1126_v33 = vld [vmem:[#allocation2 + $0x78] sm:$0xf] }
  0x9b   : > { %v8543_v2 = vld [vmem:[#allocation2 + $0x68] sm:$0x1]  ;;  %v6752_v5 = vcombine.low %v1423_v54, %v1433_v60  ;;  %v1448_v7 = vshrl.u32 %v8541_v61, 16  ;;  %v6777_v17 = vcombine.low %v1191_v50, %v8541_v61  ;;  %v1444_v9 = vshll.u32 %v8541_v61, 16  ;;  %1121 = vst [vmem:[#allocation2 + $0x6c] sm:$0xf] %v1120_v3 }
  0x9c   : > { %v1441_v12 = vor.u32 %v1440_v1, %v1437_v0  ;;  %v1454_v20 = vshll.u32 %v8543_v2, 16  ;;  %v888_v21 = vsel %vm8283_vm12, %v880_v56, %v887_v57  ;;  %v1124_v26 = vsel %vm8299_vm14, %v889_v4, %v1123_v58 }
  0x9d   : > { %7451 = vmatmul.mubr.bf16.gmra.mxu0 %v6752_v5  ;;  %7502 = vmatprep.mubr.bf16.mxu1 %v6777_v17  ;;  %v1446_v30 = vrot.slane %v1444_v9, 5  ;;  %v1450_v8 = vrot.slane %v1448_v7, 4  ;;  %1122 = vst [vmem:[#allocation2 + $0x70] sm:$0xf] %v888_v21  ;;  %1125 = vst [vmem:[#allocation2 + $0x74] sm:$0x1] %v1124_v26  ;;  %v624_v35 = vsel %vm560_vm1, %v528_v48, %v592_v51 }
  0x9e   : > { %v593_v31 = vmul.f32 0.01, %v529_v24  ;;  %v1442_v32 = vrot.slane %v1441_v12, 4  ;;  %v1456_v34 = vrot.slane %v1454_v20, 5  ;;  %v492_v37 = vmul.f32 %v8525_v6, %v453_v11  ;;  %v1130_v12 = vld [vmem:[#allocation2 + $0x80] sm:$0x1] }
  0x9f   : > { %v1451_v40 = vor.u32 %v1450_v8, %v1446_v30  ;;  %v7168_v42 = vpack.c.bf16 %v624_v35, %v624_v35  ;;  %v530_v62 = vadd.f32 %v8510_v45, %v491_v52  ;;  %v493_v63 = vmul.f32 %v8525_v6, %v454_v27 }
  0xa0   : > { %v625_v41 = vsel %vm561_vm2, %v529_v24, %v593_v31  ;;  %v1447_v44 = vsel %vm8245_vm3, %v1442_v32, %v1446_v30  ;;  %v531_v16 = vadd.f32 %v8510_v45, %v492_v37  ;;  %v494_v24 = vmul.f32 %v8525_v6, %v455_v28  ;;  %v456_v30 = vld [vmem:[%s8152_s20 + $0xc0] sm:$0xff] }
  0xa1   : > { %v7169_v46 = vpack.c.bf16 %v625_v41, %v625_v41  ;;  %v1452_v49 = vrot.slane %v1451_v40, 4  ;;  %v891_v13 = vshrl.u32 %v7168_v42, 16  ;;  %v894_v47 = vshll.u32 %v7168_v42, 16  ;;  %v457_v41 = vld [vmem:[%s8152_s20 + $0xc8] sm:$0xff] }
  0xa2   : > { %vm562_vm4 = vcmp.ge.f32.partialorder %v530_v62, 0.0  ;;  %v1193_v48 = vld [vmem:[#allocation2 + $0x6c] sm:$0xf]  ;;  %vm563_vm5 = vcmp.ge.f32.partialorder %v531_v16, 0.0  ;;  %v532_v58 = vadd.f32 %v8510_v45, %v493_v63  ;;  %v533_v60 = vadd.f32 %v8510_v45, %v494_v24 }
  0xa3   : > { %v899_v50 = vshrl.u32 %v7169_v46, 16  ;;  %v902_v51 = vshll.u32 %v7169_v46, 16  ;;  %v1457_v52 = vsel %vm8245_vm3, %v1452_v49, %v1456_v34  ;;  %v1459_v53 = vshrl.u32 %v1193_v48, 16 }
  0xa4   : > { %v1462_v55 = vshll.u32 %v1193_v48, 16  ;;  %v893_v23 = vrot.slane %v891_v13, 7  ;;  %v6753_v54 = vcombine.low %v1447_v44, %v1457_v52  ;;  %v8568_v56 = vld [vmem:[#allocation2 + $0x70] sm:$0xf]  ;;  %v8570_v57 = vld [vmem:[#allocation2 + $0x74] sm:$0x1] }
  0xa5   : > { %v901_v4 = vrot.slane %v899_v50, 7  ;;  %v1461_v0 = vrot.slane %v1459_v53, 4  ;;  %v1472_v3 = vshrl.u32 %v8568_v56, 16  ;;  %v6778_v5 = vcombine.low %v1193_v48, %v8568_v56 }
  0xa6   : > { %v1464_v1 = vrot.slane %v1462_v55, 5  ;;  %7454 = vmatprep.mubr.bf16.mxu0 %v6753_v54  ;;  %v1468_v7 = vshll.u32 %v8568_v56, 16  ;;  %v1478_v17 = vshll.u32 %v8570_v57, 16  ;;  %v896_v9 = vor.u32 %v894_v47, %v893_v23  ;;  %v458_v55 = vld [vmem:[%s8152_s20 + $0xd0] sm:$0xff] }
  0xa7   : > { %v897_v11 = vrot.slane %v893_v23, 4  ;;  %7503 = vmatmul.mubr.bf16.gmra.mxu1 %v6778_v5  ;;  %v1474_v21 = vrot.slane %v1472_v3, 4  ;;  %v904_v26 = vor.u32 %v902_v51, %v901_v4  ;;  %v906_v27 = vrot.slane %v901_v4, 4  ;;  %v459_v23 = vld [vmem:[%s8152_s20 + $0xd8] sm:$0xff]  ;;  %v1133_v3 = vld [vmem:[#allocation2 + $0x84] sm:$0xf] }
  0xa8   : > { %v1465_v20 = vor.u32 %v1464_v1, %v1461_v0  ;;  %v1470_v8 = vrot.slane %v1468_v7, 5  ;;  %v1480_v31 = vrot.slane %v1478_v17, 5  ;;  %v1127_v28 = vsel %vm8291_vm13, %v896_v9, %v1126_v33 }
  0xa9   : > { %v594_v32 = vmul.f32 0.01, %v530_v62  ;;  %v905_v35 = vsel %vm8283_vm12, %v897_v11, %v904_v26  ;;  %1128 = vst [vmem:[#allocation2 + $0x78] sm:$0xf] %v1127_v28  ;;  %v1131_v37 = vsel %vm8299_vm14, %v906_v27, %v1130_v12  ;;  %v595_v40 = vmul.f32 0.01, %v531_v16 }
  0xaa   : > { %v1466_v34 = vrot.slane %v1465_v20, 4  ;;  %v1475_v42 = vor.u32 %v1474_v21, %v1470_v8  ;;  %1129 = vst [vmem:[#allocation2 + $0x7c] sm:$0xf] %v905_v35  ;;  %1132 = vst [vmem:[#allocation2 + $0x80] sm:$0x1] %v1131_v37  ;;  %vm564_vm6 = vcmp.ge.f32.partialorder %v532_v58, 0.0  ;;  %v495_v51 = vmul.f32 %v8525_v6, %v456_v30 }
  0xab   : > { %v626_v44 = vsel %vm562_vm4, %v530_v62, %v594_v32  ;;  %vm565_vm7 = vcmp.ge.f32.partialorder %v533_v60, 0.0  ;;  %v627_v63 = vsel %vm563_vm5, %v531_v16, %v595_v40  ;;  %v596_v13 = vmul.f32 0.01, %v532_v58 }
  0xac   : > { %v1471_v46 = vsel %vm8245_vm3, %v1466_v34, %v1470_v8  ;;  %v7170_v49 = vpack.c.bf16 %v626_v44, %v626_v44  ;;  %v1476_v47 = vrot.slane %v1475_v42, 4  ;;  %v7171_v48 = vpack.c.bf16 %v627_v63, %v627_v63  ;;  %v1137_v63 = vld [vmem:[#allocation2 + $0x8c] sm:$0x1] }
  0xad   : > { %v597_v50 = vmul.f32 0.01, %v533_v60  ;;  %v628_v53 = vsel %vm564_vm6, %v532_v58, %v596_v13  ;;  %v496_v62 = vmul.f32 %v8525_v6, %v457_v41  ;;  %v534_v58 = vadd.f32 %v8510_v45, %v495_v51 }
  0xae   : > { %v908_v24 = vshrl.u32 %v7170_v49, 16  ;;  %v911_v52 = vshll.u32 %v7170_v49, 16  ;;  %v1481_v33 = vsel %vm8245_vm3, %v1476_v47, %v1480_v31  ;;  %v916_v54 = vshrl.u32 %v7171_v48, 16 }
  0xaf   : > { %v919_v4 = vshll.u32 %v7171_v48, 16  ;;  %v629_v16 = vsel %vm565_vm7, %v533_v60, %v597_v50  ;;  %v6754_v0 = vcombine.low %v1471_v46, %v1481_v33  ;;  %v7172_v5 = vpack.c.bf16 %v628_v53, %v628_v53 }
  0xb0   : > { %v910_v1 = vrot.slane %v908_v24, 7  ;;  %v7173_v7 = vpack.c.bf16 %v629_v16, %v629_v16  ;;  %v1195_v17 = vld [vmem:[#allocation2 + $0x78] sm:$0xf]  ;;  %v918_v9 = vrot.slane %v916_v54, 7  ;;  %v535_v11 = vadd.f32 %v8510_v45, %v496_v62 }
  0xb1   : > { %v497_v12 = vmul.f32 %v8525_v6, %v458_v55  ;;  %7455 = vmatmul.mubr.bf16.gmra.mxu0 %v6754_v0  ;;  %v8600_v20 = vld [vmem:[#allocation2 + $0x7c] sm:$0xf]  ;;  %v1483_v21 = vshrl.u32 %v1195_v17, 16  ;;  %v1486_v26 = vshll.u32 %v1195_v17, 16  ;;  %v8602_v27 = vld [vmem:[#allocation2 + $0x80] sm:$0x1]  ;;  %v8605_v30 = vmul.f32 %v8525_v6, %v459_v23 }
  0xb2   : > { %v913_v60 = vor.u32 %v911_v52, %v910_v1  ;;  %v1496_v8 = vshrl.u32 %v8600_v20, 16  ;;  %v6779_v31 = vcombine.low %v1195_v17, %v8600_v20  ;;  %v1492_v28 = vshll.u32 %v8600_v20, 16  ;;  %v1140_v23 = vld [vmem:[#allocation2 + $0x90] sm:$0xf] }
  0xb3   : > { %v1502_v32 = vshll.u32 %v8602_v27, 16  ;;  %v1485_v34 = vrot.slane %v1483_v21, 4  ;;  %v1488_v35 = vrot.slane %v1486_v26, 5  ;;  %v914_v37 = vrot.slane %v910_v1, 4 }
  0xb4   : > { %v921_v40 = vor.u32 %v919_v4, %v918_v9  ;;  %7506 = vmatprep.mubr.bf16.mxu1 %v6779_v31  ;;  %v1494_v41 = vrot.slane %v1492_v28, 5  ;;  %v1498_v42 = vrot.slane %v1496_v8, 4  ;;  %v1134_v46 = vsel %vm8291_vm13, %v913_v60, %v1133_v3  ;;  %v1144_v3 = vld [vmem:[#allocation2 + $0x98] sm:$0x1] }
  0xb5   : > { %v1504_v44 = vrot.slane %v1502_v32, 5  ;;  %v1489_v49 = vor.u32 %v1488_v35, %v1485_v34  ;;  %1135 = vst [vmem:[#allocation2 + $0x84] sm:$0xf] %v1134_v46  ;;  %v923_v47 = vrot.slane %v918_v9, 4  ;;  %v925_v48 = vshrl.u32 %v7172_v5, 16 }
  0xb6   : > { %v922_v13 = vsel %vm8283_vm12, %v914_v37, %v921_v40  ;;  %v1499_v50 = vor.u32 %v1498_v42, %v1494_v41  ;;  %v928_v51 = vshll.u32 %v7172_v5, 16  ;;  %v933_v24 = vshrl.u32 %v7173_v7, 16 }
  0xb7   : > { %1136 = vst [vmem:[#allocation2 + $0x88] sm:$0xf] %v922_v13  ;;  %v936_v52 = vshll.u32 %v7173_v7, 16  ;;  %v1490_v53 = vrot.slane %v1489_v49, 4  ;;  %v1138_v62 = vsel %vm8299_vm14, %v923_v47, %v1137_v63  ;;  %v927_v55 = vrot.slane %v925_v48, 7 }
  0xb8   : > { %vm566_vm8 = vcmp.ge.f32.partialorder %v534_v58, 0.0  ;;  %v1500_v33 = vrot.slane %v1499_v50, 4  ;;  %1139 = vst [vmem:[#allocation2 + $0x8c] sm:$0x1] %v1138_v62  ;;  %v935_v54 = vrot.slane %v933_v24, 7  ;;  %vm567_vm9 = vcmp.ge.f32.partialorder %v535_v11, 0.0 }
  0xb9   : > { %v598_v4 = vmul.f32 0.01, %v534_v58  ;;  %v1495_v16 = vsel %vm8245_vm3, %v1490_v53, %v1494_v41  ;;  %v930_v0 = vor.u32 %v928_v51, %v927_v55  ;;  %v931_v1 = vrot.slane %v927_v55, 4  ;;  %v1147_v62 = vld [vmem:[#allocation2 + $0x9c] sm:$0xf] }
  0xba   : > { %v599_v5 = vmul.f32 0.01, %v535_v11  ;;  %v1505_v7 = vsel %vm8245_vm3, %v1500_v33, %v1504_v44  ;;  %v938_v17 = vor.u32 %v936_v52, %v935_v54  ;;  %v940_v9 = vrot.slane %v935_v54, 4 }
  0xbb   : > { %v630_v21 = vsel %vm566_vm8, %v534_v58, %v598_v4  ;;  %v6755_v26 = vcombine.low %v1495_v16, %v1505_v7  ;;  %v1141_v60 = vsel %vm8291_vm13, %v930_v0, %v1140_v23  ;;  %v8628_v37 = vadd.f32 %v8510_v45, %v497_v12 }
  0xbc   : > { %v631_v8 = vsel %vm567_vm9, %v535_v11, %v599_v5  ;;  %v7174_v31 = vpack.c.bf16 %v630_v21, %v630_v21  ;;  %v1197_v28 = vld [vmem:[#allocation2 + $0x84] sm:$0xf]  ;;  %v939_v32 = vsel %vm8283_vm12, %v931_v1, %v938_v17  ;;  %1142 = vst [vmem:[#allocation2 + $0x90] sm:$0xf] %v1141_v60  ;;  %v1145_v34 = vsel %vm8299_vm14, %v940_v9, %v1144_v3 }
  0xbd   : > { %v7175_v35 = vpack.c.bf16 %v631_v8, %v631_v8  ;;  %7458 = vmatprep.mubr.bf16.mxu0 %v6755_v26  ;;  %v1507_v40 = vshrl.u32 %v1197_v28, 16  ;;  %v1510_v41 = vshll.u32 %v1197_v28, 16  ;;  %1143 = vst [vmem:[#allocation2 + $0x94] sm:$0xf] %v939_v32  ;;  %1146 = vst [vmem:[#allocation2 + $0x98] sm:$0x1] %v1145_v34  ;;  %v537_v54 = vadd.f32 %v8510_v45, %v8605_v30 }
  0xbe   : > { %v8630_v58 = vld [vmem:[#allocation2 + $0x88] sm:$0xf]  ;;  %v942_v11 = vshrl.u32 %v7174_v31, 16  ;;  %v945_v42 = vshll.u32 %v7174_v31, 16  ;;  %v1151_v3 = vld [vmem:[#allocation2 + $0xa4] sm:$0x1] }
  0xbf   : > { %v1520_v44 = vshrl.u32 %v8630_v58, 16  ;;  %v6780_v46 = vcombine.low %v1197_v28, %v8630_v58  ;;  %v1516_v63 = vshll.u32 %v8630_v58, 16  ;;  %v950_v49 = vshrl.u32 %v7175_v35, 16  ;;  %v8635_v12 = vld [vmem:[#allocation2 + $0x8c] sm:$0x1]  ;;  %v460_v8 = vld [vmem:[%s8152_s20 + $0xe0] sm:$0xff] }
  0xc0   : > { %v1509_v13 = vrot.slane %v1507_v40, 4  ;;  %v1512_v47 = vrot.slane %v1510_v41, 5  ;;  %v944_v48 = vrot.slane %v942_v11, 7  ;;  %v953_v50 = vshll.u32 %v7175_v35, 16 }
  0xc1   : > { %7507 = vmatmul.mubr.bf16.gmra.mxu1 %v6780_v46  ;;  %v1518_v51 = vrot.slane %v1516_v63, 5  ;;  %v1522_v24 = vrot.slane %v1520_v44, 4  ;;  %v1526_v52 = vshll.u32 %v8635_v12, 16  ;;  %v952_v53 = vrot.slane %v950_v49, 7  ;;  %v461_v44 = vld [vmem:[%s8152_s20 + $0xe8] sm:$0xff] }
  0xc2   : > { %v1513_v55 = vor.u32 %v1512_v47, %v1509_v13  ;;  %v947_v23 = vor.u32 %v945_v42, %v944_v48  ;;  %v948_v33 = vrot.slane %v944_v48, 4  ;;  %vm568_vm10 = vcmp.ge.f32.partialorder %v8628_v37, 0.0 }
  0xc3   : > { %v1523_v4 = vor.u32 %v1522_v24, %v1518_v51  ;;  %v1528_v16 = vrot.slane %v1526_v52, 5  ;;  %v955_v0 = vor.u32 %v953_v50, %v952_v53  ;;  %v957_v1 = vrot.slane %v952_v53, 4  ;;  %v1199_v7 = vld [vmem:[#allocation2 + $0x90] sm:$0xf] }
  0xc4   : > { %v1514_v5 = vrot.slane %v1513_v55, 4  ;;  %v1148_v17 = vsel %vm8291_vm13, %v947_v23, %v1147_v62  ;;  %vm569_vm11 = vcmp.ge.f32.partialorder %v537_v54, 0.0  ;;  %v8643_v21 = vld [vmem:[#allocation2 + $0x94] sm:$0xf]  ;;  %v1531_v26 = vshrl.u32 %v1199_v7, 16 }
  0xc5   : > { %v1524_v9 = vrot.slane %v1523_v4, 4  ;;  %v1534_v30 = vshll.u32 %v1199_v7, 16  ;;  %v956_v60 = vsel %vm8283_vm12, %v948_v33, %v955_v0  ;;  %1149 = vst [vmem:[#allocation2 + $0x9c] sm:$0xf] %v1148_v17  ;;  %v1544_v28 = vshrl.u32 %v8643_v21, 16 }
  0xc6   : > { %v1519_v31 = vsel %vm8245_vm3, %v1514_v5, %v1518_v51  ;;  %v6781_v32 = vcombine.low %v1199_v7, %v8643_v21  ;;  %v8652_v34 = vld [vmem:[#allocation2 + $0x98] sm:$0x1]  ;;  %v1540_v35 = vshll.u32 %v8643_v21, 16  ;;  %1150 = vst [vmem:[#allocation2 + $0xa0] sm:$0xf] %v956_v60  ;;  %v1533_v41 = vrot.slane %v1531_v26, 4 }
  0xc7   : > { %v1529_v40 = vsel %vm8245_vm3, %v1524_v9, %v1528_v16  ;;  %v1536_v11 = vrot.slane %v1534_v30, 5  ;;  %v1550_v42 = vshll.u32 %v8652_v34, 16  ;;  %v1546_v49 = vrot.slane %v1544_v28, 4 }
  0xc8   : > { %v6756_v46 = vcombine.low %v1519_v31, %v1529_v40  ;;  %7510 = vmatprep.mubr.bf16.mxu1 %v6781_v32  ;;  %v1542_v63 = vrot.slane %v1540_v35, 5  ;;  %v1152_v13 = vsel %vm8299_vm14, %v957_v1, %v1151_v3  ;;  %v600_v50 = vmul.f32 0.01, %v8628_v37 }
  0xc9   : > { %v1537_v47 = vor.u32 %v1536_v11, %v1533_v41  ;;  %v1552_v48 = vrot.slane %v1550_v42, 5  ;;  %1153 = vst [vmem:[#allocation2 + $0xa4] sm:$0x1] %v1152_v13  ;;  %v601_v51 = vmul.f32 0.01, %v537_v54  ;;  %v499_v52 = vmul.f32 %v8525_v6, %v460_v8 }
  0xca   : > { %7459 = vmatmul.mubr.bf16.gmra.mxu0 %v6756_v46  ;;  %v1547_v24 = vor.u32 %v1546_v49, %v1542_v63  ;;  %v500_v53 = vmul.f32 %v8525_v6, %v461_v44  ;;  %vm2269_vm15 = vcmask 1042432   ;;  %v632_v55 = vsel %vm568_vm10, %v8628_v37, %v600_v50  ;;  %v1154_v41 = vld [vmem:[#allocation2 + $0xa8] sm:$0xf]  ;;  %v2221_v49 = vld [vmem:[#allocation2] sm:$0xe] }
  0xcb   : > { %v1538_v62 = vrot.slane %v1537_v47, 4  ;;  %v633_v23 = vsel %vm569_vm11, %v537_v54, %v601_v51  ;;  %vm2270_vm0 = vcmask 1046532   ;;  %v7176_v16 = vpack.c.bf16 %v632_v55, %v632_v55 }
  0xcc   : > { %v1548_v33 = vrot.slane %v1547_v24, 4  ;;  %v1201_v4 = vld [vmem:[#allocation2 + $0x9c] sm:$0xf]  ;;  %v7177_v0 = vpack.c.bf16 %v633_v23, %v633_v23  ;;  %v538_v1 = vadd.f32 %v8510_v45, %v499_v52  ;;  %v539_v17 = vadd.f32 %v8510_v45, %v500_v53  ;;  %vm8684_vm4 = vmor %vm2269_vm15, %vm2270_vm0 }
  0xcd   : > { %v1543_v3 = vsel %vm8245_vm3, %v1538_v62, %v1542_v63  ;;  %v8671_v5 = vld [vmem:[#allocation2 + $0xa0] sm:$0xf]  ;;  %v1555_v6 = vshrl.u32 %v1201_v4, 16  ;;  %v1558_v7 = vshll.u32 %v1201_v4, 16  ;;  %v959_v31 = vshrl.u32 %v7176_v16, 16 }
  0xce   : > { %v1553_v37 = vsel %vm8245_vm3, %v1548_v33, %v1552_v48  ;;  %v1568_v54 = vshrl.u32 %v8671_v5, 16  ;;  %v6782_v9 = vcombine.low %v1201_v4, %v8671_v5  ;;  %v1564_v26 = vshll.u32 %v8671_v5, 16  ;;  %v1158_v63 = vld [vmem:[#allocation2 + $0xb0] sm:$0x1] }
  0xcf   : > { %v6757_v30 = vcombine.low %v1543_v3, %v1553_v37  ;;  %v1557_v60 = vrot.slane %v1555_v6, 4  ;;  %v1560_v8 = vrot.slane %v1558_v7, 5  ;;  %v962_v40 = vshll.u32 %v7176_v16, 16  ;;  %v2222_v3 = vld [vmem:[#allocation2 + $0xc] sm:$0xe] }
  0xd0   : > { %7511 = vmatmul.mubr.bf16.gmra.mxu1 %v6782_v9  ;;  %v8679_v28 = vld [vmem:[#allocation2 + $0xa4] sm:$0x1]  ;;  %v1566_v32 = vrot.slane %v1564_v26, 5  ;;  %v1570_v35 = vrot.slane %v1568_v54, 4  ;;  %v967_v45 = vshrl.u32 %v7177_v0, 16  ;;  %v961_v44 = vrot.slane %v959_v31, 7 }
  0xd1   : > { %7462 = vmatprep.mubr.bf16.mxu0 %v6757_v30  ;;  %v1561_v11 = vor.u32 %v1560_v8, %v1557_v60  ;;  %v1574_v42 = vshll.u32 %v8679_v28, 16  ;;  %v970_v46 = vshll.u32 %v7177_v0, 16  ;;  %vm570_vm1 = vcmp.ge.f32.partialorder %v538_v1, 0.0  ;;  %v2223_v9 = vld [vmem:[#allocation2 + $0x18] sm:$0xe] }
  0xd2   : > { %v1571_v13 = vor.u32 %v1570_v35, %v1566_v32  ;;  %v969_v47 = vrot.slane %v967_v45, 7  ;;  %vm571_vm2 = vcmp.ge.f32.partialorder %v539_v17, 0.0  ;;  %v964_v51 = vor.u32 %v962_v40, %v961_v44 }
  0xd3   : > { %v1562_v48 = vrot.slane %v1561_v11, 4  ;;  %v1576_v50 = vrot.slane %v1574_v42, 5  ;;  %v965_v24 = vrot.slane %v961_v44, 4  ;;  %v602_v55 = vmul.f32 0.01, %v538_v1 }
  0xd4   : > { %v1572_v52 = vrot.slane %v1571_v13, 4  ;;  %v972_v53 = vor.u32 %v970_v46, %v969_v47  ;;  %v974_v62 = vrot.slane %v969_v47, 4  ;;  %v1155_v4 = vsel %vm8291_vm13, %v964_v51, %v1154_v41  ;;  %v8058_v11 = vld [vmem:[#allocation2 + $0x1c] sm:$0xf]  ;;  %v8059_v13 = vld [vmem:[#allocation2 + $0x20] sm:$0x1] }
  0xd5   : > { %v1567_v33 = vsel %vm8245_vm3, %v1562_v48, %v1566_v32  ;;  %v603_v16 = vmul.f32 0.01, %v539_v17  ;;  %v6793_v0 = vrot.slane %v2221_v49, 9  ;;  %1156 = vst [vmem:[#allocation2 + $0xa8] sm:$0xf] %v1155_v4  ;;  %v634_v54 = vsel %vm570_vm1, %v538_v1, %v602_v55 }
  0xd6   : > { %v1577_v6 = vsel %vm8245_vm3, %v1572_v52, %v1576_v50  ;;  %v973_v7 = vsel %vm8283_vm12, %v965_v24, %v972_v53  ;;  %v1159_v37 = vsel %vm8299_vm14, %v974_v62, %v1158_v63  ;;  %v7178_v60 = vpack.c.bf16 %v634_v54, %v634_v54  ;;  %v1161_v49 = vld [vmem:[#allocation2 + $0xb4] sm:$0xf]  ;;  %v8060_v51 = vld [vmem:[#allocation2 + $0x28] sm:$0xf] }
  0xd7   : > { %v6758_v26 = vcombine.low %v1567_v33, %v1577_v6  ;;  %1157 = vst [vmem:[#allocation2 + $0xac] sm:$0xf] %v973_v7  ;;  %1160 = vst [vmem:[#allocation2 + $0xb0] sm:$0x1] %v1159_v37  ;;  %v635_v30 = vsel %vm571_vm2, %v539_v17, %v603_v16  ;;  %v8704_v8 = vsel %vm8684_vm4, %v6793_v0, %v2274_v43  ;;  %v2276_v32 = vrot.slane %v2274_v43, 4 }
  0xd8   : > { %v7179_v31 = vpack.c.bf16 %v635_v30, %v635_v30  ;;  %v6794_v35 = vrot.slane %v2222_v3, 9  ;;  %v8713_v1 = vsel %vm8684_vm4, %v8364_v39, %v2284_v36  ;;  %v2224_v17 = vld [vmem:[#allocation2 + $0x24] sm:$0xe]  ;;  %v976_v40 = vshrl.u32 %v7178_v60, 16  ;;  %v1165_v16 = vld [vmem:[#allocation2 + $0xbc] sm:$0x1] }
  0xd9   : > { %7463 = vmatmul.mubr.bf16.gmra.mxu0 %v6758_v26  ;;  %v979_v45 = vshll.u32 %v7178_v60, 16  ;;  %v6795_v41 = vrot.slane %v2223_v9, 9  ;;  %v2288_v42 = vrot.slane %v8058_v11, 5  ;;  %v8719_v14 = vsel %vm8684_vm4, %v2276_v32, %v2277_v59  ;;  %v2225_v60 = vld [vmem:[#allocation2 + $0x30] sm:$0xe] }
  0xda   : > { %v984_v44 = vshrl.u32 %v7179_v31, 16  ;;  %v987_v46 = vshll.u32 %v7179_v31, 16  ;;  %v8725_v43 = vsel %vm8684_vm4, %v6794_v35, %v2281_v29  ;;  %v978_v22 = vrot.slane %v976_v40, 7  ;;  %v8061_v29 = vld [vmem:[#allocation2 + $0x2c] sm:$0x1] }
  0xdb   : > { %v6825_v36 = vcombine.low %v8704_v8, %v8719_v14  ;;  %v6826_v39 = vcombine.low %v8725_v43, %v8713_v1  ;;  %v2290_v15 = vrot.slane %v2288_v42, 4  ;;  %v2291_v47 = vrot.slane %v8059_v13, 5  ;;  %v2226_v40 = vld [vmem:[#allocation2 + $0x3c] sm:$0xe]  ;;  %v8072_v43 = vld [vmem:[%s10611_s2] ss:$0 sm:$0xff] }
  0xdc   : > { %v986_v63 = vrot.slane %v984_v44, 7  ;;  %v6796_v59 = vrot.slane %v2224_v17, 9  ;;  %v1203_v48 = vld [vmem:[#allocation2 + $0xa8] sm:$0xf]  ;;  %v981_v50 = vor.u32 %v979_v45, %v978_v22  ;;  %v982_v19 = vrot.slane %v978_v22, 4 }
  0xdd   : > { %v2295_v24 = vrot.slane %v8060_v51, 5  ;;  %v2298_v52 = vrot.slane %v8061_v29, 5  ;;  %v1579_v62 = vshrl.u32 %v1203_v48, 16  ;;  %v1582_v55 = vshll.u32 %v1203_v48, 16 }
  0xde   : > { %v8731_v53 = vld [vmem:[#allocation2 + $0xac] sm:$0xf]  ;;  %v8733_v33 = vld [vmem:[#allocation2 + $0xb0] sm:$0x1]  ;;  %v989_v4 = vor.u32 %v987_v46, %v986_v63  ;;  %v8737_v0 = vsel %vm8684_vm4, %v6795_v41, %v2288_v42  ;;  %v1162_v30 = vsel %vm8291_vm13, %v981_v50, %v1161_v49  ;;  %v991_v35 = vrot.slane %v986_v63, 4 }
  0xdf   : > { %v1592_v3 = vshrl.u32 %v8731_v53, 16  ;;  %v6783_v6 = vcombine.low %v1203_v48, %v8731_v53  ;;  %v1588_v7 = vshll.u32 %v8731_v53, 16  ;;  %v1598_v37 = vshll.u32 %v8733_v33, 16  ;;  %1163 = vst [vmem:[#allocation2 + $0xb4] sm:$0xf] %v1162_v30 }
  0xe0   : > { %v1581_v54 = vrot.slane %v1579_v62, 4  ;;  %v1584_v9 = vrot.slane %v1582_v55, 5  ;;  %v990_v26 = vsel %vm8283_vm12, %v982_v19, %v989_v4  ;;  %v8749_v17 = vsel %vm8684_vm4, %v2290_v15, %v2291_v47  ;;  %v8062_v49 = vld [vmem:[#allocation2 + $0x34] sm:$0xf]  ;;  %v8063_v47 = vld [vmem:[#allocation2 + $0x38] sm:$0x1] }
  0xe1   : > { %7514 = vmatprep.mubr.bf16.mxu1 %v6783_v6  ;;  %v1590_v31 = vrot.slane %v1588_v7, 5  ;;  %v1594_v32 = vrot.slane %v1592_v3, 4  ;;  %1164 = vst [vmem:[#allocation2 + $0xb8] sm:$0xf] %v990_v26  ;;  %v1600_v41 = vrot.slane %v1598_v37, 5  ;;  %v8753_v11 = vsel %vm8684_vm4, %v6796_v59, %v2295_v24  ;;  %v7960_v7 = vld [vmem:[#allocation2 + $0xc] sm:$0xff]  }
  0xe2   : > { %v1585_v45 = vor.u32 %v1584_v9, %v1581_v54  ;;  %v2297_v42 = vrot.slane %v2295_v24, 4  ;;  %v1166_v46 = vsel %vm8299_vm14, %v991_v35, %v1165_v16  ;;  %v6797_v22 = vrot.slane %v2225_v60, 9  ;;  %v2227_v19 = vld [vmem:[#allocation2 + $0x48] sm:$0xe]  ;;  %v8065_v16 = vld [vmem:[#allocation2 + $0x44] sm:$0x1] }
  0xe3   : > { %v1595_v44 = vor.u32 %v1594_v32, %v1590_v31  ;;  %v2302_v13 = vrot.slane %v8062_v49, 5  ;;  %1167 = vst [vmem:[#allocation2 + $0xbc] sm:$0x1] %v1166_v46  ;;  %v2305_v48 = vrot.slane %v8063_v47, 5  ;;  %v6798_v50 = vrot.slane %v2226_v40, 9 }
  0xe4   : > { %v1586_v63 = vrot.slane %v1585_v45, 4  ;;  %v8759_v15 = vsel %vm8684_vm4, %v2297_v42, %v2298_v52  ;;  %v6827_v51 = vcombine.low %v8737_v0, %v8749_v17  ;;  %v8064_v52 = vld [vmem:[#allocation2 + $0x40] sm:$0xf]  ;;  %v2312_v3 = vrot.slane %v8065_v16, 5  ;;  %v8066_v9 = vld [vmem:[#allocation2 + $0x4c] sm:$0xf] }
  0xe5   : > { %v1596_v59 = vrot.slane %v1595_v44, 4  ;;  %v6828_v24 = vcombine.low %v8753_v11, %v8759_v15  ;;  %v2304_v29 = vrot.slane %v2302_v13, 4  ;;  %v8769_v55 = vsel %vm8684_vm4, %v6797_v22, %v2302_v13  ;;  %v2228_v30 = vld [vmem:[#allocation2 + $0x54] sm:$0xe]  ;;  %v8067_v45 = vld [vmem:[#allocation2 + $0x50] sm:$0x1] }
  0xe6   : > { %v1591_v62 = vsel %vm8245_vm3, %v1586_v63, %v1590_v31  ;;  %v2309_v4 = vrot.slane %v8064_v52, 5  ;;  %v6799_v54 = vrot.slane %v2227_v19, 9  ;;  %v2316_v26 = vrot.slane %v8066_v9, 5  ;;  %v1205_v31 = vld [vmem:[#allocation2 + $0xb4] sm:$0xf]  ;;  %v7964_v16 = vld [vmem:[#allocation2 + $0x24] sm:$0xff]  }
  0xe7   : > { %v1601_v6 = vsel %vm8245_vm3, %v1596_v59, %v1600_v41  ;;  %v8775_v37 = vsel %vm8684_vm4, %v2304_v29, %v2305_v48  ;;  %v2319_v41 = vrot.slane %v8067_v45, 5  ;;  %v1603_v42 = vshrl.u32 %v1205_v31, 16  ;;  %v2229_v48 = vld [vmem:[#allocation2 + $0x60] sm:$0xe]  ;;  %v8996_v15 = vld [vmem:[#allocation2 + $0x20] sm:$0x1] }
  0xe8   : > { %v6759_v60 = vcombine.low %v1591_v62, %v1601_v6  ;;  %v8777_v32 = vld [vmem:[#allocation2 + $0xb8] sm:$0xf]  ;;  %v8781_v35 = vsel %vm8684_vm4, %v6798_v50, %v2309_v4  ;;  %v2311_v40 = vrot.slane %v2309_v4, 4  ;;  %v1606_v44 = vshll.u32 %v1205_v31, 16 }
  0xe9   : > { %v1616_v46 = vshrl.u32 %v8777_v32, 16  ;;  %v6784_v22 = vcombine.low %v1205_v31, %v8777_v32  ;;  %v1612_v49 = vshll.u32 %v8777_v32, 16  ;;  %v6829_v13 = vcombine.low %v8769_v55, %v8775_v37 }
  0xea   : > { %7466 = vmatprep.mubr.bf16.mxu0 %v6759_v60  ;;  %v8790_v63 = vsel %vm8684_vm4, %v2311_v40, %v2312_v3  ;;  %v2318_v47 = vrot.slane %v2316_v26, 4  ;;  %v1605_v50 = vrot.slane %v1603_v42, 4  ;;  %v1608_v19 = vrot.slane %v1606_v44, 5  ;;  %v8792_v59 = vld [vmem:[#allocation2 + $0xbc] sm:$0x1] }
  0xeb   : > { %7515 = vmatmul.mubr.bf16.gmra.mxu1 %v6784_v22  ;;  %v1618_v29 = vrot.slane %v1616_v46, 4  ;;  %v8796_v62 = vsel %vm8684_vm4, %v6799_v54, %v2316_v26  ;;  %v1614_v52 = vrot.slane %v1612_v49, 5  ;;  %v1622_v4 = vshll.u32 %v8792_v59, 16  ;;  %v8068_v60 = vld [vmem:[#allocation2 + $0x58] sm:$0xf] }
  0xec   : > { %7582 = vmatprep.mubr.bf16.mxu1 %v7960_v7  ;;  %v6800_v3 = vrot.slane %v2228_v30, 9  ;;  %v1609_v6 = vor.u32 %v1608_v19, %v1605_v50  ;;  %v8803_v9 = vsel %vm8684_vm4, %v2318_v47, %v2319_v41  ;;  %v2323_v31 = vrot.slane %v8068_v60, 5  ;;  %v8069_v40 = vld [vmem:[#allocation2 + $0x5c] sm:$0x1]  ;;  %v2230_v42 = vld [vmem:[#allocation2 + $0x6c] sm:$0xe] }
  0xed   : > { %v2326_v45 = vrot.slane %v8069_v40, 5  ;;  %v1619_v54 = vor.u32 %v1618_v29, %v1614_v52  ;;  %v1624_v26 = vrot.slane %v1622_v4, 5  ;;  %v7961_v44 = vld [vmem:[#allocation2 + $0x18] sm:$0xff]   ;;  %v6801_v46 = vrot.slane %v2229_v48, 9  ;;  %v7967_v19 = vld [vmem:[%s10612_s3 + $0x170] sm:$0xff]  }
  0xee   : > { %v2330_v7 = vrot.slane %v8541_v61, 5  ;;  %v2231_v22 = vld [vmem:[#allocation2 + $0x78] sm:$0xe]  ;;  %v1610_v49 = vrot.slane %v1609_v6, 4  ;;  %v8808_v30 = vsel %vm8684_vm4, %v6800_v3, %v2323_v31  ;;  %v2325_v41 = vrot.slane %v2323_v31, 4 }
  0xef   : > { %v2333_v47 = vrot.slane %v8543_v2, 5  ;;  %v1620_v50 = vrot.slane %v1619_v54, 4  ;;  %v6831_v48 = vcombine.low %v8796_v62, %v8803_v9  ;;  %v6802_v61 = vrot.slane %v2230_v42, 9  ;;  %v2232_v60 = vld [vmem:[#allocation2 + $0x84] sm:$0xe] }
  0xf0   : > { %v2332_v29 = vrot.slane %v2330_v7, 4  ;;  %v1615_v4 = vsel %vm8245_vm3, %v1610_v49, %v1614_v52  ;;  %v8820_v3 = vsel %vm8684_vm4, %v2325_v41, %v2326_v45  ;;  %v2337_v6 = vrot.slane %v8568_v56, 5  ;;  %v2233_v45 = vld [vmem:[#allocation2 + $0x90] sm:$0xe]  ;;  %v8070_v49 = vld [vmem:[%s10612_s3 + $0x178] sm:$0xff]   ;;  %v7980_v9 = vld [vmem:[#allocation2 + $0x84] sm:$0xff]  }
  0xf1   : > { %v2340_v2 = vrot.slane %v8570_v57, 5  ;;  %v1625_v31 = vsel %vm8245_vm3, %v1620_v50, %v1624_v26  ;;  %v6832_v40 = vcombine.low %v8808_v30, %v8820_v3  ;;  %v8830_v42 = vsel %vm8684_vm4, %v6801_v46, %v2330_v7  ;;  %v3849_v62 = vld [vmem:[#allocation2 + $0x30] sm:$0xe] }
  0xf2   : > { %v8834_v52 = vsel %vm8684_vm4, %v2332_v29, %v2333_v47  ;;  %v6760_v54 = vcombine.low %v1615_v4, %v1625_v31  ;;  %v8838_v56 = vsel %vm8684_vm4, %v6802_v61, %v2337_v6  ;;  %v2339_v57 = vrot.slane %v2337_v6, 4  ;;  %v7968_v29 = vld [vmem:[#allocation2 + $0x3c] sm:$0xff]  }
  0xf3   : > { %7583 = vmatmul.mubr.bf16.vlgmr.msra.gmra.mxu1 %v7961_v44  ;;  %v6803_v26 = vrot.slane %v2231_v22, 9  ;;  %v2344_v46 = vrot.slane %v8600_v20, 5  ;;  %v2347_v7 = vrot.slane %v8602_v27, 5  ;;  %v6804_v41 = vrot.slane %v2232_v60, 9  ;;  %v7971_v44 = vld [vmem:[%s10612_s3 + $0x168] sm:$0xff]   ;;  %v462_v60 = vld [vmem:[%s8152_s20 + $0xf0] sm:$0xff] }
  0xf4   : > { %7663 = vmatpush3.bf16.msra.mxu1 %v8070_v49  ;;  %7586 = vmatprep.mubr.bf16.mxu1 %v7964_v16  ;;  %v2351_v47 = vrot.slane %v8630_v58, 5  ;;  %v8851_v22 = vsel %vm8684_vm4, %v2339_v57, %v2340_v2  ;;  %v2354_v50 = vrot.slane %v8635_v12, 5  ;;  %v6805_v16 = vrot.slane %v2233_v45, 9  ;;  %v2234_v27 = vld [vmem:[#allocation2 + $0x9c] sm:$0xe]  ;;  %v7965_v58 = vld [vmem:[#allocation2 + $0x30] sm:$0xff]  }
  0xf5   : > { %7467 = vmatmul.mubr.bf16.gmra.mxu0 %v6760_v54  ;;  %7664 = vmatprep.subr.bf16.mxu1 %v7967_v19  ;;  %v2358_v20 = vrot.slane %v8643_v21, 5  ;;  %v6833_v61 = vcombine.low %v8830_v42, %v8834_v52  ;;  %v2346_v6 = vrot.slane %v2344_v46, 4  ;;  %v2235_v21 = vld [vmem:[#allocation2 + $0xa8] sm:$0xe]  ;;  %v8874_v31 = vsel %vm8684_vm4, %v6803_v26, %v2344_v46  ;;  %v463_v49 = vld [vmem:[%s8152_s20 + $0xf8] sm:$0xff] }
  0xf6   : > { %7534 = vmatprep.mubr.bf16.mxu0 %v6825_v36  ;;  %v8864_v12 = vsel %vm8684_vm4, %v6804_v41, %v2351_v47  ;;  %v2353_v2 = vrot.slane %v2351_v47, 4  ;;  %v2361_v36 = vrot.slane %v8652_v34, 5  ;;  %v6806_v45 = vrot.slane %v2234_v27, 9  ;;  %v7975_v41 = vld [vmem:[%s10612_s3 + $0x160] sm:$0xff]  }
  0xf7   : > { %v8868_v8 = vsel %vm8684_vm4, %v6805_v16, %v2358_v20  ;;  %v2360_v14 = vrot.slane %v2358_v20, 4  ;;  %v2365_v54 = vrot.slane %v8671_v5, 5  ;;  %v2368_v57 = vrot.slane %v8679_v28, 5  ;;  %v2236_v28 = vld [vmem:[#allocation2 + $0xb4] sm:$0xe]  ;;  %v7984_v52 = vld [vmem:[#allocation2 + $0x9c] sm:$0xff]  }
  0xf8   : > { %7665 = vmatpush3.bf16.msra.mxu1 %v7967_v19  ;;  %v8884_v34 = vsel %vm8684_vm4, %v2346_v6, %v2347_v7  ;;  %v8888_v19 = vsel %vm8684_vm4, %v2353_v2, %v2354_v50  ;;  %v6807_v5 = vrot.slane %v2235_v21, 9  ;;  %v7966_v50 = vld [vmem:[%s10612_s3 + $0x130] sm:$0xff]   ;;  %v2372_v20 = vrot.slane %v8731_v53, 5  ;;  %v8071_v6 = vld [vmem:[%s10610_s1] ss:$0 sm:$0xff] }
  0xf9   : > { %7666 = vmatprep.subr.bf16.mxu1 %v7971_v44  ;;  %v8892_v26 = vsel %vm8684_vm4, %v2360_v14, %v2361_v36  ;;  %v8900_v7 = vsel %vm8684_vm4, %v6806_v45, %v2365_v54  ;;  %v2367_v16 = vrot.slane %v2365_v54, 4  ;;  %v2375_v27 = vrot.slane %v8733_v33, 5  ;;  %v3846_v14 = vld [vmem:[#allocation2 + $0xc] sm:$0xe]  ;;  %v8916_v54 = vld [vmem:[#allocation2 + $0x10] sm:$0xf] }
  0xfa   : > { %v501_v21 = vmul.f32 %v8071_v6, %v462_v60  ;;  %v502_v2 = vmul.f32 %v8071_v6, %v463_v49  ;;  %v6808_v36 = vrot.slane %v2236_v28, 9  ;;  %v2379_v45 = vrot.slane %v8777_v32, 5  ;;  %v7969_v33 = vld [vmem:[#allocation2 + $0x48] sm:$0xff]   ;;  %v8938_v60 = vld [vmem:[#allocation2 + $0x14] sm:$0x1]  ;;  %v8073_v49 = vld [vmem:[%s10612_s3 + $0x138] sm:$0xff]  }
  0xfb   : > { %7587 = vmatmul.mubr.bf16.gmra.mxu1 %v7965_v58  ;;  %v8912_v58 = vsel %vm8684_vm4, %v2367_v16, %v2368_v57  ;;  %v2382_v53 = vrot.slane %v8792_v59, 5  ;;  %v8933_v59 = vsel %vm8684_vm4, %v6807_v5, %v2372_v20  ;;  %v2374_v1 = vrot.slane %v2372_v20, 4  ;;  %v3092_v57 = vld [vmem:[#allocation2 + $0xc] sm:$0xf]  ;;  %v7972_v32 = vld [vmem:[#allocation2 + $0x54] sm:$0xff]  }
  0xfc   : > { %7590 = vmatprep.mubr.bf16.mxu1 %v7968_v29  ;;  %7667 = vmatpush3.bf16.msra.mxu1 %v7971_v44  ;;  %v8924_v44 = vld [vmem:[%s10612_s3 + $0x128] sm:$0xff]   ;;  %v7979_v29 = vld [vmem:[%s10612_s3 + $0x158] sm:$0xff]   ;;  %v541_v5 = vadd.f32 %v8072_v43, %v502_v2  ;;  %v8948_v28 = vsel %vm8684_vm4, %v6808_v36, %v2379_v45  ;;  %v2381_v16 = vrot.slane %v2379_v45, 4  ;;  %v6929_v20 = vrot.slane %v3846_v14, 9  ;;  %v7983_v2 = vld [vmem:[%s10612_s3 + $0x150] sm:$0xff]  }
  0xfd   : > { %7535 = vmatmul.mubr.bf16.vlgmr.msra.gmra.mxu0 %v6826_v39  ;;  %7668 = vmatprep.subr.bf16.mxu1 %v7975_v41  ;;  %v540_v39 = vadd.f32 %v8072_v43, %v501_v21  ;;  %v8952_v6 = vsel %vm8684_vm4, %v2374_v1, %v2375_v27  ;;  %v3915_v43 = vrot.slane %v8938_v60, 5  ;;  %v3144_v47 = vshll.u32 %v3092_v57, 16  ;;  %v3095_v27 = vld [vmem:[#allocation2 + $0x18] sm:$0xf]  ;;  %v3106_v42 = vld [vmem:[#allocation2 + $0x44] sm:$0x1] }
  0xfe   : > { %7615 = vmatpush3.bf16.msra.mxu0 %v8073_v49  ;;  %7538 = vmatprep.mubr.bf16.mxu0 %v6827_v51  ;;  %v3912_v49 = vrot.slane %v8916_v54, 5  ;;  %vm573_vm6 = vcmp.ge.f32.partialorder %v541_v5, 0.0  ;;  %v605_v17 = vmul.f32 0.01, %v541_v5  ;;  %v8959_v51 = vsel %vm8684_vm4, %v2381_v16, %v2382_v53  ;;  %v7974_v16 = vld [vmem:[%s10612_s3 + $0x120] sm:$0xff]  }
  0xff   : > { %7616 = vmatprep.subr.bf16.mxu0 %v7966_v50  ;;  %vm572_vm5 = vcmp.ge.f32.partialorder %v540_v39, 0.0  ;;  %v604_v21 = vmul.f32 0.01, %v540_v39  ;;  %v3141_v53 = vshrl.u32 %v3092_v57, 16  ;;  %v7973_v57 = vld [vmem:[#allocation2 + $0x60] sm:$0xff]   ;;  %v3146_v11 = vrot.slane %v3144_v47, 5 }
 0x100   : > { %7669 = vmatpush3.bf16.msra.mxu1 %v7975_v41  ;;  %v3914_v36 = vrot.slane %v3912_v49, 4  ;;  %v637_v45 = vsel %vm573_vm6, %v541_v5, %v605_v17  ;;  %v8977_v17 = vsel %vm8684_vm4, %v6929_v20, %v3912_v49  ;;  %v3847_v41 = vld [vmem:[#allocation2 + $0x18] sm:$0xe]  ;;  %v1168_v49 = vld [vmem:[#allocation2 + $0xc0] sm:$0xf] }
 0x101   : > { %7670 = vmatprep.subr.bf16.mxu1 %v7979_v29  ;;  %v636_v14 = vsel %vm572_vm5, %v540_v39, %v604_v21  ;;  %v7181_v0 = vpack.c.bf16 %v637_v45, %v637_v45  ;;  %v3150_v39 = vshll.u32 %v8916_v54, 16  ;;  %v3154_v21 = vshrl.u32 %v8916_v54, 16  ;;  %v8987_v54 = vld [vmem:[%s10612_s3 + $0x118] sm:$0xff]   ;;  %v7991_v47 = vld [vmem:[%s10612_s3 + $0x140] sm:$0xff]  }
 0x102   : > { %7617 = vmatpush3.bf16.msra.mxu0 %v7966_v50  ;;  %v7180_v1 = vpack.c.bf16 %v636_v14, %v636_v14  ;;  %v8979_v14 = vld [vmem:[#allocation2 + $0x1c] sm:$0xf]  ;;  %v8994_v45 = vsel %vm8684_vm4, %v3914_v36, %v3915_v43  ;;  %v6930_v43 = vrot.slane %v3847_v41, 9  ;;  %v7982_v41 = vld [vmem:[%s10612_s3 + $0x110] sm:$0xff]  }
 0x103   : > { %7591 = vmatmul.mubr.bf16.gmra.mxu1 %v7969_v33  ;;  %7618 = vmatprep.subr.bf16.mxu0 %v8924_v44  ;;  %v3143_v33 = vrot.slane %v3141_v53, 4  ;;  %v1004_v20 = vshll.u32 %v7181_v0, 16  ;;  %v3152_v53 = vrot.slane %v3150_v39, 5  ;;  %v3156_v46 = vrot.slane %v3154_v21, 4 }
 0x104   : > { %7594 = vmatprep.mubr.bf16.mxu1 %v7972_v32  ;;  %7671 = vmatpush3.bf16.msra.mxu1 %v7979_v29  ;;  %v993_v50 = vshrl.u32 %v7180_v1, 16  ;;  %v996_v5 = vshll.u32 %v7180_v1, 16  ;;  %v7987_v29 = vld [vmem:[%s10612_s3 + $0x148] sm:$0xff]   ;;  %v1001_v32 = vshrl.u32 %v7181_v0, 16  ;;  %v3160_v0 = vshll.u32 %v8938_v60, 16 }
 0x105   : > { %7539 = vmatmul.mubr.bf16.gmra.mxu0 %v6828_v24  ;;  %7672 = vmatprep.subr.bf16.mxu1 %v7983_v2  ;;  %v7976_v24 = vld [vmem:[#allocation2 + $0x6c] sm:$0xff]   ;;  %v3147_v36 = vor.u32 %v3146_v11, %v3143_v33  ;;  %v3919_v55 = vrot.slane %v8979_v14, 5  ;;  %v3922_v33 = vrot.slane %v8996_v15, 5  ;;  %v3098_v11 = vld [vmem:[#allocation2 + $0x24] sm:$0xf]  ;;  %v3174_v10 = vshll.u32 %v8979_v14, 16 }
 0x106   : > { %7542 = vmatprep.mubr.bf16.mxu0 %v6829_v13  ;;  %7619 = vmatpush3.bf16.msra.mxu0 %v8924_v44  ;;  %v995_v1 = vrot.slane %v993_v50, 7  ;;  %v9003_v4 = vrot.slane %v1001_v32, 7  ;;  %v3157_v44 = vor.u32 %v3156_v46, %v3152_v53  ;;  %v3162_v39 = vrot.slane %v3160_v0, 5 }
 0x107   : > { %7620 = vmatprep.subr.bf16.mxu0 %v7974_v16  ;;  %v6961_v50 = vcombine.low %v8977_v17, %v8994_v45  ;;  %v3148_v32 = vrot.slane %v3147_v36, 4  ;;  %v3921_v46 = vrot.slane %v3919_v55, 4  ;;  %v3168_v0 = vshll.u32 %v3095_v27, 16  ;;  %v9024_v36 = vld [vmem:[#allocation2 + $0x2c] sm:$0x1] }
 0x108   : > { %7673 = vmatpush3.bf16.msra.mxu1 %v7983_v2  ;;  %v998_v37 = vor.u32 %v996_v5, %v995_v1  ;;  %v999_v13 = vrot.slane %v995_v1, 4  ;;  %v1006_v60 = vor.u32 %v1004_v20, %v9003_v4  ;;  %v1008_v21 = vrot.slane %v9003_v4, 4 }
 0x109   : > { %7674 = vmatprep.subr.bf16.mxu1 %v7987_v29  ;;  %v3158_v5 = vrot.slane %v3157_v44, 4  ;;  %v3165_v1 = vshrl.u32 %v3095_v27, 16  ;;  %v10632_v27 = vcombine.low %v8781_v35, %v8790_v63  ;;  %v7986_v35 = vld [vmem:[%s10612_s3 + $0x108] sm:$0xff]   ;;  %v3176_v63 = vrot.slane %v3174_v10, 5 }
 0x10a   : > { %7621 = vmatpush3.bf16.msra.mxu0 %v7974_v16  ;;  %v1169_v2 = vsel %vm8291_vm13, %v998_v37, %v1168_v49  ;;  %v1007_v20 = vsel %vm8283_vm12, %v999_v13, %v1006_v60  ;;  %v3153_v16 = vsel %vm8245_vm3, %v3148_v32, %v3152_v53  ;;  %v9030_v49 = vsel %vm8684_vm4, %v6930_v43, %v3919_v55  ;;  %v9046_v43 = vld [vmem:[%s10612_s3 + $0x1f8] sm:$0xff]   ;;  %v3099_v55 = vld [vmem:[#allocation2 + $0x28] sm:$0xf] }
 0x10b   : > { %7595 = vmatmul.mubr.bf16.gmra.mxu1 %v7973_v57  ;;  %7622 = vmatprep.subr.bf16.mxu0 %v8987_v54  ;;  %1170 = vst [vmem:[#allocation2 + $0xc0] sm:$0xf] %v1169_v2  ;;  %1171 = vst [vmem:[#allocation2 + $0xc4] sm:$0xf] %v1007_v20  ;;  %v3163_v57 = vsel %vm8245_vm3, %v3158_v5, %v3162_v39  ;;  %v3178_v37 = vshrl.u32 %v8979_v14, 16  ;;  %v3170_v13 = vrot.slane %v3168_v0, 5 }
 0x10c   : > { %7598 = vmatprep.mubr.bf16.mxu1 %v7976_v24  ;;  %7675 = vmatpush3.bf16.msra.mxu1 %v7987_v29  ;;  %v9037_v53 = vcombine.low %v3153_v16, %v3163_v57  ;;  %v9041_v29 = vsel %vm8684_vm4, %v3921_v46, %v3922_v33  ;;  %v3167_v24 = vrot.slane %v3165_v1, 4  ;;  %v3184_v44 = vshll.u32 %v8996_v15, 16  ;;  %v7977_v60 = vld [vmem:[#allocation2 + $0x78] sm:$0xff]  }
 0x10d   : > { %7543 = vmatmul.mubr.bf16.gmra.mxu0 %v10632_v27  ;;  %7676 = vmatprep.subr.bf16.mxu1 %v7991_v47  ;;  %v3180_v14 = vrot.slane %v3178_v37, 4  ;;  %v6931_v39 = vrot.slane %v3848_v18, 9  ;;  %v3926_v2 = vrot.slane %v3099_v55, 5  ;;  %v3929_v5 = vrot.slane %v9024_v36, 5  ;;  %v9057_v16 = vld [vmem:[#allocation2 + $0x38] sm:$0x1] }
 0x10e   : > { %7546 = vmatprep.mubr.bf16.mxu0 %v6831_v48  ;;  %7623 = vmatpush3.bf16.msra.mxu0 %v8987_v54  ;;  %v3171_v32 = vor.u32 %v3170_v13, %v3167_v24  ;;  %v3189_v46 = vshrl.u32 %v3098_v11, 16  ;;  %v3186_v54 = vrot.slane %v3184_v44, 5  ;;  %v3192_v33 = vshll.u32 %v3098_v11, 16  ;;  %v7990_v11 = vld [vmem:[%s10612_s3 + $0x100] sm:$0xff]  }
 0x10f   : > { %7624 = vmatprep.subr.bf16.mxu0 %v7982_v41  ;;  %v3181_v48 = vor.u32 %v3180_v14, %v3176_v63  ;;  %v3198_v20 = vshll.u32 %v3099_v55, 16  ;;  %v9062_v15 = vsel %vm8684_vm4, %v6931_v39, %v3926_v2  ;;  %v3928_v0 = vrot.slane %v3926_v2, 4  ;;  %v3101_v14 = vld [vmem:[#allocation2 + $0x30] sm:$0xf] }
 0x110   : > { %7677 = vmatpush3.bf16.msra.mxu1 %v7991_v47  ;;  %v3172_v1 = vrot.slane %v3171_v32, 4  ;;  %v3191_v18 = vrot.slane %v3189_v46, 4  ;;  %v3194_v10 = vrot.slane %v3192_v33, 5  ;;  %v3202_v47 = vshrl.u32 %v3099_v55, 16  ;;  %v3850_v46 = vld [vmem:[#allocation2 + $0x3c] sm:$0xe] }
 0x111   : > { %7758 = vmatprep.subr.bf16.mxu1 %v9046_v43  ;;  %v3182_v57 = vrot.slane %v3181_v48, 4  ;;  %v9064_v37 = vrot.slane %v3198_v20, 5  ;;  %v6962_v27 = vcombine.low %v9030_v49, %v9041_v29  ;;  %v3208_v13 = vshll.u32 %v9024_v36, 16  ;;  %v7981_v48 = vld [vmem:[#allocation2 + $0x90] sm:$0xff]   ;;  %v7997_v29 = vld [vmem:[%s10612_s3 + $0x1e8] sm:$0xff]  }
 0x112   : > { %7625 = vmatpush3.bf16.msra.mxu0 %v7982_v41  ;;  %v3177_v24 = vsel %vm8245_vm3, %v3172_v1, %v3176_v63  ;;  %v9075_v41 = vsel %vm8684_vm4, %v3928_v0, %v3929_v5  ;;  %v3195_v44 = vor.u32 %v3194_v10, %v3191_v18  ;;  %v3204_v39 = vrot.slane %v3202_v47, 4 }
 0x113   : > { %7599 = vmatmul.mubr.bf16.gmra.mxu1 %v7977_v60  ;;  %7626 = vmatprep.subr.bf16.mxu0 %v7986_v35  ;;  %v3187_v55 = vsel %vm8245_vm3, %v3182_v57, %v3186_v54  ;;  %v3102_v60 = vld [vmem:[#allocation2 + $0x34] sm:$0xf]  ;;  %v6932_v32 = vrot.slane %v3849_v62, 9  ;;  %v6963_v63 = vcombine.low %v9062_v15, %v9075_v41  ;;  %v3210_v2 = vrot.slane %v3208_v13, 5  ;;  %v9092_v62 = vld [vmem:[%s10612_s3 + $0x1b8] sm:$0xff]  }
 0x114   : > { %7602 = vmatprep.mubr.bf16.mxu1 %v7980_v9  ;;  %v3933_v5 = vrot.slane %v3102_v60, 5  ;;  %v3936_v36 = vrot.slane %v9057_v16, 5  ;;  %v3196_v30 = vrot.slane %v3195_v44, 4  ;;  %v3205_v3 = vor.u32 %v3204_v39, %v9064_v37  ;;  %v3104_v13 = vld [vmem:[#allocation2 + $0x3c] sm:$0xf] }
 0x115   : > { %7547 = vmatmul.mubr.bf16.gmra.mxu0 %v6832_v40  ;;  %v3213_v40 = vshrl.u32 %v3101_v14, 16  ;;  %v3216_v9 = vshll.u32 %v3101_v14, 16  ;;  %v9095_v54 = vcombine.low %v3177_v24, %v3187_v55  ;;  %v3222_v20 = vshll.u32 %v3102_v60, 16  ;;  %v3105_v39 = vld [vmem:[#allocation2 + $0x40] sm:$0xf] }
 0x116   : > { %7550 = vmatprep.mubr.bf16.mxu0 %v6833_v61  ;;  %7627 = vmatpush3.bf16.msra.mxu0 %v7986_v35  ;;  %v3935_v33 = vrot.slane %v3933_v5, 4  ;;  %v3226_v1 = vshrl.u32 %v3102_v60, 16  ;;  %v3206_v61 = vrot.slane %v3205_v3, 4  ;;  %v9099_v35 = vsel %vm8684_vm4, %v6932_v32, %v3933_v5 }
 0x117   : > { %7628 = vmatprep.subr.bf16.mxu0 %v7990_v11  ;;  %v3215_v0 = vrot.slane %v3213_v40, 4  ;;  %v3218_v18 = vrot.slane %v3216_v9, 5  ;;  %v3224_v10 = vrot.slane %v3222_v20, 5  ;;  %v3232_v24 = vshll.u32 %v9057_v16, 16  ;;  %v3851_v20 = vld [vmem:[#allocation2 + $0x48] sm:$0xe] }
 0x118   : > { %v9103_v57 = vsel %vm8684_vm4, %v3935_v33, %v3936_v36  ;;  %v3228_v47 = vrot.slane %v3226_v1, 4  ;;  %v3201_v14 = vsel %vm8245_vm3, %v3196_v30, %v9064_v37  ;;  %v3211_v55 = vsel %vm8245_vm3, %v3206_v61, %v3210_v2  ;;  %v3109_v30 = vld [vmem:[#allocation2 + $0x50] sm:$0x1] }
 0x119   : > { %v3219_v44 = vor.u32 %v3218_v18, %v3215_v0  ;;  %v6933_v60 = vrot.slane %v3850_v46, 9  ;;  %v6964_v32 = vcombine.low %v9099_v35, %v9103_v57  ;;  %v3234_v16 = vrot.slane %v3232_v24, 5  ;;  %v3108_v24 = vld [vmem:[#allocation2 + $0x4c] sm:$0xf] }
 0x11a   : > { %7629 = vmatpush3.bf16.msra.mxu0 %v7990_v11  ;;  %v3229_v5 = vor.u32 %v3228_v47, %v3224_v10  ;;  %v3940_v36 = vrot.slane %v3105_v39, 5  ;;  %v3943_v3 = vrot.slane %v3106_v42, 5  ;;  %v3237_v40 = vshrl.u32 %v3104_v13, 16 }
 0x11b   : > { %7603 = vmatmul.mubr.bf16.gmra.mxu1 %v7981_v48  ;;  %7710 = vmatprep.subr.bf16.mxu0 %v9092_v62  ;;  %v3220_v11 = vrot.slane %v3219_v44, 4  ;;  %v3240_v37 = vshll.u32 %v3104_v13, 16  ;;  %v10633_v2 = vcombine.low %v8838_v56, %v8851_v22  ;;  %v9117_v46 = vcombine.low %v3201_v14, %v3211_v55  ;;  %v3107_v56 = vld [vmem:[#allocation2 + $0x48] sm:$0xf] }
 0x11c   : > { %7606 = vmatprep.mubr.bf16.mxu1 %v7984_v52  ;;  %v3230_v9 = vrot.slane %v3229_v5, 4  ;;  %v3942_v48 = vrot.slane %v3940_v36, 4  ;;  %v3246_v33 = vshll.u32 %v3105_v39, 16  ;;  %v10634_v1 = vcombine.low %v8874_v31, %v8884_v34  ;;  %v7985_v52 = vld [vmem:[#allocation2 + $0xa8] sm:$0xff]   ;;  %v7988_v31 = vld [vmem:[#allocation2 + $0xb4] sm:$0xff]  }
 0x11d   : > { %7551 = vmatmul.mubr.bf16.gmra.mxu0 %v10633_v2  ;;  %v3225_v61 = vsel %vm8245_vm3, %v3220_v11, %v3224_v10  ;;  %v3239_v0 = vrot.slane %v3237_v40, 4  ;;  %v3242_v18 = vrot.slane %v3240_v37, 5  ;;  %v3250_v47 = vshrl.u32 %v3105_v39, 16 }
 0x11e   : > { %7554 = vmatprep.mubr.bf16.mxu0 %v10634_v1  ;;  %v3235_v22 = vsel %vm8245_vm3, %v3230_v9, %v3234_v16  ;;  %v9128_v13 = vsel %vm8684_vm4, %v6933_v60, %v3940_v36  ;;  %v3248_v14 = vrot.slane %v3246_v33, 5  ;;  %v3256_v55 = vshll.u32 %v3106_v42, 16 }
 0x11f   : > { %v9130_v34 = vcombine.low %v3225_v61, %v3235_v22  ;;  %v9134_v10 = vsel %vm8684_vm4, %v3942_v48, %v3943_v3  ;;  %v3243_v44 = vor.u32 %v3242_v18, %v3239_v0  ;;  %v3252_v39 = vrot.slane %v3250_v47, 4  ;;  %v3112_v3 = vld [vmem:[#allocation2 + $0x5c] sm:$0x1]  ;;  %v3852_v18 = vld [vmem:[#allocation2 + $0x54] sm:$0xe] }
 0x120   : > { %v3258_v5 = vrot.slane %v3256_v55, 5  ;;  %v6934_v11 = vrot.slane %v3851_v20, 9  ;;  %v3947_v40 = vrot.slane %v3108_v24, 5  ;;  %v3950_v37 = vrot.slane %v3109_v30, 5  ;;  %v3110_v55 = vld [vmem:[#allocation2 + $0x54] sm:$0xf] }
 0x121   : > { %v3244_v16 = vrot.slane %v3243_v44, 4  ;;  %v3253_v2 = vor.u32 %v3252_v39, %v3248_v14  ;;  %v3261_v9 = vshrl.u32 %v3107_v56, 16  ;;  %v3264_v60 = vshll.u32 %v3107_v56, 16 }
 0x122   : > { %v9138_v42 = vsel %vm8684_vm4, %v6934_v11, %v3947_v40  ;;  %v3949_v36 = vrot.slane %v3947_v40, 4  ;;  %v3270_v33 = vshll.u32 %v3108_v24, 16  ;;  %v3274_v1 = vshrl.u32 %v3108_v24, 16  ;;  %v3111_v11 = vld [vmem:[#allocation2 + $0x58] sm:$0xf]  ;;  %v7989_v40 = vld [vmem:[#allocation2 + $0xc0] sm:$0xff]  }
 0x123   : > { %7607 = vmatmul.mubr.bf16.gmra.mxu1 %v7985_v52  ;;  %v6965_v48 = vcombine.low %v9128_v13, %v9134_v10  ;;  %v3254_v20 = vrot.slane %v3253_v2, 4  ;;  %v3263_v61 = vrot.slane %v3261_v9, 4  ;;  %v3266_v0 = vrot.slane %v3264_v60, 5  ;;  %v8001_v10 = vld [vmem:[%s10612_s3 + $0x1d8] sm:$0xff]  }
 0x124   : > { %7610 = vmatprep.mubr.bf16.mxu1 %v7988_v31  ;;  %v10635_v47 = vcombine.low %v8864_v12, %v8888_v19  ;;  %v9147_v52 = vsel %vm8684_vm4, %v3949_v36, %v3950_v37  ;;  %v3272_v56 = vrot.slane %v3270_v33, 5  ;;  %v3276_v22 = vrot.slane %v3274_v1, 4  ;;  %v3115_v33 = vld [vmem:[#allocation2 + $0x68] sm:$0x1]  ;;  %v3853_v1 = vld [vmem:[#allocation2 + $0x60] sm:$0xe] }
 0x125   : > { %v3280_v24 = vshll.u32 %v3109_v30, 16  ;;  %v10636_v31 = vcombine.low %v8868_v8, %v8892_v26  ;;  %v3249_v44 = vsel %vm8245_vm3, %v3244_v16, %v3248_v14  ;;  %v3259_v39 = vsel %vm8245_vm3, %v3254_v20, %v3258_v5 }
 0x126   : > { %7555 = vmatmul.mubr.bf16.gmra.mxu0 %v10635_v47  ;;  %v6966_v12 = vcombine.low %v9138_v42, %v9147_v52  ;;  %v3267_v19 = vor.u32 %v3266_v0, %v3263_v61  ;;  %v3277_v37 = vor.u32 %v3276_v22, %v3272_v56  ;;  %v6935_v30 = vrot.slane %v3852_v18, 9  ;;  %v3113_v47 = vld [vmem:[#allocation2 + $0x60] sm:$0xf]  ;;  %v3114_v18 = vld [vmem:[#allocation2 + $0x64] sm:$0xf] }
 0x127   : > { %7558 = vmatprep.mubr.bf16.mxu0 %v10636_v31  ;;  %v3282_v2 = vrot.slane %v3280_v24, 5  ;;  %v3954_v9 = vrot.slane %v3111_v11, 5  ;;  %v3957_v36 = vrot.slane %v3112_v3, 5  ;;  %v3285_v8 = vshrl.u32 %v3110_v55, 16 }
 0x128   : > { %v3268_v60 = vrot.slane %v3267_v19, 4  ;;  %v3288_v26 = vshll.u32 %v3110_v55, 16  ;;  %v9158_v14 = vcombine.low %v3249_v44, %v3259_v39  ;;  %v3278_v16 = vrot.slane %v3277_v37, 4 }
 0x129   : > { %v3956_v5 = vrot.slane %v3954_v9, 4  ;;  %v3294_v20 = vshll.u32 %v3111_v11, 16  ;;  %v3287_v0 = vrot.slane %v3285_v8, 4  ;;  %v3298_v24 = vshrl.u32 %v3111_v11, 16 }
 0x12a   : > { %v3273_v61 = vsel %vm8245_vm3, %v3268_v60, %v3272_v56  ;;  %v3290_v22 = vrot.slane %v3288_v26, 5  ;;  %v3283_v31 = vsel %vm8245_vm3, %v3278_v16, %v3282_v2  ;;  %v9166_v55 = vsel %vm8684_vm4, %v6935_v30, %v3954_v9 }
 0x12b   : > { %7611 = vmatmul.mubr.bf16.gmra.mxu1 %v7989_v40  ;;  %v3296_v44 = vrot.slane %v3294_v20, 5  ;;  %v3304_v39 = vshll.u32 %v3112_v3, 16  ;;  %v9171_v19 = vcombine.low %v3273_v61, %v3283_v31  ;;  %v9175_v56 = vsel %vm8684_vm4, %v3956_v5, %v3957_v36  ;;  %v3854_v36 = vld [vmem:[#allocation2 + $0x6c] sm:$0xe]  ;;  %v3118_v5 = vld [vmem:[#allocation2 + $0x74] sm:$0x1] }
 0x12c   : > { %7678 = vmatprep.mubr.bf16.mxu1 %v6961_v50  ;;  %v3291_v11 = vor.u32 %v3290_v22, %v3287_v0  ;;  %v3300_v40 = vrot.slane %v3298_v24, 4  ;;  %v10637_v37 = vcombine.low %v8900_v7, %v8912_v58  ;;  %v6936_v30 = vrot.slane %v3853_v1, 9  ;;  %v3116_v1 = vld [vmem:[#allocation2 + $0x6c] sm:$0xf] }
 0x12d   : > { %v3306_v2 = vrot.slane %v3304_v39, 5  ;;  %v3961_v9 = vrot.slane %v3114_v18, 5  ;;  %v3964_v3 = vrot.slane %v3115_v33, 5  ;;  %v10638_v17 = vcombine.low %v8933_v59, %v8952_v6 }
 0x12e   : > { %7559 = vmatmul.mubr.bf16.gmra.mxu0 %v10637_v37  ;;  %v3292_v45 = vrot.slane %v3291_v11, 4  ;;  %v3301_v50 = vor.u32 %v3300_v40, %v3296_v44  ;;  %v3309_v60 = vshrl.u32 %v3113_v47, 16  ;;  %v3312_v8 = vshll.u32 %v3113_v47, 16  ;;  %v7995_v47 = vld [vmem:[%s10612_s3 + $0x1f0] sm:$0xff]  }
 0x12f   : > { %7562 = vmatprep.mubr.bf16.mxu0 %v10638_v17  ;;  %v9185_v26 = vsel %vm8684_vm4, %v6936_v30, %v3961_v9  ;;  %v3963_v16 = vrot.slane %v3961_v9, 4  ;;  %v3318_v7 = vshll.u32 %v3114_v18, 16  ;;  %v3322_v58 = vshrl.u32 %v3114_v18, 16  ;;  %v3117_v37 = vld [vmem:[#allocation2 + $0x70] sm:$0xf] }
 0x130   : > { %v6967_v20 = vcombine.low %v9166_v55, %v9175_v56  ;;  %v3302_v61 = vrot.slane %v3301_v50, 4  ;;  %v3311_v59 = vrot.slane %v3309_v60, 4  ;;  %v3314_v6 = vrot.slane %v3312_v8, 5  ;;  %v9209_v50 = vld [vmem:[#allocation2 + $0x80] sm:$0x1] }
 0x131   : > { %v9194_v0 = vsel %vm8684_vm4, %v3963_v16, %v3964_v3  ;;  %v3320_v22 = vrot.slane %v3318_v7, 5  ;;  %v3324_v24 = vrot.slane %v3322_v58, 4  ;;  %v3328_v31 = vshll.u32 %v3115_v33, 16  ;;  %v3855_v60 = vld [vmem:[#allocation2 + $0x78] sm:$0xe] }
 0x132   : > { %v3297_v18 = vsel %vm8245_vm3, %v3292_v45, %v3296_v44  ;;  %v3307_v39 = vsel %vm8245_vm3, %v3302_v61, %v3306_v2  ;;  %v6968_v11 = vcombine.low %v9185_v26, %v9194_v0  ;;  %v3315_v40 = vor.u32 %v3314_v6, %v3311_v59 }
 0x133   : > { %7679 = vmatmul.mubr.bf16.vlgmr.msra.gmra.mxu1 %v6962_v27  ;;  %v3325_v30 = vor.u32 %v3324_v24, %v3320_v22  ;;  %v3330_v9 = vrot.slane %v3328_v31, 5  ;;  %v6937_v3 = vrot.slane %v3854_v36, 9  ;;  %v3968_v17 = vrot.slane %v3117_v37, 5  ;;  %v3120_v24 = vld [vmem:[#allocation2 + $0x7c] sm:$0xf] }
 0x134   : > { %7759 = vmatpush3.bf16.msra.mxu1 %v9046_v43  ;;  %7682 = vmatprep.mubr.bf16.mxu1 %v6963_v63  ;;  %v3316_v33 = vrot.slane %v3315_v40, 4  ;;  %v3971_v44 = vrot.slane %v3118_v5, 5  ;;  %v3333_v2 = vshrl.u32 %v3116_v1, 16  ;;  %v3336_v45 = vshll.u32 %v3116_v1, 16  ;;  %v3119_v63 = vld [vmem:[#allocation2 + $0x78] sm:$0xf]  ;;  %v9242_v40 = vpop.f32.mrf.mxu1 }
 0x135   : > { %v10639_v49 = vcombine.low %v8948_v28, %v8959_v51  ;;  %7760 = vmatprep.subr.bf16.mxu1 %v7995_v47  ;;  %v9217_v43 = vcombine.low %v3297_v18, %v3307_v39  ;;  %v3326_v15 = vrot.slane %v3325_v30, 4  ;;  %v3970_v27 = vrot.slane %v3968_v17, 4 }
 0x136   : > { %v3342_v41 = vshll.u32 %v3117_v37, 16  ;;  %v3321_v8 = vsel %vm8245_vm3, %v3316_v33, %v3320_v22  ;;  %v3335_v36 = vrot.slane %v3333_v2, 4  ;;  %v3338_v16 = vrot.slane %v3336_v45, 5  ;;  %v7994_v33 = vld [vmem:[%s10612_s3 + $0x1b0] sm:$0xff]  }
 0x137   : > { %7563 = vmatmul.mubr.bf16.gmra.mxu0 %v10639_v49  ;;  %v3346_v28 = vshrl.u32 %v3117_v37, 16  ;;  %v3331_v51 = vsel %vm8245_vm3, %v3326_v15, %v3330_v9  ;;  %v9226_v7 = vsel %vm8684_vm4, %v6937_v3, %v3968_v17  ;;  %v3352_v1 = vshll.u32 %v3118_v5, 16  ;;  %v9245_v17 = vpop.f32.mrf.mxu0  ;;  %v3124_v15 = vld [vmem:[#allocation2 + $0x8c] sm:$0x1] }
 0x138   : > { %7630 = vmatprep.mubr.bf16.mxu0 %v9037_v53  ;;  %v9228_v58 = vrot.slane %v3342_v41, 5  ;;  %7761 = vmatpush3.bf16.msra.mxu1 %v7995_v47  ;;  %v9230_v61 = vcombine.low %v3321_v8, %v3331_v51  ;;  %v7999_v53 = vld [vmem:[%s10612_s3 + $0x1e0] sm:$0xff]   ;;  %v9237_v59 = vsel %vm8684_vm4, %v3970_v27, %v3971_v44  ;;  %v3339_v6 = vor.u32 %v3338_v16, %v3335_v36  ;;  %v3123_v16 = vld [vmem:[#allocation2 + $0x88] sm:$0xf] }
 0x139   : > { %v3348_v22 = vrot.slane %v3346_v28, 4  ;;  %7762 = vmatprep.subr.bf16.mxu1 %v7997_v29  ;;  %v3354_v31 = vrot.slane %v3352_v1, 5  ;;  %v6938_v18 = vrot.slane %v3855_v60, 9  ;;  %v3975_v39 = vrot.slane %v3120_v24, 5  ;;  %v9240_v47 = vld [vmem:[#allocation2 + $0x84] sm:$0xe]  ;;  %v9284_v51 = vpop.f32.mrf.mxu0 }
 0x13a   : > { %v3978_v5 = vrot.slane %v9209_v50, 5  ;;  %v3340_v37 = vrot.slane %v3339_v6, 4  ;;  %v3357_v9 = vshrl.u32 %v3119_v63, 16  ;;  %v3360_v3 = vshll.u32 %v3119_v63, 16 }
 0x13b   : > { %v3349_v30 = vor.u32 %v3348_v22, %v9228_v58  ;;  %7683 = vmatmul.mubr.bf16.gmra.mxu1 %v6964_v32  ;;  %v6969_v44 = vcombine.low %v9226_v7, %v9237_v59  ;;  %v3977_v2 = vrot.slane %v3975_v39, 4  ;;  %v3366_v45 = vshll.u32 %v3120_v24, 16  ;;  %v9383_v7 = vld [vmem:[%s10614_s5 + $0x38] sm:$0xff]  }
 0x13c   : > { %v3370_v60 = vshrl.u32 %v3120_v24, 16  ;;  %7686 = vmatprep.mubr.bf16.mxu1 %v6965_v48  ;;  %7763 = vmatpush3.bf16.msra.mxu1 %v7997_v29  ;;  %v9260_v35 = vsel %vm8684_vm4, %v6938_v18, %v3975_v39  ;;  %v3359_v57 = vrot.slane %v3357_v9, 4  ;;  %v3362_v32 = vrot.slane %v3360_v3, 5  ;;  %v3122_v48 = vld [vmem:[#allocation2 + $0x84] sm:$0xf]  ;;  %v9271_v29 = vpop.f32.mrf.mxu1  ;;  %v8003_v9 = vld [vmem:[%s10612_s3 + $0x1d0] sm:$0xff]  }
 0x13d   : > { %v3350_v49 = vrot.slane %v3349_v30, 4  ;;  %7764 = vmatprep.subr.bf16.mxu1 %v7999_v53  ;;  %v9265_v27 = vsel %vm8684_vm4, %v3977_v2, %v3978_v5  ;;  %v3368_v41 = vrot.slane %v3366_v45, 5  ;;  %v3376_v13 = vshll.u32 %v9209_v50, 16  ;;  %10640 = vst [vmem:[#allocation3_spill] sm:$0xff] %v9271_v29  ;;  %v9288_v39 = vld [vmem:[#allocation2 + $0x98] sm:$0x1] }
 0x13e   : > { %v3372_v63 = vrot.slane %v3370_v60, 4  ;;  %v3345_v8 = vsel %vm8245_vm3, %v3340_v37, %v9228_v58  ;;  %v3363_v36 = vor.u32 %v3362_v32, %v3359_v57  ;;  %v6939_v28 = vrot.slane %v9240_v47, 9  ;;  %v9295_v3 = vpop.f32.mrf.mxu1  ;;  %v7998_v57 = vld [vmem:[%s10612_s3 + $0x1a0] sm:$0xff]  }
 0x13f   : > { %7631 = vmatmul.mubr.bf16.vlgmr.msra.gmra.mxu0 %v9095_v54  ;;  %v7996_v54 = vld [vmem:[%s10612_s3 + $0x1a8] sm:$0xff]   ;;  %v3355_v50 = vsel %vm8245_vm3, %v3350_v49, %v3354_v31  ;;  %v3378_v1 = vrot.slane %v3376_v13, 5  ;;  %v3982_v6 = vrot.slane %v3123_v16, 5  ;;  %v3985_v24 = vrot.slane %v3124_v15, 5  ;;  %v3857_v31 = vld [vmem:[#allocation2 + $0x90] sm:$0xe]  ;;  %v9299_v49 = vpop.f32.mrf.mxu0 }
 0x140   : > { %7711 = vmatpush3.bf16.msra.mxu0 %v9092_v62  ;;  %7634 = vmatprep.mubr.bf16.mxu0 %v9117_v46  ;;  %v6970_v62 = vcombine.low %v9260_v35, %v9265_v27  ;;  %v3373_v46 = vor.u32 %v3372_v63, %v3368_v41  ;;  %v3364_v22 = vrot.slane %v3363_v36, 4  ;;  %v3381_v58 = vshrl.u32 %v3122_v48, 16  ;;  %10641 = vst [vmem:[#allocation4_spill] sm:$0xff] %v9295_v3  ;;  %v3125_v13 = vld [vmem:[#allocation2 + $0x90] sm:$0xf] }
 0x141   : > { %7712 = vmatprep.subr.bf16.mxu0 %v7994_v33  ;;  %7765 = vmatpush3.bf16.msra.mxu1 %v7999_v53  ;;  %v3384_v18 = vshll.u32 %v3122_v48, 16  ;;  %v9290_v5 = vcombine.low %v3345_v8, %v3355_v50  ;;  %v3984_v37 = vrot.slane %v3982_v6, 4  ;;  %v3390_v30 = vshll.u32 %v3123_v16, 16  ;;  %10642 = vst [vmem:[#allocation5_spill] sm:$0xff] %v9299_v49  ;;  %v3126_v8 = vld [vmem:[#allocation2 + $0x94] sm:$0xf] }
 0x142   : > { %v3374_v47 = vrot.slane %v3373_v46, 4  ;;  %7766 = vmatprep.subr.bf16.mxu1 %v8001_v10  ;;  %v3369_v53 = vsel %vm8245_vm3, %v3364_v22, %v3368_v41  ;;  %v3383_v2 = vrot.slane %v3381_v58, 4  ;;  %v3394_v60 = vshrl.u32 %v3123_v16, 16  ;;  %v8005_v50 = vld [vmem:[%s10612_s3 + $0x1c8] sm:$0xff]  }
 0x143   : > { %v3386_v45 = vrot.slane %v3384_v18, 5  ;;  %7687 = vmatmul.mubr.bf16.gmra.mxu1 %v6966_v12  ;;  %v9311_v32 = vsel %vm8684_vm4, %v6939_v28, %v3982_v6  ;;  %v9313_v41 = vrot.slane %v3390_v30, 5  ;;  %v3400_v63 = vshll.u32 %v3124_v15, 16  ;;  %v3129_v30 = vld [vmem:[#allocation2 + $0xa0] sm:$0xf] }
 0x144   : > { %7713 = vmatpush3.bf16.msra.mxu0 %v7994_v33  ;;  %v3379_v33 = vsel %vm8245_vm3, %v3374_v47, %v3378_v1  ;;  %7690 = vmatprep.mubr.bf16.mxu1 %v6967_v20  ;;  %v9322_v52 = vsel %vm8684_vm4, %v3984_v37, %v3985_v24  ;;  %v3396_v48 = vrot.slane %v3394_v60, 4  ;;  %v6940_v36 = vrot.slane %v3857_v31, 9  ;;  %v9329_v20 = vpop.f32.mrf.mxu1  ;;  %v9333_v1 = vpop.f32.mrf.mxu0 }
 0x145   : > { %7714 = vmatprep.subr.bf16.mxu0 %v7996_v54  ;;  %v9318_v42 = vcombine.low %v3369_v53, %v3379_v33  ;;  %7767 = vmatpush3.bf16.msra.mxu1 %v8001_v10  ;;  %v3387_v12 = vor.u32 %v3386_v45, %v3383_v2  ;;  %v3402_v15 = vrot.slane %v3400_v63, 5  ;;  %v3989_v55 = vrot.slane %v3126_v8, 5  ;;  %10643 = vst [vmem:[#allocation6_spill] sm:$0xff] %v9329_v20  ;;  %v3128_v53 = vld [vmem:[#allocation2 + $0x9c] sm:$0xf]  ;;  %v8007_v63 = vld [vmem:[%s10612_s3 + $0x1c0] sm:$0xff]  }
 0x146   : > { %v3992_v56 = vrot.slane %v9288_v39, 5  ;;  %7768 = vmatprep.subr.bf16.mxu1 %v8003_v9  ;;  %v3397_v16 = vor.u32 %v3396_v48, %v9313_v41  ;;  %v3405_v28 = vshrl.u32 %v3125_v13, 16  ;;  %v3408_v46 = vshll.u32 %v3125_v13, 16  ;;  %10644 = vst [vmem:[#allocation7_spill] sm:$0xff] %v9333_v1  ;;  %v9354_v13 = vpop.f32.mrf.mxu1  ;;  %v8002_v48 = vld [vmem:[%s10612_s3 + $0x190] sm:$0xff]  }
 0x147   : > { %7635 = vmatmul.mubr.bf16.gmra.mxu0 %v9130_v34  ;;  %v3388_v10 = vrot.slane %v3387_v12, 4  ;;  %v8000_v34 = vld [vmem:[%s10612_s3 + $0x198] sm:$0xff]   ;;  %v6971_v6 = vcombine.low %v9311_v32, %v9322_v52  ;;  %v3991_v22 = vrot.slane %v3989_v55, 4  ;;  %v3414_v24 = vshll.u32 %v3126_v8, 16 }
 0x148   : > { %7638 = vmatprep.mubr.bf16.mxu0 %v9158_v14  ;;  %7715 = vmatpush3.bf16.msra.mxu0 %v7996_v54  ;;  %v3418_v58 = vshrl.u32 %v3126_v8, 16  ;;  %v9340_v14 = vld [vmem:[#allocation2 + $0xa4] sm:$0x1]  ;;  %v3858_v54 = vld [vmem:[#allocation2 + $0x9c] sm:$0xe]  ;;  %v3398_v18 = vrot.slane %v3397_v16, 4  ;;  %v9344_v31 = vsel %vm8684_vm4, %v6940_v36, %v3989_v55  ;;  %v9364_v36 = vpop.f32.mrf.mxu0  ;;  %v9385_v59 = vpop.f32.mrf.mxu1 }
 0x149   : > { %7716 = vmatprep.subr.bf16.mxu0 %v7998_v57  ;;  %v3407_v47 = vrot.slane %v3405_v28, 4  ;;  %v3410_v37 = vrot.slane %v3408_v46, 5  ;;  %7769 = vmatpush3.bf16.msra.mxu1 %v8003_v9  ;;  %v9348_v2 = vsel %vm8684_vm4, %v3991_v22, %v3992_v56  ;;  %v3416_v45 = vrot.slane %v3414_v24, 5  ;;  %v9375_v46 = vld [vmem:[#allocation2 + $0xb0] sm:$0x1]  ;;  %10645 = vst [vmem:[#allocation8_spill] sm:$0xff] %v9385_v59 }
 0x14a   : > { %v3420_v60 = vrot.slane %v3418_v58, 4  ;;  %v3424_v33 = vshll.u32 %v9288_v39, 16  ;;  %7770 = vmatprep.subr.bf16.mxu1 %v8005_v50  ;;  %v3393_v9 = vsel %vm8245_vm3, %v3388_v10, %v9313_v41  ;;  %v3403_v12 = vsel %vm8245_vm3, %v3398_v18, %v3402_v15  ;;  %v3859_v24 = vld [vmem:[#allocation2 + $0xa8] sm:$0xe] }
 0x14b   : > { %v3411_v39 = vor.u32 %v3410_v37, %v3407_v47  ;;  %v6941_v8 = vrot.slane %v3858_v54, 9  ;;  %7691 = vmatmul.mubr.bf16.gmra.mxu1 %v6968_v11  ;;  %v3996_v56 = vrot.slane %v3129_v30, 5  ;;  %v3999_v10 = vrot.slane %v9340_v14, 5  ;;  %v8004_v54 = vld [vmem:[%s10612_s3 + $0x188] sm:$0xff]   ;;  %v9393_v47 = vpop.f32.mrf.mxu0 }
 0x14c   : > { %7717 = vmatpush3.bf16.msra.mxu0 %v7998_v57  ;;  %v6972_v57 = vcombine.low %v9344_v31, %v9348_v2  ;;  %v3421_v41 = vor.u32 %v3420_v60, %v3416_v45  ;;  %v3426_v55 = vrot.slane %v3424_v33, 5  ;;  %7694 = vmatprep.mubr.bf16.mxu1 %v6969_v44  ;;  %v3429_v16 = vshrl.u32 %v3128_v53, 16  ;;  %v3131_v18 = vld [vmem:[#allocation2 + $0xa8] sm:$0xf]  ;;  %10646 = vst [vmem:[#allocation9_spill] sm:$0xff] %v9393_v47 }
 0x14d   : > { %7718 = vmatprep.subr.bf16.mxu0 %v8000_v34  ;;  %v3412_v15 = vrot.slane %v3411_v39, 4  ;;  %v3432_v28 = vshll.u32 %v3128_v53, 16  ;;  %7771 = vmatpush3.bf16.msra.mxu1 %v8005_v50  ;;  %v9378_v26 = vcombine.low %v3393_v9, %v3403_v12  ;;  %v3998_v11 = vrot.slane %v3996_v56, 4  ;;  %v3132_v9 = vld [vmem:[#allocation2 + $0xac] sm:$0xf] }
 0x14e   : > { %v3422_v0 = vrot.slane %v3421_v41, 4  ;;  %v3438_v22 = vshll.u32 %v3129_v30, 16  ;;  %7772 = vmatprep.subr.bf16.mxu1 %v8007_v63  ;;  %v3431_v44 = vrot.slane %v3429_v16, 4  ;;  %v3442_v58 = vshrl.u32 %v3129_v30, 16  ;;  %v3138_v2 = vld [vmem:[#allocation2 + $0xc4] sm:$0xf] }
 0x14f   : > { %7639 = vmatmul.mubr.bf16.gmra.mxu0 %v9171_v19  ;;  %v3417_v19 = vsel %vm8245_vm3, %v3412_v15, %v3416_v45  ;;  %v3434_v50 = vrot.slane %v3432_v28, 5  ;;  %v3448_v53 = vshll.u32 %v9340_v14, 16  ;;  %v9406_v30 = vsel %vm8684_vm4, %v3998_v11, %v3999_v10  ;;  %v9412_v14 = vpop.f32.mrf.mxu1  ;;  %v9414_v28 = vpop.f32.mrf.mxu0  ;;  %v9741_v47 = vld [vmem:[#allocation2 + $0x94] sm:$0xf] }
 0x150   : > { %7642 = vmatprep.mubr.bf16.mxu0 %v9217_v43  ;;  %7719 = vmatpush3.bf16.msra.mxu0 %v8000_v34  ;;  %v3427_v37 = vsel %vm8245_vm3, %v3422_v0, %v3426_v55  ;;  %v9399_v43 = vsel %vm8684_vm4, %v6941_v8, %v3996_v56  ;;  %v3440_v34 = vrot.slane %v3438_v22, 5  ;;  %v3444_v33 = vrot.slane %v3442_v58, 4  ;;  %v9409_v8 = vld [vmem:[#allocation2 + $0xb4] sm:$0xe]  ;;  %10647 = vst [vmem:[#allocation10_spill] sm:$0xff] %v9412_v14 }
 0x151   : > { %7720 = vmatprep.subr.bf16.mxu0 %v8002_v48  ;;  %v9402_v45 = vcombine.low %v3417_v19, %v3427_v37  ;;  %v3435_v60 = vor.u32 %v3434_v50, %v3431_v44  ;;  %7773 = vmatpush3.bf16.msra.mxu1 %v8007_v63  ;;  %v3450_v12 = vrot.slane %v3448_v53, 5  ;;  %v6942_v39 = vrot.slane %v3859_v24, 9  ;;  %10648 = vst [vmem:[#allocation11_spill] sm:$0xff] %v9414_v28  ;;  %v3136_v24 = vld [vmem:[#allocation2 + $0xbc] sm:$0x1]  ;;  %v9437_v32 = vpop.f32.mrf.mxu1 }
 0x152   : > { %v4003_v41 = vrot.slane %v3132_v9, 5  ;;  %v4006_v55 = vrot.slane %v9375_v46, 5  ;;  %7854 = vmatprep.subr.bf16.mxu1 %v9383_v7  ;;  %v3445_v15 = vor.u32 %v3444_v33, %v3440_v34  ;;  %v3453_v10 = vshrl.u32 %v3131_v18, 16  ;;  %v3134_v19 = vld [vmem:[#allocation2 + $0xb4] sm:$0xf]  ;;  %10649 = vst [vmem:[#allocation12_spill] sm:$0xff] %v9437_v32 }
 0x153   : > { %v3436_v56 = vrot.slane %v3435_v60, 4  ;;  %v3456_v16 = vshll.u32 %v3131_v18, 16  ;;  %7695 = vmatmul.mubr.bf16.gmra.mxu1 %v6970_v62  ;;  %v6973_v63 = vcombine.low %v9399_v43, %v9406_v30  ;;  %v3462_v11 = vshll.u32 %v3132_v9, 16  ;;  %v3135_v50 = vld [vmem:[#allocation2 + $0xb8] sm:$0xf] }
 0x154   : > { %7721 = vmatpush3.bf16.msra.mxu0 %v8002_v48  ;;  %v4005_v0 = vrot.slane %v4003_v41, 4  ;;  %v3466_v22 = vshrl.u32 %v3132_v9, 16  ;;  %v8006_v48 = vld [vmem:[%s10612_s3 + $0x180] sm:$0xff]   ;;  %7698 = vmatprep.mubr.bf16.mxu1 %v6971_v6  ;;  %v3446_v44 = vrot.slane %v3445_v15, 4  ;;  %v9429_v35 = vsel %vm8684_vm4, %v6942_v39, %v4003_v41  ;;  %v9448_v30 = vld [vmem:[%s10612_s3 + $0x238] sm:$0xff]  }
 0x155   : > { %7722 = vmatprep.subr.bf16.mxu0 %v8004_v54  ;;  %v3455_v27 = vrot.slane %v3453_v10, 4  ;;  %v3458_v62 = vrot.slane %v3456_v16, 5  ;;  %v3464_v18 = vrot.slane %v3462_v11, 5  ;;  %v3472_v43 = vshll.u32 %v9375_v46, 16  ;;  %v9450_v46 = vpop.f32.mrf.mxu0  ;;  %v1172_v41 = vld [vmem:[#allocation2 + $0xc8] sm:$0x1]  ;;  %v9456_v16 = vpop.f32.mrf.mxu1 }
 0x156   : > { %v9434_v58 = vsel %vm8684_vm4, %v4005_v0, %v4006_v55  ;;  %v3468_v37 = vrot.slane %v3466_v22, 4  ;;  %v3441_v52 = vsel %vm8245_vm3, %v3436_v56, %v3440_v34  ;;  %v3451_v6 = vsel %vm8245_vm3, %v3446_v44, %v3450_v12  ;;  %10650 = vst [vmem:[#allocation13_spill] sm:$0xff] %v9450_v46  ;;  %v3861_v55 = vld [vmem:[#allocation2 + $0xc0] sm:$0xe] }
 0x157   : > { %7643 = vmatmul.mubr.bf16.gmra.mxu0 %v9230_v61  ;;  %v3459_v53 = vor.u32 %v3458_v62, %v3455_v27  ;;  %v6943_v61 = vrot.slane %v9409_v8, 9  ;;  %v3474_v33 = vrot.slane %v3472_v43, 5  ;;  %v4010_v34 = vrot.slane %v3135_v50, 5  ;;  %v9460_v27 = vpop.f32.mrf.mxu0 }
 0x158   : > { %7646 = vmatprep.mubr.bf16.mxu0 %v9290_v5  ;;  %7723 = vmatpush3.bf16.msra.mxu0 %v8004_v54  ;;  %v6974_v5 = vcombine.low %v9429_v35, %v9434_v58  ;;  %v3469_v60 = vor.u32 %v3468_v37, %v3464_v18  ;;  %v4013_v12 = vrot.slane %v3136_v24, 5  ;;  %v3477_v39 = vshrl.u32 %v3134_v19, 16 }
 0x159   : > { %7724 = vmatprep.subr.bf16.mxu0 %v8006_v48  ;;  %v3460_v9 = vrot.slane %v3459_v53, 4  ;;  %v3480_v54 = vshll.u32 %v3134_v19, 16  ;;  %v9454_v8 = vcombine.low %v3441_v52, %v3451_v6  ;;  %v4012_v15 = vrot.slane %v4010_v34, 4  ;;  %v3137_v52 = vld [vmem:[#allocation2 + $0xc0] sm:$0xf] }
 0x15a   : > { %v3470_v56 = vrot.slane %v3469_v60, 4  ;;  %v3486_v10 = vshll.u32 %v3135_v50, 16  ;;  %v3479_v11 = vrot.slane %v3477_v39, 4  ;;  %v3490_v44 = vshrl.u32 %v3135_v50, 16  ;;  %v4732_v39 = vld [vmem:[#allocation2 + $0x1c] sm:$0xf] }
 0x15b   : > { %v3465_v0 = vsel %vm8245_vm3, %v3460_v9, %v3464_v18  ;;  %v3482_v22 = vrot.slane %v3480_v54, 5  ;;  %7699 = vmatmul.mubr.bf16.gmra.mxu1 %v6972_v57  ;;  %v4011_v62 = vsel %vm8684_vm4, %v6943_v61, %v4010_v34  ;;  %v3496_v43 = vshll.u32 %v3136_v24, 16  ;;  %v4731_v57 = vld [vmem:[#allocation2 + $0x18] sm:$0xf]  ;;  %v4733_v54 = vld [vmem:[#allocation2 + $0x20] sm:$0x1] }
 0x15c   : > { %7725 = vmatpush3.bf16.msra.mxu0 %v8006_v48  ;;  %v3475_v19 = vsel %vm8245_vm3, %v3470_v56, %v3474_v33  ;;  %v3488_v37 = vrot.slane %v3486_v10, 5  ;;  %7702 = vmatprep.mubr.bf16.mxu1 %v6973_v63  ;;  %v4014_v48 = vsel %vm8684_vm4, %v4012_v15, %v4013_v12  ;;  %v3492_v31 = vrot.slane %v3490_v44, 4  ;;  %v9479_v63 = vpop.f32.mrf.mxu1  ;;  %v9482_v12 = vpop.f32.mrf.mxu0 }
 0x15d   : > { %7806 = vmatprep.subr.bf16.mxu0 %v9448_v30  ;;  %v9470_v50 = vcombine.low %v3465_v0, %v3475_v19  ;;  %v3483_v18 = vor.u32 %v3482_v22, %v3479_v11  ;;  %v3498_v6 = vrot.slane %v3496_v43, 5  ;;  %v1173_v24 = vsel %vm8299_vm14, %v1008_v21, %v1172_v41 }
 0x15e   : > { %v6944_v53 = vrot.slane %v3861_v55, 9  ;;  %v4017_v61 = vrot.slane %v3138_v2, 5  ;;  %v3493_v33 = vor.u32 %v3492_v31, %v3488_v37  ;;  %1174 = vst [vmem:[#allocation2 + $0xc8] sm:$0x1] %v1173_v24  ;;  %v3501_v34 = vshrl.u32 %v3137_v52, 16  ;;  %v9492_v22 = vpop.f32.mrf.mxu1 }
 0x15f   : > { %7647 = vmatmul.mubr.bf16.gmra.mxu0 %v9318_v42  ;;  %v3484_v60 = vrot.slane %v3483_v18, 4  ;;  %v3504_v9 = vshll.u32 %v3137_v52, 16  ;;  %v6975_v42 = vcombine.low %v4011_v62, %v4014_v48  ;;  %v3510_v25 = vshll.u32 %v3138_v2, 16  ;;  %v4734_v52 = vld [vmem:[#allocation2 + $0x24] sm:$0xf]  ;;  %v9496_v48 = vpop.f32.mrf.mxu0 }
 0x160   : > { %7650 = vmatprep.mubr.bf16.mxu0 %v9378_v26  ;;  %v9486_v4 = vsel %vm8684_vm4, %v6944_v53, %v4017_v61  ;;  %v3514_v21 = vshrl.u32 %v3138_v2, 16  ;;  %v3494_v26 = vrot.slane %v3493_v33, 4  ;;  %v3503_v55 = vrot.slane %v3501_v34, 4  ;;  %v9505_v58 = vpop.f32.mrf.mxu1 }
 0x161   : > { %v3489_v41 = vsel %vm8245_vm3, %v3484_v60, %v3488_v37  ;;  %v3506_v56 = vrot.slane %v3504_v9, 5  ;;  %v9490_v15 = vrot.slane %v3510_v25, 5  ;;  %v4780_v0 = vshrl.u32 %v4731_v57, 16  ;;  %10651 = vst [vmem:[#allocation14_spill] sm:$0xff] %v9505_v58  ;;  %v8019_v58 = vld [vmem:[%s10614_s5 + $0x28] sm:$0xff]  }
 0x162   : > { %v3516_v10 = vrot.slane %v3514_v21, 4  ;;  %v4783_v11 = vshll.u32 %v4731_v57, 16  ;;  %v3499_v44 = vsel %vm8245_vm3, %v3494_v26, %v3498_v6  ;;  %v4789_v62 = vshll.u32 %v4732_v39, 16  ;;  %v9502_v57 = vld [vmem:[#allocation2 + $0x28] sm:$0xf] }
 0x163   : > { %v3507_v19 = vor.u32 %v3506_v56, %v3503_v55  ;;  %v4793_v43 = vshrl.u32 %v4732_v39, 16  ;;  %7703 = vmatmul.mubr.bf16.gmra.mxu1 %v6974_v5  ;;  %v4019_v37 = vrot.slane %v4017_v61, 4  ;;  %v4782_v31 = vrot.slane %v4780_v0, 4 }
 0x164   : > { %v3517_v18 = vor.u32 %v3516_v10, %v9490_v15  ;;  %v4785_v2 = vrot.slane %v4783_v11, 5  ;;  %7706 = vmatprep.mubr.bf16.mxu1 %v6975_v42  ;;  %v6919_v24 = vcombine.low %v3489_v41, %v3499_v44  ;;  %v4791_v6 = vrot.slane %v4789_v62, 5  ;;  %v9508_v42 = vpop.f32.mrf.mxu0 }
 0x165   : > { %v4795_v53 = vrot.slane %v4793_v43, 4  ;;  %v4799_v60 = vshll.u32 %v4733_v54, 16  ;;  %v3139_v33 = vld [vmem:[#allocation2 + $0xc8] sm:$0x1]  ;;  %v3508_v34 = vrot.slane %v3507_v19, 4  ;;  %v4804_v25 = vshrl.u32 %v4734_v52, 16 }
 0x166   : > { %v4786_v9 = vor.u32 %v4785_v2, %v4782_v31  ;;  %v4807_v35 = vshll.u32 %v4734_v52, 16  ;;  %v4020_v5 = vrot.slane %v3139_v33, 5  ;;  %v3518_v61 = vrot.slane %v3517_v18, 4  ;;  %10652 = vst [vmem:[#allocation15_spill] sm:$0xff] %v9508_v42  ;;  %v9510_v54 = vld [vmem:[#allocation2 + $0x2c] sm:$0x1]  ;;  %v9519_v52 = vpop.f32.mrf.mxu1 }
 0x167   : > { %7651 = vmatmul.mubr.bf16.gmra.mxu0 %v9402_v45  ;;  %v3520_v21 = vshll.u32 %v3139_v33, 16  ;;  %v4796_v39 = vor.u32 %v4795_v53, %v4791_v6  ;;  %v4801_v26 = vrot.slane %v4799_v60, 5  ;;  %v4806_v45 = vrot.slane %v4804_v25, 4  ;;  %v4737_v43 = vld [vmem:[#allocation2 + $0x30] sm:$0xf] }
 0x168   : > { %7654 = vmatprep.mubr.bf16.mxu0 %v9454_v8  ;;  %v4787_v41 = vrot.slane %v4786_v9, 4  ;;  %v4809_v55 = vrot.slane %v4807_v35, 5  ;;  %v4021_v56 = vsel %vm8684_vm4, %v4019_v37, %v4020_v5  ;;  %v4813_v11 = vshll.u32 %v9502_v57, 16  ;;  %v9531_v9 = vld [vmem:[#allocation2 + $0x34] sm:$0xf] }
 0x169   : > { %v3522_v10 = vrot.slane %v3520_v21, 5  ;;  %v4797_v0 = vrot.slane %v4796_v39, 4  ;;  %v6976_v8 = vcombine.low %v9486_v4, %v4021_v56  ;;  %v4817_v62 = vshrl.u32 %v9502_v57, 16  ;;  %v9527_v4 = vpop.f32.mrf.mxu0  ;;  %v9533_v25 = vld [vmem:[#allocation2 + $0x38] sm:$0x1]  ;;  %v9538_v39 = vpop.f32.mrf.mxu1 }
 0x16a   : > { %v4792_v44 = vsel %vm8245_vm3, %v4787_v41, %v4791_v6  ;;  %v4810_v19 = vor.u32 %v4809_v55, %v4806_v45  ;;  %v3513_v18 = vsel %vm8245_vm3, %v3508_v34, %v9490_v15  ;;  %v4815_v31 = vrot.slane %v4813_v11, 5  ;;  %v4740_v15 = vld [vmem:[#allocation2 + $0x3c] sm:$0xf]  ;;  %v9536_v21 = vld [vmem:[#allocation2 + $0x40] sm:$0xf] }
 0x16b   : > { %v4802_v37 = vsel %vm8245_vm3, %v4797_v0, %v4801_v26  ;;  %v4823_v2 = vshll.u32 %v9510_v54, 16  ;;  %7707 = vmatmul.mubr.bf16.gmra.mxu1 %v6976_v8  ;;  %v3523_v6 = vsel %vm8245_vm3, %v3518_v61, %v3522_v10  ;;  %v4819_v33 = vrot.slane %v4817_v62, 4  ;;  %v9543_v55 = vld [vmem:[#allocation2 + $0x44] sm:$0x1]  ;;  %v9545_v56 = vpop.f32.mrf.mxu0  ;;  %v8008_v62 = vld [vmem:[#allocation2 + $0x18] sm:$0xff]  }
 0x16c   : > { %v7041_v53 = vcombine.low %v4792_v44, %v4802_v37  ;;  %v4811_v60 = vrot.slane %v4810_v19, 4  ;;  %v4828_v5 = vshrl.u32 %v4737_v43, 16  ;;  %v6920_v61 = vcombine.low %v3513_v18, %v3523_v6  ;;  %v9555_v6 = vpop.f32.mrf.mxu1 }
 0x16d   : > { %v4820_v34 = vor.u32 %v4819_v33, %v4815_v31  ;;  %v4825_v35 = vrot.slane %v4823_v2, 5  ;;  %v4831_v26 = vshll.u32 %v4737_v43, 16  ;;  %v4837_v45 = vshll.u32 %v9531_v9, 16  ;;  %v8015_v2 = vld [vmem:[%s10614_s5 + $0x30] sm:$0xff]  }
 0x16e   : > { %7774 = vmatprep.mubr.bf16.mxu1 %v7041_v53  ;;  %v4816_v41 = vsel %vm8245_vm3, %v4811_v60, %v4815_v31  ;;  %v4830_v10 = vrot.slane %v4828_v5, 4  ;;  %v4841_v0 = vshrl.u32 %v9531_v9, 16  ;;  %v4847_v11 = vshll.u32 %v9533_v25, 16  ;;  %v9557_v5 = vpop.f32.mrf.mxu0 }
 0x16f   : > { %7655 = vmatmul.mubr.bf16.gmra.mxu0 %v9470_v50  ;;  %v4821_v50 = vrot.slane %v4820_v34, 4  ;;  %v4833_v8 = vrot.slane %v4831_v26, 5  ;;  %v4839_v44 = vrot.slane %v4837_v45, 5  ;;  %v4855_v19 = vshll.u32 %v4740_v15, 16 }
 0x170   : > { %7658 = vmatprep.mubr.bf16.mxu0 %v6919_v24  ;;  %v4852_v24 = vshrl.u32 %v4740_v15, 16  ;;  %v4843_v18 = vrot.slane %v4841_v0, 4  ;;  %v4849_v37 = vrot.slane %v4847_v11, 5  ;;  %v4861_v31 = vshll.u32 %v9536_v21, 16 }
 0x171   : > { %v4826_v43 = vsel %vm8245_vm3, %v4821_v50, %v4825_v35  ;;  %v4834_v60 = vor.u32 %v4833_v8, %v4830_v10  ;;  %v4857_v34 = vrot.slane %v4855_v19, 5  ;;  %v4865_v35 = vshrl.u32 %v9536_v21, 16  ;;  %v4743_v50 = vld [vmem:[#allocation2 + $0x48] sm:$0xf]  ;;  %v9565_v8 = vld [vmem:[#allocation2 + $0x4c] sm:$0xf]  ;;  %v9569_v19 = vpop.f32.mrf.mxu1 }
 0x172   : > { %v7042_v53 = vcombine.low %v4816_v41, %v4826_v43  ;;  %v4854_v33 = vrot.slane %v4852_v24, 4  ;;  %v4844_v15 = vor.u32 %v4843_v18, %v4839_v44  ;;  %v4863_v26 = vrot.slane %v4861_v31, 5  ;;  %v9567_v24 = vld [vmem:[#allocation2 + $0x50] sm:$0x1]  ;;  %10653 = vst [vmem:[#allocation16_spill] sm:$0xff] %v9569_v19 }
 0x173   : > { %v4871_v45 = vshll.u32 %v9543_v55, 16  ;;  %v4835_v0 = vrot.slane %v4834_v60, 4  ;;  %v4867_v10 = vrot.slane %v4865_v35, 4  ;;  %v4876_v60 = vshrl.u32 %v4743_v50, 16 }
 0x174   : > { %7775 = vmatmul.mubr.bf16.vlgmr.msra.gmra.mxu1 %v7042_v53  ;;  %v4858_v11 = vor.u32 %v4857_v34, %v4854_v33  ;;  %v4845_v41 = vrot.slane %v4844_v15, 4  ;;  %v9573_v53 = vpop.f32.mrf.mxu0  ;;  %v4879_v33 = vshll.u32 %v4743_v50, 16  ;;  %v4746_v34 = vld [vmem:[#allocation2 + $0x54] sm:$0xf]  ;;  %v9584_v50 = vpop.f32.mrf.mxu1 }
 0x175   : > { %7855 = vmatpush3.bf16.msra.mxu1 %v9383_v7  ;;  %v4840_v43 = vsel %vm8245_vm3, %v4835_v0, %v4839_v44  ;;  %v4873_v31 = vrot.slane %v4871_v45, 5  ;;  %10654 = vst [vmem:[#allocation17_spill] sm:$0xff] %v9573_v53  ;;  %v4889_v44 = vshrl.u32 %v9565_v8, 16  ;;  %v9581_v0 = vld [vmem:[#allocation2 + $0x58] sm:$0xf]  ;;  %v8010_v45 = vld [vmem:[#allocation2 + $0x24] sm:$0xff]  }
 0x176   : > { %v4859_v18 = vrot.slane %v4858_v11, 4  ;;  %7856 = vmatprep.subr.bf16.mxu1 %v8015_v2  ;;  %v4850_v7 = vsel %vm8245_vm3, %v4845_v41, %v4849_v37  ;;  %v8012_v11 = vld [vmem:[#allocation2 + $0x30] sm:$0xff]   ;;  %v4878_v53 = vrot.slane %v4876_v60, 4  ;;  %v4881_v37 = vrot.slane %v4879_v33, 5  ;;  %v9588_v42 = vpop.f32.mrf.mxu0 }
 0x177   : > { %7659 = vmatmul.mubr.bf16.gmra.mxu0 %v6920_v61  ;;  %v4868_v61 = vor.u32 %v4867_v10, %v4863_v26  ;;  %v7043_v15 = vcombine.low %v4840_v43, %v4850_v7  ;;  %v4895_v41 = vshll.u32 %v9567_v24, 16  ;;  %v4891_v43 = vrot.slane %v4889_v44, 4 }
 0x178   : > { %7726 = vmatprep.mubr.bf16.mxu0 %v8008_v62  ;;  %v4864_v35 = vsel %vm8245_vm3, %v4859_v18, %v4863_v26  ;;  %v4885_v62 = vshll.u32 %v9565_v8, 16  ;;  %v9586_v26 = vld [vmem:[#allocation2 + $0x5c] sm:$0x1]  ;;  %v4900_v18 = vshrl.u32 %v4746_v34, 16  ;;  %v4903_v7 = vshll.u32 %v4746_v34, 16  ;;  %v8023_v34 = vld [vmem:[%s10614_s5 + $0x20] sm:$0xff]  }
 0x179   : > { %v4869_v19 = vrot.slane %v4868_v61, 4  ;;  %7857 = vmatpush3.bf16.msra.mxu1 %v8015_v2  ;;  %7778 = vmatprep.mubr.bf16.mxu1 %v7043_v15  ;;  %v8013_v2 = vld [vmem:[%s10612_s3 + $0x230] sm:$0xff]   ;;  %v4882_v60 = vor.u32 %v4881_v37, %v4878_v53  ;;  %v4897_v33 = vrot.slane %v4895_v41, 5  ;;  %v4909_v15 = vshll.u32 %v9581_v0, 16  ;;  %v9603_v53 = vpop.f32.mrf.mxu1 }
 0x17a   : > { %v4887_v10 = vrot.slane %v4885_v62, 5  ;;  %7858 = vmatprep.subr.bf16.mxu1 %v8019_v58  ;;  %v4902_v32 = vrot.slane %v4900_v18, 4  ;;  %v4905_v46 = vrot.slane %v4903_v7, 5  ;;  %v4749_v18 = vld [vmem:[#allocation2 + $0x60] sm:$0xf]  ;;  %v9617_v7 = vpop.f32.mrf.mxu0 }
 0x17b   : > { %v4874_v61 = vsel %vm8245_vm3, %v4869_v19, %v4873_v31  ;;  %v4883_v14 = vrot.slane %v4882_v60, 4  ;;  %v9599_v28 = vrot.slane %v4909_v15, 5  ;;  %v4913_v19 = vshrl.u32 %v9581_v0, 16 }
 0x17c   : > { %v7044_v62 = vcombine.low %v4864_v35, %v4874_v61  ;;  %v4892_v44 = vor.u32 %v4891_v43, %v4887_v10  ;;  %v4919_v31 = vshll.u32 %v9586_v26, 16  ;;  %v4906_v41 = vor.u32 %v4905_v46, %v4902_v32  ;;  %v8016_v35 = vld [vmem:[#allocation2 + $0x48] sm:$0xff]  }
 0x17d   : > { %7859 = vmatpush3.bf16.msra.mxu1 %v8019_v58  ;;  %v9612_v43 = vadd.f32 %v9456_v16, %v9460_v27  ;;  %v8027_v58 = vld [vmem:[%s10614_s5 + $0x18] sm:$0xff]   ;;  %v4888_v32 = vsel %vm8245_vm3, %v4883_v14, %v4887_v10  ;;  %v4915_v46 = vrot.slane %v4913_v19, 4  ;;  %v9626_v16 = vld [vmem:[#allocation2 + $0x64] sm:$0xf]  ;;  %v9628_v27 = vld [vmem:[#allocation2 + $0x68] sm:$0x1] }
 0x17e   : > { %v4893_v37 = vrot.slane %v4892_v44, 4  ;;  %7779 = vmatmul.mubr.bf16.gmra.mxu1 %v7044_v62  ;;  %v4907_v60 = vrot.slane %v4906_v41, 4  ;;  %v4921_v15 = vrot.slane %v4919_v31, 5  ;;  %v9634_v62 = vadd.f32 %v9492_v22, %v9496_v48  ;;  %v4752_v44 = vld [vmem:[#allocation2 + $0x6c] sm:$0xf]  ;;  %7860 = vmatprep.subr.bf16.mxu1 %v8023_v34  ;;  %v8014_v14 = vld [vmem:[#allocation2 + $0x3c] sm:$0xff]   ;;  %v9647_v41 = vpop.f32.mrf.mxu0 }
 0x17f   : > { %7727 = vmatmul.mubr.bf16.vlgmr.msra.gmra.mxu0 %v8010_v45  ;;  %v8017_v45 = vld [vmem:[%s10612_s3 + $0x228] sm:$0xff]   ;;  %10655 = vst [vmem:[#allocation18_spill] sm:$0xff] %v9612_v43  ;;  %v4927_v19 = vshll.u32 %v4749_v18, 16  ;;  %v4933_v22 = vshll.u32 %v9626_v16, 16  ;;  %v4937_v48 = vshrl.u32 %v9626_v16, 16  ;;  %v4943_v31 = vshll.u32 %v9628_v27, 16 }
 0x180   : > { %7807 = vmatpush3.bf16.msra.mxu0 %v9448_v30  ;;  %7730 = vmatprep.mubr.bf16.mxu0 %v8012_v11  ;;  %v9624_v11 = vadd.f32 %v9479_v63, %v9482_v12  ;;  %v4898_v61 = vsel %vm8245_vm3, %v4893_v37, %v4897_v33  ;;  %10657 = vst [vmem:[#allocation20_spill] sm:$0xff] %v9634_v62  ;;  %v4924_v12 = vshrl.u32 %v4749_v18, 16  ;;  %v9637_v30 = vpop.f32.mrf.mxu1  ;;  %v9645_v37 = vld [vmem:[#allocation2 + $0x70] sm:$0xf]  ;;  %v4951_v43 = vshll.u32 %v4752_v44, 16  ;;  %v9663_v3 = vpop.f32.mrf.mxu0 }
 0x181   : > { %7808 = vmatprep.subr.bf16.mxu0 %v8013_v2  ;;  %v7045_v10 = vcombine.low %v4888_v32, %v4898_v61  ;;  %v4916_v63 = vor.u32 %v4915_v46, %v9599_v28  ;;  %7861 = vmatpush3.bf16.msra.mxu1 %v8023_v34  ;;  %v4912_v33 = vsel %vm8245_vm3, %v4907_v60, %v9599_v28  ;;  %v4929_v18 = vrot.slane %v4927_v19, 5  ;;  %v8021_v28 = vld [vmem:[%s10612_s3 + $0x220] sm:$0xff]   ;;  %v8031_v46 = vld [vmem:[%s10614_s5 + $0x10] sm:$0xff]  }
 0x182   : > { %10656 = vst [vmem:[#allocation19_spill] sm:$0xff] %v9624_v11  ;;  %7862 = vmatprep.subr.bf16.mxu1 %v8027_v58  ;;  %v4948_v32 = vshrl.u32 %v4752_v44, 16  ;;  %v4935_v61 = vrot.slane %v4933_v22, 5  ;;  %v4939_v60 = vrot.slane %v4937_v48, 4  ;;  %v4945_v62 = vrot.slane %v4943_v31, 5  ;;  %v9660_v20 = vpop.f32.mrf.mxu1 }
 0x183   : > { %7782 = vmatprep.mubr.bf16.mxu1 %v7045_v10  ;;  %v4917_v34 = vrot.slane %v4916_v63, 4  ;;  %v9655_v11 = vld [vmem:[#allocation2 + $0x74] sm:$0x1]  ;;  %v4957_v19 = vshll.u32 %v9645_v37, 16  ;;  %v4953_v48 = vrot.slane %v4951_v43, 5  ;;  %v4961_v31 = vshrl.u32 %v9645_v37, 16 }
 0x184   : > { %7809 = vmatpush3.bf16.msra.mxu0 %v8013_v2  ;;  %v4926_v2 = vrot.slane %v4924_v12, 4  ;;  %v4950_v12 = vrot.slane %v4948_v32, 4  ;;  %v4940_v22 = vor.u32 %v4939_v60, %v4935_v61  ;;  %v9679_v32 = vld [vmem:[#allocation2 + $0x7c] sm:$0xf]  ;;  %v9714_v44 = vld [vmem:[#allocation2 + $0x8c] sm:$0x1] }
 0x185   : > { %7810 = vmatprep.subr.bf16.mxu0 %v8017_v45  ;;  %v4922_v10 = vsel %vm8245_vm3, %v4917_v34, %v4921_v15  ;;  %7863 = vmatpush3.bf16.msra.mxu1 %v8027_v58  ;;  %v9668_v15 = vld [vmem:[%s10614_s5 + $0x8] sm:$0xff]   ;;  %v4959_v58 = vrot.slane %v4957_v19, 5  ;;  %v4967_v34 = vshll.u32 %v9655_v11, 16  ;;  %v9686_v19 = vadd.f32 %v9538_v39, %v9545_v56 }
 0x186   : > { %v4930_v63 = vor.u32 %v4929_v18, %v4926_v2  ;;  %v7046_v1 = vcombine.low %v4912_v33, %v4922_v10  ;;  %7864 = vmatprep.subr.bf16.mxu1 %v8031_v46  ;;  %v4954_v43 = vor.u32 %v4953_v48, %v4950_v12  ;;  %v4963_v33 = vrot.slane %v4961_v31, 4  ;;  %v4755_v18 = vld [vmem:[#allocation2 + $0x78] sm:$0xf]  ;;  %v9692_v12 = vld [vmem:[#allocation2 + $0x80] sm:$0x1] }
 0x187   : > { %7731 = vmatmul.mubr.bf16.gmra.mxu0 %v8014_v14  ;;  %v9677_v2 = vadd.f32 %v9519_v52, %v9527_v4  ;;  %v8018_v10 = vld [vmem:[#allocation2 + $0x54] sm:$0xff]   ;;  %10659 = vst [vmem:[#allocation22_spill] sm:$0xff] %v9686_v19  ;;  %v9694_v52 = vpop.f32.mrf.mxu1  ;;  %v4981_v60 = vshll.u32 %v9679_v32, 16 }
 0x188   : > { %7734 = vmatprep.mubr.bf16.mxu0 %v8016_v35  ;;  %7811 = vmatpush3.bf16.msra.mxu0 %v8017_v45  ;;  %v4931_v14 = vrot.slane %v4930_v63, 4  ;;  %v8025_v35 = vld [vmem:[%s10612_s3 + $0x218] sm:$0xff]   ;;  %v4941_v45 = vrot.slane %v4940_v22, 4  ;;  %v8020_v22 = vld [vmem:[#allocation2 + $0x60] sm:$0xff]   ;;  %v4955_v48 = vrot.slane %v4954_v43, 4  ;;  %v4964_v31 = vor.u32 %v4963_v33, %v4959_v58 }
 0x189   : > { %7812 = vmatprep.subr.bf16.mxu0 %v8021_v28  ;;  %7783 = vmatmul.mubr.bf16.gmra.mxu1 %v7046_v1  ;;  %10658 = vst [vmem:[#allocation21_spill] sm:$0xff] %v9677_v2  ;;  %v9690_v1 = vadd.f32 %v9555_v6, %v9557_v5  ;;  %v4972_v6 = vshrl.u32 %v4755_v18, 16  ;;  %v4975_v5 = vshll.u32 %v4755_v18, 16  ;;  %v9709_v43 = vld [vmem:[#allocation2 + $0x88] sm:$0xf]  ;;  %v8039_v33 = vld [vmem:[%s10614_s5] sm:$0xff]  }
 0x18a   : > { %v4936_v63 = vsel %vm8245_vm3, %v4931_v14, %v4935_v61  ;;  %7865 = vmatpush3.bf16.msra.mxu1 %v8031_v46  ;;  %v4946_v4 = vsel %vm8245_vm3, %v4941_v45, %v4945_v62  ;;  %v4969_v61 = vrot.slane %v4967_v34, 5  ;;  %v4758_v14 = vld [vmem:[#allocation2 + $0x84] sm:$0xf]  ;;  %v9698_v39 = vpop.f32.mrf.mxu0  ;;  %v8029_v62 = vld [vmem:[%s10612_s3 + $0x210] sm:$0xff]   ;;  %v4960_v46 = vsel %vm8245_vm3, %v4955_v48, %v4959_v58  ;;  %v9716_v58 = vpop.f32.mrf.mxu1 }
 0x18b   : > { %10660 = vst [vmem:[#allocation23_spill] sm:$0xff] %v9690_v1  ;;  %7866 = vmatprep.subr.bf16.mxu1 %v9668_v15  ;;  %v7047_v56 = vcombine.low %v4936_v63, %v4946_v4  ;;  %v4965_v34 = vrot.slane %v4964_v31, 4  ;;  %v4991_v45 = vshll.u32 %v9692_v12, 16  ;;  %v4974_v18 = vrot.slane %v4972_v6, 4 }
 0x18c   : > { %7813 = vmatpush3.bf16.msra.mxu0 %v8021_v28  ;;  %v4985_v28 = vshrl.u32 %v9679_v32, 16  ;;  %v4977_v63 = vrot.slane %v4975_v5, 5  ;;  %v4983_v4 = vrot.slane %v4981_v60, 5  ;;  %v4996_v1 = vshrl.u32 %v4758_v14, 16  ;;  %v9718_v48 = vpop.f32.mrf.mxu0  ;;  %v8033_v5 = vld [vmem:[%s10612_s3 + $0x208] sm:$0xff]  }
 0x18d   : > { %7814 = vmatprep.subr.bf16.mxu0 %v8025_v35  ;;  %7786 = vmatprep.mubr.bf16.mxu1 %v7047_v56  ;;  %v4970_v31 = vsel %vm8245_vm3, %v4965_v34, %v4969_v61  ;;  %v4993_v2 = vrot.slane %v4991_v45, 5  ;;  %v4999_v49 = vshll.u32 %v4758_v14, 16  ;;  %v5005_v60 = vshll.u32 %v9709_v43, 16  ;;  %v4761_v14 = vld [vmem:[#allocation2 + $0x90] sm:$0xf] }
 0x18e   : > { %v4987_v19 = vrot.slane %v4985_v28, 4  ;;  %v4978_v56 = vor.u32 %v4977_v63, %v4974_v18  ;;  %v4998_v6 = vrot.slane %v4996_v1, 4  ;;  %7867 = vmatpush3.bf16.msra.mxu1 %v9668_v15  ;;  %v5009_v61 = vshrl.u32 %v9709_v43, 16  ;;  %v9737_v15 = vpop.f32.mrf.mxu1  ;;  %v8024_v18 = vld [vmem:[#allocation2 + $0x78] sm:$0xff]  }
 0x18f   : > { %7735 = vmatmul.mubr.bf16.gmra.mxu0 %v8018_v10  ;;  %v7048_v10 = vcombine.low %v4960_v46, %v4970_v31  ;;  %v5001_v59 = vrot.slane %v4999_v49, 5  ;;  %v5015_v34 = vshll.u32 %v9714_v44, 16  ;;  %7868 = vmatprep.subr.bf16.mxu1 %v8039_v33  ;;  %v5007_v46 = vrot.slane %v5005_v60, 5  ;;  %v9739_v49 = vpop.f32.mrf.mxu0 }
 0x190   : > { %7738 = vmatprep.mubr.bf16.mxu0 %v8020_v22  ;;  %7815 = vmatpush3.bf16.msra.mxu0 %v8025_v35  ;;  %v4988_v22 = vor.u32 %v4987_v19, %v4983_v4  ;;  %v8022_v35 = vld [vmem:[#allocation2 + $0x6c] sm:$0xff]   ;;  %v4979_v1 = vrot.slane %v4978_v56, 4  ;;  %v9731_v28 = vadd.f32 %v9584_v50, %v9588_v42  ;;  %v9735_v45 = vadd.f32 %v9603_v53, %v9617_v7  ;;  %v9753_v7 = vld [vmem:[#allocation2 + $0x98] sm:$0x1] }
 0x191   : > { %7816 = vmatprep.subr.bf16.mxu0 %v8029_v62  ;;  %7787 = vmatmul.mubr.bf16.gmra.mxu1 %v7048_v10  ;;  %v5002_v63 = vor.u32 %v5001_v59, %v4998_v6  ;;  %v5011_v31 = vrot.slane %v5009_v61, 4  ;;  %v5017_v10 = vrot.slane %v5015_v34, 5  ;;  %v9747_v50 = vadd.f32 %v9637_v30, %v9647_v41  ;;  %v8037_v59 = vld [vmem:[%s10612_s3 + $0x200] sm:$0xff]   ;;  %v4764_v41 = vld [vmem:[#allocation2 + $0x9c] sm:$0xf]  ;;  %v2177_v34 = vpop.f32.mrf.mxu1 }
 0x192   : > { %10661 = vst [vmem:[#allocation24_spill] sm:$0xff] %v9731_v28  ;;  %10662 = vst [vmem:[#allocation25_spill] sm:$0xff] %v9735_v45  ;;  %v4989_v19 = vrot.slane %v4988_v22, 4  ;;  %v4984_v42 = vsel %vm8245_vm3, %v4979_v1, %v4983_v4  ;;  %v9751_v53 = vadd.f32 %v9660_v20, %v9663_v3  ;;  %v5020_v56 = vshrl.u32 %v4761_v14, 16  ;;  %7869 = vmatpush3.bf16.msra.mxu1 %v8039_v33  ;;  %v9762_v61 = vld [vmem:[#allocation2 + $0xa0] sm:$0xf]  ;;  %v1872_v1 = vpop.f32.mrf.mxu0 }
 0x193   : > { %10663 = vst [vmem:[#allocation26_spill] sm:$0xff] %v9747_v50  ;;  %v5003_v4 = vrot.slane %v5002_v63, 4  ;;  %v5012_v6 = vor.u32 %v5011_v31, %v5007_v46  ;;  %v5023_v30 = vshll.u32 %v4761_v14, 16  ;;  %v5029_v20 = vshll.u32 %v9741_v47, 16  ;;  %v9767_v31 = vld [vmem:[#allocation2 + $0xa4] sm:$0x1] }
 0x194   : > { %7817 = vmatpush3.bf16.msra.mxu0 %v8029_v62  ;;  %10664 = vst [vmem:[#allocation27_spill] sm:$0xff] %v9751_v53  ;;  %v4994_v62 = vsel %vm8245_vm3, %v4989_v19, %v4993_v2  ;;  %v5022_v3 = vrot.slane %v5020_v56, 4  ;;  %v5033_v22 = vshrl.u32 %v9741_v47, 16  ;;  %v5039_v14 = vshll.u32 %v9753_v7, 16  ;;  %v8028_v50 = vld [vmem:[#allocation2 + $0x90] sm:$0xff]  }
 0x195   : > { %7818 = vmatprep.subr.bf16.mxu0 %v8033_v5  ;;  %v7049_v60 = vcombine.low %v4984_v42, %v4994_v62  ;;  %v5008_v33 = vsel %vm8245_vm3, %v5003_v4, %v5007_v46  ;;  %v5013_v2 = vrot.slane %v5012_v6, 4  ;;  %v5025_v19 = vrot.slane %v5023_v30, 5  ;;  %v8026_v6 = vld [vmem:[#allocation2 + $0x84] sm:$0xff]  }
 0x196   : > { %v5035_v63 = vrot.slane %v5033_v22, 4  ;;  %v5044_v42 = vshrl.u32 %v4764_v41, 16  ;;  %v5047_v56 = vshll.u32 %v4764_v41, 16  ;;  %v5041_v53 = vrot.slane %v5039_v14, 5  ;;  %v9784_v14 = vld [vmem:[#allocation2 + $0xac] sm:$0xf] }
 0x197   : > { %7739 = vmatmul.mubr.bf16.gmra.mxu0 %v8022_v35  ;;  %7790 = vmatprep.mubr.bf16.mxu1 %v7049_v60  ;;  %v5031_v35 = vrot.slane %v5029_v20, 5  ;;  %v5018_v62 = vsel %vm8245_vm3, %v5013_v2, %v5017_v10  ;;  %v5053_v46 = vshll.u32 %v9762_v61, 16  ;;  %v9772_v20 = vpop.f32.mrf.mxu1  ;;  %v5057_v41 = vshrl.u32 %v9762_v61, 16  ;;  %v4767_v10 = vld [vmem:[#allocation2 + $0xa8] sm:$0xf]  ;;  %10667 = vst [vmem:[#allocation30_spill] sm:$0xff] %v9784_v14 }
 0x198   : > { %7742 = vmatprep.mubr.bf16.mxu0 %v8024_v18  ;;  %7819 = vmatpush3.bf16.msra.mxu0 %v8033_v5  ;;  %v5026_v18 = vor.u32 %v5025_v19, %v5022_v3  ;;  %v7050_v4 = vcombine.low %v5008_v33, %v5018_v62  ;;  %v5046_v5 = vrot.slane %v5044_v42, 4  ;;  %v5049_v60 = vrot.slane %v5047_v56, 5 }
 0x199   : > { %7820 = vmatprep.subr.bf16.mxu0 %v8037_v59  ;;  %v5036_v30 = vor.u32 %v5035_v63, %v5031_v35  ;;  %v7464_v22 = vpop.f32.mrf.mxu0  ;;  %v5055_v28 = vrot.slane %v5053_v46, 5  ;;  %v5063_v29 = vshll.u32 %v9767_v31, 16  ;;  %v9778_v33 = vadd.f32 %v9694_v52, %v9698_v39  ;;  %v4770_v46 = vld [vmem:[#allocation2 + $0xb4] sm:$0xf] }
 0x19a   : > { %v5027_v45 = vrot.slane %v5026_v18, 4  ;;  %7791 = vmatmul.mubr.bf16.gmra.mxu1 %v7050_v4  ;;  %v5050_v2 = vor.u32 %v5049_v60, %v5046_v5  ;;  %v9782_v19 = vadd.f32 %v9716_v58, %v9718_v48  ;;  %v5059_v56 = vrot.slane %v5057_v41, 4  ;;  %v9792_v18 = vld [vmem:[#allocation2 + $0xb0] sm:$0x1]  ;;  %v2190_v4 = vpop.f32.mrf.mxu1  ;;  %v8030_v60 = vld [vmem:[#allocation2 + $0x9c] sm:$0xff]  }
 0x19b   : > { %v5037_v3 = vrot.slane %v5036_v30, 4  ;;  %10665 = vst [vmem:[#allocation28_spill] sm:$0xff] %v9778_v33  ;;  %v1885_v63 = vpop.f32.mrf.mxu0  ;;  %v5065_v62 = vrot.slane %v5063_v29, 5  ;;  %10669 = vst [vmem:[#allocation32_spill] sm:$0xff] %v9792_v18  ;;  %v9796_v58 = vadd.f32 %v2177_v34, %v1872_v1  ;;  %v5068_v48 = vshrl.u32 %v4767_v10, 16 }
 0x19c   : > { %7821 = vmatpush3.bf16.msra.mxu0 %v8037_v59  ;;  %10666 = vst [vmem:[#allocation29_spill] sm:$0xff] %v9782_v19  ;;  %v5032_v42 = vsel %vm8245_vm3, %v5027_v45, %v5031_v35  ;;  %v9790_v59 = vadd.f32 %v9737_v15, %v9739_v49  ;;  %v5051_v39 = vrot.slane %v5050_v2, 4  ;;  %v5060_v45 = vor.u32 %v5059_v56, %v5055_v28  ;;  %v9799_v15 = vld [vmem:[#allocation2 + $0xb8] sm:$0xf] }
 0x19d   : > { %v5042_v52 = vsel %vm8245_vm3, %v5037_v3, %v5041_v53  ;;  %10670 = vst [vmem:[#allocation33_spill] sm:$0xff] %v9796_v58  ;;  %v5071_v29 = vshll.u32 %v4767_v10, 16  ;;  %v5077_v35 = vshll.u32 %v9784_v14, 16  ;;  %v5081_v53 = vshrl.u32 %v9784_v14, 16  ;;  %v7465_v1 = vpop.f32.mrf.mxu0  ;;  %v8032_v58 = vld [vmem:[#allocation2 + $0xa8] sm:$0xff]  }
 0x19e   : > { %10668 = vst [vmem:[#allocation31_spill] sm:$0xff] %v9790_v59  ;;  %v7051_v30 = vcombine.low %v5032_v42, %v5042_v52  ;;  %v5056_v49 = vsel %vm8245_vm3, %v5051_v39, %v5055_v28  ;;  %v5087_v34 = vshll.u32 %v9792_v18, 16  ;;  %v5061_v5 = vrot.slane %v5060_v45, 4  ;;  %v9805_v42 = vld [vmem:[#allocation2 + $0xbc] sm:$0x1]  ;;  %v7513_v28 = vpop.f32.mrf.mxu1 }
 0x19f   : > { %7743 = vmatmul.mubr.bf16.gmra.mxu0 %v8026_v6  ;;  %v5070_v6 = vrot.slane %v5068_v48, 4  ;;  %v5073_v41 = vrot.slane %v5071_v29, 5  ;;  %v5092_v3 = vshrl.u32 %v4770_v46, 16  ;;  %v5083_v10 = vrot.slane %v5081_v53, 4  ;;  %v1888_v53 = vpop.f32.mrf.mxu0  ;;  %v4773_v14 = vld [vmem:[#allocation2 + $0xc0] sm:$0xf] }
 0x1a0   : > { %7746 = vmatprep.mubr.bf16.mxu0 %v8028_v50  ;;  %7794 = vmatprep.mubr.bf16.mxu1 %v7051_v30  ;;  %v5079_v50 = vrot.slane %v5077_v35, 5  ;;  %v5089_v2 = vrot.slane %v5087_v34, 5  ;;  %v5095_v56 = vshll.u32 %v4770_v46, 16  ;;  %v5101_v52 = vshll.u32 %v9799_v15, 16 }
 0x1a1   : > { %v5066_v39 = vsel %vm8245_vm3, %v5061_v5, %v5065_v62  ;;  %v5074_v48 = vor.u32 %v5073_v41, %v5070_v6  ;;  %v5094_v59 = vrot.slane %v5092_v3, 4  ;;  %v5105_v30 = vshrl.u32 %v9799_v15, 16  ;;  %v9819_v3 = vld [vmem:[#allocation2 + $0xc4] sm:$0xf] }
 0x1a2   : > { %v7052_v45 = vcombine.low %v5056_v49, %v5066_v39  ;;  %v5084_v29 = vor.u32 %v5083_v10, %v5079_v50  ;;  %v5097_v35 = vrot.slane %v5095_v56, 5  ;;  %v5103_v19 = vrot.slane %v5101_v52, 5  ;;  %v2193_v49 = vpop.f32.mrf.mxu1 }
 0x1a3   : > { %v5075_v34 = vrot.slane %v5074_v48, 4  ;;  %v5107_v33 = vrot.slane %v5105_v30, 4  ;;  %v5111_v46 = vshll.u32 %v9805_v42, 16  ;;  %v9813_v18 = vadd.f32 %v9772_v20, %v7464_v22  ;;  %v9825_v22 = vld [vmem:[#allocation2 + $0xc8] sm:$0x1]  ;;  %v8034_v30 = vld [vmem:[#allocation2 + $0xb4] sm:$0xff]  }
 0x1a4   : > { %7795 = vmatmul.mubr.bf16.gmra.mxu1 %v7052_v45  ;;  %v5085_v62 = vrot.slane %v5084_v29, 4  ;;  %v5098_v6 = vor.u32 %v5097_v35, %v5094_v59  ;;  %v9815_v5 = vadd.f32 %v2190_v4, %v1885_v63  ;;  %v9817_v41 = vadd.f32 %v7513_v28, %v7465_v1  ;;  %v9836_v35 = vld [vmem:[#allocation2 + $0xd4] sm:$0x1] }
 0x1a5   : > { %10671 = vst [vmem:[#allocation34_spill] sm:$0xff] %v9813_v18  ;;  %v5080_v10 = vsel %vm8245_vm3, %v5075_v34, %v5079_v50  ;;  %v5108_v56 = vor.u32 %v5107_v33, %v5103_v19  ;;  %v5113_v52 = vrot.slane %v5111_v46, 5  ;;  %v9823_v20 = vadd.f32 %v2193_v49, %v1888_v53  ;;  %v8036_v46 = vld [vmem:[#allocation2 + $0xc0] sm:$0xff]  }
 0x1a6   : > { %10672 = vst [vmem:[#allocation35_spill] sm:$0xff] %v9815_v5  ;;  %10673 = vst [vmem:[#allocation36_spill] sm:$0xff] %v9817_v41  ;;  %v5090_v59 = vsel %vm8245_vm3, %v5085_v62, %v5089_v2  ;;  %v5099_v63 = vrot.slane %v5098_v6, 4  ;;  %v5116_v4 = vshrl.u32 %v4773_v14, 16  ;;  %v5119_v1 = vshll.u32 %v4773_v14, 16  ;;  %v8038_v5 = vld [vmem:[#allocation2 + $0xcc] sm:$0xff]  }
 0x1a7   : > { %7747 = vmatmul.mubr.bf16.gmra.mxu0 %v8030_v60  ;;  %10674 = vst [vmem:[#allocation37_spill] sm:$0xff] %v9823_v20  ;;  %v4776_v60 = vld [vmem:[#allocation2 + $0xcc] sm:$0xf]  ;;  %v7053_v28 = vcombine.low %v5080_v10, %v5090_v59  ;;  %v5109_v39 = vrot.slane %v5108_v56, 4  ;;  %v5125_v48 = vshll.u32 %v9819_v3, 16  ;;  %v5129_v50 = vshrl.u32 %v9819_v3, 16 }
 0x1a8   : > { %7750 = vmatprep.mubr.bf16.mxu0 %v8032_v58  ;;  %v9831_v58 = vld [vmem:[#allocation2 + $0xd0] sm:$0xf]  ;;  %v5104_v33 = vsel %vm8245_vm3, %v5099_v63, %v5103_v19  ;;  %v5118_v45 = vrot.slane %v5116_v4, 4  ;;  %v5121_v29 = vrot.slane %v5119_v1, 5  ;;  %v5135_v2 = vshll.u32 %v9825_v22, 16 }
 0x1a9   : > { %7798 = vmatprep.mubr.bf16.mxu1 %v7053_v28  ;;  %v5114_v14 = vsel %vm8245_vm3, %v5109_v39, %v5113_v52  ;;  %v5127_v53 = vrot.slane %v5125_v48, 5  ;;  %v5131_v34 = vrot.slane %v5129_v50, 4  ;;  %v5140_v62 = vshrl.u32 %v4776_v60, 16  ;;  %v5485_v6 = vld [vmem:[#allocation2 + $0x18] sm:$0xe] }
 0x1aa   : > { %v7054_v49 = vcombine.low %v5104_v33, %v5114_v14  ;;  %v5122_v10 = vor.u32 %v5121_v29, %v5118_v45  ;;  %v5137_v56 = vrot.slane %v5135_v2, 5  ;;  %v5143_v59 = vshll.u32 %v4776_v60, 16  ;;  %v8074_v60 = vld [vmem:[#allocation2 + $0x1c] sm:$0xf]  ;;  %v5486_v14 = vld [vmem:[#allocation2 + $0x24] sm:$0xe] }
 0x1ab   : > { %v7516_v19 = vpop.f32.mrf.mxu1  ;;  %v5132_v63 = vor.u32 %v5131_v34, %v5127_v53  ;;  %v5142_v4 = vrot.slane %v5140_v62, 4  ;;  %v5149_v1 = vshll.u32 %v9831_v58, 16  ;;  %v5153_v20 = vshrl.u32 %v9831_v58, 16  ;;  %v5487_v41 = vld [vmem:[#allocation2 + $0x30] sm:$0xe] }
 0x1ac   : > { %7799 = vmatmul.mubr.bf16.gmra.mxu1 %v7054_v49  ;;  %v5123_v28 = vrot.slane %v5122_v10, 4  ;;  %v5145_v52 = vrot.slane %v5143_v59, 5  ;;  %v5159_v39 = vshll.u32 %v9836_v35, 16  ;;  %v7065_v50 = vrot.slane %v5485_v6, 9  ;;  %v8075_v10 = vld [vmem:[#allocation2 + $0x20] sm:$0x1] }
 0x1ad   : > { %v9843_v48 = vpop.f32.mrf.mxu1  ;;  %v5133_v33 = vrot.slane %v5132_v63, 4  ;;  %v5151_v45 = vrot.slane %v5149_v1, 5  ;;  %v5155_v29 = vrot.slane %v5153_v20, 4  ;;  %v5551_v2 = vrot.slane %v8074_v60, 5 }
 0x1ae   : > { %v5128_v34 = vsel %vm8245_vm3, %v5123_v28, %v5127_v53  ;;  %v5146_v62 = vor.u32 %v5145_v52, %v5142_v4  ;;  %v5161_v49 = vrot.slane %v5159_v39, 5  ;;  %v5554_v59 = vrot.slane %v8075_v10, 5 }
 0x1af   : > { %7751 = vmatmul.mubr.bf16.gmra.mxu0 %v8034_v30  ;;  %v9847_v30 = vpop.f32.mrf.mxu1  ;;  %v5138_v6 = vsel %vm8245_vm3, %v5133_v33, %v5137_v56  ;;  %v5156_v63 = vor.u32 %v5155_v29, %v5151_v45  ;;  %v5552_v20 = vsel %vm8684_vm4, %v7065_v50, %v5551_v2  ;;  %v7066_v53 = vrot.slane %v5486_v14, 9  ;;  %v5488_v29 = vld [vmem:[#allocation2 + $0x3c] sm:$0xe] }
 0x1b0   : > { %7754 = vmatprep.mubr.bf16.mxu0 %v8036_v46  ;;  %v5553_v46 = vrot.slane %v5551_v2, 4  ;;  %v7055_v1 = vcombine.low %v5128_v34, %v5138_v6  ;;  %v5147_v60 = vrot.slane %v5146_v62, 4  ;;  %v10675_v4 = vrot.slane %v9502_v57, 5  ;;  %v8040_v6 = vld [vmem:[%s8157_s23] sm:$0xff]  }
 0x1b1   : > { %v9853_v18 = vpop.f32.mrf.mxu1  ;;  %v5157_v52 = vrot.slane %v5156_v63, 4  ;;  %v7067_v56 = vrot.slane %v5487_v41, 9  ;;  %v5565_v33 = vrot.slane %v9531_v9, 5  ;;  %v10677_v10 = vrot.slane %v9510_v54, 5 }
 0x1b2   : > { %v5560_v28 = vrot.slane %v10675_v4, 4  ;;  %v5555_v39 = vsel %vm8684_vm4, %v5553_v46, %v5554_v59  ;;  %7802 = vmatprep.mubr.bf16.mxu1 %v7055_v1  ;;  %v5152_v50 = vsel %vm8245_vm3, %v5147_v60, %v5151_v45  ;;  %v10676_v14 = vmov %v10675_v4  ;;  %v5489_v59 = vld [vmem:[#allocation2 + $0x48] sm:$0xe]  ;;  %v5490_v46 = vld [vmem:[#allocation2 + $0x54] sm:$0xe] }
 0x1b3   : > { %v9862_v2 = vpop.f32.mrf.mxu1  ;;  %v7097_v34 = vcombine.low %v5552_v20, %v5555_v39  ;;  %v5559_v62 = vsel %vm8684_vm4, %v7066_v53, %v10676_v14  ;;  %v5162_v9 = vsel %vm8245_vm3, %v5157_v52, %v5161_v49  ;;  %v5566_v45 = vsel %vm8684_vm4, %v7067_v56, %v5565_v33  ;;  %v5491_v39 = vld [vmem:[#allocation2 + $0x60] sm:$0xe] }
 0x1b4   : > { %v5562_v41 = vsel %vm8684_vm4, %v5560_v28, %v10677_v10  ;;  %v5567_v20 = vrot.slane %v5565_v33, 4  ;;  %v7056_v57 = vcombine.low %v5152_v50, %v5162_v9  ;;  %v5568_v54 = vrot.slane %v9533_v25, 5 }
 0x1b5   : > { %v7098_v63 = vcombine.low %v5559_v62, %v5562_v41  ;;  %v7468_v1 = vpop.f32.mrf.mxu0  ;;  %v9877_v60 = vpop.f32.mrf.mxu1  ;;  %v7068_v53 = vrot.slane %v5488_v29, 9  ;;  %v5572_v4 = vrot.slane %v9536_v21, 5  ;;  %v7069_v38 = vrot.slane %v5489_v59, 9  ;;  %v5492_v59 = vld [vmem:[#allocation2 + $0x6c] sm:$0xe] }
 0x1b6   : > { %v9881_v28 = vadd.f32 %v7516_v19, %v7468_v1  ;;  %v5579_v49 = vrot.slane %v9565_v8, 5  ;;  %v5582_v52 = vrot.slane %v9567_v24, 5  ;;  %v5603_v56 = vrot.slane %v9655_v11, 5  ;;  %7803 = vmatmul.mubr.bf16.gmra.mxu1 %v7056_v57  ;;  %v8041_v1 = vld [vmem:[%s8157_s23 + $0x8] sm:$0xff]  }
 0x1b7   : > { %7755 = vmatmul.mubr.bf16.gmra.mxu0 %v8038_v5  ;;  %v1901_v5 = vpop.f32.mrf.mxu0  ;;  %v9886_v33 = vpop.f32.mrf.mxu1  ;;  %v5569_v25 = vsel %vm8684_vm4, %v5567_v20, %v5568_v54  ;;  %v5574_v29 = vrot.slane %v5572_v4, 4  ;;  %v7070_v21 = vrot.slane %v5490_v46, 9  ;;  %7870 = vmatprep.mubr.bf16.mxu1 %v8040_v6  ;;  %v9895_v8 = vsel %vm8684_vm4, %v7068_v53, %v5572_v4 }
 0x1b8   : > { %7822 = vmatprep.mubr.bf16.mxu0 %v7097_v34  ;;  %v9891_v19 = vadd.f32 %v9843_v48, %v1901_v5  ;;  %v9899_v24 = vsel %vm8684_vm4, %v7069_v38, %v5579_v49  ;;  %v5581_v50 = vrot.slane %v5579_v49, 4  ;;  %v7099_v62 = vcombine.low %v5566_v45, %v5569_v25  ;;  %v5493_v45 = vld [vmem:[#allocation2 + $0x78] sm:$0xe] }
 0x1b9   : > { %v7469_v34 = vpop.f32.mrf.mxu0  ;;  %v9901_v14 = vpop.f32.mrf.mxu1  ;;  %v5586_v10 = vrot.slane %v9581_v0, 5  ;;  %v7071_v41 = vrot.slane %v5491_v39, 9  ;;  %v5593_v48 = vrot.slane %v9626_v16, 5  ;;  %v10678_v6 = vrot.slane %v9543_v55, 5 }
 0x1ba   : > { %v9906_v9 = vadd.f32 %v9847_v30, %v7469_v34  ;;  %v9916_v46 = vsel %vm8684_vm4, %v5581_v50, %v5582_v52  ;;  %v5596_v0 = vrot.slane %v9628_v27, 5  ;;  %v8042_v27 = vld [vmem:[%s8157_s23 + $0x10] sm:$0xff]   ;;  %v7072_v49 = vrot.slane %v5492_v59, 9  ;;  %v5494_v34 = vld [vmem:[#allocation2 + $0x84] sm:$0xe] }
 0x1bb   : > { %v9912_v20 = vsel %vm8684_vm4, %v5574_v29, %v10678_v6  ;;  %v1904_v57 = vpop.f32.mrf.mxu0  ;;  %v9920_v16 = vpop.f32.mrf.mxu1  ;;  %v7101_v30 = vcombine.low %v9899_v24, %v9916_v46  ;;  %v9926_v55 = vsel %vm8684_vm4, %v7070_v21, %v5586_v10  ;;  %v5588_v54 = vrot.slane %v5586_v10, 4  ;;  %v5495_v10 = vld [vmem:[#allocation2 + $0x90] sm:$0xe] }
 0x1bc   : > { %v9930_v53 = vsel %vm8684_vm4, %v7071_v41, %v5593_v48  ;;  %v9933_v4 = vadd.f32 %v9853_v18, %v1904_v57  ;;  %v5595_v38 = vrot.slane %v5593_v48, 4  ;;  %v5600_v52 = vrot.slane %v9645_v37, 5 }
 0x1bd   : > { %v9937_v39 = vpop.f32.mrf.mxu0  ;;  %v9939_v5 = vpop.f32.mrf.mxu1  ;;  %v10680_v25 = vrot.slane %v9586_v26, 5  ;;  %v7073_v21 = vrot.slane %v5493_v45, 9  ;;  %v5607_v18 = vrot.slane %v9679_v32, 5  ;;  %v5610_v50 = vrot.slane %v9692_v12, 5 }
 0x1be   : > { %10679 = vst [vmem:[#allocation38_spill] sm:$0xff] %v9933_v4  ;;  %v9957_v26 = vsel %vm8684_vm4, %v7072_v49, %v5600_v52  ;;  %7871 = vmatmul.mubr.bf16.vlgmr.msra.gmra.mxu1 %v8041_v1  ;;  %v5602_v12 = vrot.slane %v5600_v52, 4  ;;  %v7100_v6 = vcombine.low %v9895_v8, %v9912_v20  ;;  %v5614_v45 = vrot.slane %v9709_v43, 5  ;;  %v5496_v43 = vld [vmem:[#allocation2 + $0x9c] sm:$0xe] }
 0x1bf   : > { %7823 = vmatmul.mubr.bf16.vlgmr.msra.gmra.mxu0 %v7098_v63  ;;  %v9945_v29 = vsel %vm8684_vm4, %v5588_v54, %v10680_v25  ;;  %v9953_v63 = vsel %vm8684_vm4, %v5595_v38, %v5596_v0  ;;  %v2547_v41 = vpop.f32.mrf.mxu0  ;;  %v9959_v48 = vpop.f32.mrf.mxu1  ;;  %v5609_v59 = vrot.slane %v5607_v18, 4  ;;  %7874 = vmatprep.mubr.bf16.mxu1 %v8042_v27  ;;  %v7074_v0 = vrot.slane %v5494_v34, 9  ;;  %v8043_v52 = vld [vmem:[%s8157_s23 + $0x18] sm:$0xff]  }
 0x1c0   : > { %7826 = vmatprep.mubr.bf16.mxu0 %v7099_v62  ;;  %v9965_v62 = vsel %vm8684_vm4, %v7073_v21, %v5607_v18  ;;  %v5617_v57 = vrot.slane %v9714_v44, 5  ;;  %v9977_v38 = vsel %vm8684_vm4, %v5602_v12, %v5603_v56  ;;  %v7075_v8 = vrot.slane %v5495_v10, 9  ;;  %v8044_v12 = vld [vmem:[%s8157_s23 + $0x20] sm:$0xff]   ;;  %v10681_v49 = vld [vmem:[#allocation3_spill] sm:$0xff] }
 0x1c1   : > { %v7537_v1 = vpop.f32.mrf.mxu0  ;;  %v9971_v54 = vpop.f32.mrf.mxu1  ;;  %v9981_v27 = vsel %vm8684_vm4, %v5609_v59, %v5610_v50  ;;  %v5621_v20 = vrot.slane %v9741_v47, 5  ;;  %v9990_v11 = vsel %vm8684_vm4, %v7074_v0, %v5614_v45  ;;  %v5616_v21 = vrot.slane %v5614_v45, 4 }
 0x1c2   : > { %v5624_v50 = vrot.slane %v9753_v7, 5  ;;  %v2103_v34 = vadd.f32 %v9242_v40, %v9245_v17  ;;  %v2119_v10 = vadd.f32 %v9354_v13, %v9364_v36  ;;  %v7076_v59 = vrot.slane %v5496_v43, 9  ;;  %v5498_v13 = vld [vmem:[#allocation2 + $0xb4] sm:$0xe]  ;;  %v10682_v36 = vld [vmem:[#allocation9_spill] sm:$0xff] }
 0x1c3   : > { %v2550_v56 = vpop.f32.mrf.mxu0  ;;  %v9993_v25 = vpop.f32.mrf.mxu1  ;;  %v9997_v18 = vsel %vm8684_vm4, %v7075_v8, %v5621_v20  ;;  %v5623_v47 = vrot.slane %v5621_v20, 4  ;;  %v5628_v0 = vrot.slane %v9762_v61, 5  ;;  %v2095_v45 = vadd.f32 %v10681_v49, %v9284_v51  ;;  %v10683_v61 = vld [vmem:[#allocation8_spill] sm:$0xff]  ;;  %v5500_v51 = vld [vmem:[#allocation2 + $0xcc] sm:$0xe] }
 0x1c4   : > { %v10012_v7 = vsel %vm8684_vm4, %v5616_v21, %v5617_v57  ;;  %v5631_v17 = vrot.slane %v9767_v31, 5  ;;  %v2111_v20 = vadd.f32 %v10683_v61, %v10682_v36  ;;  %v10684_v57 = vld [vmem:[#allocation5_spill] sm:$0xff]  ;;  %v10685_v49 = vld [vmem:[#allocation4_spill] sm:$0xff]  ;;  %v10687_v31 = vld [vmem:[#allocation6_spill] sm:$0xff]  ;;  %v7080_v37 = vrot.slane %v5500_v51, 9 }
 0x1c5   : > { %v7540_v44 = vpop.f32.mrf.mxu0  ;;  %v10008_v8 = vpop.f32.mrf.mxu1  ;;  %v10016_v40 = vsel %vm8684_vm4, %v5623_v47, %v5624_v50  ;;  %v2106_v21 = vadd.f32 %v10685_v49, %v10684_v57  ;;  %v10686_v47 = vld [vmem:[#allocation7_spill] sm:$0xff]  ;;  %v10036_v24 = vsel %vm8684_vm4, %v7076_v59, %v5628_v0  ;;  %v5630_v46 = vrot.slane %v5628_v0, 4  ;;  %v10693_v51 = vld [vmem:[#allocation18_spill] sm:$0xff] }
 0x1c6   : > { %v2680_v43 = vadd.f32 %v7540_v44, %v2119_v10  ;;  %v2098_v50 = vadd.f32 %v10687_v31, %v10686_v47  ;;  %7875 = vmatmul.mubr.bf16.gmra.mxu1 %v8043_v52  ;;  %v10689_v44 = vld [vmem:[#allocation10_spill] sm:$0xff]  ;;  %v5642_v57 = vrot.slane %v9799_v15, 5  ;;  %v2676_v49 = vadd.f32 %v9937_v39, %v2103_v34  ;;  %v8045_v34 = vld [vmem:[%s8157_s23 + $0x28] sm:$0xff]  }
 0x1c7   : > { %7827 = vmatmul.mubr.bf16.gmra.mxu0 %v7100_v6  ;;  %v2563_v32 = vpop.f32.mrf.mxu0  ;;  %v10032_v36 = vpop.f32.mrf.mxu1  ;;  %7878 = vmatprep.mubr.bf16.mxu1 %v8044_v12  ;;  %v7078_v6 = vrot.slane %v5498_v13, 9  ;;  %v2674_v52 = vadd.f32 %v2547_v41, %v2095_v45  ;;  %v10044_v59 = vsel %vm8684_vm4, %v5630_v46, %v5631_v17  ;;  %v5645_v0 = vrot.slane %v9805_v42, 5  ;;  %v8046_v42 = vld [vmem:[%s8157_s23 + $0x30] sm:$0xff]  }
 0x1c8   : > { %7830 = vmatprep.mubr.bf16.mxu0 %v7101_v30  ;;  %v10688_v30 = vld [vmem:[#allocation11_spill] sm:$0xff]  ;;  %v2678_v61 = vadd.f32 %v2563_v32, %v2111_v20  ;;  %v10691_v32 = vld [vmem:[#allocation12_spill] sm:$0xff]  ;;  %v7108_v15 = vcombine.low %v10036_v24, %v10044_v59  ;;  %v2677_v13 = vadd.f32 %v7537_v1, %v2106_v21  ;;  %v2675_v39 = vadd.f32 %v2550_v56, %v2098_v50 }
 0x1c9   : > { %v2122_v10 = vadd.f32 %v10689_v44, %v10688_v30  ;;  %v7541_v47 = vpop.f32.mrf.mxu0  ;;  %v2968_v31 = vpop.f32.mrf.mxu1  ;;  %v10690_v30 = vld [vmem:[#allocation13_spill] sm:$0xff]  ;;  %v10054_v44 = vsel %vm8684_vm4, %v7078_v6, %v5642_v57  ;;  %v5644_v17 = vrot.slane %v5642_v57, 4  ;;  %v5656_v4 = vrot.slane %v9831_v58, 5 }
 0x1ca   : > { %v2114_v12 = vadd.f32 %v10691_v32, %v10690_v30  ;;  %v5659_v21 = vrot.slane %v9836_v35, 5  ;;  %v10067_v6 = vadd.f32 %v9862_v2, %v2676_v49  ;;  %v10070_v50 = vadd.f32 %v9877_v60, %v2674_v52 }
 0x1cb   : > { %v2681_v20 = vadd.f32 %v7541_v47, %v2122_v10  ;;  %v2566_v41 = vpop.f32.mrf.mxu0  ;;  %v7596_v45 = vpop.f32.mrf.mxu1  ;;  %v10692_v10 = vcombine.low %v9926_v55, %v9945_v29  ;;  %v10063_v56 = vsel %vm8684_vm4, %v5644_v17, %v5645_v0  ;;  %v10694_v57 = vcombine.low %v9930_v53, %v9953_v63  ;;  %v10695_v63 = vld [vmem:[#allocation19_spill] sm:$0xff]  ;;  %v8048_v17 = vld [vmem:[%s8157_s23 + $0x40] sm:$0xff]  }
 0x1cc   : > { %v2679_v46 = vadd.f32 %v2566_v41, %v2114_v12  ;;  %v7110_v55 = vcombine.low %v10054_v44, %v10063_v56  ;;  %v10080_v29 = vsel %vm8684_vm4, %v7080_v37, %v5656_v4  ;;  %v5658_v49 = vrot.slane %v5656_v4, 4  ;;  %v10697_v12 = vld [vmem:[#allocation14_spill] sm:$0xff] }
 0x1cd   : > { %v7544_v30 = vpop.f32.mrf.mxu0  ;;  %v2981_v1 = vpop.f32.mrf.mxu1  ;;  %v10083_v60 = vadd.f32 %v9886_v33, %v2677_v13  ;;  %v10086_v52 = vadd.f32 %v9901_v14, %v2675_v39  ;;  %v10089_v53 = vadd.f32 %v9920_v16, %v2680_v43  ;;  %v10093_v37 = vadd.f32 %v9939_v5, %v2678_v61  ;;  %v10696_v43 = vld [vmem:[#allocation15_spill] sm:$0xff]  ;;  %v10698_v5 = vld [vmem:[#allocation20_spill] sm:$0xff] }
 0x1ce   : > { %v2684_v58 = vadd.f32 %v7544_v30, %v10693_v51  ;;  %7879 = vmatmul.mubr.bf16.gmra.mxu1 %v8045_v34  ;;  %v10096_v0 = vadd.f32 %v9959_v48, %v2681_v20  ;;  %v10099_v33 = vadd.f32 %v9971_v54, %v2679_v46  ;;  %v10103_v32 = vsel %vm8684_vm4, %v5658_v49, %v5659_v21  ;;  %v8047_v39 = vld [vmem:[%s8157_s23 + $0x38] sm:$0xff]   ;;  %v10703_v49 = vld [vmem:[#allocation22_spill] sm:$0xff] }
 0x1cf   : > { %7831 = vmatmul.mubr.bf16.gmra.mxu0 %v10692_v10  ;;  %v2579_v35 = vpop.f32.mrf.mxu0  ;;  %v7597_v2 = vpop.f32.mrf.mxu1  ;;  %7882 = vmatprep.mubr.bf16.mxu1 %v8046_v42  ;;  %v2130_v13 = vadd.f32 %v10697_v12, %v10696_v43  ;;  %v7112_v48 = vcombine.low %v10080_v29, %v10103_v32  ;;  %v10699_v42 = vcombine.low %v9957_v26, %v9977_v38  ;;  %v10700_v10 = vld [vmem:[#allocation21_spill] sm:$0xff]  ;;  %v10706_v12 = vld [vmem:[#allocation23_spill] sm:$0xff] }
 0x1d0   : > { %7834 = vmatprep.mubr.bf16.mxu0 %v10694_v57  ;;  %v2682_v47 = vadd.f32 %v2579_v35, %v10695_v63  ;;  %v10106_v16 = vadd.f32 %v9993_v25, %v2684_v58  ;;  %v5497_v26 = vld [vmem:[#allocation2 + $0xa8] sm:$0xe] }
 0x1d1   : > { %v7545_v4 = vpop.f32.mrf.mxu0  ;;  %v2984_v14 = vpop.f32.mrf.mxu1  ;;  %v10704_v43 = vld [vmem:[#allocation17_spill] sm:$0xff] }
 0x1d2   : > { %v2685_v61 = vadd.f32 %v7545_v4, %v10698_v5  ;;  %v10114_v54 = vadd.f32 %v10008_v8, %v2682_v47  ;;  %v10701_v8 = vcombine.low %v9965_v62, %v9981_v27  ;;  %v10705_v62 = vld [vmem:[#allocation16_spill] sm:$0xff] }
 0x1d3   : > { %v2582_v20 = vpop.f32.mrf.mxu0  ;;  %v7600_v41 = vpop.f32.mrf.mxu1  ;;  %v2146_v27 = vadd.f32 %v10705_v62, %v10704_v43  ;;  %v10711_v43 = vld [vmem:[#allocation25_spill] sm:$0xff] }
 0x1d4   : > { %v2683_v34 = vadd.f32 %v2582_v20, %v2130_v13  ;;  %v10119_v46 = vadd.f32 %v10032_v36, %v2685_v61  ;;  %v10702_v36 = vld [vmem:[#allocation30_spill] sm:$0xff]  ;;  %v8049_v61 = vld [vmem:[%s8157_s23 + $0x48] sm:$0xff]  }
 0x1d5   : > { %v7548_v25 = vpop.f32.mrf.mxu0  ;;  %v2997_v30 = vpop.f32.mrf.mxu1  ;;  %v5635_v35 = vrot.slane %v10702_v36, 5  ;;  %v10709_v36 = vld [vmem:[#allocation24_spill] sm:$0xff] }
 0x1d6   : > { %v2688_v21 = vadd.f32 %v7548_v25, %v10700_v10  ;;  %v10128_v51 = vadd.f32 %v2968_v31, %v2683_v34  ;;  %7883 = vmatmul.mubr.bf16.gmra.mxu1 %v8047_v39  ;;  %v7077_v39 = vrot.slane %v5497_v26, 9  ;;  %v10707_v25 = vld [vmem:[#allocation32_spill] sm:$0xff]  ;;  %v8050_v10 = vld [vmem:[%s8157_s23 + $0x50] sm:$0xff]  }
 0x1d7   : > { %7835 = vmatmul.mubr.bf16.gmra.mxu0 %v10699_v42  ;;  %v2595_v58 = vpop.f32.mrf.mxu0  ;;  %v7601_v57 = vpop.f32.mrf.mxu1  ;;  %7886 = vmatprep.mubr.bf16.mxu1 %v8048_v17  ;;  %v5637_v34 = vrot.slane %v5635_v35, 4  ;;  %v5638_v42 = vrot.slane %v10707_v25, 5 }
 0x1d8   : > { %7838 = vmatprep.mubr.bf16.mxu0 %v10701_v8  ;;  %v2686_v63 = vadd.f32 %v2595_v58, %v10703_v49  ;;  %v10132_v38 = vadd.f32 %v7596_v45, %v2688_v21  ;;  %v10708_v8 = vcombine.low %v9990_v11, %v10012_v7  ;;  %v10710_v49 = vcombine.low %v9997_v18, %v10016_v40  ;;  %v5499_v18 = vld [vmem:[#allocation2 + $0xc0] sm:$0xe] }
 0x1d9   : > { %v7549_v47 = vpop.f32.mrf.mxu0  ;;  %v3000_v4 = vpop.f32.mrf.mxu1  ;;  %v5639_v11 = vsel %vm8684_vm4, %v5637_v34, %v5638_v42  ;;  %v5649_v7 = vrot.slane %v9819_v3, 5  ;;  %v7079_v34 = vrot.slane %v5499_v18, 9  ;;  %v5652_v3 = vrot.slane %v9825_v22, 5 }
 0x1da   : > { %v2689_v31 = vadd.f32 %v7549_v47, %v10706_v12  ;;  %v10137_v13 = vadd.f32 %v2981_v1, %v2686_v63  ;;  %v10712_v12 = vld [vmem:[#allocation26_spill] sm:$0xff] }
 0x1db   : > { %v2598_v5 = vpop.f32.mrf.mxu0  ;;  %v7604_v20 = vpop.f32.mrf.mxu1  ;;  %v5651_v42 = vrot.slane %v5649_v7, 4 }
 0x1dc   : > { %v2687_v17 = vadd.f32 %v2598_v5, %v2146_v27  ;;  %v10142_v45 = vadd.f32 %v7597_v2, %v2689_v31  ;;  %v5636_v2 = vsel %vm8684_vm4, %v7077_v39, %v5635_v35  ;;  %v8051_v39 = vld [vmem:[%s8157_s23 + $0x58] sm:$0xff]  }
 0x1dd   : > { %v7552_v21 = vpop.f32.mrf.mxu0  ;;  %v3013_v58 = vpop.f32.mrf.mxu1  ;;  %v7109_v5 = vcombine.low %v5636_v2, %v5639_v11  ;;  %v5653_v2 = vsel %vm8684_vm4, %v5651_v42, %v5652_v3  ;;  %v10715_v11 = vld [vmem:[#allocation29_spill] sm:$0xff]  ;;  %v10718_v42 = vld [vmem:[#allocation34_spill] sm:$0xff] }
 0x1de   : > { %v2692_v1 = vadd.f32 %v7552_v21, %v10709_v36  ;;  %v10151_v63 = vadd.f32 %v2984_v14, %v2687_v17  ;;  %7887 = vmatmul.mubr.bf16.gmra.mxu1 %v8049_v61  ;;  %v10713_v17 = vld [vmem:[#allocation27_spill] sm:$0xff] }
 0x1df   : > { %7839 = vmatmul.mubr.bf16.gmra.mxu0 %v10708_v8  ;;  %v2611_v26 = vpop.f32.mrf.mxu0  ;;  %v7605_v47 = vpop.f32.mrf.mxu1  ;;  %7890 = vmatprep.mubr.bf16.mxu1 %v8050_v10  ;;  %v8052_v10 = vld [vmem:[%s8157_s23 + $0x60] sm:$0xff]  }
 0x1e0   : > { %7842 = vmatprep.mubr.bf16.mxu0 %v10710_v49  ;;  %v2690_v62 = vadd.f32 %v2611_v26, %v10711_v43  ;;  %v10159_v40 = vadd.f32 %v7600_v41, %v2692_v1 }
 0x1e1   : > { %v7553_v14 = vpop.f32.mrf.mxu0  ;;  %v3016_v27 = vpop.f32.mrf.mxu1 }
 0x1e2   : > { %v2693_v31 = vadd.f32 %v7553_v14, %v10712_v12  ;;  %v10162_v61 = vadd.f32 %v2997_v30, %v2690_v62  ;;  %v10714_v30 = vld [vmem:[#allocation28_spill] sm:$0xff]  ;;  %v10716_v62 = vld [vmem:[#allocation31_spill] sm:$0xff] }
 0x1e3   : > { %v2614_v35 = vpop.f32.mrf.mxu0  ;;  %v7608_v25 = vpop.f32.mrf.mxu1 }
 0x1e4   : > { %v2691_v21 = vadd.f32 %v2614_v35, %v10713_v17  ;;  %v10168_v8 = vadd.f32 %v7601_v57, %v2693_v31  ;;  %v5650_v57 = vsel %vm8684_vm4, %v7079_v34, %v5649_v7  ;;  %v8053_v31 = vld [vmem:[%s8157_s23 + $0x68] sm:$0xff]  }
 0x1e5   : > { %v3029_v36 = vpop.f32.mrf.mxu1  ;;  %v7111_v18 = vcombine.low %v5650_v57, %v5653_v2  ;;  %v10717_v35 = vld [vmem:[#allocation33_spill] sm:$0xff]  ;;  %v8055_v57 = vld [vmem:[%s8157_s23 + $0x78] sm:$0xff]  }
 0x1e6   : > { %v7556_v41 = vpop.f32.mrf.mxu0  ;;  %v10174_v49 = vadd.f32 %v3000_v4, %v2691_v21  ;;  %7891 = vmatmul.mubr.bf16.gmra.mxu1 %v8051_v39  ;;  %v8054_v39 = vld [vmem:[%s8157_s23 + $0x70] sm:$0xff]  }
 0x1e7   : > { %7843 = vmatmul.mubr.bf16.gmra.mxu0 %v7108_v15  ;;  %v2696_v1 = vadd.f32 %v7556_v41, %v10714_v30  ;;  %v7609_v22 = vpop.f32.mrf.mxu1  ;;  %7894 = vmatprep.mubr.bf16.mxu1 %v8052_v10  ;;  %v10719_v10 = vld [vmem:[#allocation35_spill] sm:$0xff] }
 0x1e8   : > { %7846 = vmatprep.mubr.bf16.mxu0 %v7109_v5  ;;  %v2627_v26 = vpop.f32.mrf.mxu0 }
 0x1e9   : > { %v2694_v24 = vadd.f32 %v2627_v26, %v10715_v11  ;;  %v10181_v59 = vadd.f32 %v7604_v20, %v2696_v1  ;;  %v3032_v43 = vpop.f32.mrf.mxu1  ;;  %v10720_v26 = vld [vmem:[#allocation36_spill] sm:$0xff]  ;;  %v10721_v11 = vld [vmem:[#allocation37_spill] sm:$0xff] }
 0x1ea   : > { %v7557_v15 = vpop.f32.mrf.mxu0 }
 0x1eb   : > { %v2697_v4 = vadd.f32 %v7557_v15, %v10716_v62  ;;  %v10184_v14 = vadd.f32 %v3013_v58, %v2694_v24  ;;  %v7612_v5 = vpop.f32.mrf.mxu1 }
 0x1ec   : > { %v2630_v12 = vpop.f32.mrf.mxu0 }
 0x1ed   : > { %v2695_v7 = vadd.f32 %v2630_v12, %v10717_v35  ;;  %v10189_v23 = vadd.f32 %v7605_v47, %v2697_v4  ;;  %v3045_v20 = vpop.f32.mrf.mxu1 }
 0x1ee   : > { %v7560_v34 = vpop.f32.mrf.mxu0  ;;  %7895 = vmatmul.mubr.bf16.gmra.mxu1 %v8053_v31 }
 0x1ef   : > { %7847 = vmatmul.mubr.bf16.gmra.mxu0 %v7110_v55  ;;  %v2700_v3 = vadd.f32 %v7560_v34, %v10718_v42  ;;  %v10195_v58 = vadd.f32 %v3016_v27, %v2695_v7  ;;  %v7613_v21 = vpop.f32.mrf.mxu1  ;;  %7898 = vmatprep.mubr.bf16.mxu1 %v8054_v39 }
 0x1f0   : > { %7850 = vmatprep.mubr.bf16.mxu0 %v7111_v18  ;;  %v2643_v17 = vpop.f32.mrf.mxu0 }
 0x1f1   : > { %v2698_v41 = vadd.f32 %v2643_v17, %v10719_v10  ;;  %v10198_v47 = vadd.f32 %v7608_v25, %v2700_v3  ;;  %v3048_v1 = vpop.f32.mrf.mxu1 }
 0x1f2   : > { %v7561_v30 = vpop.f32.mrf.mxu0 }
 0x1f3   : > { %v2701_v44 = vadd.f32 %v7561_v30, %v10720_v26  ;;  %v10201_v56 = vadd.f32 %v3029_v36, %v2698_v41  ;;  %v7680_v2 = vpop.f32.mrf.mxu1 }
 0x1f4   : > { %v2646_v55 = vpop.f32.mrf.mxu0 }
 0x1f5   : > { %v2699_v27 = vadd.f32 %v2646_v55, %v10721_v11  ;;  %v10205_v24 = vadd.f32 %v7609_v22, %v2701_v44  ;;  %v4185_v25 = vpop.f32.mrf.mxu1 }
 0x1f6   : > { %7899 = vmatmul.mubr.bf16.gmra.mxu1 %v8055_v57 }
 0x1f7   : > { %v7564_v15 = vpop.f32.mrf.mxu0  ;;  %7851 = vmatmul.mubr.bf16.gmra.mxu0 %v7112_v48  ;;  %v10211_v4 = vadd.f32 %v3032_v43, %v2699_v27  ;;  %v7681_v18 = vpop.f32.mrf.mxu1  ;;  %v10722_v48 = vld [vmem:[#allocation38_spill] sm:$0xff] }
 0x1f8   : > { %v2704_v62 = vadd.f32 %v7564_v15, %v9881_v28 }
 0x1f9   : > { %v2659_v36 = vpop.f32.mrf.mxu0  ;;  %v4188_v22 = vpop.f32.mrf.mxu1 }
 0x1fa   : > { %v2702_v12 = vadd.f32 %v2659_v36, %v9891_v19  ;;  %v10214_v31 = vadd.f32 %v7612_v5, %v2704_v62 }
 0x1fb   : > { %v7565_v35 = vpop.f32.mrf.mxu0  ;;  %v7684_v32 = vpop.f32.mrf.mxu1 }
 0x1fc   : > { %v2705_v7 = vadd.f32 %v7565_v35, %v9906_v9  ;;  %v10217_v39 = vadd.f32 %v3045_v20, %v2702_v12 }
 0x1fd   : > { %v2662_v29 = vpop.f32.mrf.mxu0  ;;  %v4201_v42 = vpop.f32.mrf.mxu1 }
 0x1fe   : > { %v2703_v34 = vadd.f32 %v2662_v29, %v10722_v48  ;;  %v10220_v28 = vadd.f32 %v7613_v21, %v2705_v7 }
 0x1ff   : > { %v7632_v43 = vpop.f32.mrf.mxu0  ;;  %v7685_v5 = vpop.f32.mrf.mxu1 }
 0x200   : > { %v3816_v3 = vadd.f32 %v7632_v43, %v10067_v6  ;;  %v10223_v17 = vadd.f32 %v3048_v1, %v2703_v34 }
 0x201   : > { %v3687_v19 = vpop.f32.mrf.mxu0  ;;  %v4204_v20 = vpop.f32.mrf.mxu1 }
 0x202   : > { %v3814_v10 = vadd.f32 %v3687_v19, %v10070_v50  ;;  %v10226_v41 = vadd.f32 %v7680_v2, %v3816_v3 }
 0x203   : > { %v7633_v9 = vpop.f32.mrf.mxu0  ;;  %v7688_v44 = vpop.f32.mrf.mxu1 }
 0x204   : > { %v3817_v30 = vadd.f32 %v7633_v9, %v10083_v60  ;;  %v10229_v26 = vadd.f32 %v4185_v25, %v3814_v10 }
 0x205   : > { %v3690_v21 = vpop.f32.mrf.mxu0  ;;  %v4217_v1 = vpop.f32.mrf.mxu1 }
 0x206   : > { %v3815_v55 = vadd.f32 %v3690_v21, %v10086_v52  ;;  %v10232_v57 = vadd.f32 %v7681_v18, %v3817_v30 }
 0x207   : > { %v7636_v6 = vpop.f32.mrf.mxu0  ;;  %v7689_v2 = vpop.f32.mrf.mxu1 }
 0x208   : > { %v3820_v11 = vadd.f32 %v7636_v6, %v10089_v53  ;;  %v10235_v27 = vadd.f32 %v4188_v22, %v3815_v55 }
 0x209   : > { %v3703_v50 = vpop.f32.mrf.mxu0  ;;  %v4220_v25 = vpop.f32.mrf.mxu1 }
 0x20a   : > { %v3818_v15 = vadd.f32 %v3703_v50, %v10093_v37  ;;  %v10238_v62 = vadd.f32 %v7684_v32, %v3820_v11 }
 0x20b   : > { %v7637_v60 = vpop.f32.mrf.mxu0  ;;  %v7692_v18 = vpop.f32.mrf.mxu1 }
 0x20c   : > { %v3821_v36 = vadd.f32 %v7637_v60, %v10096_v0  ;;  %v10241_v12 = vadd.f32 %v4201_v42, %v3818_v15 }
 0x20d   : > { %v3706_v52 = vpop.f32.mrf.mxu0  ;;  %v4233_v22 = vpop.f32.mrf.mxu1 }
 0x20e   : > { %v3819_v35 = vadd.f32 %v3706_v52, %v10099_v33  ;;  %v10244_v7 = vadd.f32 %v7685_v5, %v3821_v36 }
 0x20f   : > { %v7640_v53 = vpop.f32.mrf.mxu0  ;;  %v7693_v32 = vpop.f32.mrf.mxu1 }
 0x210   : > { %v3824_v29 = vadd.f32 %v7640_v53, %v10106_v16  ;;  %v10247_v48 = vadd.f32 %v4204_v20, %v3819_v35 }
 0x211   : > { %v3719_v37 = vpop.f32.mrf.mxu0  ;;  %v4236_v42 = vpop.f32.mrf.mxu1 }
 0x212   : > { %v3822_v34 = vadd.f32 %v3719_v37, %v10114_v54  ;;  %v10250_v43 = vadd.f32 %v7688_v44, %v3824_v29 }
 0x213   : > { %v7641_v0 = vpop.f32.mrf.mxu0  ;;  %v7696_v5 = vpop.f32.mrf.mxu1 }
 0x214   : > { %v3825_v3 = vadd.f32 %v7641_v0, %v10119_v46  ;;  %v10253_v19 = vadd.f32 %v4217_v1, %v3822_v34 }
 0x215   : > { %v3722_v33 = vpop.f32.mrf.mxu0  ;;  %v4249_v20 = vpop.f32.mrf.mxu1 }
 0x216   : > { %v3823_v10 = vadd.f32 %v3722_v33, %v10128_v51  ;;  %v10256_v9 = vadd.f32 %v7689_v2, %v3825_v3 }
 0x217   : > { %v7644_v16 = vpop.f32.mrf.mxu0  ;;  %v7697_v44 = vpop.f32.mrf.mxu1 }
 0x218   : > { %v3828_v30 = vadd.f32 %v7644_v16, %v10132_v38  ;;  %v10259_v21 = vadd.f32 %v4220_v25, %v3823_v10 }
 0x219   : > { %v3735_v54 = vpop.f32.mrf.mxu0  ;;  %v4252_v1 = vpop.f32.mrf.mxu1 }
 0x21a   : > { %v3826_v55 = vadd.f32 %v3735_v54, %v10137_v13  ;;  %v10262_v6 = vadd.f32 %v7692_v18, %v3828_v30 }
 0x21b   : > { %v7645_v46 = vpop.f32.mrf.mxu0  ;;  %v7700_v2 = vpop.f32.mrf.mxu1 }
 0x21c   : > { %v3829_v11 = vadd.f32 %v7645_v46, %v10142_v45  ;;  %v10265_v50 = vadd.f32 %v4233_v22, %v3826_v55 }
 0x21d   : > { %v3738_v51 = vpop.f32.mrf.mxu0  ;;  %v4265_v25 = vpop.f32.mrf.mxu1 }
 0x21e   : > { %v3827_v15 = vadd.f32 %v3738_v51, %v10151_v63  ;;  %v10268_v60 = vadd.f32 %v7693_v32, %v3829_v11 }
 0x21f   : > { %v7648_v38 = vpop.f32.mrf.mxu0  ;;  %v7701_v18 = vpop.f32.mrf.mxu1 }
 0x220   : > { %v3832_v36 = vadd.f32 %v7648_v38, %v10159_v40  ;;  %v10271_v52 = vadd.f32 %v4236_v42, %v3827_v15 }
 0x221   : > { %v3751_v13 = vpop.f32.mrf.mxu0  ;;  %v4268_v22 = vpop.f32.mrf.mxu1 }
 0x222   : > { %v3830_v35 = vadd.f32 %v3751_v13, %v10162_v61  ;;  %v10274_v53 = vadd.f32 %v7696_v5, %v3832_v36 }
 0x223   : > { %v7649_v45 = vpop.f32.mrf.mxu0  ;;  %v7704_v32 = vpop.f32.mrf.mxu1 }
 0x224   : > { %v3833_v29 = vadd.f32 %v7649_v45, %v10168_v8  ;;  %v10277_v37 = vadd.f32 %v4249_v20, %v3830_v35 }
 0x225   : > { %v3754_v63 = vpop.f32.mrf.mxu0  ;;  %v4281_v42 = vpop.f32.mrf.mxu1 }
 0x226   : > { %v3831_v34 = vadd.f32 %v3754_v63, %v10174_v49  ;;  %v10280_v0 = vadd.f32 %v7697_v44, %v3833_v29 }
 0x227   : > { %v7652_v40 = vpop.f32.mrf.mxu0  ;;  %v7705_v5 = vpop.f32.mrf.mxu1 }
 0x228   : > { %v3836_v3 = vadd.f32 %v7652_v40, %v10181_v59  ;;  %v10283_v33 = vadd.f32 %v4252_v1, %v3831_v34 }
 0x229   : > { %v3767_v61 = vpop.f32.mrf.mxu0  ;;  %v4284_v20 = vpop.f32.mrf.mxu1 }
 0x22a   : > { %10723 = vst [vmem:[#allocation3_spill] sm:$0xff] %v10283_v33  ;;  %v3834_v10 = vadd.f32 %v3767_v61, %v10184_v14  ;;  %v10286_v16 = vadd.f32 %v7700_v2, %v3836_v3 }
 0x22b   : > { %v7653_v8 = vpop.f32.mrf.mxu0  ;;  %v7708_v44 = vpop.f32.mrf.mxu1 }
 0x22c   : > { %10724 = vst [vmem:[#allocation9_spill] sm:$0xff] %v10286_v16  ;;  %v3837_v30 = vadd.f32 %v7653_v8, %v10189_v23  ;;  %v10289_v54 = vadd.f32 %v4265_v25, %v3834_v10 }
 0x22d   : > { %v3770_v49 = vpop.f32.mrf.mxu0  ;;  %v4297_v1 = vpop.f32.mrf.mxu1 }
 0x22e   : > { %10725 = vst [vmem:[#allocation8_spill] sm:$0xff] %v10289_v54  ;;  %v3835_v55 = vadd.f32 %v3770_v49, %v10195_v58  ;;  %v10292_v46 = vadd.f32 %v7701_v18, %v3837_v30 }
 0x22f   : > { %v7656_v59 = vpop.f32.mrf.mxu0  ;;  %v7709_v2 = vpop.f32.mrf.mxu1 }
 0x230   : > { %10726 = vst [vmem:[#allocation5_spill] sm:$0xff] %v10292_v46  ;;  %v3840_v11 = vadd.f32 %v7656_v59, %v10198_v47  ;;  %v10295_v51 = vadd.f32 %v4268_v22, %v3835_v55 }
 0x231   : > { %v3783_v14 = vpop.f32.mrf.mxu0  ;;  %v4300_v25 = vpop.f32.mrf.mxu1 }
 0x232   : > { %10727 = vst [vmem:[#allocation4_spill] sm:$0xff] %v10295_v51  ;;  %v3838_v15 = vadd.f32 %v3783_v14, %v10201_v56  ;;  %v10298_v38 = vadd.f32 %v7704_v32, %v3840_v11 }
 0x233   : > { %v7657_v23 = vpop.f32.mrf.mxu0 }
 0x234   : > { %10728 = vst [vmem:[#allocation7_spill] sm:$0xff] %v10298_v38  ;;  %v3841_v36 = vadd.f32 %v7657_v23, %v10205_v24  ;;  %v10301_v13 = vadd.f32 %v4281_v42, %v3838_v15  ;;  %v10304_v35 = vpop.f32.mrf.mxu1 }
 0x235   : > { %v3786_v58 = vpop.f32.mrf.mxu0 }
 0x236   : > { %10729 = vst [vmem:[#allocation6_spill] sm:$0xff] %v10301_v13  ;;  %v3839_v18 = vadd.f32 %v3786_v58, %v10211_v4  ;;  %v10306_v47 = vadd.f32 %v7705_v5, %v3841_v36  ;;  %v10309_v29 = vpop.f32.mrf.mxu1 }
 0x237   : > { %v7660_v45 = vpop.f32.mrf.mxu0 }
 0x238   : > { %10730 = vst [vmem:[#allocation11_spill] sm:$0xff] %v10306_v47  ;;  %v3844_v22 = vadd.f32 %v7660_v45, %v10214_v31  ;;  %v10311_v56 = vadd.f32 %v4284_v20, %v3839_v18  ;;  %v10314_v24 = vpop.f32.mrf.mxu1 }
 0x239   : > { %v3799_v63 = vpop.f32.mrf.mxu0 }
 0x23a   : > { %10731 = vst [vmem:[#allocation10_spill] sm:$0xff] %v10311_v56  ;;  %v3842_v32 = vadd.f32 %v3799_v63, %v10217_v39  ;;  %v10316_v34 = vadd.f32 %v7708_v44, %v3844_v22  ;;  %v10321_v61 = vpop.f32.mrf.mxu1 }
 0x23b   : > { %v7661_v40 = vpop.f32.mrf.mxu0 }
 0x23c   : > { %10732 = vst [vmem:[#allocation13_spill] sm:$0xff] %v10316_v34  ;;  %v3845_v4 = vadd.f32 %v7661_v40, %v10220_v28  ;;  %v10319_v42 = vadd.f32 %v4297_v1, %v3842_v32 }
 0x23d   : > { %v3802_v3 = vpop.f32.mrf.mxu0 }
 0x23e   : > { %10733 = vst [vmem:[#allocation12_spill] sm:$0xff] %v10319_v42  ;;  %v3843_v31 = vadd.f32 %v3802_v3, %v10223_v17  ;;  %v10324_v5 = vadd.f32 %v7709_v2, %v3845_v4  ;;  %v10328_v20 = vpop.f32.mrf.mxu1 }
 0x23f   : > { %v7728_v10 = vpop.f32.mrf.mxu0 }
 0x240   : > { %10734 = vst [vmem:[#allocation18_spill] sm:$0xff] %v10324_v5  ;;  %v10326_v8 = vadd.f32 %v4300_v25, %v3843_v31  ;;  %v10330_v49 = vpop.f32.mrf.mxu1 }
 0x241   : > { %v4572_v39 = vpop.f32.mrf.mxu0 }
 0x242   : > { %10735 = vst [vmem:[#allocation19_spill] sm:$0xff] %v10326_v8  ;;  %v10332_v28 = vpop.f32.mrf.mxu1 }
 0x243   : > { %v7729_v30 = vpop.f32.mrf.mxu0 }
 0x244   : > { %v10334_v59 = vpop.f32.mrf.mxu1 }
 0x245   : > { %v4575_v44 = vpop.f32.mrf.mxu0 }
 0x247   : > { %v7732_v55 = vpop.f32.mrf.mxu0 }
 0x249   : > { %v4588_v1 = vpop.f32.mrf.mxu0  ;;  %v10336_v11 = vpop.f32.mrf.mxu1 }
 0x24b   : > { %v7733_v17 = vpop.f32.mrf.mxu0  ;;  %v10338_v14 = vpop.f32.mrf.mxu1 }
 0x24d   : > { %v4591_v2 = vpop.f32.mrf.mxu0  ;;  %v10340_v15 = vpop.f32.mrf.mxu1 }
 0x24f   : > { %v7736_v23 = vpop.f32.mrf.mxu0  ;;  %v10342_v25 = vpop.f32.mrf.mxu1 }
 0x251   : > { %v4604_v36 = vpop.f32.mrf.mxu0  ;;  %v10344_v18 = vpop.f32.mrf.mxu1 }
 0x253   : > { %v7737_v58 = vpop.f32.mrf.mxu0  ;;  %v10346_v22 = vpop.f32.mrf.mxu1 }
 0x255   : > { %v4607_v45 = vpop.f32.mrf.mxu0  ;;  %v10348_v32 = vpop.f32.mrf.mxu1 }
 0x257   : > { %v7740_v63 = vpop.f32.mrf.mxu0  ;;  %v10350_v4 = vpop.f32.mrf.mxu1 }
 0x259   : > { %v4620_v40 = vpop.f32.mrf.mxu0 }
 0x25a   : > { %v10352_v8 = vpop.f32.mrf.mxu1 }
 0x25b   : > { %v7741_v3 = vpop.f32.mrf.mxu0  ;;  %10736 = vst [vmem:[#allocation15_spill] sm:$0xff] %v10352_v8 }
 0x25c   : > { %v10354_v42 = vpop.f32.mrf.mxu1 }
 0x25d   : > { %v4623_v31 = vpop.f32.mrf.mxu0  ;;  %10737 = vst [vmem:[#allocation14_spill] sm:$0xff] %v10354_v42 }
 0x25e   : > { %v10358_v56 = vpop.f32.mrf.mxu1 }
 0x25f   : > { %v7744_v5 = vpop.f32.mrf.mxu0  ;;  %10738 = vst [vmem:[#allocation20_spill] sm:$0xff] %v10358_v56 }
 0x260   : > { %v10362_v13 = vpop.f32.mrf.mxu1 }
 0x261   : > { %v10356_v34 = vpop.f32.mrf.mxu0  ;;  %10740 = vst [vmem:[#allocation30_spill] sm:$0xff] %v10362_v13 }
 0x263   : > { %v10360_v47 = vpop.f32.mrf.mxu0 }
 0x264   : > { %10739 = vst [vmem:[#allocation21_spill] sm:$0xff] %v10360_v47  ;;  %v10366_v51 = vpop.f32.mrf.mxu1 }
 0x265   : > { %v10364_v38 = vpop.f32.mrf.mxu0  ;;  %10742 = vst [vmem:[#allocation17_spill] sm:$0xff] %v10366_v51 }
 0x266   : > { %10741 = vst [vmem:[#allocation22_spill] sm:$0xff] %v10364_v38  ;;  %v10370_v54 = vpop.f32.mrf.mxu1 }
 0x267   : > { %v10368_v46 = vpop.f32.mrf.mxu0  ;;  %10744 = vst [vmem:[#allocation23_spill] sm:$0xff] %v10370_v54 }
 0x268   : > { %10743 = vst [vmem:[#allocation16_spill] sm:$0xff] %v10368_v46  ;;  %v10374_v33 = vpop.f32.mrf.mxu1 }
 0x269   : > { %v10372_v16 = vpop.f32.mrf.mxu0  ;;  %10746 = vst [vmem:[#allocation24_spill] sm:$0xff] %v10374_v33 }
 0x26a   : > { %10745 = vst [vmem:[#allocation32_spill] sm:$0xff] %v10372_v16  ;;  %v10378_v8 = vpop.f32.mrf.mxu1 }
 0x26b   : > { %v10376_v42 = vpop.f32.mrf.mxu0  ;;  %10748 = vst [vmem:[#allocation26_spill] sm:$0xff] %v10378_v8 }
 0x26c   : > { %10747 = vst [vmem:[#allocation25_spill] sm:$0xff] %v10376_v42  ;;  %v10382_v47 = vpop.f32.mrf.mxu1 }
 0x26d   : > { %v10380_v56 = vpop.f32.mrf.mxu0  ;;  %10750 = vst [vmem:[#allocation28_spill] sm:$0xff] %v10382_v47  ;;  %v4701_v47 = vadd.f32 %v7728_v10, %v10226_v41  ;;  %v4705_v41 = vadd.f32 %v7732_v55, %v10238_v62  ;;  %v4708_v62 = vadd.f32 %v4607_v45, %v10259_v21 }
 0x26e   : > { %10749 = vst [vmem:[#allocation27_spill] sm:$0xff] %v10380_v56  ;;  %v10386_v38 = vpop.f32.mrf.mxu1 }
 0x26f   : > { %v10384_v13 = vpop.f32.mrf.mxu0  ;;  %10752 = vst [vmem:[#allocation31_spill] sm:$0xff] %v10386_v38  ;;  %v4699_v38 = vadd.f32 %v4572_v39, %v10229_v26  ;;  %v4703_v26 = vadd.f32 %v4588_v1, %v10241_v12  ;;  %v4713_v12 = vadd.f32 %v7740_v63, %v10262_v6 }
 0x270   : > { %10751 = vst [vmem:[#allocation29_spill] sm:$0xff] %v10384_v13  ;;  %v10390_v46 = vpop.f32.mrf.mxu1 }
 0x271   : > { %v10388_v51 = vpop.f32.mrf.mxu0  ;;  %10754 = vst [vmem:[#allocation34_spill] sm:$0xff] %v10390_v46  ;;  %v5457_v6 = vadd.f32 %v10330_v49, %v4703_v26  ;;  %v10456_v49 = vadd.f32 %v10344_v18, %v4713_v12 }
 0x272   : > { %10753 = vst [vmem:[#allocation33_spill] sm:$0xff] %v10388_v51  ;;  %v10394_v16 = vpop.f32.mrf.mxu1  ;;  %v4702_v51 = vadd.f32 %v7729_v30, %v10232_v57  ;;  %v4706_v57 = vadd.f32 %v7733_v17, %v10244_v7  ;;  %v4704_v30 = vadd.f32 %v4591_v2, %v10247_v48  ;;  %v4714_v48 = vadd.f32 %v7741_v3, %v10268_v60 }
 0x273   : > { %v10392_v54 = vpop.f32.mrf.mxu0  ;;  %10756 = vst [vmem:[#allocation36_spill] sm:$0xff] %v10394_v16  ;;  %v4700_v16 = vadd.f32 %v4575_v44, %v10235_v27  ;;  %v4709_v44 = vadd.f32 %v7736_v23, %v10250_v43  ;;  %v4712_v43 = vadd.f32 %v4623_v31, %v10271_v52  ;;  %v10762_v31 = vld [vmem:[#allocation14_spill] sm:$0xff] }
 0x274   : > { %10755 = vst [vmem:[#allocation35_spill] sm:$0xff] %v10392_v54  ;;  %v5456_v27 = vadd.f32 %v10314_v24, %v4702_v51  ;;  %v4711_v51 = vadd.f32 %v4620_v40, %v10265_v50  ;;  %v4717_v24 = vadd.f32 %v7744_v5, %v10274_v53  ;;  %v5460_v1 = vadd.f32 %v10332_v28, %v4706_v57 }
 0x275   : > { %v10396_v33 = vpop.f32.mrf.mxu0  ;;  %v5454_v55 = vadd.f32 %v10321_v61, %v4700_v16  ;;  %v5458_v50 = vadd.f32 %v10334_v59, %v4704_v30  ;;  %v10442_v60 = vadd.f32 %v10336_v11, %v4709_v44  ;;  %v4715_v53 = vadd.f32 %v10356_v34, %v10277_v37  ;;  %v10760_v34 = vld [vmem:[#allocation21_spill] sm:$0xff]  ;;  %v10764_v30 = vld [vmem:[#allocation22_spill] sm:$0xff] }
 0x276   : > { %10757 = vst [vmem:[#allocation37_spill] sm:$0xff] %v10396_v33  ;;  %v10400_v8 = vpop.f32.mrf.mxu1  ;;  %v10460_v59 = vadd.f32 %v10346_v22, %v4711_v51  ;;  %v10463_v11 = vadd.f32 %v10348_v32, %v4714_v48  ;;  %v10466_v37 = vadd.f32 %v10350_v4, %v4712_v43  ;;  %v4718_v17 = vadd.f32 %v10760_v34, %v10280_v0 }
 0x277   : > { %v10398_v42 = vpop.f32.mrf.mxu0  ;;  %10758 = vst [vmem:[#allocation38_spill] sm:$0xff] %v10400_v8  ;;  %v5455_v8 = vadd.f32 %v10304_v35, %v4701_v47  ;;  %v4707_v35 = vadd.f32 %v4604_v36, %v10253_v19  ;;  %v10475_v0 = vadd.f32 %v10762_v31, %v4715_v53  ;;  %v10767_v53 = vld [vmem:[#allocation20_spill] sm:$0xff] }
 0x278   : > { %v10407_v13 = vpop.f32.mrf.mxu1 }
 0x279   : > { %v10402_v56 = vpop.f32.mrf.mxu0  ;;  %v10445_v52 = vadd.f32 %v10338_v14, %v4707_v35 }
 0x27a   : > { %10759 = vst [vmem:[#allocation39_spill] sm:$0xff] %v10402_v56  ;;  %v10412_v54 = vpop.f32.mrf.mxu1  ;;  %v5453_v56 = vadd.f32 %v10309_v29, %v4699_v38  ;;  %v4710_v38 = vadd.f32 %v7737_v58, %v10256_v9 }
 0x27b   : > { %v10409_v46 = vpop.f32.mrf.mxu0 }
 0x27c   : > { %v10421_v10 = vpop.f32.mrf.mxu1  ;;  %v10450_v5 = vadd.f32 %v10340_v15, %v4710_v38 }
 0x27d   : > { %v10414_v33 = vpop.f32.mrf.mxu0 }
 0x27e   : > { %v7872_v7 = vpop.f32.mrf.mxu1 }
 0x27f   : > { %v7824_v39 = vpop.f32.mrf.mxu0  ;;  %v6523_v63 = vmul.f32 %v7872_v7, %v7872_v7 }
 0x280   : > { %v5953_v47 = vadd.f32 %v7824_v39, %v5455_v8  ;;  %v6353_v9 = vpop.f32.mrf.mxu1  ;;  %v5459_v8 = vadd.f32 %v10328_v20, %v4705_v41  ;;  %v10453_v20 = vadd.f32 %v10342_v25, %v4708_v62  ;;  %v10761_v25 = vld [vmem:[#allocation15_spill] sm:$0xff] }
 0x281   : > { %v5824_v29 = vpop.f32.mrf.mxu0  ;;  %v6521_v14 = vmul.f32 %v6353_v9, %v6353_v9  ;;  %v10471_v36 = vadd.f32 %v10761_v25, %v4717_v24 }
 0x282   : > { %5985 = vst [vmem:[%s8162_s26 + $0x10] sm:$0xff] %v5953_v47  ;;  %v5951_v19 = vadd.f32 %v5824_v29, %v5453_v56  ;;  %v7873_v56 = vpop.f32.mrf.mxu1  ;;  %v6058_v32 = vmul.f32 %v5953_v47, %v5953_v47 }
 0x283   : > { %v7825_v21 = vpop.f32.mrf.mxu0  ;;  %v6524_v35 = vmul.f32 %v7873_v56, %v7873_v56 }
 0x284   : > { %5983 = vst [vmem:[%s8162_s26] sm:$0xff] %v5951_v19  ;;  %v5954_v16 = vadd.f32 %v7825_v21, %v5456_v27  ;;  %v6056_v2 = vmul.f32 %v5951_v19, %v5951_v19  ;;  %v6356_v15 = vpop.f32.mrf.mxu1  ;;  %v10763_v27 = vld [vmem:[#allocation3_spill] sm:$0xff] }
 0x285   : > { %v5827_v61 = vpop.f32.mrf.mxu0  ;;  %v6481_v58 = vadd.f32 %v6356_v15, %v6353_v9  ;;  %v6522_v18 = vmul.f32 %v6356_v15, %v6356_v15  ;;  %v4716_v44 = vadd.f32 %v10764_v30, %v10763_v27  ;;  %v10769_v15 = vld [vmem:[#allocation32_spill] sm:$0xff] }
 0x286   : > { %5986 = vst [vmem:[%s8162_s26 + $0x18] sm:$0xff] %v5954_v16  ;;  %v5952_v28 = vadd.f32 %v5827_v61, %v5454_v55  ;;  %v7876_v40 = vpop.f32.mrf.mxu1  ;;  %v6059_v38 = vmul.f32 %v5954_v16, %v5954_v16  ;;  %v10484_v61 = vadd.f32 %v10767_v53, %v4718_v17 }
 0x287   : > { %v7828_v23 = vpop.f32.mrf.mxu0  ;;  %v6482_v41 = vadd.f32 %v7872_v7, %v6481_v58  ;;  %v6553_v26 = vadd.f32 %v6522_v18, %v6521_v14  ;;  %v10766_v7 = vld [vmem:[#allocation16_spill] sm:$0xff] }
 0x288   : > { %5984 = vst [vmem:[%s8162_s26 + $0x8] sm:$0xff] %v5952_v28  ;;  %v6016_v45 = vadd.f32 %v5952_v28, %v5951_v19  ;;  %v6057_v22 = vmul.f32 %v5952_v28, %v5952_v28  ;;  %v5957_v4 = vadd.f32 %v7828_v23, %v5459_v8  ;;  %v6369_v62 = vpop.f32.mrf.mxu1  ;;  %v10765_v19 = vld [vmem:[#allocation9_spill] sm:$0xff] }
 0x289   : > { %v5840_v3 = vpop.f32.mrf.mxu0  ;;  %v6554_v55 = vadd.f32 %v6553_v26, %v6523_v63  ;;  %v6483_v48 = vadd.f32 %v7873_v56, %v6482_v41  ;;  %v6525_v43 = vmul.f32 %v6369_v62, %v6369_v62  ;;  %v4721_v24 = vadd.f32 %v10766_v7, %v10765_v19 }
 0x28a   : > { %v6017_v57 = vadd.f32 %v6016_v45, %v5953_v47  ;;  %v6088_v39 = vadd.f32 %v6057_v22, %v6056_v2  ;;  %5989 = vst [vmem:[%s8162_s26 + $0x30] sm:$0xff] %v5957_v4  ;;  %v5955_v12 = vadd.f32 %v5840_v3, %v5457_v6  ;;  %v7877_v9 = vpop.f32.mrf.mxu1  ;;  %v10768_v2 = vld [vmem:[#allocation8_spill] sm:$0xff] }
 0x28b   : > { %v7829_v29 = vpop.f32.mrf.mxu0  ;;  %v6484_v28 = vadd.f32 %v6483_v48, %v6369_v62  ;;  %v6555_v6 = vadd.f32 %v6554_v55, %v6524_v35  ;;  %v4719_v56 = vadd.f32 %v10769_v15, %v10768_v2  ;;  %v10772_v35 = vld [vmem:[#allocation5_spill] sm:$0xff]  ;;  %v10775_v2 = vld [vmem:[#allocation4_spill] sm:$0xff] }
 0x28c   : > { %v6089_v51 = vadd.f32 %v6088_v39, %v6058_v32  ;;  %5987 = vst [vmem:[%s8162_s26 + $0x20] sm:$0xff] %v5955_v12  ;;  %v6018_v47 = vadd.f32 %v6017_v57, %v5954_v16  ;;  %v5958_v21 = vadd.f32 %v7829_v29, %v5460_v1  ;;  %v6060_v34 = vmul.f32 %v5955_v12, %v5955_v12  ;;  %v6372_v25 = vpop.f32.mrf.mxu1  ;;  %v10770_v16 = vld [vmem:[#allocation30_spill] sm:$0xff]  ;;  %v10771_v57 = vld [vmem:[#allocation17_spill] sm:$0xff] }
 0x28d   : > { %v5843_v8 = vpop.f32.mrf.mxu0  ;;  %v10490_v45 = vadd.f32 %v10770_v16, %v4716_v44  ;;  %v6556_v1 = vadd.f32 %v6555_v6, %v6525_v43  ;;  %v6485_v17 = vadd.f32 %v6484_v28, %v6372_v25  ;;  %v6526_v63 = vmul.f32 %v6372_v25, %v6372_v25 }
 0x28e   : > { %v6090_v14 = vadd.f32 %v6089_v51, %v6059_v38  ;;  %v6019_v23 = vadd.f32 %v6018_v47, %v5955_v12  ;;  %5990 = vst [vmem:[%s8162_s26 + $0x38] sm:$0xff] %v5958_v21  ;;  %v5956_v58 = vadd.f32 %v5843_v8, %v5458_v50  ;;  %v7880_v31 = vpop.f32.mrf.mxu1  ;;  %v10495_v39 = vadd.f32 %v10771_v57, %v4721_v24  ;;  %v10773_v38 = vld [vmem:[#allocation25_spill] sm:$0xff] }
 0x28f   : > { %v7832_v18 = vpop.f32.mrf.mxu0  ;;  %v6527_v50 = vmul.f32 %v7876_v40, %v7876_v40  ;;  %v6486_v27 = vadd.f32 %v7876_v40, %v6485_v17  ;;  %v6557_v30 = vadd.f32 %v6556_v1, %v6526_v63  ;;  %v4722_v62 = vadd.f32 %v10773_v38, %v10772_v35  ;;  %v10779_v35 = vld [vmem:[#allocation29_spill] sm:$0xff] }
 0x290   : > { %v6091_v22 = vadd.f32 %v6090_v14, %v6060_v34  ;;  %5988 = vst [vmem:[%s8162_s26 + $0x28] sm:$0xff] %v5956_v58  ;;  %v6020_v32 = vadd.f32 %v6019_v23, %v5956_v58  ;;  %v6061_v3 = vmul.f32 %v5956_v58, %v5956_v58  ;;  %v5961_v41 = vadd.f32 %v7832_v18, %v10442_v60  ;;  %v6385_v51 = vpop.f32.mrf.mxu1  ;;  %v10774_v34 = vld [vmem:[#allocation23_spill] sm:$0xff] }
 0x291   : > { %v5856_v26 = vpop.f32.mrf.mxu0  ;;  %v6062_v12 = vmul.f32 %v5957_v4, %v5957_v4  ;;  %v6528_v60 = vmul.f32 %v7877_v9, %v7877_v9  ;;  %v6558_v43 = vadd.f32 %v6557_v30, %v6527_v50  ;;  %v6487_v19 = vadd.f32 %v7877_v9, %v6486_v27  ;;  %v10776_v9 = vld [vmem:[#allocation27_spill] sm:$0xff] }
 0x292   : > { %v5959_v44 = vadd.f32 %v5856_v26, %v10445_v52  ;;  %v6021_v29 = vadd.f32 %v6020_v32, %v5957_v4  ;;  %v6092_v55 = vadd.f32 %v6091_v22, %v6061_v3  ;;  %5993 = vst [vmem:[%s8162_s26 + $0x50] sm:$0xff] %v5961_v41  ;;  %v6529_v7 = vmul.f32 %v6385_v51, %v6385_v51  ;;  %v7881_v8 = vpop.f32.mrf.mxu1  ;;  %v10777_v3 = vld [vmem:[#allocation24_spill] sm:$0xff] }
 0x293   : > { %v7833_v48 = vpop.f32.mrf.mxu0  ;;  %v6063_v24 = vmul.f32 %v5958_v21, %v5958_v21  ;;  %v6488_v28 = vadd.f32 %v6487_v19, %v6385_v51  ;;  %v6559_v4 = vadd.f32 %v6558_v43, %v6528_v60  ;;  %v10505_v14 = vadd.f32 %v10774_v34, %v4719_v56 }
 0x294   : > { %5991 = vst [vmem:[%s8162_s26 + $0x40] sm:$0xff] %v5959_v44  ;;  %v6093_v40 = vadd.f32 %v6092_v55, %v6062_v12  ;;  %v6022_v47 = vadd.f32 %v6021_v29, %v5958_v21  ;;  %v5962_v52 = vadd.f32 %v7833_v48, %v10450_v5  ;;  %v4720_v15 = vadd.f32 %v10776_v9, %v10775_v2  ;;  %v6388_v21 = vpop.f32.mrf.mxu1 }
 0x295   : > { %v5859_v53 = vpop.f32.mrf.mxu0  ;;  %v6064_v25 = vmul.f32 %v5959_v44, %v5959_v44  ;;  %v6560_v16 = vadd.f32 %v6559_v4, %v6529_v7  ;;  %v6489_v5 = vadd.f32 %v6488_v28, %v6388_v21  ;;  %v6530_v1 = vmul.f32 %v6388_v21, %v6388_v21  ;;  %v10780_v28 = vld [vmem:[#allocation26_spill] sm:$0xff] }
 0x296   : > { %v5960_v6 = vadd.f32 %v5859_v53, %v10453_v20  ;;  %v6023_v23 = vadd.f32 %v6022_v47, %v5959_v44  ;;  %v6094_v58 = vadd.f32 %v6093_v40, %v6063_v24  ;;  %5994 = vst [vmem:[%s8162_s26 + $0x58] sm:$0xff] %v5962_v52  ;;  %v7884_v63 = vpop.f32.mrf.mxu1  ;;  %v10513_v26 = vadd.f32 %v10777_v3, %v4722_v62  ;;  %v10778_v44 = vld [vmem:[#allocation7_spill] sm:$0xff] }
 0x297   : > { %v7836_v18 = vpop.f32.mrf.mxu0  ;;  %v6531_v57 = vmul.f32 %v7880_v31, %v7880_v31  ;;  %v6490_v50 = vadd.f32 %v7880_v31, %v6489_v5  ;;  %v6561_v27 = vadd.f32 %v6560_v16, %v6530_v1  ;;  %v4725_v38 = vadd.f32 %v10779_v35, %v10778_v44 }
 0x298   : > { %5992 = vst [vmem:[%s8162_s26 + $0x48] sm:$0xff] %v5960_v6  ;;  %v6065_v22 = vmul.f32 %v5960_v6, %v5960_v6  ;;  %v6095_v17 = vadd.f32 %v6094_v58, %v6064_v25  ;;  %v6024_v20 = vadd.f32 %v6023_v23, %v5960_v6  ;;  %v5965_v56 = vadd.f32 %v7836_v18, %v10456_v49  ;;  %v6401_v51 = vpop.f32.mrf.mxu1  ;;  %v10781_v6 = vld [vmem:[#allocation6_spill] sm:$0xff] }
 0x299   : > { %v5872_v32 = vpop.f32.mrf.mxu0  ;;  %v6066_v12 = vmul.f32 %v5961_v41, %v5961_v41  ;;  %v6532_v49 = vmul.f32 %v7881_v8, %v7881_v8  ;;  %v6562_v60 = vadd.f32 %v6561_v27, %v6531_v57  ;;  %v6491_v43 = vadd.f32 %v7881_v8, %v6490_v50  ;;  %v10782_v8 = vld [vmem:[#allocation33_spill] sm:$0xff]  ;;  %v10784_v50 = vld [vmem:[#allocation11_spill] sm:$0xff] }
 0x29a   : > { %v5963_v30 = vadd.f32 %v5872_v32, %v10460_v59  ;;  %v6025_v29 = vadd.f32 %v6024_v20, %v5961_v41  ;;  %v6096_v55 = vadd.f32 %v6095_v17, %v6065_v22  ;;  %5997 = vst [vmem:[%s8162_s26 + $0x70] sm:$0xff] %v5965_v56  ;;  %v6533_v62 = vmul.f32 %v6401_v51, %v6401_v51  ;;  %v7885_v24 = vpop.f32.mrf.mxu1  ;;  %v10783_v22 = vld [vmem:[#allocation28_spill] sm:$0xff]  ;;  %v10785_v27 = vld [vmem:[#allocation35_spill] sm:$0xff] }
 0x29b   : > { %v7837_v48 = vpop.f32.mrf.mxu0  ;;  %v6067_v19 = vmul.f32 %v5962_v52, %v5962_v52  ;;  %v6492_v47 = vadd.f32 %v6491_v43, %v6401_v51  ;;  %v6563_v41 = vadd.f32 %v6562_v60, %v6532_v49  ;;  %v10523_v4 = vadd.f32 %v10780_v28, %v4720_v15 }
 0x29c   : > { %5995 = vst [vmem:[%s8162_s26 + $0x60] sm:$0xff] %v5963_v30  ;;  %v6097_v31 = vadd.f32 %v6096_v55, %v6066_v12  ;;  %v6026_v7 = vadd.f32 %v6025_v29, %v5962_v52  ;;  %v5966_v59 = vadd.f32 %v7837_v48, %v10463_v11  ;;  %v4723_v34 = vadd.f32 %v10782_v8, %v10781_v6  ;;  %v6404_v52 = vpop.f32.mrf.mxu1 }
 0x29d   : > { %v5875_v40 = vpop.f32.mrf.mxu0  ;;  %v6068_v9 = vmul.f32 %v5963_v30, %v5963_v30  ;;  %v6564_v58 = vadd.f32 %v6563_v41, %v6533_v62  ;;  %v6493_v11 = vadd.f32 %v6492_v47, %v6404_v52  ;;  %v6534_v21 = vmul.f32 %v6404_v52, %v6404_v52  ;;  %v10787_v47 = vld [vmem:[#allocation10_spill] sm:$0xff] }
 0x29e   : > { %v5964_v53 = vadd.f32 %v5875_v40, %v10466_v37  ;;  %v6027_v2 = vadd.f32 %v6026_v7, %v5963_v30  ;;  %v6098_v23 = vadd.f32 %v6097_v31, %v6067_v19  ;;  %5998 = vst [vmem:[%s8162_s26 + $0x78] sm:$0xff] %v5966_v59  ;;  %v7888_v5 = vpop.f32.mrf.mxu1  ;;  %v10531_v17 = vadd.f32 %v10783_v22, %v4725_v38  ;;  %v10786_v7 = vld [vmem:[#allocation31_spill] sm:$0xff]  ;;  %v10790_v22 = vld [vmem:[#allocation13_spill] sm:$0xff] }
 0x29f   : > { %v7840_v25 = vpop.f32.mrf.mxu0  ;;  %v6535_v20 = vmul.f32 %v7884_v63, %v7884_v63  ;;  %v6494_v32 = vadd.f32 %v7884_v63, %v6493_v11  ;;  %v6565_v3 = vadd.f32 %v6564_v58, %v6534_v21  ;;  %v4726_v30 = vadd.f32 %v10785_v27, %v10784_v50  ;;  %v10789_v11 = vld [vmem:[#allocation34_spill] sm:$0xff] }
 0x2a0   : > { %5996 = vst [vmem:[%s8162_s26 + $0x68] sm:$0xff] %v5964_v53  ;;  %v6069_v18 = vmul.f32 %v5964_v53, %v5964_v53  ;;  %v6099_v16 = vadd.f32 %v6098_v23, %v6068_v9  ;;  %v6028_v37 = vadd.f32 %v6027_v2, %v5964_v53  ;;  %v5969_v15 = vadd.f32 %v7840_v25, %v10471_v36  ;;  %v6417_v29 = vpop.f32.mrf.mxu1 }
 0x2a1   : > { %v5888_v1 = vpop.f32.mrf.mxu0  ;;  %v6070_v44 = vmul.f32 %v5965_v56, %v5965_v56  ;;  %v6536_v36 = vmul.f32 %v7885_v24, %v7885_v24  ;;  %v6566_v51 = vadd.f32 %v6565_v3, %v6535_v20  ;;  %v6495_v48 = vadd.f32 %v7885_v24, %v6494_v32  ;;  %v10788_v24 = vld [vmem:[#allocation37_spill] sm:$0xff] }
 0x2a2   : > { %v5967_v57 = vadd.f32 %v5888_v1, %v10475_v0  ;;  %v6029_v35 = vadd.f32 %v6028_v37, %v5965_v56  ;;  %v6100_v12 = vadd.f32 %v6099_v16, %v6069_v18  ;;  %6001 = vst [vmem:[%s8162_s26 + $0x90] sm:$0xff] %v5969_v15  ;;  %v6537_v38 = vmul.f32 %v6417_v29, %v6417_v29  ;;  %v7889_v43 = vpop.f32.mrf.mxu1 }
 0x2a3   : > { %v7841_v55 = vpop.f32.mrf.mxu0  ;;  %v6071_v49 = vmul.f32 %v5966_v59, %v5966_v59  ;;  %v6496_v19 = vadd.f32 %v6495_v48, %v6417_v29  ;;  %v6567_v56 = vadd.f32 %v6566_v51, %v6536_v36  ;;  %v10541_v40 = vadd.f32 %v10786_v7, %v4723_v34  ;;  %v10791_v48 = vld [vmem:[#allocation36_spill] sm:$0xff] }
 0x2a4   : > { %5999 = vst [vmem:[%s8162_s26 + $0x80] sm:$0xff] %v5967_v57  ;;  %v6101_v63 = vadd.f32 %v6100_v12, %v6070_v44  ;;  %v6030_v60 = vadd.f32 %v6029_v35, %v5966_v59  ;;  %v5970_v0 = vadd.f32 %v7841_v55, %v10484_v61  ;;  %v4724_v41 = vadd.f32 %v10788_v24, %v10787_v47  ;;  %v6420_v59 = vpop.f32.mrf.mxu1 }
 0x2a5   : > { %v5891_v62 = vpop.f32.mrf.mxu0  ;;  %v6072_v28 = vmul.f32 %v5967_v57, %v5967_v57  ;;  %v6568_v2 = vadd.f32 %v6567_v56, %v6537_v38  ;;  %v6497_v61 = vadd.f32 %v6496_v19, %v6420_v59  ;;  %v6538_v9 = vmul.f32 %v6420_v59, %v6420_v59 }
 0x2a6   : > { %v5968_v31 = vadd.f32 %v5891_v62, %v10490_v45  ;;  %v6031_v53 = vadd.f32 %v6030_v60, %v5967_v57  ;;  %v6102_v6 = vadd.f32 %v6101_v63, %v6071_v49  ;;  %6002 = vst [vmem:[%s8162_s26 + $0x98] sm:$0xff] %v5970_v0  ;;  %v7892_v25 = vpop.f32.mrf.mxu1  ;;  %v10549_v21 = vadd.f32 %v10789_v11, %v4726_v30  ;;  %v10792_v49 = vld [vmem:[#allocation12_spill] sm:$0xff]  ;;  %v10793_v63 = vld [vmem:[#allocation39_spill] sm:$0xff] }
 0x2a7   : > { %v7844_v8 = vpop.f32.mrf.mxu0  ;;  %v6539_v18 = vmul.f32 %v7888_v5, %v7888_v5  ;;  %v6498_v16 = vadd.f32 %v7888_v5, %v6497_v61  ;;  %v6569_v37 = vadd.f32 %v6568_v2, %v6538_v9  ;;  %v4729_v20 = vadd.f32 %v10398_v42, %v10790_v22 }
 0x2a8   : > { %6000 = vst [vmem:[%s8162_s26 + $0x88] sm:$0xff] %v5968_v31  ;;  %v6073_v23 = vmul.f32 %v5968_v31, %v5968_v31  ;;  %v6103_v52 = vadd.f32 %v6102_v6, %v6072_v28  ;;  %v6032_v45 = vadd.f32 %v6031_v53, %v5968_v31  ;;  %v5973_v34 = vadd.f32 %v7844_v8, %v10495_v39  ;;  %v6433_v50 = vpop.f32.mrf.mxu1  ;;  %v10794_v6 = vld [vmem:[#allocation38_spill] sm:$0xff] }
 0x2a9   : > { %v5904_v58 = vpop.f32.mrf.mxu0  ;;  %v6074_v32 = vmul.f32 %v5969_v15, %v5969_v15  ;;  %v6540_v39 = vmul.f32 %v7889_v43, %v7889_v43  ;;  %v6570_v44 = vadd.f32 %v6569_v37, %v6539_v18  ;;  %v6499_v35 = vadd.f32 %v7889_v43, %v6498_v16 }
 0x2aa   : > { %v5971_v1 = vadd.f32 %v5904_v58, %v10505_v14  ;;  %v6033_v3 = vadd.f32 %v6032_v45, %v5969_v15  ;;  %v6104_v57 = vadd.f32 %v6103_v52, %v6073_v23  ;;  %6005 = vst [vmem:[%s8162_s26 + $0xb0] sm:$0xff] %v5973_v34  ;;  %v6541_v30 = vmul.f32 %v6433_v50, %v6433_v50  ;;  %v7893_v55 = vpop.f32.mrf.mxu1  ;;  %v10795_v23 = vld [vmem:[#allocation18_spill] sm:$0xff] }
 0x2ab   : > { %v7845_v27 = vpop.f32.mrf.mxu0  ;;  %v6075_v12 = vmul.f32 %v5970_v0, %v5970_v0  ;;  %v6500_v36 = vadd.f32 %v6499_v35, %v6433_v50  ;;  %v6571_v15 = vadd.f32 %v6570_v44, %v6540_v39  ;;  %v5478_v38 = vadd.f32 %v10791_v48, %v4724_v41  ;;  %v10796_v39 = vld [vmem:[#allocation19_spill] sm:$0xff] }
 0x2ac   : > { %6003 = vst [vmem:[%s8162_s26 + $0xa0] sm:$0xff] %v5971_v1  ;;  %v6105_v5 = vadd.f32 %v6104_v57, %v6074_v32  ;;  %v6034_v29 = vadd.f32 %v6033_v3, %v5970_v0  ;;  %v5974_v14 = vadd.f32 %v7845_v27, %v10513_v26  ;;  %v4727_v60 = vadd.f32 %v10793_v63, %v10792_v49  ;;  %v6436_v56 = vpop.f32.mrf.mxu1 }
 0x2ad   : > { %v5907_v42 = vpop.f32.mrf.mxu0  ;;  %v6076_v62 = vmul.f32 %v5971_v1, %v5971_v1  ;;  %v6572_v31 = vadd.f32 %v6571_v15, %v6541_v30  ;;  %v6501_v7 = vadd.f32 %v6500_v36, %v6436_v56  ;;  %v6542_v26 = vmul.f32 %v6436_v56, %v6436_v56 }
 0x2ae   : > { %v5972_v51 = vadd.f32 %v5907_v42, %v10523_v4  ;;  %v6035_v43 = vadd.f32 %v6034_v29, %v5971_v1  ;;  %v6106_v19 = vadd.f32 %v6105_v5, %v6075_v12  ;;  %6006 = vst [vmem:[%s8162_s26 + $0xb8] sm:$0xff] %v5974_v14  ;;  %v7896_v4 = vpop.f32.mrf.mxu1  ;;  %v5483_v59 = vadd.f32 %v10794_v6, %v4729_v20 }
 0x2af   : > { %v7848_v0 = vpop.f32.mrf.mxu0  ;;  %v6543_v8 = vmul.f32 %v7892_v25, %v7892_v25  ;;  %v6502_v2 = vadd.f32 %v7892_v25, %v6501_v7  ;;  %v6573_v61 = vadd.f32 %v6572_v31, %v6542_v26  ;;  %v4730_v52 = vadd.f32 %v10409_v46, %v10795_v23 }
 0x2b0   : > { %6004 = vst [vmem:[%s8162_s26 + $0xa8] sm:$0xff] %v5972_v51  ;;  %v6077_v47 = vmul.f32 %v5972_v51, %v5972_v51  ;;  %v6107_v24 = vadd.f32 %v6106_v19, %v6076_v62  ;;  %v6036_v53 = vadd.f32 %v6035_v43, %v5972_v51  ;;  %v5977_v41 = vadd.f32 %v7848_v0, %v10531_v17  ;;  %v6449_v18 = vpop.f32.mrf.mxu1 }
 0x2b1   : > { %v5920_v28 = vpop.f32.mrf.mxu0  ;;  %v6078_v45 = vmul.f32 %v5973_v34, %v5973_v34  ;;  %v6544_v37 = vmul.f32 %v7893_v55, %v7893_v55  ;;  %v6574_v17 = vadd.f32 %v6573_v61, %v6543_v8  ;;  %v6503_v1 = vadd.f32 %v7893_v55, %v6502_v2 }
 0x2b2   : > { %v5975_v9 = vadd.f32 %v5920_v28, %v10541_v40  ;;  %v6037_v58 = vadd.f32 %v6036_v53, %v5973_v34  ;;  %v6108_v11 = vadd.f32 %v6107_v24, %v6077_v47  ;;  %6009 = vst [vmem:[%s8162_s26 + $0xd0] sm:$0xff] %v5977_v41  ;;  %v6545_v22 = vmul.f32 %v6449_v18, %v6449_v18  ;;  %v7897_v3 = vpop.f32.mrf.mxu1 }
 0x2b3   : > { %v7849_v16 = vpop.f32.mrf.mxu0  ;;  %v6079_v20 = vmul.f32 %v5974_v14, %v5974_v14  ;;  %v6504_v57 = vadd.f32 %v6503_v1, %v6449_v18  ;;  %v6575_v34 = vadd.f32 %v6574_v17, %v6544_v37  ;;  %v5481_v27 = vadd.f32 %v10407_v13, %v4727_v60 }
 0x2b4   : > { %6007 = vst [vmem:[%s8162_s26 + $0xc0] sm:$0xff] %v5975_v9  ;;  %v6109_v25 = vadd.f32 %v6108_v11, %v6078_v45  ;;  %v6038_v32 = vadd.f32 %v6037_v58, %v5974_v14  ;;  %v5978_v40 = vadd.f32 %v7849_v16, %v10549_v21  ;;  %v4728_v44 = vadd.f32 %v10414_v33, %v10796_v39  ;;  %v6452_v5 = vpop.f32.mrf.mxu1 }
 0x2b5   : > { %v5923_v46 = vpop.f32.mrf.mxu0  ;;  %v6080_v30 = vmul.f32 %v5975_v9, %v5975_v9  ;;  %v6576_v55 = vadd.f32 %v6575_v34, %v6545_v22  ;;  %v6505_v14 = vadd.f32 %v6504_v57, %v6452_v5  ;;  %v6546_v42 = vmul.f32 %v6452_v5, %v6452_v5 }
 0x2b6   : > { %v5976_v50 = vadd.f32 %v5923_v46, %v5478_v38  ;;  %v6039_v35 = vadd.f32 %v6038_v32, %v5975_v9  ;;  %v6110_v12 = vadd.f32 %v6109_v25, %v6079_v20  ;;  %6010 = vst [vmem:[%s8162_s26 + $0xd8] sm:$0xff] %v5978_v40  ;;  %v7900_v51 = vpop.f32.mrf.mxu1  ;;  %v5484_v38 = vadd.f32 %v10412_v54, %v4730_v52 }
 0x2b7   : > { %v7852_v29 = vpop.f32.mrf.mxu0  ;;  %v6547_v33 = vmul.f32 %v7896_v4, %v7896_v4  ;;  %v6506_v49 = vadd.f32 %v7896_v4, %v6505_v14  ;;  %v6577_v63 = vadd.f32 %v6576_v55, %v6546_v42  ;;  %v6082_v43 = vmul.f32 %v5977_v41, %v5977_v41 }
 0x2b8   : > { %6008 = vst [vmem:[%s8162_s26 + $0xc8] sm:$0xff] %v5976_v50  ;;  %v6081_v21 = vmul.f32 %v5976_v50, %v5976_v50  ;;  %v6111_v36 = vadd.f32 %v6110_v12, %v6080_v30  ;;  %v6040_v15 = vadd.f32 %v6039_v35, %v5976_v50  ;;  %v5981_v48 = vadd.f32 %v7852_v29, %v5483_v59  ;;  %v6465_v56 = vpop.f32.mrf.mxu1 }
 0x2b9   : > { %v5936_v13 = vpop.f32.mrf.mxu0  ;;  %v5482_v31 = vadd.f32 %v10421_v10, %v4728_v44  ;;  %v6548_v7 = vmul.f32 %v7897_v3, %v7897_v3  ;;  %v6578_v26 = vadd.f32 %v6577_v63, %v6547_v33  ;;  %v6507_v47 = vadd.f32 %v7897_v3, %v6506_v49 }
 0x2ba   : > { %v5979_v60 = vadd.f32 %v5936_v13, %v5481_v27  ;;  %v6041_v62 = vadd.f32 %v6040_v15, %v5977_v41  ;;  %v6112_v19 = vadd.f32 %v6111_v36, %v6081_v21  ;;  %6013 = vst [vmem:[%s8162_s26 + $0xf0] sm:$0xff] %v5981_v48  ;;  %v6549_v24 = vmul.f32 %v6465_v56, %v6465_v56  ;;  %v7901_v28 = vpop.f32.mrf.mxu1 }
 0x2bb   : > { %v7853_v0 = vpop.f32.mrf.mxu0  ;;  %v6083_v54 = vmul.f32 %v5978_v40, %v5978_v40  ;;  %v6508_v41 = vadd.f32 %v6507_v47, %v6465_v56  ;;  %v6579_v8 = vadd.f32 %v6578_v26, %v6548_v7  ;;  %v6551_v37 = vmul.f32 %v7900_v51, %v7900_v51  ;;  %v6055_v7 = vld [vmem:[%s10617_s8] sm:$0x1] }
 0x2bc   : > { %6011 = vst [vmem:[%s8162_s26 + $0xe0] sm:$0xff] %v5979_v60  ;;  %v6113_v53 = vadd.f32 %v6112_v19, %v6082_v43  ;;  %v6042_v4 = vadd.f32 %v6041_v62, %v5978_v40  ;;  %v5982_v6 = vadd.f32 %v7853_v0, %v5484_v38  ;;  %v6084_v9 = vmul.f32 %v5979_v60, %v5979_v60  ;;  %v6468_v10 = vpop.f32.mrf.mxu1  ;;  %v6480_v38 = vld [vmem:[%s10618_s9] sm:$0x1] }
 0x2bd   : > { %v5939_v59 = vpop.f32.mrf.mxu0  ;;  %v6580_v52 = vadd.f32 %v6579_v8, %v6549_v24  ;;  %v6509_v45 = vadd.f32 %v6508_v41, %v6468_v10  ;;  %v6550_v58 = vmul.f32 %v6468_v10, %v6468_v10  ;;  %v6086_v22 = vmul.f32 %v5981_v48, %v5981_v48  ;;  %v6015_v43 = vld [vmem:[%s10616_s7] sm:$0x1] }
 0x2be   : > { %v5980_v2 = vadd.f32 %v5939_v59, %v5482_v31  ;;  %v6043_v61 = vadd.f32 %v6042_v4, %v5979_v60  ;;  %v6114_v23 = vadd.f32 %v6113_v53, %v6083_v54  ;;  %6014 = vst [vmem:[%s8162_s26 + $0xf8] sm:$0xff] %v5982_v6  ;;  %v6552_v32 = vmul.f32 %v7901_v28, %v7901_v28  ;;  %v6520_v62 = vld [vmem:[%s10619_s10] sm:$0x1] }
 0x2bf   : > { %v6510_v17 = vadd.f32 %v7900_v51, %v6509_v45  ;;  %v6581_v1 = vadd.f32 %v6580_v52, %v6550_v58  ;;  %v6087_v46 = vmul.f32 %v5982_v6, %v5982_v6 }
 0x2c0   : > { %6012 = vst [vmem:[%s8162_s26 + $0xe8] sm:$0xff] %v5980_v2  ;;  %v6085_v11 = vmul.f32 %v5980_v2, %v5980_v2  ;;  %v6115_v18 = vadd.f32 %v6114_v23, %v6084_v9  ;;  %v6044_v16 = vadd.f32 %v6043_v61, %v5980_v2 }
 0x2c1   : > { %v6511_v3 = vadd.f32 %v7901_v28, %v6510_v17  ;;  %v6582_v40 = vadd.f32 %v6581_v1, %v6551_v37 }
 0x2c2   : > { %v6045_v20 = vadd.f32 %v6044_v16, %v5981_v48  ;;  %v6116_v25 = vadd.f32 %v6115_v18, %v6085_v11 }
 0x2c3   : > { %v6512_v50 = vrot.slane %v6511_v3, 4  ;;  %v6583_v27 = vadd.f32 %v6582_v40, %v6552_v32 }
 0x2c4   : > { %v6046_v57 = vadd.f32 %v6045_v20, %v5982_v6  ;;  %v6117_v34 = vadd.f32 %v6116_v25, %v6086_v22 }
 0x2c5   : > { %v6513_v35 = vadd.f32 %v6512_v50, %v6511_v3  ;;  %v6584_v30 = vrot.slane %v6583_v27, 4 }
 0x2c6   : > { %v6047_v39 = vrot.slane %v6046_v57, 4  ;;  %v6118_v44 = vadd.f32 %v6117_v34, %v6087_v46 }
 0x2c7   : > { %v6514_v29 = vrot.slane %v6513_v35, 2  ;;  %v6585_v55 = vadd.f32 %v6584_v30, %v6583_v27 }
 0x2c8   : > { %v6048_v12 = vadd.f32 %v6047_v39, %v6046_v57  ;;  %v6119_v5 = vrot.slane %v6118_v44, 4 }
 0x2c9   : > { %v6515_v21 = vadd.f32 %v6514_v29, %v6513_v35  ;;  %v6586_v36 = vrot.slane %v6585_v55, 2 }
 0x2ca   : > { %v6049_v14 = vrot.slane %v6048_v12, 2  ;;  %v6120_v42 = vadd.f32 %v6119_v5, %v6118_v44 }
 0x2cb   : > { %v6516_v48 = vrot.slane %v6515_v21, 1  ;;  %v6587_v13 = vadd.f32 %v6586_v36, %v6585_v55 }
 0x2cc   : > { %v6050_v15 = vadd.f32 %v6049_v14, %v6048_v12  ;;  %v6121_v51 = vrot.slane %v6120_v42, 2 }
 0x2cd   : > { %v6517_v63 = vadd.f32 %v6516_v48, %v6515_v21  ;;  %v6588_v60 = vrot.slane %v6587_v13, 1 }
 0x2ce   : > { %v6051_v33 = vrot.slane %v6050_v15, 1  ;;  %v6122_v49 = vadd.f32 %v6121_v51, %v6120_v42 }
 0x2cf   : > { %v6518_v0 = vadd.f32 %v6517_v63, %v6480_v38  ;;  %v6589_v31 = vadd.f32 %v6588_v60, %v6587_v13 }
 0x2d0   : > { %v6052_v19 = vadd.f32 %v6051_v33, %v6050_v15  ;;  %v6123_v56 = vrot.slane %v6122_v49, 1 }
 0x2d1   : > { %6519 = vst [vmem:[%s10618_s9] sm:$0x1] %v6518_v0  ;;  %v6590_v24 = vadd.f32 %v6589_v31, %v6520_v62 }
 0x2d2   : > { %v6053_v26 = vadd.f32 %v6052_v19, %v6015_v43  ;;  %v6124_v47 = vadd.f32 %v6123_v56, %v6122_v49 }
 0x2d3   : > { %6591 = vst [vmem:[%s10619_s10] sm:$0x1] %v6590_v24 }
 0x2d4   : > { %6054 = vst [vmem:[%s10616_s7] sm:$0x1] %v6053_v26  ;;  %v6125_v54 = vadd.f32 %v6124_v47, %v6055_v7 }
 0x2d6   : > { %6126 = vst [vmem:[%s10617_s8] sm:$0x1] %v6125_v54 }
 0x2d7 PF: > { %s21_s13 = sadd.s32 1, %s8082_s13  }
 0x2d8   : > { %p18_p5 = scmp.ge.s32.totalorder %s21_s13, 4  }
 0x2da   :  { %20 = sbr.rel (!%p18_p5) target bundleno = 1 (0x1), region = 123 }

</bundles_post_ra>
